<compile_context>
chip_gen: v7x
topology: tpu7x:2x2x1
jax: 0.10.0
libtpu: 0.0.40
codegen_flags: <defaults>
</compile_context>

<pallas_src>
import functools

import numpy as np
import jax
import jax.numpy as jnp
from jax import lax
from jax.experimental import pallas as pl
from jax.experimental.pallas import tpu as pltpu

PAD = 0
LN_EPS = 1e-5
ATTN_DTYPE = jnp.bfloat16   # attention-map writeback dtype (halves HBM bytes)


# ----------------------------------------------------------------------------
# Small capability probe: single-buffered weight BlockSpecs
# ----------------------------------------------------------------------------
_BUFFERED_ONE_OK = None


def _buffered_one_supported():
    """Probe pl.Buffered(1) once; fall back to default double-buffering."""
    global _BUFFERED_ONE_OK
    if _BUFFERED_ONE_OK is None:
        def _probe_kernel(x_ref, o_ref):
            o_ref[...] = x_ref[...] + 1.0
        try:
            x = jnp.zeros((8, 128), jnp.float32)
            y = pl.pallas_call(
                _probe_kernel,
                out_shape=jax.ShapeDtypeStruct((8, 128), jnp.float32),
                grid=(2,),
                in_specs=[pl.BlockSpec((8, 128), lambda i: (0, 0),
                                       pipeline_mode=pl.Buffered(1))],
                out_specs=pl.BlockSpec((8, 128), lambda i: (0, 0)),
            )(x)
            jax.block_until_ready(y)
            _BUFFERED_ONE_OK = True
        except Exception:
            _BUFFERED_ONE_OK = False
    return _BUFFERED_ONE_OK


def _weight_spec(shape):
    """Whole-array weight block, resident in VMEM across the batch grid axis.

    Constant index_map => the block never changes; single-buffer it if the
    installed Pallas supports pl.Buffered(1) (halves weight VMEM footprint).
    """
    index_map = lambda *_: (0,) * len(shape)
    if _buffered_one_supported():
        return pl.BlockSpec(shape, index_map, pipeline_mode=pl.Buffered(1))
    return pl.BlockSpec(shape, index_map)


# ----------------------------------------------------------------------------
# Fused decoder-layer kernel
# ----------------------------------------------------------------------------
def _layer_norm(y, g, b):
    # Single-pass LN: mean and mean-of-squares (one XLU reduce fewer than
    # the mean/centered-variance form).
    mean = jnp.mean(y, axis=-1, keepdims=True)
    msq = jnp.mean(y * y, axis=-1, keepdims=True)
    var = jnp.maximum(msq - mean * mean, 0.0)
    return (y - mean) * lax.rsqrt(var + LN_EPS) * g + b


def _mha_block(x_q2d, x_kv2d, mask_for_batch,
               wq_ref, wk_ref, wv_ref, wp_ref, bp_ref, g_ref, b_ref,
               attn_ref, ctx_ref,
               *, tb, lq, lk, n_head, d_k, d_v, inv_temper):
    """One multi-head attention sub-block, fully in VMEM.

    x_q2d:  (TB*Lq, D) f32     x_kv2d: (TB*Lk, D) f32
    mask_for_batch(bi) -> (Lq, Lk) bool (True == masked)
    wq/wk: (D, H*d_k) bf16     wv: (D, H*d_v) bf16    wp: (H*d_v, D) bf16
    attn_ref: (H, TB, Lq, Lk) output block (bf16)
    ctx_ref:  (TB*Lq, H*d_v) f32 VMEM scratch (head-major feature layout)
    Returns (TB*Lq, D) f32.
    """
    xq = x_q2d.astype(jnp.bfloat16)
    xkv = x_kv2d.astype(jnp.bfloat16)

    # Packed projections: one MXU pass per tensor for ALL heads and ALL TB
    # batch rows (M = TB*Lq).  Scale 1/sqrt(d_model) folded into q.
    q_all = jnp.dot(xq, wq_ref[...], preferred_element_type=jnp.float32) * inv_temper
    k_all = jnp.dot(xkv, wk_ref[...], preferred_element_type=jnp.float32)
    v_all = jnp.dot(xkv, wv_ref[...], preferred_element_type=jnp.float32)

    q_b = q_all.astype(jnp.bfloat16)
    k_b = k_all.astype(jnp.bfloat16)
    v_b = v_all.astype(jnp.bfloat16)

    neg_big = jnp.float32(-1e30)   # finite: avoids NaN on fully-masked rows

    for bi in range(tb):                 # static unroll over batch rows
        masked = mask_for_batch(bi)      # (Lq, Lk) bool, computed once per row
        qr = slice(bi * lq, (bi + 1) * lq)
        kr = slice(bi * lk, (bi + 1) * lk)
        for h in range(n_head):          # static unroll; no per-head grid
            q_h = q_b[qr, h * d_k:(h + 1) * d_k]
            k_h = k_b[kr, h * d_k:(h + 1) * d_k]
            v_h = v_b[kr, h * d_v:(h + 1) * d_v]

            # NOTE: K = d_k underfills the MXU for small d_k; acceptable since
            # the projections / FFN dominate the FLOPs.
            scores = jnp.dot(q_h, k_h.T, preferred_element_type=jnp.float32)
            scores = jnp.where(masked, neg_big, scores)

            m = jnp.max(scores, axis=-1, keepdims=True)
            e = jnp.exp(scores - m)
            s = jnp.sum(e, axis=-1, keepdims=True)
            attn = e * pl.reciprocal(s, approx=True)     # (Lq, Lk) f32

            attn_ref[h, bi] = attn.astype(attn_ref.dtype)
            # Scatter this head's context into the shared scratch at its
            # static lane offset (replaces jnp.concatenate of H temporaries).
            ctx_ref[bi * lq:(bi + 1) * lq, h * d_v:(h + 1) * d_v] = jnp.dot(
                attn.astype(jnp.bfloat16), v_h,
                preferred_element_type=jnp.float32)

    # Output projection (K = H*d_v), residual + LayerNorm.
    y = jnp.dot(ctx_ref[...].astype(jnp.bfloat16), wp_ref[...],
                preferred_element_type=jnp.float32) + bp_ref[...]
    y = y + x_q2d
    return _layer_norm(y, g_ref[...], b_ref[...])


def _decoder_layer_kernel(
        # token ids + per-batch-tile activations
        tgt_ref, src_ref, dec_ref, enc_ref,
        # self-attention weights
        s_wq, s_wk, s_wv, s_wp, s_bp, s_g, s_b,
        # enc-dec attention weights
        e_wq, e_wk, e_wv, e_wp, e_bp, e_g, e_b,
        # position-wise FFN weights
        f_w1, f_b1, f_w2, f_b2, f_g, f_b,
        # outputs
        out_ref, sattn_ref, eattn_ref,
        # scratch
        ctx_ref,
        *, n_head, d_k, d_v, inv_temper):
    tb, lq, d_model = dec_ref.shape
    lk = enc_ref.shape[1]
    lsrc = src_ref.shape[1]

    # Fold the batch tile into the MXU M-dimension.
    x = dec_ref[...].reshape(tb * lq, d_model)       # (TB*Lq, D) f32
    enc = enc_ref[...].reshape(tb * lk, d_model)     # (TB*Lk, D) f32

    # Masks generated in-kernel from the raw token ids — no O(B*L^2) HBM reads.
    tseq = tgt_ref[...]                              # (TB, Lq)   int32
    sseq = src_ref[...]                              # (TB, Lsrc) int32
    row = lax.broadcasted_iota(jnp.int32, (lq, lq), 0)
    col = lax.broadcasted_iota(jnp.int32, (lq, lq), 1)
    sub_mask = col > row                             # future positions (triu, k=1)

    def slf_mask(bi):                                # key-side PAD | subsequent
        key_pad = tseq[bi:bi + 1, :] == PAD          # (1, Lq)
        return jnp.broadcast_to(key_pad, (lq, lq)) | sub_mask

    def enc_mask(bi):                                # key-side PAD of src_seq
        key_pad = sseq[bi:bi + 1, :] == PAD          # (1, Lsrc)
        return jnp.broadcast_to(key_pad, (lq, lsrc))

    x1 = _mha_block(x, x, slf_mask,
                    s_wq, s_wk, s_wv, s_wp, s_bp, s_g, s_b,
                    sattn_ref, ctx_ref, tb=tb, lq=lq, lk=lq,
                    n_head=n_head, d_k=d_k, d_v=d_v, inv_temper=inv_temper)
    x2 = _mha_block(x1, enc, enc_mask,
                    e_wq, e_wk, e_wv, e_wp, e_bp, e_g, e_b,
                    eattn_ref, ctx_ref, tb=tb, lq=lq, lk=lk,
                    n_head=n_head, d_k=d_k, d_v=d_v, inv_temper=inv_temper)

    # Position-wise FFN (Conv1d(k=1) == pointwise linear), residual + LN.
    h = jnp.dot(x2.astype(jnp.bfloat16), f_w1[...],
                preferred_element_type=jnp.float32) + f_b1[...]
    h = jnp.maximum(h, 0.0)
    y = jnp.dot(h.astype(jnp.bfloat16), f_w2[...],
                preferred_element_type=jnp.float32) + f_b2[...]
    y = y + x2
    out_ref[...] = _layer_norm(y, f_g[...], f_b[...]).reshape(tb, lq, d_model)


# ----------------------------------------------------------------------------
# VMEM / tiling / cost heuristics
# ----------------------------------------------------------------------------
def _estimate_step_vmem(tb, lq, lk, lsrc, d_model, h, d_k, d_v, d_inner,
                        weights, weight_bufs):
    f32, bf16 = 4, 2
    attn_b = jnp.dtype(ATTN_DTYPE).itemsize
    # Double-buffered (pipeline depth 2) activation / token-id / output blocks.
    io = 2 * (tb * lq * d_model * f32 + tb * lk * d_model * f32
              + tb * lq * 4 + tb * lsrc * 4
              + tb * lq * d_model * f32
              + h * tb * lq * lq * attn_b
              + h * tb * lq * lk * attn_b)
    wts = weight_bufs * sum(int(np.prod(w.shape)) * w.dtype.itemsize
                            for w in weights)
    scratch = tb * lq * h * d_v * f32
    # Live in-kernel temporaries (packed q/k/v f32+bf16, scores, FFN hidden,
    # a few (M, D) f32 residual / LN intermediates).
    tmp = (tb * (lq + lk) * (2 * h * d_k + h * d_v) * (f32 + bf16)
           + tb * lq * max(lq, lk) * f32 * 2
           + tb * lq * d_inner * (f32 + bf16)
           + 4 * tb * lq * d_model * f32)
    return io + wts + scratch + tmp


def _pick_batch_tile(b, lq, lk, lsrc, d_model, h, d_k, d_v, d_inner, weights):
    """Largest divisor of B whose per-step footprint fits a v7x-safe budget."""
    weight_bufs = 1 if _buffered_one_supported() else 2
    budget = 40 * (1 << 20)     # leave headroom under v7x's 64 MiB VMEM
    best = 1
    for tb in range(1, b + 1):
        if b % tb:
            continue
        est = _estimate_step_vmem(tb, lq, lk, lsrc, d_model, h, d_k, d_v,
                                  d_inner, weights, weight_bufs)
        if est <= budget and (tb == 1 or tb * lq <= 1024):
            best = tb
    return best


def _vmem_limit_bytes(tb, lq, lk, lsrc, d_model, h, d_k, d_v, d_inner, weights):
    weight_bufs = 1 if _buffered_one_supported() else 2
    est = _estimate_step_vmem(tb, lq, lk, lsrc, d_model, h, d_k, d_v, d_inner,
                              weights, weight_bufs)
    # 1.5x headroom for compiler temporaries; never below the 32 MiB default.
    # (If a config genuinely needs >64 MiB it must be re-tiled for v7x anyway.)
    return int(min(max(1.5 * est, 32 * (1 << 20)), 100 * (1 << 20)))


def _cost_estimate(b, lq, lk, d_model, h, d_k, d_v, d_inner, weights):
    hdk, hdv = h * d_k, h * d_v

    def mha_flops(klen):
        return (2 * b * lq * d_model * hdk                 # q projection
                + 2 * b * klen * d_model * (hdk + hdv)     # k, v projection
                + 2 * b * h * lq * klen * d_k              # scores
                + 2 * b * h * lq * klen * d_v              # attn @ v
                + 2 * b * lq * hdv * d_model)              # output projection

    flops = mha_flops(lq) + mha_flops(lk) + 4 * b * lq * d_model * d_inner
    transcendentals = b * h * lq * (lq + lk)               # softmax exps
    attn_b = jnp.dtype(ATTN_DTYPE).itemsize
    bytes_accessed = (2 * b * lq * d_model * 4             # dec in + out
                      + b * lk * d_model * 4               # enc out
                      + b * (lq + lk) * 4                  # token ids
                      + h * b * lq * (lq + lk) * attn_b    # attention maps
                      + sum(int(np.prod(w.shape)) * w.dtype.itemsize
                            for w in weights))
    return pl.CostEstimate(flops=int(flops),
                           transcendentals=int(transcendentals),
                           bytes_accessed=int(bytes_accessed))


# ----------------------------------------------------------------------------
# Per-layer wrapper
# ----------------------------------------------------------------------------
def decoder_layer_apply(dec_in, enc_out, tgt_seq, src_seq, lp,
                        *, n_head, d_k, d_v):
    """One fused decoder layer: (B, Lq, D) -> (B, Lq, D) + attention maps."""
    B, Lq, D = dec_in.shape
    Lk = enc_out.shape[1]
    Lsrc = src_seq.shape[1]
    assert Lsrc == Lk, "src_seq length must match enc_output length"
    d_inner = lp['f_w1'].shape[1]

    weights = (lp['s_wq'], lp['s_wk'], lp['s_wv'], lp['s_wp'], lp['s_bp'],
               lp['s_g'], lp['s_b'],
               lp['e_wq'], lp['e_wk'], lp['e_wv'], lp['e_wp'], lp['e_bp'],
               lp['e_g'], lp['e_b'],
               lp['f_w1'], lp['f_b1'], lp['f_w2'], lp['f_b2'], lp['f_g'],
               lp['f_b'])

    TB = _pick_batch_tile(B, Lq, Lk, Lsrc, D, n_head, d_k, d_v, d_inner,
                          weights)

    kern = functools.partial(_decoder_layer_kernel, n_head=n_head, d_k=d_k,
                             d_v=d_v, inv_temper=float(1.0 / np.sqrt(D)))

    in_specs = [
        pl.BlockSpec((TB, Lq), lambda b: (b, 0)),          # tgt token ids
        pl.BlockSpec((TB, Lsrc), lambda b: (b, 0)),        # src token ids
        pl.BlockSpec((TB, Lq, D), lambda b: (b, 0, 0)),    # dec input
        pl.BlockSpec((TB, Lk, D), lambda b: (b, 0, 0)),    # enc output
    ] + [_weight_spec(w.shape) for w in weights]

    out_shape = (
        jax.ShapeDtypeStruct((B, Lq, D), jnp.float32),
        jax.ShapeDtypeStruct((n_head, B, Lq, Lq), ATTN_DTYPE),
        jax.ShapeDtypeStruct((n_head, B, Lq, Lk), ATTN_DTYPE),
    )
    # Attention maps stay in (H, B, Lq, Lk) layout: each grid step writes H
    # contiguous (TB, Lq, Lk) chunks and the reference (H*B, Lq, Lk) layout is
    # then a free reshape (no extra XLA transpose pass over HBM).
    out_specs = (
        pl.BlockSpec((TB, Lq, D), lambda b: (b, 0, 0)),
        pl.BlockSpec((n_head, TB, Lq, Lq), lambda b: (0, b, 0, 0)),
        pl.BlockSpec((n_head, TB, Lq, Lk), lambda b: (0, b, 0, 0)),
    )

    out, sattn, eattn = pl.pallas_call(
        kern,
        out_shape=out_shape,
        grid=(B // TB,),
        in_specs=in_specs,
        out_specs=out_specs,
        scratch_shapes=[pltpu.VMEM((TB * Lq, n_head * d_v), jnp.float32)],
        compiler_params=pltpu.CompilerParams(
            dimension_semantics=("parallel",),
            vmem_limit_bytes=_vmem_limit_bytes(TB, Lq, Lk, Lsrc, D, n_head,
                                               d_k, d_v, d_inner, weights)),
        cost_estimate=_cost_estimate(B, Lq, Lk, D, n_head, d_k, d_v, d_inner,
                                     weights),
    )(tgt_seq, src_seq, dec_in, enc_out, *weights)

    # (H, B, Lq, Lk) -> (H*B, Lq, Lk): matches the reference attn layout.
    return (out,
            sattn.reshape(n_head * B, Lq, Lq),
            eattn.reshape(n_head * B, Lq, Lk))


# ----------------------------------------------------------------------------
# Decoder forward (embedding glue in plain JAX, layers in Pallas)
# ----------------------------------------------------------------------------
def decoder_forward(params, tgt_seq, tgt_pos, src_seq, enc_output,
                    *, n_head, d_k, d_v):
    dec_input = params['tgt_word_emb'][tgt_seq] + params['position_enc'][tgt_pos]

    dec_output = dec_input
    slf_attns, enc_attns = [], []
    for lp in params['layers']:
        dec_output, sa, ea = decoder_layer_apply(
            dec_output, enc_output, tgt_seq, src_seq, lp,
            n_head=n_head, d_k=d_k, d_v=d_v)
        slf_attns.append(sa)
        enc_attns.append(ea)
    return dec_output, slf_attns, enc_attns


# ----------------------------------------------------------------------------
# Parameter construction + one-time packing for the fused kernel
# ----------------------------------------------------------------------------
def position_encoding_init(n_position, d_pos_vec):
    pe = np.array(
        [[pos / np.power(10000, 2 * (j // 2) / d_pos_vec) for j in range(d_pos_vec)]
         if pos != 0 else np.zeros(d_pos_vec) for pos in range(n_position)])
    pe[1:, 0::2] = np.sin(pe[1:, 0::2])
    pe[1:, 1::2] = np.cos(pe[1:, 1::2])
    return jnp.asarray(pe, dtype=jnp.float32)


def _xavier(key, shape):
    fan_in, fan_out = shape[-2], shape[-1]
    std = np.sqrt(2.0 / (fan_in + fan_out))
    return std * jax.random.normal(key, shape, dtype=jnp.float32)


def init_mha_params(key, n_head, d_model, d_k, d_v):
    ks = jax.random.split(key, 5)
    return {
        'w_qs': _xavier(ks[0], (n_head, d_model, d_k)),
        'w_ks': _xavier(ks[1], (n_head, d_model, d_k)),
        'w_vs': _xavier(ks[2], (n_head, d_model, d_v)),
        'w_proj': _xavier(ks[3], (n_head * d_v, d_model)),
        'b_proj': jnp.zeros((1, d_model), jnp.float32),
        'ln_g': jnp.ones((1, d_model), jnp.float32),
        'ln_b': jnp.zeros((1, d_model), jnp.float32),
    }


def init_ffn_params(key, d_model, d_inner):
    k1, k2 = jax.random.split(key)
    return {
        'w1': _xavier(k1, (d_model, d_inner)),
        'b1': jnp.zeros((1, d_inner), jnp.float32),
        'w2': _xavier(k2, (d_inner, d_model)),
        'b2': jnp.zeros((1, d_model), jnp.float32),
        'ln_g': jnp.ones((1, d_model), jnp.float32),
        'ln_b': jnp.zeros((1, d_model), jnp.float32),
    }


def init_decoder_params(key, n_tgt_vocab, max_length, n_layers, n_head,
                        d_k, d_v, d_word_vec, d_model, d_inner):
    n_position = max_length + 1
    k_emb, k_layers = jax.random.split(key)
    word_emb = 0.1 * jax.random.normal(k_emb, (n_tgt_vocab, d_word_vec),
                                       dtype=jnp.float32)
    word_emb = word_emb.at[PAD].set(0.0)  # padding_idx = 0
    layers = []
    for k in jax.random.split(k_layers, n_layers):
        ka, kb, kc = jax.random.split(k, 3)
        layers.append({
            'slf_attn': init_mha_params(ka, n_head, d_model, d_k, d_v),
            'enc_attn': init_mha_params(kb, n_head, d_model, d_k, d_v),
            'pos_ffn': init_ffn_params(kc, d_model, d_inner),
        })
    return {
        'tgt_word_emb': word_emb,
        'position_enc': position_encoding_init(n_position, d_word_vec),
        'layers': layers,
    }


def _pack_heads(w):
    # (H, D, d) -> (D, H*d): column block h corresponds to head h,
    # so  x @ packed[:, h*d:(h+1)*d] == x @ w[h]
    # TODO(synk): for configs where D / H*d_k / H*d_v / d_inner are not
    #   multiples of 128, pad the packed matrices here (free at runtime) to
    #   restore full-width vld/vst and full MXU columns.
    H, D, d = w.shape
    return jnp.transpose(w, (1, 0, 2)).reshape(D, H * d)


def pack_decoder_params(raw, matmul_dtype=jnp.bfloat16):
    """One-time (outside jit) repack into the fused-kernel layout."""
    _buffered_one_supported()   # warm the Buffered(1) capability probe

    def pack_mha(p, pre):
        return {
            pre + 'wq': _pack_heads(p['w_qs']).astype(matmul_dtype),
            pre + 'wk': _pack_heads(p['w_ks']).astype(matmul_dtype),
            pre + 'wv': _pack_heads(p['w_vs']).astype(matmul_dtype),
            pre + 'wp': p['w_proj'].astype(matmul_dtype),
            pre + 'bp': p['b_proj'],
            pre + 'g': p['ln_g'],
            pre + 'b': p['ln_b'],
        }

    layers = []
    for l in raw['layers']:
        d = {}
        d.update(pack_mha(l['slf_attn'], 's_'))
        d.update(pack_mha(l['enc_attn'], 'e_'))
        fp = l['pos_ffn']
        d.update({
            'f_w1': fp['w1'].astype(matmul_dtype),
            'f_b1': fp['b1'],
            'f_w2': fp['w2'].astype(matmul_dtype),
            'f_b2': fp['b2'],
            'f_g': fp['ln_g'],
            'f_b': fp['ln_b'],
        })
        layers.append(d)
    return {'tgt_word_emb': raw['tgt_word_emb'],
            'position_enc': raw['position_enc'],
            'layers': layers}


# ----------------------------------------------------------------------------
# Pure-JAX float32 reference (for a loose correctness check)
# ----------------------------------------------------------------------------
def build_masks(tgt_seq, src_seq):
    B, Lq = tgt_seq.shape
    Lsrc = src_seq.shape[1]
    pad_mask = jnp.broadcast_to((tgt_seq == PAD)[:, None, :], (B, Lq, Lq))
    sub_mask = jnp.triu(jnp.ones((Lq, Lq), dtype=jnp.int32), k=1)[None]
    slf_mask = ((pad_mask.astype(jnp.int32) + sub_mask) > 0).astype(jnp.int32)
    enc_mask = jnp.broadcast_to((src_seq == PAD)[:, None, :],
                                (B, Lq, Lsrc)).astype(jnp.int32)
    return slf_mask, enc_mask


def _mha_ref(q, k, v, mask, p):
    H, D, dk = p['w_qs'].shape
    dv = p['w_vs'].shape[2]
    B, Lq, _ = q.shape
    Lk = k.shape[1]
    qs = jnp.einsum('bqd,hde->hbqe', q, p['w_qs']).reshape(H * B, Lq, dk)
    ks = jnp.einsum('bkd,hde->hbke', k, p['w_ks']).reshape(H * B, Lk, dk)
    vs = jnp.einsum('bkd,hde->hbke', v, p['w_vs']).reshape(H * B, Lk, dv)
    mrep = jnp.tile(mask, (H, 1, 1))
    scores = jnp.einsum('nqe,nke->nqk', qs, ks) / jnp.sqrt(jnp.float32(D))
    scores = jnp.where(mrep > 0, -1e30, scores)
    attn = jax.nn.softmax(scores, axis=-1)
    ctx = jnp.einsum('nqk,nke->nqe', attn, vs)
    ctx = ctx.reshape(H, B, Lq, dv).transpose(1, 2, 0, 3).reshape(B, Lq, H * dv)
    y = ctx @ p['w_proj'] + p['b_proj'][0] + q
    return _layer_norm(y, p['ln_g'][0], p['ln_b'][0]), attn


def _ffn_ref(x, p):
    h = jnp.maximum(x @ p['w1'] + p['b1'][0], 0.0)
    y = h @ p['w2'] + p['b2'][0] + x
    return _layer_norm(y, p['ln_g'][0], p['ln_b'][0])


def decoder_forward_ref(raw, tgt_seq, tgt_pos, src_seq, enc_output):
    x = raw['tgt_word_emb'][tgt_seq] + raw['position_enc'][tgt_pos]
    slf_mask, enc_mask = build_masks(tgt_seq, src_seq)
    slf_attns, enc_attns = [], []
    for l in raw['layers']:
        x, sa = _mha_ref(x, x, x, slf_mask, l['slf_attn'])
        x, ea = _mha_ref(x, enc_output, enc_output, enc_mask, l['enc_attn'])
        x = _ffn_ref(x, l['pos_ffn'])
        slf_attns.append(sa)
        enc_attns.append(ea)
    return x, slf_attns, enc_attns


# ----------------------------------------------------------------------------
if __name__ == "__main__":
    B, L, V = 2, 8, 50
    D_MODEL, N_HEAD, D_K, D_V, D_INNER, N_LAYERS = 32, 4, 8, 8, 64, 2

    raw_params = init_decoder_params(jax.random.PRNGKey(0), V, L, N_LAYERS,
                                     N_HEAD, D_K, D_V, D_MODEL, D_MODEL,
                                     D_INNER)
    params = pack_decoder_params(raw_params)

    k1, k2, k3 = jax.random.split(jax.random.PRNGKey(0), 3)
    tgt_seq = jax.random.randint(k1, (B, L), 1, V, dtype=jnp.int32)
    tgt_pos = jnp.broadcast_to(jnp.arange(1, L + 1, dtype=jnp.int32)[None, :],
                               (B, L))
    src_seq = jax.random.randint(k2, (B, L), 1, V, dtype=jnp.int32)
    src_seq = src_seq.at[:, -1].set(PAD)  # exercise the key-side PAD mask
    enc_output = jax.random.normal(k3, (B, L, D_MODEL), dtype=jnp.float32)

    fwd = jax.jit(functools.partial(decoder_forward,
                                    n_head=N_HEAD, d_k=D_K, d_v=D_V))
    dec_out, slf_attns, enc_attns = fwd(params, tgt_seq, tgt_pos, src_seq,
                                        enc_output)
    jax.block_until_ready(dec_out)

    # Shape / sanity checks matching the module interface.
    assert dec_out.shape == (B, L, D_MODEL)
    assert len(slf_attns) == N_LAYERS and len(enc_attns) == N_LAYERS
    assert slf_attns[0].shape == (N_HEAD * B, L, L)
    assert enc_attns[0].shape == (N_HEAD * B, L, L)
    assert bool(jnp.all(jnp.isfinite(dec_out)))

    # Loose numerical check against a pure-JAX f32 reference
    # (kernel matmuls run in bf16 and attention maps are written back in bf16,
    #  so tolerances are coarse but still catch structural bugs such as wrong
    #  head ordering, mask generation or batch-tile indexing).
    ref_out, ref_slf, ref_enc = decoder_forward_ref(raw_params, tgt_seq,
                                                    tgt_pos, src_seq,
                                                    enc_output)
    assert float(jnp.max(jnp.abs(dec_out - ref_out))) < 0.25
    assert float(jnp.max(jnp.abs(slf_attns[-1].astype(jnp.float32)
                                 - ref_slf[-1]))) < 0.1
    assert float(jnp.max(jnp.abs(enc_attns[-1].astype(jnp.float32)
                                 - ref_enc[-1]))) < 0.1

    print("KERNEL_OK")
</pallas_src>

<mosaic_0001>
module attributes {stable_mosaic.version = 11 : i64} {
  func.func @_probe_kernel(%arg0: i32, %arg1: memref<8x128xf32, #tpu.memory_space<vmem>>, %arg2: memref<8x128xf32, #tpu.memory_space<vmem>>) attributes {dimension_semantics = [#tpu.dimension_semantics<arbitrary>], iteration_bounds = array<i64: 2>, scalar_prefetch = 0 : i64, scratch_operands = 0 : i64, tpu.core_type = #tpu.core_type<tc>, window_params = [{pipeline_mode = #tpu.pipeline_mode<synchronous>, transform_indices = @transform_0, window_bounds = array<i64: 8, 128>}, {pipeline_mode = #tpu.pipeline_mode<synchronous>, transform_indices = @transform_1, window_bounds = array<i64: 8, 128>}]} {
    %c0 = arith.constant 0 : index
    %c0_0 = arith.constant 0 : index
    %0 = vector.load %arg1[%c0, %c0_0] : memref<8x128xf32, #tpu.memory_space<vmem>>, vector<8x128xf32>
    %cst = arith.constant 1.000000e+00 : f32
    %1 = vector.broadcast %cst : f32 to vector<8x128xf32>
    %2 = arith.addf %0, %1 : vector<8x128xf32>
    %c0_1 = arith.constant 0 : index
    %c0_2 = arith.constant 0 : index
    %3 = vector.load %arg2[%c0_1, %c0_2] : memref<8x128xf32, #tpu.memory_space<vmem>>, vector<8x128xf32>
    tpu.vector_store %arg2[%c0_1, %c0_2], %2 {strides = array<i32>} : memref<8x128xf32, #tpu.memory_space<vmem>>, vector<8x128xf32>,
    return
  }
  func.func @transform_0(%arg0: i32) -> (i32, i32) {
    %c0_i32 = arith.constant 0 : i32
    %c0_i32_0 = arith.constant 0 : i32
    %c0_i32_1 = arith.constant 0 : i32
    return %c0_i32, %c0_i32_0 : i32, i32
  }
  func.func @transform_1(%arg0: i32) -> (i32, i32) {
    %c0_i32 = arith.constant 0 : i32
    %c0_i32_0 = arith.constant 0 : i32
    %c0_i32_1 = arith.constant 0 : i32
    return %c0_i32, %c0_i32_0 : i32, i32
  }
}

module attributes {stable_mosaic.version = 11 : i64} {
  func.func @_decoder_layer_kernel(%arg0: i32, %arg1: memref<2x8xi32, #tpu.memory_space<vmem>>, %arg2: memref<2x8xi32, #tpu.memory_space<vmem>>, %arg3: memref<2x8x32xf32, #tpu.memory_space<vmem>>, %arg4: memref<2x8x32xf32, #tpu.memory_space<vmem>>, %arg5: memref<32x32xbf16, #tpu.memory_space<vmem>>, %arg6: memref<32x32xbf16, #tpu.memory_space<vmem>>, %arg7: memref<32x32xbf16, #tpu.memory_space<vmem>>, %arg8: memref<32x32xbf16, #tpu.memory_space<vmem>>, %arg9: memref<1x32xf32, #tpu.memory_space<vmem>>, %arg10: memref<1x32xf32, #tpu.memory_space<vmem>>, %arg11: memref<1x32xf32, #tpu.memory_space<vmem>>, %arg12: memref<32x32xbf16, #tpu.memory_space<vmem>>, %arg13: memref<32x32xbf16, #tpu.memory_space<vmem>>, %arg14: memref<32x32xbf16, #tpu.memory_space<vmem>>, %arg15: memref<32x32xbf16, #tpu.memory_space<vmem>>, %arg16: memref<1x32xf32, #tpu.memory_space<vmem>>, %arg17: memref<1x32xf32, #tpu.memory_space<vmem>>, %arg18: memref<1x32xf32, #tpu.memory_space<vmem>>, %arg19: memref<32x64xbf16, #tpu.memory_space<vmem>>, %arg20: memref<1x64xf32, #tpu.memory_space<vmem>>, %arg21: memref<64x32xbf16, #tpu.memory_space<vmem>>, %arg22: memref<1x32xf32, #tpu.memory_space<vmem>>, %arg23: memref<1x32xf32, #tpu.memory_space<vmem>>, %arg24: memref<1x32xf32, #tpu.memory_space<vmem>>, %arg25: memref<2x8x32xf32, #tpu.memory_space<vmem>>, %arg26: memref<4x2x8x8xbf16, #tpu.memory_space<vmem>>, %arg27: memref<4x2x8x8xbf16, #tpu.memory_space<vmem>>, %arg28: memref<16x32xf32, #tpu.memory_space<vmem>>) attributes {dimension_semantics = [#tpu.dimension_semantics<parallel>], iteration_bounds = array<i64: 1>, scalar_prefetch = 0 : i64, scratch_operands = 1 : i64, tpu.core_type = #tpu.core_type<tc>, window_params = [{transform_indices = @transform_0, window_bounds = array<i64: 2, 8>}, {transform_indices = @transform_1, window_bounds = array<i64: 2, 8>}, {transform_indices = @transform_2, window_bounds = array<i64: 2, 8, 32>}, {transform_indices = @transform_3, window_bounds = array<i64: 2, 8, 32>}, {pipeline_mode = #tpu.pipeline_mode<synchronous>, transform_indices = @transform_4, window_bounds = array<i64: 32, 32>}, {pipeline_mode = #tpu.pipeline_mode<synchronous>, transform_indices = @transform_5, window_bounds = array<i64: 32, 32>}, {pipeline_mode = #tpu.pipeline_mode<synchronous>, transform_indices = @transform_6, window_bounds = array<i64: 32, 32>}, {pipeline_mode = #tpu.pipeline_mode<synchronous>, transform_indices = @transform_7, window_bounds = array<i64: 32, 32>}, {pipeline_mode = #tpu.pipeline_mode<synchronous>, transform_indices = @transform_8, window_bounds = array<i64: 1, 32>}, {pipeline_mode = #tpu.pipeline_mode<synchronous>, transform_indices = @transform_9, window_bounds = array<i64: 1, 32>}, {pipeline_mode = #tpu.pipeline_mode<synchronous>, transform_indices = @transform_10, window_bounds = array<i64: 1, 32>}, {pipeline_mode = #tpu.pipeline_mode<synchronous>, transform_indices = @transform_11, window_bounds = array<i64: 32, 32>}, {pipeline_mode = #tpu.pipeline_mode<synchronous>, transform_indices = @transform_12, window_bounds = array<i64: 32, 32>}, {pipeline_mode = #tpu.pipeline_mode<synchronous>, transform_indices = @transform_13, window_bounds = array<i64: 32, 32>}, {pipeline_mode = #tpu.pipeline_mode<synchronous>, transform_indices = @transform_14, window_bounds = array<i64: 32, 32>}, {pipeline_mode = #tpu.pipeline_mode<synchronous>, transform_indices = @transform_15, window_bounds = array<i64: 1, 32>}, {pipeline_mode = #tpu.pipeline_mode<synchronous>, transform_indices = @transform_16, window_bounds = array<i64: 1, 32>}, {pipeline_mode = #tpu.pipeline_mode<synchronous>, transform_indices = @transform_17, window_bounds = array<i64: 1, 32>}, {pipeline_mode = #tpu.pipeline_mode<synchronous>, transform_indices = @transform_18, window_bounds = array<i64: 32, 64>}, {pipeline_mode = #tpu.pipeline_mode<synchronous>, transform_indices = @transform_19, window_bounds = array<i64: 1, 64>}, {pipeline_mode = #tpu.pipeline_mode<synchronous>, transform_indices = @transform_20, window_bounds = array<i64: 64, 32>}, {pipeline_mode = #tpu.pipeline_mode<synchronous>, transform_indices = @transform_21, window_bounds = array<i64: 1, 32>}, {pipeline_mode = #tpu.pipeline_mode<synchronous>, transform_indices = @transform_22, window_bounds = array<i64: 1, 32>}, {pipeline_mode = #tpu.pipeline_mode<synchronous>, transform_indices = @transform_23, window_bounds = array<i64: 1, 32>}, {transform_indices = @transform_24, window_bounds = array<i64: 2, 8, 32>}, {transform_indices = @transform_25, window_bounds = array<i64: 4, 2, 8, 8>}, {transform_indices = @transform_26, window_bounds = array<i64: 4, 2, 8, 8>}]} {
    %c0 = arith.constant 0 : index
    %c0_0 = arith.constant 0 : index
    %c0_1 = arith.constant 0 : index
    %0 = vector.load %arg3[%c0, %c0_0, %c0_1] : memref<2x8x32xf32, #tpu.memory_space<vmem>>, vector<2x8x32xf32>
    %1 = vector.shape_cast %0 : vector<2x8x32xf32> to vector<16x32xf32>
    %c0_2 = arith.constant 0 : index
    %c0_3 = arith.constant 0 : index
    %c0_4 = arith.constant 0 : index
    %2 = vector.load %arg4[%c0_2, %c0_3, %c0_4] : memref<2x8x32xf32, #tpu.memory_space<vmem>>, vector<2x8x32xf32>
    %3 = vector.shape_cast %2 : vector<2x8x32xf32> to vector<16x32xf32>
    %c0_5 = arith.constant 0 : index
    %c0_6 = arith.constant 0 : index
    %4 = vector.load %arg1[%c0_5, %c0_6] : memref<2x8xi32, #tpu.memory_space<vmem>>, vector<2x8xi32>
    %c0_7 = arith.constant 0 : index
    %c0_8 = arith.constant 0 : index
    %5 = vector.load %arg2[%c0_7, %c0_8] : memref<2x8xi32, #tpu.memory_space<vmem>>, vector<2x8xi32>
    %6 = tpu.iota {dimensions = array<i32: 0>} : vector<8x8xi32>
    %7 = tpu.iota {dimensions = array<i32: 1>} : vector<8x8xi32>
    %8 = arith.cmpi sgt, %7, %6 : vector<8x8xi32>
    %9 = arith.truncf %1 : vector<16x32xf32> to vector<16x32xbf16>
    %10 = arith.truncf %1 : vector<16x32xf32> to vector<16x32xbf16>
    %c0_9 = arith.constant 0 : index
    %c0_10 = arith.constant 0 : index
    %11 = vector.load %arg5[%c0_9, %c0_10] : memref<32x32xbf16, #tpu.memory_space<vmem>>, vector<32x32xbf16>
    %cst = arith.constant dense<0.000000e+00> : vector<16x32xf32>
    %12 = tpu.matmul %9, %11, %cst {dimension_numbers = #tpu.dot_dimension_numbers<[1], [0], [0], [1], [0, 0, 1, 1], [], []>} : vector<16x32xbf16>, vector<32x32xbf16>, vector<16x32xf32> -> vector<16x32xf32>
    %cst_11 = arith.constant 0.176776692 : f32
    %13 = vector.broadcast %cst_11 : f32 to vector<16x32xf32>
    %14 = arith.mulf %12, %13 : vector<16x32xf32>
    %c0_12 = arith.constant 0 : index
    %c0_13 = arith.constant 0 : index
    %15 = vector.load %arg6[%c0_12, %c0_13] : memref<32x32xbf16, #tpu.memory_space<vmem>>, vector<32x32xbf16>
    %cst_14 = arith.constant dense<0.000000e+00> : vector<16x32xf32>
    %16 = tpu.matmul %10, %15, %cst_14 {dimension_numbers = #tpu.dot_dimension_numbers<[1], [0], [0], [1], [0, 0, 1, 1], [], []>} : vector<16x32xbf16>, vector<32x32xbf16>, vector<16x32xf32> -> vector<16x32xf32>
    %c0_15 = arith.constant 0 : index
    %c0_16 = arith.constant 0 : index
    %17 = vector.load %arg7[%c0_15, %c0_16] : memref<32x32xbf16, #tpu.memory_space<vmem>>, vector<32x32xbf16>
    %cst_17 = arith.constant dense<0.000000e+00> : vector<16x32xf32>
    %18 = tpu.matmul %10, %17, %cst_17 {dimension_numbers = #tpu.dot_dimension_numbers<[1], [0], [0], [1], [0, 0, 1, 1], [], []>} : vector<16x32xbf16>, vector<32x32xbf16>, vector<16x32xf32> -> vector<16x32xf32>
    %19 = arith.truncf %14 : vector<16x32xf32> to vector<16x32xbf16>
    %20 = arith.truncf %16 : vector<16x32xf32> to vector<16x32xbf16>
    %21 = arith.truncf %18 : vector<16x32xf32> to vector<16x32xbf16>
    %22 = vector.extract_strided_slice %4 {offsets = [0, 0], sizes = [1, 8], strides = [1, 1]} : vector<2x8xi32> to vector<1x8xi32>
    %c0_i32 = arith.constant 0 : i32
    %23 = vector.broadcast %c0_i32 : i32 to vector<1x8xi32>
    %24 = arith.cmpi eq, %22, %23 : vector<1x8xi32>
    %25 = vector.shape_cast %24 : vector<1x8xi1> to vector<1x8xi1>
    %26 = vector.broadcast %25 : vector<1x8xi1> to vector<8x8xi1>
    %27 = arith.ori %26, %8 : vector<8x8xi1>
    %28 = vector.extract_strided_slice %19 {offsets = [0, 0], sizes = [8, 8], strides = [1, 1]} : vector<16x32xbf16> to vector<8x8xbf16>
    %29 = vector.extract_strided_slice %20 {offsets = [0, 0], sizes = [8, 8], strides = [1, 1]} : vector<16x32xbf16> to vector<8x8xbf16>
    %30 = vector.extract_strided_slice %21 {offsets = [0, 0], sizes = [8, 8], strides = [1, 1]} : vector<16x32xbf16> to vector<8x8xbf16>
    %31 = tpu.transpose %29, [1, 0] : vector<8x8xbf16> -> vector<8x8xbf16>
    %cst_18 = arith.constant dense<0.000000e+00> : vector<8x8xf32>
    %32 = tpu.matmul %28, %31, %cst_18 {dimension_numbers = #tpu.dot_dimension_numbers<[1], [0], [0], [1], [0, 0, 1, 1], [], []>} : vector<8x8xbf16>, vector<8x8xbf16>, vector<8x8xf32> -> vector<8x8xf32>
    %cst_19 = arith.constant -1.000000e+30 : f32
    %33 = vector.broadcast %cst_19 : f32 to vector<8x8xf32>
    %34 = arith.select %27, %33, %32 : vector<8x8xi1>, vector<8x8xf32>
    %cst_20 = arith.constant dense<0xFF800000> : vector<8xf32>
    %35 = vector.multi_reduction <maximumf>, %34, %cst_20 [1] : vector<8x8xf32> to vector<8xf32>
    %36 = vector.shape_cast %35 : vector<8xf32> to vector<8x1xf32>
    %37 = vector.broadcast %36 : vector<8x1xf32> to vector<8x8xf32>
    %38 = arith.subf %34, %37 : vector<8x8xf32>
    %39 = math.exp %38 : vector<8x8xf32>
    %cst_21 = arith.constant dense<0.000000e+00> : vector<8xf32>
    %40 = vector.multi_reduction <add>, %39, %cst_21 [1] : vector<8x8xf32> to vector<8xf32>
    %41 = vector.shape_cast %40 : vector<8xf32> to vector<8x1xf32>
    %42 = tpu.reciprocal %41 {approx = true} : vector<8x1xf32> -> vector<8x1xf32>
    %43 = vector.broadcast %42 : vector<8x1xf32> to vector<8x8xf32>
    %44 = arith.mulf %39, %43 : vector<8x8xf32>
    %45 = arith.truncf %44 : vector<8x8xf32> to vector<8x8xbf16>
    %c0_22 = arith.constant 0 : index
    %c0_23 = arith.constant 0 : index
    %c0_24 = arith.constant 0 : index
    %c0_25 = arith.constant 0 : index
    %46 = vector.load %arg26[%c0_22, %c0_23, %c0_24, %c0_25] : memref<4x2x8x8xbf16, #tpu.memory_space<vmem>>, vector<1x1x8x8xbf16>
    %47 = vector.shape_cast %46 : vector<1x1x8x8xbf16> to vector<8x8xbf16>
    %48 = vector.shape_cast %45 : vector<8x8xbf16> to vector<1x1x8x8xbf16>
    tpu.vector_store %arg26[%c0_22, %c0_23, %c0_24, %c0_25], %48 {strides = array<i32>} : memref<4x2x8x8xbf16, #tpu.memory_space<vmem>>, vector<1x1x8x8xbf16>,
    %49 = arith.truncf %44 : vector<8x8xf32> to vector<8x8xbf16>
    %cst_26 = arith.constant dense<0.000000e+00> : vector<8x8xf32>
    %50 = tpu.matmul %49, %30, %cst_26 {dimension_numbers = #tpu.dot_dimension_numbers<[1], [0], [0], [1], [0, 0, 1, 1], [], []>} : vector<8x8xbf16>, vector<8x8xbf16>, vector<8x8xf32> -> vector<8x8xf32>
    %c0_27 = arith.constant 0 : index
    %c0_28 = arith.constant 0 : index
    %51 = vector.load %arg28[%c0_27, %c0_28] : memref<16x32xf32, #tpu.memory_space<vmem>>, vector<8x8xf32>
    tpu.vector_store %arg28[%c0_27, %c0_28], %50 {strides = array<i32>} : memref<16x32xf32, #tpu.memory_space<vmem>>, vector<8x8xf32>,
    %52 = vector.extract_strided_slice %19 {offsets = [0, 8], sizes = [8, 8], strides = [1, 1]} : vector<16x32xbf16> to vector<8x8xbf16>
    %53 = vector.extract_strided_slice %20 {offsets = [0, 8], sizes = [8, 8], strides = [1, 1]} : vector<16x32xbf16> to vector<8x8xbf16>
    %54 = vector.extract_strided_slice %21 {offsets = [0, 8], sizes = [8, 8], strides = [1, 1]} : vector<16x32xbf16> to vector<8x8xbf16>
    %55 = tpu.transpose %53, [1, 0] : vector<8x8xbf16> -> vector<8x8xbf16>
    %cst_29 = arith.constant dense<0.000000e+00> : vector<8x8xf32>
    %56 = tpu.matmul %52, %55, %cst_29 {dimension_numbers = #tpu.dot_dimension_numbers<[1], [0], [0], [1], [0, 0, 1, 1], [], []>} : vector<8x8xbf16>, vector<8x8xbf16>, vector<8x8xf32> -> vector<8x8xf32>
    %cst_30 = arith.constant -1.000000e+30 : f32
    %57 = vector.broadcast %cst_30 : f32 to vector<8x8xf32>
    %58 = arith.select %27, %57, %56 : vector<8x8xi1>, vector<8x8xf32>
    %cst_31 = arith.constant dense<0xFF800000> : vector<8xf32>
    %59 = vector.multi_reduction <maximumf>, %58, %cst_31 [1] : vector<8x8xf32> to vector<8xf32>
    %60 = vector.shape_cast %59 : vector<8xf32> to vector<8x1xf32>
    %61 = vector.broadcast %60 : vector<8x1xf32> to vector<8x8xf32>
    %62 = arith.subf %58, %61 : vector<8x8xf32>
    %63 = math.exp %62 : vector<8x8xf32>
    %cst_32 = arith.constant dense<0.000000e+00> : vector<8xf32>
    %64 = vector.multi_reduction <add>, %63, %cst_32 [1] : vector<8x8xf32> to vector<8xf32>
    %65 = vector.shape_cast %64 : vector<8xf32> to vector<8x1xf32>
    %66 = tpu.reciprocal %65 {approx = true} : vector<8x1xf32> -> vector<8x1xf32>
    %67 = vector.broadcast %66 : vector<8x1xf32> to vector<8x8xf32>
    %68 = arith.mulf %63, %67 : vector<8x8xf32>
    %69 = arith.truncf %68 : vector<8x8xf32> to vector<8x8xbf16>
    %c1 = arith.constant 1 : index
    %c0_33 = arith.constant 0 : index
    %c0_34 = arith.constant 0 : index
    %c0_35 = arith.constant 0 : index
    %70 = vector.load %arg26[%c1, %c0_33, %c0_34, %c0_35] : memref<4x2x8x8xbf16, #tpu.memory_space<vmem>>, vector<1x1x8x8xbf16>
    %71 = vector.shape_cast %70 : vector<1x1x8x8xbf16> to vector<8x8xbf16>
    %72 = vector.shape_cast %69 : vector<8x8xbf16> to vector<1x1x8x8xbf16>
    tpu.vector_store %arg26[%c1, %c0_33, %c0_34, %c0_35], %72 {strides = array<i32>} : memref<4x2x8x8xbf16, #tpu.memory_space<vmem>>, vector<1x1x8x8xbf16>,
    %73 = arith.truncf %68 : vector<8x8xf32> to vector<8x8xbf16>
    %cst_36 = arith.constant dense<0.000000e+00> : vector<8x8xf32>
    %74 = tpu.matmul %73, %54, %cst_36 {dimension_numbers = #tpu.dot_dimension_numbers<[1], [0], [0], [1], [0, 0, 1, 1], [], []>} : vector<8x8xbf16>, vector<8x8xbf16>, vector<8x8xf32> -> vector<8x8xf32>
    %c0_37 = arith.constant 0 : index
    %c8 = arith.constant 8 : index
    %75 = vector.load %arg28[%c0_37, %c8] : memref<16x32xf32, #tpu.memory_space<vmem>>, vector<8x8xf32>
    tpu.vector_store %arg28[%c0_37, %c8], %74 {strides = array<i32>} : memref<16x32xf32, #tpu.memory_space<vmem>>, vector<8x8xf32>,
    %76 = vector.extract_strided_slice %19 {offsets = [0, 16], sizes = [8, 8], strides = [1, 1]} : vector<16x32xbf16> to vector<8x8xbf16>
    %77 = vector.extract_strided_slice %20 {offsets = [0, 16], sizes = [8, 8], strides = [1, 1]} : vector<16x32xbf16> to vector<8x8xbf16>
    %78 = vector.extract_strided_slice %21 {offsets = [0, 16], sizes = [8, 8], strides = [1, 1]} : vector<16x32xbf16> to vector<8x8xbf16>
    %79 = tpu.transpose %77, [1, 0] : vector<8x8xbf16> -> vector<8x8xbf16>
    %cst_38 = arith.constant dense<0.000000e+00> : vector<8x8xf32>
    %80 = tpu.matmul %76, %79, %cst_38 {dimension_numbers = #tpu.dot_dimension_numbers<[1], [0], [0], [1], [0, 0, 1, 1], [], []>} : vector<8x8xbf16>, vector<8x8xbf16>, vector<8x8xf32> -> vector<8x8xf32>
    %cst_39 = arith.constant -1.000000e+30 : f32
    %81 = vector.broadcast %cst_39 : f32 to vector<8x8xf32>
    %82 = arith.select %27, %81, %80 : vector<8x8xi1>, vector<8x8xf32>
    %cst_40 = arith.constant dense<0xFF800000> : vector<8xf32>
    %83 = vector.multi_reduction <maximumf>, %82, %cst_40 [1] : vector<8x8xf32> to vector<8xf32>
    %84 = vector.shape_cast %83 : vector<8xf32> to vector<8x1xf32>
    %85 = vector.broadcast %84 : vector<8x1xf32> to vector<8x8xf32>
    %86 = arith.subf %82, %85 : vector<8x8xf32>
    %87 = math.exp %86 : vector<8x8xf32>
    %cst_41 = arith.constant dense<0.000000e+00> : vector<8xf32>
    %88 = vector.multi_reduction <add>, %87, %cst_41 [1] : vector<8x8xf32> to vector<8xf32>
    %89 = vector.shape_cast %88 : vector<8xf32> to vector<8x1xf32>
    %90 = tpu.reciprocal %89 {approx = true} : vector<8x1xf32> -> vector<8x1xf32>
    %91 = vector.broadcast %90 : vector<8x1xf32> to vector<8x8xf32>
    %92 = arith.mulf %87, %91 : vector<8x8xf32>
    %93 = arith.truncf %92 : vector<8x8xf32> to vector<8x8xbf16>
    %c2 = arith.constant 2 : index
    %c0_42 = arith.constant 0 : index
    %c0_43 = arith.constant 0 : index
    %c0_44 = arith.constant 0 : index
    %94 = vector.load %arg26[%c2, %c0_42, %c0_43, %c0_44] : memref<4x2x8x8xbf16, #tpu.memory_space<vmem>>, vector<1x1x8x8xbf16>
    %95 = vector.shape_cast %94 : vector<1x1x8x8xbf16> to vector<8x8xbf16>
    %96 = vector.shape_cast %93 : vector<8x8xbf16> to vector<1x1x8x8xbf16>
    tpu.vector_store %arg26[%c2, %c0_42, %c0_43, %c0_44], %96 {strides = array<i32>} : memref<4x2x8x8xbf16, #tpu.memory_space<vmem>>, vector<1x1x8x8xbf16>,
    %97 = arith.truncf %92 : vector<8x8xf32> to vector<8x8xbf16>
    %cst_45 = arith.constant dense<0.000000e+00> : vector<8x8xf32>
    %98 = tpu.matmul %97, %78, %cst_45 {dimension_numbers = #tpu.dot_dimension_numbers<[1], [0], [0], [1], [0, 0, 1, 1], [], []>} : vector<8x8xbf16>, vector<8x8xbf16>, vector<8x8xf32> -> vector<8x8xf32>
    %c0_46 = arith.constant 0 : index
    %c16 = arith.constant 16 : index
    %99 = vector.load %arg28[%c0_46, %c16] : memref<16x32xf32, #tpu.memory_space<vmem>>, vector<8x8xf32>
    tpu.vector_store %arg28[%c0_46, %c16], %98 {strides = array<i32>} : memref<16x32xf32, #tpu.memory_space<vmem>>, vector<8x8xf32>,
    %100 = vector.extract_strided_slice %19 {offsets = [0, 24], sizes = [8, 8], strides = [1, 1]} : vector<16x32xbf16> to vector<8x8xbf16>
    %101 = vector.extract_strided_slice %20 {offsets = [0, 24], sizes = [8, 8], strides = [1, 1]} : vector<16x32xbf16> to vector<8x8xbf16>
    %102 = vector.extract_strided_slice %21 {offsets = [0, 24], sizes = [8, 8], strides = [1, 1]} : vector<16x32xbf16> to vector<8x8xbf16>
    %103 = tpu.transpose %101, [1, 0] : vector<8x8xbf16> -> vector<8x8xbf16>
    %cst_47 = arith.constant dense<0.000000e+00> : vector<8x8xf32>
    %104 = tpu.matmul %100, %103, %cst_47 {dimension_numbers = #tpu.dot_dimension_numbers<[1], [0], [0], [1], [0, 0, 1, 1], [], []>} : vector<8x8xbf16>, vector<8x8xbf16>, vector<8x8xf32> -> vector<8x8xf32>
    %cst_48 = arith.constant -1.000000e+30 : f32
    %105 = vector.broadcast %cst_48 : f32 to vector<8x8xf32>
    %106 = arith.select %27, %105, %104 : vector<8x8xi1>, vector<8x8xf32>
    %cst_49 = arith.constant dense<0xFF800000> : vector<8xf32>
    %107 = vector.multi_reduction <maximumf>, %106, %cst_49 [1] : vector<8x8xf32> to vector<8xf32>
    %108 = vector.shape_cast %107 : vector<8xf32> to vector<8x1xf32>
    %109 = vector.broadcast %108 : vector<8x1xf32> to vector<8x8xf32>
    %110 = arith.subf %106, %109 : vector<8x8xf32>
    %111 = math.exp %110 : vector<8x8xf32>
    %cst_50 = arith.constant dense<0.000000e+00> : vector<8xf32>
    %112 = vector.multi_reduction <add>, %111, %cst_50 [1] : vector<8x8xf32> to vector<8xf32>
    %113 = vector.shape_cast %112 : vector<8xf32> to vector<8x1xf32>
    %114 = tpu.reciprocal %113 {approx = true} : vector<8x1xf32> -> vector<8x1xf32>
    %115 = vector.broadcast %114 : vector<8x1xf32> to vector<8x8xf32>
    %116 = arith.mulf %111, %115 : vector<8x8xf32>
    %117 = arith.truncf %116 : vector<8x8xf32> to vector<8x8xbf16>
    %c3 = arith.constant 3 : index
    %c0_51 = arith.constant 0 : index
    %c0_52 = arith.constant 0 : index
    %c0_53 = arith.constant 0 : index
    %118 = vector.load %arg26[%c3, %c0_51, %c0_52, %c0_53] : memref<4x2x8x8xbf16, #tpu.memory_space<vmem>>, vector<1x1x8x8xbf16>
    %119 = vector.shape_cast %118 : vector<1x1x8x8xbf16> to vector<8x8xbf16>
    %120 = vector.shape_cast %117 : vector<8x8xbf16> to vector<1x1x8x8xbf16>
    tpu.vector_store %arg26[%c3, %c0_51, %c0_52, %c0_53], %120 {strides = array<i32>} : memref<4x2x8x8xbf16, #tpu.memory_space<vmem>>, vector<1x1x8x8xbf16>,
    %121 = arith.truncf %116 : vector<8x8xf32> to vector<8x8xbf16>
    %cst_54 = arith.constant dense<0.000000e+00> : vector<8x8xf32>
    %122 = tpu.matmul %121, %102, %cst_54 {dimension_numbers = #tpu.dot_dimension_numbers<[1], [0], [0], [1], [0, 0, 1, 1], [], []>} : vector<8x8xbf16>, vector<8x8xbf16>, vector<8x8xf32> -> vector<8x8xf32>
    %c0_55 = arith.constant 0 : index
    %c24 = arith.constant 24 : index
    %123 = vector.load %arg28[%c0_55, %c24] : memref<16x32xf32, #tpu.memory_space<vmem>>, vector<8x8xf32>
    tpu.vector_store %arg28[%c0_55, %c24], %122 {strides = array<i32>} : memref<16x32xf32, #tpu.memory_space<vmem>>, vector<8x8xf32>,
    %124 = vector.extract_strided_slice %4 {offsets = [1, 0], sizes = [1, 8], strides = [1, 1]} : vector<2x8xi32> to vector<1x8xi32>
    %c0_i32_56 = arith.constant 0 : i32
    %125 = vector.broadcast %c0_i32_56 : i32 to vector<1x8xi32>
    %126 = arith.cmpi eq, %124, %125 : vector<1x8xi32>
    %127 = vector.shape_cast %126 : vector<1x8xi1> to vector<1x8xi1>
    %128 = vector.broadcast %127 : vector<1x8xi1> to vector<8x8xi1>
    %129 = arith.ori %128, %8 : vector<8x8xi1>
    %130 = vector.extract_strided_slice %19 {offsets = [8, 0], sizes = [8, 8], strides = [1, 1]} : vector<16x32xbf16> to vector<8x8xbf16>
    %131 = vector.extract_strided_slice %20 {offsets = [8, 0], sizes = [8, 8], strides = [1, 1]} : vector<16x32xbf16> to vector<8x8xbf16>
    %132 = vector.extract_strided_slice %21 {offsets = [8, 0], sizes = [8, 8], strides = [1, 1]} : vector<16x32xbf16> to vector<8x8xbf16>
    %133 = tpu.transpose %131, [1, 0] : vector<8x8xbf16> -> vector<8x8xbf16>
    %cst_57 = arith.constant dense<0.000000e+00> : vector<8x8xf32>
    %134 = tpu.matmul %130, %133, %cst_57 {dimension_numbers = #tpu.dot_dimension_numbers<[1], [0], [0], [1], [0, 0, 1, 1], [], []>} : vector<8x8xbf16>, vector<8x8xbf16>, vector<8x8xf32> -> vector<8x8xf32>
    %cst_58 = arith.constant -1.000000e+30 : f32
    %135 = vector.broadcast %cst_58 : f32 to vector<8x8xf32>
    %136 = arith.select %129, %135, %134 : vector<8x8xi1>, vector<8x8xf32>
    %cst_59 = arith.constant dense<0xFF800000> : vector<8xf32>
    %137 = vector.multi_reduction <maximumf>, %136, %cst_59 [1] : vector<8x8xf32> to vector<8xf32>
    %138 = vector.shape_cast %137 : vector<8xf32> to vector<8x1xf32>
    %139 = vector.broadcast %138 : vector<8x1xf32> to vector<8x8xf32>
    %140 = arith.subf %136, %139 : vector<8x8xf32>
    %141 = math.exp %140 : vector<8x8xf32>
    %cst_60 = arith.constant dense<0.000000e+00> : vector<8xf32>
    %142 = vector.multi_reduction <add>, %141, %cst_60 [1] : vector<8x8xf32> to vector<8xf32>
    %143 = vector.shape_cast %142 : vector<8xf32> to vector<8x1xf32>
    %144 = tpu.reciprocal %143 {approx = true} : vector<8x1xf32> -> vector<8x1xf32>
    %145 = vector.broadcast %144 : vector<8x1xf32> to vector<8x8xf32>
    %146 = arith.mulf %141, %145 : vector<8x8xf32>
    %147 = arith.truncf %146 : vector<8x8xf32> to vector<8x8xbf16>
    %c0_61 = arith.constant 0 : index
    %c1_62 = arith.constant 1 : index
    %c0_63 = arith.constant 0 : index
    %c0_64 = arith.constant 0 : index
    %148 = vector.load %arg26[%c0_61, %c1_62, %c0_63, %c0_64] : memref<4x2x8x8xbf16, #tpu.memory_space<vmem>>, vector<1x1x8x8xbf16>
    %149 = vector.shape_cast %148 : vector<1x1x8x8xbf16> to vector<8x8xbf16>
    %150 = vector.shape_cast %147 : vector<8x8xbf16> to vector<1x1x8x8xbf16>
    tpu.vector_store %arg26[%c0_61, %c1_62, %c0_63, %c0_64], %150 {strides = array<i32>} : memref<4x2x8x8xbf16, #tpu.memory_space<vmem>>, vector<1x1x8x8xbf16>,
    %151 = arith.truncf %146 : vector<8x8xf32> to vector<8x8xbf16>
    %cst_65 = arith.constant dense<0.000000e+00> : vector<8x8xf32>
    %152 = tpu.matmul %151, %132, %cst_65 {dimension_numbers = #tpu.dot_dimension_numbers<[1], [0], [0], [1], [0, 0, 1, 1], [], []>} : vector<8x8xbf16>, vector<8x8xbf16>, vector<8x8xf32> -> vector<8x8xf32>
    %c8_66 = arith.constant 8 : index
    %c0_67 = arith.constant 0 : index
    %153 = vector.load %arg28[%c8_66, %c0_67] : memref<16x32xf32, #tpu.memory_space<vmem>>, vector<8x8xf32>
    tpu.vector_store %arg28[%c8_66, %c0_67], %152 {strides = array<i32>} : memref<16x32xf32, #tpu.memory_space<vmem>>, vector<8x8xf32>,
    %154 = vector.extract_strided_slice %19 {offsets = [8, 8], sizes = [8, 8], strides = [1, 1]} : vector<16x32xbf16> to vector<8x8xbf16>
    %155 = vector.extract_strided_slice %20 {offsets = [8, 8], sizes = [8, 8], strides = [1, 1]} : vector<16x32xbf16> to vector<8x8xbf16>
    %156 = vector.extract_strided_slice %21 {offsets = [8, 8], sizes = [8, 8], strides = [1, 1]} : vector<16x32xbf16> to vector<8x8xbf16>
    %157 = tpu.transpose %155, [1, 0] : vector<8x8xbf16> -> vector<8x8xbf16>
    %cst_68 = arith.constant dense<0.000000e+00> : vector<8x8xf32>
    %158 = tpu.matmul %154, %157, %cst_68 {dimension_numbers = #tpu.dot_dimension_numbers<[1], [0], [0], [1], [0, 0, 1, 1], [], []>} : vector<8x8xbf16>, vector<8x8xbf16>, vector<8x8xf32> -> vector<8x8xf32>
    %cst_69 = arith.constant -1.000000e+30 : f32
    %159 = vector.broadcast %cst_69 : f32 to vector<8x8xf32>
    %160 = arith.select %129, %159, %158 : vector<8x8xi1>, vector<8x8xf32>
    %cst_70 = arith.constant dense<0xFF800000> : vector<8xf32>
    %161 = vector.multi_reduction <maximumf>, %160, %cst_70 [1] : vector<8x8xf32> to vector<8xf32>
    %162 = vector.shape_cast %161 : vector<8xf32> to vector<8x1xf32>
    %163 = vector.broadcast %162 : vector<8x1xf32> to vector<8x8xf32>
    %164 = arith.subf %160, %163 : vector<8x8xf32>
    %165 = math.exp %164 : vector<8x8xf32>
    %cst_71 = arith.constant dense<0.000000e+00> : vector<8xf32>
    %166 = vector.multi_reduction <add>, %165, %cst_71 [1] : vector<8x8xf32> to vector<8xf32>
    %167 = vector.shape_cast %166 : vector<8xf32> to vector<8x1xf32>
    %168 = tpu.reciprocal %167 {approx = true} : vector<8x1xf32> -> vector<8x1xf32>
    %169 = vector.broadcast %168 : vector<8x1xf32> to vector<8x8xf32>
    %170 = arith.mulf %165, %169 : vector<8x8xf32>
    %171 = arith.truncf %170 : vector<8x8xf32> to vector<8x8xbf16>
    %c1_72 = arith.constant 1 : index
    %c1_73 = arith.constant 1 : index
    %c0_74 = arith.constant 0 : index
    %c0_75 = arith.constant 0 : index
    %172 = vector.load %arg26[%c1_72, %c1_73, %c0_74, %c0_75] : memref<4x2x8x8xbf16, #tpu.memory_space<vmem>>, vector<1x1x8x8xbf16>
    %173 = vector.shape_cast %172 : vector<1x1x8x8xbf16> to vector<8x8xbf16>
    %174 = vector.shape_cast %171 : vector<8x8xbf16> to vector<1x1x8x8xbf16>
    tpu.vector_store %arg26[%c1_72, %c1_73, %c0_74, %c0_75], %174 {strides = array<i32>} : memref<4x2x8x8xbf16, #tpu.memory_space<vmem>>, vector<1x1x8x8xbf16>,
    %175 = arith.truncf %170 : vector<8x8xf32> to vector<8x8xbf16>
    %cst_76 = arith.constant dense<0.000000e+00> : vector<8x8xf32>
    %176 = tpu.matmul %175, %156, %cst_76 {dimension_numbers = #tpu.dot_dimension_numbers<[1], [0], [0], [1], [0, 0, 1, 1], [], []>} : vector<8x8xbf16>, vector<8x8xbf16>, vector<8x8xf32> -> vector<8x8xf32>
    %c8_77 = arith.constant 8 : index
    %c8_78 = arith.constant 8 : index
    %177 = vector.load %arg28[%c8_77, %c8_78] : memref<16x32xf32, #tpu.memory_space<vmem>>, vector<8x8xf32>
    tpu.vector_store %arg28[%c8_77, %c8_78], %176 {strides = array<i32>} : memref<16x32xf32, #tpu.memory_space<vmem>>, vector<8x8xf32>,
    %178 = vector.extract_strided_slice %19 {offsets = [8, 16], sizes = [8, 8], strides = [1, 1]} : vector<16x32xbf16> to vector<8x8xbf16>
    %179 = vector.extract_strided_slice %20 {offsets = [8, 16], sizes = [8, 8], strides = [1, 1]} : vector<16x32xbf16> to vector<8x8xbf16>
    %180 = vector.extract_strided_slice %21 {offsets = [8, 16], sizes = [8, 8], strides = [1, 1]} : vector<16x32xbf16> to vector<8x8xbf16>
    %181 = tpu.transpose %179, [1, 0] : vector<8x8xbf16> -> vector<8x8xbf16>
    %cst_79 = arith.constant dense<0.000000e+00> : vector<8x8xf32>
    %182 = tpu.matmul %178, %181, %cst_79 {dimension_numbers = #tpu.dot_dimension_numbers<[1], [0], [0], [1], [0, 0, 1, 1], [], []>} : vector<8x8xbf16>, vector<8x8xbf16>, vector<8x8xf32> -> vector<8x8xf32>
    %cst_80 = arith.constant -1.000000e+30 : f32
    %183 = vector.broadcast %cst_80 : f32 to vector<8x8xf32>
    %184 = arith.select %129, %183, %182 : vector<8x8xi1>, vector<8x8xf32>
    %cst_81 = arith.constant dense<0xFF800000> : vector<8xf32>
    %185 = vector.multi_reduction <maximumf>, %184, %cst_81 [1] : vector<8x8xf32> to vector<8xf32>
    %186 = vector.shape_cast %185 : vector<8xf32> to vector<8x1xf32>
    %187 = vector.broadcast %186 : vector<8x1xf32> to vector<8x8xf32>
    %188 = arith.subf %184, %187 : vector<8x8xf32>
    %189 = math.exp %188 : vector<8x8xf32>
    %cst_82 = arith.constant dense<0.000000e+00> : vector<8xf32>
    %190 = vector.multi_reduction <add>, %189, %cst_82 [1] : vector<8x8xf32> to vector<8xf32>
    %191 = vector.shape_cast %190 : vector<8xf32> to vector<8x1xf32>
    %192 = tpu.reciprocal %191 {approx = true} : vector<8x1xf32> -> vector<8x1xf32>
    %193 = vector.broadcast %192 : vector<8x1xf32> to vector<8x8xf32>
    %194 = arith.mulf %189, %193 : vector<8x8xf32>
    %195 = arith.truncf %194 : vector<8x8xf32> to vector<8x8xbf16>
    %c2_83 = arith.constant 2 : index
    %c1_84 = arith.constant 1 : index
    %c0_85 = arith.constant 0 : index
    %c0_86 = arith.constant 0 : index
    %196 = vector.load %arg26[%c2_83, %c1_84, %c0_85, %c0_86] : memref<4x2x8x8xbf16, #tpu.memory_space<vmem>>, vector<1x1x8x8xbf16>
    %197 = vector.shape_cast %196 : vector<1x1x8x8xbf16> to vector<8x8xbf16>
    %198 = vector.shape_cast %195 : vector<8x8xbf16> to vector<1x1x8x8xbf16>
    tpu.vector_store %arg26[%c2_83, %c1_84, %c0_85, %c0_86], %198 {strides = array<i32>} : memref<4x2x8x8xbf16, #tpu.memory_space<vmem>>, vector<1x1x8x8xbf16>,
    %199 = arith.truncf %194 : vector<8x8xf32> to vector<8x8xbf16>
    %cst_87 = arith.constant dense<0.000000e+00> : vector<8x8xf32>
    %200 = tpu.matmul %199, %180, %cst_87 {dimension_numbers = #tpu.dot_dimension_numbers<[1], [0], [0], [1], [0, 0, 1, 1], [], []>} : vector<8x8xbf16>, vector<8x8xbf16>, vector<8x8xf32> -> vector<8x8xf32>
    %c8_88 = arith.constant 8 : index
    %c16_89 = arith.constant 16 : index
    %201 = vector.load %arg28[%c8_88, %c16_89] : memref<16x32xf32, #tpu.memory_space<vmem>>, vector<8x8xf32>
    tpu.vector_store %arg28[%c8_88, %c16_89], %200 {strides = array<i32>} : memref<16x32xf32, #tpu.memory_space<vmem>>, vector<8x8xf32>,
    %202 = vector.extract_strided_slice %19 {offsets = [8, 24], sizes = [8, 8], strides = [1, 1]} : vector<16x32xbf16> to vector<8x8xbf16>
    %203 = vector.extract_strided_slice %20 {offsets = [8, 24], sizes = [8, 8], strides = [1, 1]} : vector<16x32xbf16> to vector<8x8xbf16>
    %204 = vector.extract_strided_slice %21 {offsets = [8, 24], sizes = [8, 8], strides = [1, 1]} : vector<16x32xbf16> to vector<8x8xbf16>
    %205 = tpu.transpose %203, [1, 0] : vector<8x8xbf16> -> vector<8x8xbf16>
    %cst_90 = arith.constant dense<0.000000e+00> : vector<8x8xf32>
    %206 = tpu.matmul %202, %205, %cst_90 {dimension_numbers = #tpu.dot_dimension_numbers<[1], [0], [0], [1], [0, 0, 1, 1], [], []>} : vector<8x8xbf16>, vector<8x8xbf16>, vector<8x8xf32> -> vector<8x8xf32>
    %cst_91 = arith.constant -1.000000e+30 : f32
    %207 = vector.broadcast %cst_91 : f32 to vector<8x8xf32>
    %208 = arith.select %129, %207, %206 : vector<8x8xi1>, vector<8x8xf32>
    %cst_92 = arith.constant dense<0xFF800000> : vector<8xf32>
    %209 = vector.multi_reduction <maximumf>, %208, %cst_92 [1] : vector<8x8xf32> to vector<8xf32>
    %210 = vector.shape_cast %209 : vector<8xf32> to vector<8x1xf32>
    %211 = vector.broadcast %210 : vector<8x1xf32> to vector<8x8xf32>
    %212 = arith.subf %208, %211 : vector<8x8xf32>
    %213 = math.exp %212 : vector<8x8xf32>
    %cst_93 = arith.constant dense<0.000000e+00> : vector<8xf32>
    %214 = vector.multi_reduction <add>, %213, %cst_93 [1] : vector<8x8xf32> to vector<8xf32>
    %215 = vector.shape_cast %214 : vector<8xf32> to vector<8x1xf32>
    %216 = tpu.reciprocal %215 {approx = true} : vector<8x1xf32> -> vector<8x1xf32>
    %217 = vector.broadcast %216 : vector<8x1xf32> to vector<8x8xf32>
    %218 = arith.mulf %213, %217 : vector<8x8xf32>
    %219 = arith.truncf %218 : vector<8x8xf32> to vector<8x8xbf16>
    %c3_94 = arith.constant 3 : index
    %c1_95 = arith.constant 1 : index
    %c0_96 = arith.constant 0 : index
    %c0_97 = arith.constant 0 : index
    %220 = vector.load %arg26[%c3_94, %c1_95, %c0_96, %c0_97] : memref<4x2x8x8xbf16, #tpu.memory_space<vmem>>, vector<1x1x8x8xbf16>
    %221 = vector.shape_cast %220 : vector<1x1x8x8xbf16> to vector<8x8xbf16>
    %222 = vector.shape_cast %219 : vector<8x8xbf16> to vector<1x1x8x8xbf16>
    tpu.vector_store %arg26[%c3_94, %c1_95, %c0_96, %c0_97], %222 {strides = array<i32>} : memref<4x2x8x8xbf16, #tpu.memory_space<vmem>>, vector<1x1x8x8xbf16>,
    %223 = arith.truncf %218 : vector<8x8xf32> to vector<8x8xbf16>
    %cst_98 = arith.constant dense<0.000000e+00> : vector<8x8xf32>
    %224 = tpu.matmul %223, %204, %cst_98 {dimension_numbers = #tpu.dot_dimension_numbers<[1], [0], [0], [1], [0, 0, 1, 1], [], []>} : vector<8x8xbf16>, vector<8x8xbf16>, vector<8x8xf32> -> vector<8x8xf32>
    %c8_99 = arith.constant 8 : index
    %c24_100 = arith.constant 24 : index
    %225 = vector.load %arg28[%c8_99, %c24_100] : memref<16x32xf32, #tpu.memory_space<vmem>>, vector<8x8xf32>
    tpu.vector_store %arg28[%c8_99, %c24_100], %224 {strides = array<i32>} : memref<16x32xf32, #tpu.memory_space<vmem>>, vector<8x8xf32>,
    %c0_101 = arith.constant 0 : index
    %c0_102 = arith.constant 0 : index
    %226 = vector.load %arg28[%c0_101, %c0_102] : memref<16x32xf32, #tpu.memory_space<vmem>>, vector<16x32xf32>
    %227 = arith.truncf %226 : vector<16x32xf32> to vector<16x32xbf16>
    %c0_103 = arith.constant 0 : index
    %c0_104 = arith.constant 0 : index
    %228 = vector.load %arg8[%c0_103, %c0_104] : memref<32x32xbf16, #tpu.memory_space<vmem>>, vector<32x32xbf16>
    %cst_105 = arith.constant dense<0.000000e+00> : vector<16x32xf32>
    %229 = tpu.matmul %227, %228, %cst_105 {dimension_numbers = #tpu.dot_dimension_numbers<[1], [0], [0], [1], [0, 0, 1, 1], [], []>} : vector<16x32xbf16>, vector<32x32xbf16>, vector<16x32xf32> -> vector<16x32xf32>
    %c0_106 = arith.constant 0 : index
    %c0_107 = arith.constant 0 : index
    %230 = vector.load %arg9[%c0_106, %c0_107] : memref<1x32xf32, #tpu.memory_space<vmem>>, vector<1x32xf32>
    %231 = vector.broadcast %230 : vector<1x32xf32> to vector<16x32xf32>
    %232 = arith.addf %229, %231 : vector<16x32xf32>
    %233 = arith.addf %232, %1 : vector<16x32xf32>
    %c0_108 = arith.constant 0 : index
    %c0_109 = arith.constant 0 : index
    %234 = vector.load %arg10[%c0_108, %c0_109] : memref<1x32xf32, #tpu.memory_space<vmem>>, vector<1x32xf32>
    %c0_110 = arith.constant 0 : index
    %c0_111 = arith.constant 0 : index
    %235 = vector.load %arg11[%c0_110, %c0_111] : memref<1x32xf32, #tpu.memory_space<vmem>>, vector<1x32xf32>
    %cst_112 = arith.constant dense<0.000000e+00> : vector<16xf32>
    %236 = vector.multi_reduction <add>, %233, %cst_112 [1] : vector<16x32xf32> to vector<16xf32>
    %237 = vector.shape_cast %236 : vector<16xf32> to vector<16x1xf32>
    %cst_113 = arith.constant 3.200000e+01 : f32
    %238 = vector.broadcast %cst_113 : f32 to vector<16x1xf32>
    %239 = arith.divf %237, %238 : vector<16x1xf32>
    %240 = arith.mulf %233, %233 : vector<16x32xf32>
    %cst_114 = arith.constant dense<0.000000e+00> : vector<16xf32>
    %241 = vector.multi_reduction <add>, %240, %cst_114 [1] : vector<16x32xf32> to vector<16xf32>
    %242 = vector.shape_cast %241 : vector<16xf32> to vector<16x1xf32>
    %cst_115 = arith.constant 3.200000e+01 : f32
    %243 = vector.broadcast %cst_115 : f32 to vector<16x1xf32>
    %244 = arith.divf %242, %243 : vector<16x1xf32>
    %245 = arith.mulf %239, %239 : vector<16x1xf32>
    %246 = arith.subf %244, %245 : vector<16x1xf32>
    %cst_116 = arith.constant 0.000000e+00 : f32
    %247 = vector.broadcast %cst_116 : f32 to vector<16x1xf32>
    %248 = arith.maximumf %246, %247 : vector<16x1xf32>
    %249 = vector.broadcast %239 : vector<16x1xf32> to vector<16x32xf32>
    %250 = arith.subf %233, %249 : vector<16x32xf32>
    %cst_117 = arith.constant 9.99999974E-6 : f32
    %251 = vector.broadcast %cst_117 : f32 to vector<16x1xf32>
    %252 = arith.addf %248, %251 : vector<16x1xf32>
    %253 = math.rsqrt %252 : vector<16x1xf32>
    %254 = vector.broadcast %253 : vector<16x1xf32> to vector<16x32xf32>
    %255 = arith.mulf %250, %254 : vector<16x32xf32>
    %256 = vector.broadcast %234 : vector<1x32xf32> to vector<16x32xf32>
    %257 = arith.mulf %255, %256 : vector<16x32xf32>
    %258 = vector.broadcast %235 : vector<1x32xf32> to vector<16x32xf32>
    %259 = arith.addf %257, %258 : vector<16x32xf32>
    %260 = arith.truncf %259 : vector<16x32xf32> to vector<16x32xbf16>
    %261 = arith.truncf %3 : vector<16x32xf32> to vector<16x32xbf16>
    %c0_118 = arith.constant 0 : index
    %c0_119 = arith.constant 0 : index
    %262 = vector.load %arg12[%c0_118, %c0_119] : memref<32x32xbf16, #tpu.memory_space<vmem>>, vector<32x32xbf16>
    %cst_120 = arith.constant dense<0.000000e+00> : vector<16x32xf32>
    %263 = tpu.matmul %260, %262, %cst_120 {dimension_numbers = #tpu.dot_dimension_numbers<[1], [0], [0], [1], [0, 0, 1, 1], [], []>} : vector<16x32xbf16>, vector<32x32xbf16>, vector<16x32xf32> -> vector<16x32xf32>
    %cst_121 = arith.constant 0.176776692 : f32
    %264 = vector.broadcast %cst_121 : f32 to vector<16x32xf32>
    %265 = arith.mulf %263, %264 : vector<16x32xf32>
    %c0_122 = arith.constant 0 : index
    %c0_123 = arith.constant 0 : index
    %266 = vector.load %arg13[%c0_122, %c0_123] : memref<32x32xbf16, #tpu.memory_space<vmem>>, vector<32x32xbf16>
    %cst_124 = arith.constant dense<0.000000e+00> : vector<16x32xf32>
    %267 = tpu.matmul %261, %266, %cst_124 {dimension_numbers = #tpu.dot_dimension_numbers<[1], [0], [0], [1], [0, 0, 1, 1], [], []>} : vector<16x32xbf16>, vector<32x32xbf16>, vector<16x32xf32> -> vector<16x32xf32>
    %c0_125 = arith.constant 0 : index
    %c0_126 = arith.constant 0 : index
    %268 = vector.load %arg14[%c0_125, %c0_126] : memref<32x32xbf16, #tpu.memory_space<vmem>>, vector<32x32xbf16>
    %cst_127 = arith.constant dense<0.000000e+00> : vector<16x32xf32>
    %269 = tpu.matmul %261, %268, %cst_127 {dimension_numbers = #tpu.dot_dimension_numbers<[1], [0], [0], [1], [0, 0, 1, 1], [], []>} : vector<16x32xbf16>, vector<32x32xbf16>, vector<16x32xf32> -> vector<16x32xf32>
    %270 = arith.truncf %265 : vector<16x32xf32> to vector<16x32xbf16>
    %271 = arith.truncf %267 : vector<16x32xf32> to vector<16x32xbf16>
    %272 = arith.truncf %269 : vector<16x32xf32> to vector<16x32xbf16>
    %273 = vector.extract_strided_slice %5 {offsets = [0, 0], sizes = [1, 8], strides = [1, 1]} : vector<2x8xi32> to vector<1x8xi32>
    %c0_i32_128 = arith.constant 0 : i32
    %274 = vector.broadcast %c0_i32_128 : i32 to vector<1x8xi32>
    %275 = arith.cmpi eq, %273, %274 : vector<1x8xi32>
    %276 = vector.shape_cast %275 : vector<1x8xi1> to vector<1x8xi1>
    %277 = vector.broadcast %276 : vector<1x8xi1> to vector<8x8xi1>
    %278 = vector.extract_strided_slice %270 {offsets = [0, 0], sizes = [8, 8], strides = [1, 1]} : vector<16x32xbf16> to vector<8x8xbf16>
    %279 = vector.extract_strided_slice %271 {offsets = [0, 0], sizes = [8, 8], strides = [1, 1]} : vector<16x32xbf16> to vector<8x8xbf16>
    %280 = vector.extract_strided_slice %272 {offsets = [0, 0], sizes = [8, 8], strides = [1, 1]} : vector<16x32xbf16> to vector<8x8xbf16>
    %281 = tpu.transpose %279, [1, 0] : vector<8x8xbf16> -> vector<8x8xbf16>
    %cst_129 = arith.constant dense<0.000000e+00> : vector<8x8xf32>
    %282 = tpu.matmul %278, %281, %cst_129 {dimension_numbers = #tpu.dot_dimension_numbers<[1], [0], [0], [1], [0, 0, 1, 1], [], []>} : vector<8x8xbf16>, vector<8x8xbf16>, vector<8x8xf32> -> vector<8x8xf32>
    %cst_130 = arith.constant -1.000000e+30 : f32
    %283 = vector.broadcast %cst_130 : f32 to vector<8x8xf32>
    %284 = arith.select %277, %283, %282 : vector<8x8xi1>, vector<8x8xf32>
    %cst_131 = arith.constant dense<0xFF800000> : vector<8xf32>
    %285 = vector.multi_reduction <maximumf>, %284, %cst_131 [1] : vector<8x8xf32> to vector<8xf32>
    %286 = vector.shape_cast %285 : vector<8xf32> to vector<8x1xf32>
    %287 = vector.broadcast %286 : vector<8x1xf32> to vector<8x8xf32>
    %288 = arith.subf %284, %287 : vector<8x8xf32>
    %289 = math.exp %288 : vector<8x8xf32>
    %cst_132 = arith.constant dense<0.000000e+00> : vector<8xf32>
    %290 = vector.multi_reduction <add>, %289, %cst_132 [1] : vector<8x8xf32> to vector<8xf32>
    %291 = vector.shape_cast %290 : vector<8xf32> to vector<8x1xf32>
    %292 = tpu.reciprocal %291 {approx = true} : vector<8x1xf32> -> vector<8x1xf32>
    %293 = vector.broadcast %292 : vector<8x1xf32> to vector<8x8xf32>
    %294 = arith.mulf %289, %293 : vector<8x8xf32>
    %295 = arith.truncf %294 : vector<8x8xf32> to vector<8x8xbf16>
    %c0_133 = arith.constant 0 : index
    %c0_134 = arith.constant 0 : index
    %c0_135 = arith.constant 0 : index
    %c0_136 = arith.constant 0 : index
    %296 = vector.load %arg27[%c0_133, %c0_134, %c0_135, %c0_136] : memref<4x2x8x8xbf16, #tpu.memory_space<vmem>>, vector<1x1x8x8xbf16>
    %297 = vector.shape_cast %296 : vector<1x1x8x8xbf16> to vector<8x8xbf16>
    %298 = vector.shape_cast %295 : vector<8x8xbf16> to vector<1x1x8x8xbf16>
    tpu.vector_store %arg27[%c0_133, %c0_134, %c0_135, %c0_136], %298 {strides = array<i32>} : memref<4x2x8x8xbf16, #tpu.memory_space<vmem>>, vector<1x1x8x8xbf16>,
    %299 = arith.truncf %294 : vector<8x8xf32> to vector<8x8xbf16>
    %cst_137 = arith.constant dense<0.000000e+00> : vector<8x8xf32>
    %300 = tpu.matmul %299, %280, %cst_137 {dimension_numbers = #tpu.dot_dimension_numbers<[1], [0], [0], [1], [0, 0, 1, 1], [], []>} : vector<8x8xbf16>, vector<8x8xbf16>, vector<8x8xf32> -> vector<8x8xf32>
    %c0_138 = arith.constant 0 : index
    %c0_139 = arith.constant 0 : index
    %301 = vector.load %arg28[%c0_138, %c0_139] : memref<16x32xf32, #tpu.memory_space<vmem>>, vector<8x8xf32>
    tpu.vector_store %arg28[%c0_138, %c0_139], %300 {strides = array<i32>} : memref<16x32xf32, #tpu.memory_space<vmem>>, vector<8x8xf32>,
    %302 = vector.extract_strided_slice %270 {offsets = [0, 8], sizes = [8, 8], strides = [1, 1]} : vector<16x32xbf16> to vector<8x8xbf16>
    %303 = vector.extract_strided_slice %271 {offsets = [0, 8], sizes = [8, 8], strides = [1, 1]} : vector<16x32xbf16> to vector<8x8xbf16>
    %304 = vector.extract_strided_slice %272 {offsets = [0, 8], sizes = [8, 8], strides = [1, 1]} : vector<16x32xbf16> to vector<8x8xbf16>
    %305 = tpu.transpose %303, [1, 0] : vector<8x8xbf16> -> vector<8x8xbf16>
    %cst_140 = arith.constant dense<0.000000e+00> : vector<8x8xf32>
    %306 = tpu.matmul %302, %305, %cst_140 {dimension_numbers = #tpu.dot_dimension_numbers<[1], [0], [0], [1], [0, 0, 1, 1], [], []>} : vector<8x8xbf16>, vector<8x8xbf16>, vector<8x8xf32> -> vector<8x8xf32>
    %cst_141 = arith.constant -1.000000e+30 : f32
    %307 = vector.broadcast %cst_141 : f32 to vector<8x8xf32>
    %308 = arith.select %277, %307, %306 : vector<8x8xi1>, vector<8x8xf32>
    %cst_142 = arith.constant dense<0xFF800000> : vector<8xf32>
    %309 = vector.multi_reduction <maximumf>, %308, %cst_142 [1] : vector<8x8xf32> to vector<8xf32>
    %310 = vector.shape_cast %309 : vector<8xf32> to vector<8x1xf32>
    %311 = vector.broadcast %310 : vector<8x1xf32> to vector<8x8xf32>
    %312 = arith.subf %308, %311 : vector<8x8xf32>
    %313 = math.exp %312 : vector<8x8xf32>
    %cst_143 = arith.constant dense<0.000000e+00> : vector<8xf32>
    %314 = vector.multi_reduction <add>, %313, %cst_143 [1] : vector<8x8xf32> to vector<8xf32>
    %315 = vector.shape_cast %314 : vector<8xf32> to vector<8x1xf32>
    %316 = tpu.reciprocal %315 {approx = true} : vector<8x1xf32> -> vector<8x1xf32>
    %317 = vector.broadcast %316 : vector<8x1xf32> to vector<8x8xf32>
    %318 = arith.mulf %313, %317 : vector<8x8xf32>
    %319 = arith.truncf %318 : vector<8x8xf32> to vector<8x8xbf16>
    %c1_144 = arith.constant 1 : index
    %c0_145 = arith.constant 0 : index
    %c0_146 = arith.constant 0 : index
    %c0_147 = arith.constant 0 : index
    %320 = vector.load %arg27[%c1_144, %c0_145, %c0_146, %c0_147] : memref<4x2x8x8xbf16, #tpu.memory_space<vmem>>, vector<1x1x8x8xbf16>
    %321 = vector.shape_cast %320 : vector<1x1x8x8xbf16> to vector<8x8xbf16>
    %322 = vector.shape_cast %319 : vector<8x8xbf16> to vector<1x1x8x8xbf16>
    tpu.vector_store %arg27[%c1_144, %c0_145, %c0_146, %c0_147], %322 {strides = array<i32>} : memref<4x2x8x8xbf16, #tpu.memory_space<vmem>>, vector<1x1x8x8xbf16>,
    %323 = arith.truncf %318 : vector<8x8xf32> to vector<8x8xbf16>
    %cst_148 = arith.constant dense<0.000000e+00> : vector<8x8xf32>
    %324 = tpu.matmul %323, %304, %cst_148 {dimension_numbers = #tpu.dot_dimension_numbers<[1], [0], [0], [1], [0, 0, 1, 1], [], []>} : vector<8x8xbf16>, vector<8x8xbf16>, vector<8x8xf32> -> vector<8x8xf32>
    %c0_149 = arith.constant 0 : index
    %c8_150 = arith.constant 8 : index
    %325 = vector.load %arg28[%c0_149, %c8_150] : memref<16x32xf32, #tpu.memory_space<vmem>>, vector<8x8xf32>
    tpu.vector_store %arg28[%c0_149, %c8_150], %324 {strides = array<i32>} : memref<16x32xf32, #tpu.memory_space<vmem>>, vector<8x8xf32>,
    %326 = vector.extract_strided_slice %270 {offsets = [0, 16], sizes = [8, 8], strides = [1, 1]} : vector<16x32xbf16> to vector<8x8xbf16>
    %327 = vector.extract_strided_slice %271 {offsets = [0, 16], sizes = [8, 8], strides = [1, 1]} : vector<16x32xbf16> to vector<8x8xbf16>
    %328 = vector.extract_strided_slice %272 {offsets = [0, 16], sizes = [8, 8], strides = [1, 1]} : vector<16x32xbf16> to vector<8x8xbf16>
    %329 = tpu.transpose %327, [1, 0] : vector<8x8xbf16> -> vector<8x8xbf16>
    %cst_151 = arith.constant dense<0.000000e+00> : vector<8x8xf32>
    %330 = tpu.matmul %326, %329, %cst_151 {dimension_numbers = #tpu.dot_dimension_numbers<[1], [0], [0], [1], [0, 0, 1, 1], [], []>} : vector<8x8xbf16>, vector<8x8xbf16>, vector<8x8xf32> -> vector<8x8xf32>
    %cst_152 = arith.constant -1.000000e+30 : f32
    %331 = vector.broadcast %cst_152 : f32 to vector<8x8xf32>
    %332 = arith.select %277, %331, %330 : vector<8x8xi1>, vector<8x8xf32>
    %cst_153 = arith.constant dense<0xFF800000> : vector<8xf32>
    %333 = vector.multi_reduction <maximumf>, %332, %cst_153 [1] : vector<8x8xf32> to vector<8xf32>
    %334 = vector.shape_cast %333 : vector<8xf32> to vector<8x1xf32>
    %335 = vector.broadcast %334 : vector<8x1xf32> to vector<8x8xf32>
    %336 = arith.subf %332, %335 : vector<8x8xf32>
    %337 = math.exp %336 : vector<8x8xf32>
    %cst_154 = arith.constant dense<0.000000e+00> : vector<8xf32>
    %338 = vector.multi_reduction <add>, %337, %cst_154 [1] : vector<8x8xf32> to vector<8xf32>
    %339 = vector.shape_cast %338 : vector<8xf32> to vector<8x1xf32>
    %340 = tpu.reciprocal %339 {approx = true} : vector<8x1xf32> -> vector<8x1xf32>
    %341 = vector.broadcast %340 : vector<8x1xf32> to vector<8x8xf32>
    %342 = arith.mulf %337, %341 : vector<8x8xf32>
    %343 = arith.truncf %342 : vector<8x8xf32> to vector<8x8xbf16>
    %c2_155 = arith.constant 2 : index
    %c0_156 = arith.constant 0 : index
    %c0_157 = arith.constant 0 : index
    %c0_158 = arith.constant 0 : index
    %344 = vector.load %arg27[%c2_155, %c0_156, %c0_157, %c0_158] : memref<4x2x8x8xbf16, #tpu.memory_space<vmem>>, vector<1x1x8x8xbf16>
    %345 = vector.shape_cast %344 : vector<1x1x8x8xbf16> to vector<8x8xbf16>
    %346 = vector.shape_cast %343 : vector<8x8xbf16> to vector<1x1x8x8xbf16>
    tpu.vector_store %arg27[%c2_155, %c0_156, %c0_157, %c0_158], %346 {strides = array<i32>} : memref<4x2x8x8xbf16, #tpu.memory_space<vmem>>, vector<1x1x8x8xbf16>,
    %347 = arith.truncf %342 : vector<8x8xf32> to vector<8x8xbf16>
    %cst_159 = arith.constant dense<0.000000e+00> : vector<8x8xf32>
    %348 = tpu.matmul %347, %328, %cst_159 {dimension_numbers = #tpu.dot_dimension_numbers<[1], [0], [0], [1], [0, 0, 1, 1], [], []>} : vector<8x8xbf16>, vector<8x8xbf16>, vector<8x8xf32> -> vector<8x8xf32>
    %c0_160 = arith.constant 0 : index
    %c16_161 = arith.constant 16 : index
    %349 = vector.load %arg28[%c0_160, %c16_161] : memref<16x32xf32, #tpu.memory_space<vmem>>, vector<8x8xf32>
    tpu.vector_store %arg28[%c0_160, %c16_161], %348 {strides = array<i32>} : memref<16x32xf32, #tpu.memory_space<vmem>>, vector<8x8xf32>,
    %350 = vector.extract_strided_slice %270 {offsets = [0, 24], sizes = [8, 8], strides = [1, 1]} : vector<16x32xbf16> to vector<8x8xbf16>
    %351 = vector.extract_strided_slice %271 {offsets = [0, 24], sizes = [8, 8], strides = [1, 1]} : vector<16x32xbf16> to vector<8x8xbf16>
    %352 = vector.extract_strided_slice %272 {offsets = [0, 24], sizes = [8, 8], strides = [1, 1]} : vector<16x32xbf16> to vector<8x8xbf16>
    %353 = tpu.transpose %351, [1, 0] : vector<8x8xbf16> -> vector<8x8xbf16>
    %cst_162 = arith.constant dense<0.000000e+00> : vector<8x8xf32>
    %354 = tpu.matmul %350, %353, %cst_162 {dimension_numbers = #tpu.dot_dimension_numbers<[1], [0], [0], [1], [0, 0, 1, 1], [], []>} : vector<8x8xbf16>, vector<8x8xbf16>, vector<8x8xf32> -> vector<8x8xf32>
    %cst_163 = arith.constant -1.000000e+30 : f32
    %355 = vector.broadcast %cst_163 : f32 to vector<8x8xf32>
    %356 = arith.select %277, %355, %354 : vector<8x8xi1>, vector<8x8xf32>
    %cst_164 = arith.constant dense<0xFF800000> : vector<8xf32>
    %357 = vector.multi_reduction <maximumf>, %356, %cst_164 [1] : vector<8x8xf32> to vector<8xf32>
    %358 = vector.shape_cast %357 : vector<8xf32> to vector<8x1xf32>
    %359 = vector.broadcast %358 : vector<8x1xf32> to vector<8x8xf32>
    %360 = arith.subf %356, %359 : vector<8x8xf32>
    %361 = math.exp %360 : vector<8x8xf32>
    %cst_165 = arith.constant dense<0.000000e+00> : vector<8xf32>
    %362 = vector.multi_reduction <add>, %361, %cst_165 [1] : vector<8x8xf32> to vector<8xf32>
    %363 = vector.shape_cast %362 : vector<8xf32> to vector<8x1xf32>
    %364 = tpu.reciprocal %363 {approx = true} : vector<8x1xf32> -> vector<8x1xf32>
    %365 = vector.broadcast %364 : vector<8x1xf32> to vector<8x8xf32>
    %366 = arith.mulf %361, %365 : vector<8x8xf32>
    %367 = arith.truncf %366 : vector<8x8xf32> to vector<8x8xbf16>
    %c3_166 = arith.constant 3 : index
    %c0_167 = arith.constant 0 : index
    %c0_168 = arith.constant 0 : index
    %c0_169 = arith.constant 0 : index
    %368 = vector.load %arg27[%c3_166, %c0_167, %c0_168, %c0_169] : memref<4x2x8x8xbf16, #tpu.memory_space<vmem>>, vector<1x1x8x8xbf16>
    %369 = vector.shape_cast %368 : vector<1x1x8x8xbf16> to vector<8x8xbf16>
    %370 = vector.shape_cast %367 : vector<8x8xbf16> to vector<1x1x8x8xbf16>
    tpu.vector_store %arg27[%c3_166, %c0_167, %c0_168, %c0_169], %370 {strides = array<i32>} : memref<4x2x8x8xbf16, #tpu.memory_space<vmem>>, vector<1x1x8x8xbf16>,
    %371 = arith.truncf %366 : vector<8x8xf32> to vector<8x8xbf16>
    %cst_170 = arith.constant dense<0.000000e+00> : vector<8x8xf32>
    %372 = tpu.matmul %371, %352, %cst_170 {dimension_numbers = #tpu.dot_dimension_numbers<[1], [0], [0], [1], [0, 0, 1, 1], [], []>} : vector<8x8xbf16>, vector<8x8xbf16>, vector<8x8xf32> -> vector<8x8xf32>
    %c0_171 = arith.constant 0 : index
    %c24_172 = arith.constant 24 : index
    %373 = vector.load %arg28[%c0_171, %c24_172] : memref<16x32xf32, #tpu.memory_space<vmem>>, vector<8x8xf32>
    tpu.vector_store %arg28[%c0_171, %c24_172], %372 {strides = array<i32>} : memref<16x32xf32, #tpu.memory_space<vmem>>, vector<8x8xf32>,
    %374 = vector.extract_strided_slice %5 {offsets = [1, 0], sizes = [1, 8], strides = [1, 1]} : vector<2x8xi32> to vector<1x8xi32>
    %c0_i32_173 = arith.constant 0 : i32
    %375 = vector.broadcast %c0_i32_173 : i32 to vector<1x8xi32>
    %376 = arith.cmpi eq, %374, %375 : vector<1x8xi32>
    %377 = vector.shape_cast %376 : vector<1x8xi1> to vector<1x8xi1>
    %378 = vector.broadcast %377 : vector<1x8xi1> to vector<8x8xi1>
    %379 = vector.extract_strided_slice %270 {offsets = [8, 0], sizes = [8, 8], strides = [1, 1]} : vector<16x32xbf16> to vector<8x8xbf16>
    %380 = vector.extract_strided_slice %271 {offsets = [8, 0], sizes = [8, 8], strides = [1, 1]} : vector<16x32xbf16> to vector<8x8xbf16>
    %381 = vector.extract_strided_slice %272 {offsets = [8, 0], sizes = [8, 8], strides = [1, 1]} : vector<16x32xbf16> to vector<8x8xbf16>
    %382 = tpu.transpose %380, [1, 0] : vector<8x8xbf16> -> vector<8x8xbf16>
    %cst_174 = arith.constant dense<0.000000e+00> : vector<8x8xf32>
    %383 = tpu.matmul %379, %382, %cst_174 {dimension_numbers = #tpu.dot_dimension_numbers<[1], [0], [0], [1], [0, 0, 1, 1], [], []>} : vector<8x8xbf16>, vector<8x8xbf16>, vector<8x8xf32> -> vector<8x8xf32>
    %cst_175 = arith.constant -1.000000e+30 : f32
    %384 = vector.broadcast %cst_175 : f32 to vector<8x8xf32>
    %385 = arith.select %378, %384, %383 : vector<8x8xi1>, vector<8x8xf32>
    %cst_176 = arith.constant dense<0xFF800000> : vector<8xf32>
    %386 = vector.multi_reduction <maximumf>, %385, %cst_176 [1] : vector<8x8xf32> to vector<8xf32>
    %387 = vector.shape_cast %386 : vector<8xf32> to vector<8x1xf32>
    %388 = vector.broadcast %387 : vector<8x1xf32> to vector<8x8xf32>
    %389 = arith.subf %385, %388 : vector<8x8xf32>
    %390 = math.exp %389 : vector<8x8xf32>
    %cst_177 = arith.constant dense<0.000000e+00> : vector<8xf32>
    %391 = vector.multi_reduction <add>, %390, %cst_177 [1] : vector<8x8xf32> to vector<8xf32>
    %392 = vector.shape_cast %391 : vector<8xf32> to vector<8x1xf32>
    %393 = tpu.reciprocal %392 {approx = true} : vector<8x1xf32> -> vector<8x1xf32>
    %394 = vector.broadcast %393 : vector<8x1xf32> to vector<8x8xf32>
    %395 = arith.mulf %390, %394 : vector<8x8xf32>
    %396 = arith.truncf %395 : vector<8x8xf32> to vector<8x8xbf16>
    %c0_178 = arith.constant 0 : index
    %c1_179 = arith.constant 1 : index
    %c0_180 = arith.constant 0 : index
    %c0_181 = arith.constant 0 : index
    %397 = vector.load %arg27[%c0_178, %c1_179, %c0_180, %c0_181] : memref<4x2x8x8xbf16, #tpu.memory_space<vmem>>, vector<1x1x8x8xbf16>
    %398 = vector.shape_cast %397 : vector<1x1x8x8xbf16> to vector<8x8xbf16>
    %399 = vector.shape_cast %396 : vector<8x8xbf16> to vector<1x1x8x8xbf16>
    tpu.vector_store %arg27[%c0_178, %c1_179, %c0_180, %c0_181], %399 {strides = array<i32>} : memref<4x2x8x8xbf16, #tpu.memory_space<vmem>>, vector<1x1x8x8xbf16>,
    %400 = arith.truncf %395 : vector<8x8xf32> to vector<8x8xbf16>
    %cst_182 = arith.constant dense<0.000000e+00> : vector<8x8xf32>
    %401 = tpu.matmul %400, %381, %cst_182 {dimension_numbers = #tpu.dot_dimension_numbers<[1], [0], [0], [1], [0, 0, 1, 1], [], []>} : vector<8x8xbf16>, vector<8x8xbf16>, vector<8x8xf32> -> vector<8x8xf32>
    %c8_183 = arith.constant 8 : index
    %c0_184 = arith.constant 0 : index
    %402 = vector.load %arg28[%c8_183, %c0_184] : memref<16x32xf32, #tpu.memory_space<vmem>>, vector<8x8xf32>
    tpu.vector_store %arg28[%c8_183, %c0_184], %401 {strides = array<i32>} : memref<16x32xf32, #tpu.memory_space<vmem>>, vector<8x8xf32>,
    %403 = vector.extract_strided_slice %270 {offsets = [8, 8], sizes = [8, 8], strides = [1, 1]} : vector<16x32xbf16> to vector<8x8xbf16>
    %404 = vector.extract_strided_slice %271 {offsets = [8, 8], sizes = [8, 8], strides = [1, 1]} : vector<16x32xbf16> to vector<8x8xbf16>
    %405 = vector.extract_strided_slice %272 {offsets = [8, 8], sizes = [8, 8], strides = [1, 1]} : vector<16x32xbf16> to vector<8x8xbf16>
    %406 = tpu.transpose %404, [1, 0] : vector<8x8xbf16> -> vector<8x8xbf16>
    %cst_185 = arith.constant dense<0.000000e+00> : vector<8x8xf32>
    %407 = tpu.matmul %403, %406, %cst_185 {dimension_numbers = #tpu.dot_dimension_numbers<[1], [0], [0], [1], [0, 0, 1, 1], [], []>} : vector<8x8xbf16>, vector<8x8xbf16>, vector<8x8xf32> -> vector<8x8xf32>
    %cst_186 = arith.constant -1.000000e+30 : f32
    %408 = vector.broadcast %cst_186 : f32 to vector<8x8xf32>
    %409 = arith.select %378, %408, %407 : vector<8x8xi1>, vector<8x8xf32>
    %cst_187 = arith.constant dense<0xFF800000> : vector<8xf32>
    %410 = vector.multi_reduction <maximumf>, %409, %cst_187 [1] : vector<8x8xf32> to vector<8xf32>
    %411 = vector.shape_cast %410 : vector<8xf32> to vector<8x1xf32>
    %412 = vector.broadcast %411 : vector<8x1xf32> to vector<8x8xf32>
    %413 = arith.subf %409, %412 : vector<8x8xf32>
    %414 = math.exp %413 : vector<8x8xf32>
    %cst_188 = arith.constant dense<0.000000e+00> : vector<8xf32>
    %415 = vector.multi_reduction <add>, %414, %cst_188 [1] : vector<8x8xf32> to vector<8xf32>
    %416 = vector.shape_cast %415 : vector<8xf32> to vector<8x1xf32>
    %417 = tpu.reciprocal %416 {approx = true} : vector<8x1xf32> -> vector<8x1xf32>
    %418 = vector.broadcast %417 : vector<8x1xf32> to vector<8x8xf32>
    %419 = arith.mulf %414, %418 : vector<8x8xf32>
    %420 = arith.truncf %419 : vector<8x8xf32> to vector<8x8xbf16>
    %c1_189 = arith.constant 1 : index
    %c1_190 = arith.constant 1 : index
    %c0_191 = arith.constant 0 : index
    %c0_192 = arith.constant 0 : index
    %421 = vector.load %arg27[%c1_189, %c1_190, %c0_191, %c0_192] : memref<4x2x8x8xbf16, #tpu.memory_space<vmem>>, vector<1x1x8x8xbf16>
    %422 = vector.shape_cast %421 : vector<1x1x8x8xbf16> to vector<8x8xbf16>
    %423 = vector.shape_cast %420 : vector<8x8xbf16> to vector<1x1x8x8xbf16>
    tpu.vector_store %arg27[%c1_189, %c1_190, %c0_191, %c0_192], %423 {strides = array<i32>} : memref<4x2x8x8xbf16, #tpu.memory_space<vmem>>, vector<1x1x8x8xbf16>,
    %424 = arith.truncf %419 : vector<8x8xf32> to vector<8x8xbf16>
    %cst_193 = arith.constant dense<0.000000e+00> : vector<8x8xf32>
    %425 = tpu.matmul %424, %405, %cst_193 {dimension_numbers = #tpu.dot_dimension_numbers<[1], [0], [0], [1], [0, 0, 1, 1], [], []>} : vector<8x8xbf16>, vector<8x8xbf16>, vector<8x8xf32> -> vector<8x8xf32>
    %c8_194 = arith.constant 8 : index
    %c8_195 = arith.constant 8 : index
    %426 = vector.load %arg28[%c8_194, %c8_195] : memref<16x32xf32, #tpu.memory_space<vmem>>, vector<8x8xf32>
    tpu.vector_store %arg28[%c8_194, %c8_195], %425 {strides = array<i32>} : memref<16x32xf32, #tpu.memory_space<vmem>>, vector<8x8xf32>,
    %427 = vector.extract_strided_slice %270 {offsets = [8, 16], sizes = [8, 8], strides = [1, 1]} : vector<16x32xbf16> to vector<8x8xbf16>
    %428 = vector.extract_strided_slice %271 {offsets = [8, 16], sizes = [8, 8], strides = [1, 1]} : vector<16x32xbf16> to vector<8x8xbf16>
    %429 = vector.extract_strided_slice %272 {offsets = [8, 16], sizes = [8, 8], strides = [1, 1]} : vector<16x32xbf16> to vector<8x8xbf16>
    %430 = tpu.transpose %428, [1, 0] : vector<8x8xbf16> -> vector<8x8xbf16>
    %cst_196 = arith.constant dense<0.000000e+00> : vector<8x8xf32>
    %431 = tpu.matmul %427, %430, %cst_196 {dimension_numbers = #tpu.dot_dimension_numbers<[1], [0], [0], [1], [0, 0, 1, 1], [], []>} : vector<8x8xbf16>, vector<8x8xbf16>, vector<8x8xf32> -> vector<8x8xf32>
    %cst_197 = arith.constant -1.000000e+30 : f32
    %432 = vector.broadcast %cst_197 : f32 to vector<8x8xf32>
    %433 = arith.select %378, %432, %431 : vector<8x8xi1>, vector<8x8xf32>
    %cst_198 = arith.constant dense<0xFF800000> : vector<8xf32>
    %434 = vector.multi_reduction <maximumf>, %433, %cst_198 [1] : vector<8x8xf32> to vector<8xf32>
    %435 = vector.shape_cast %434 : vector<8xf32> to vector<8x1xf32>
    %436 = vector.broadcast %435 : vector<8x1xf32> to vector<8x8xf32>
    %437 = arith.subf %433, %436 : vector<8x8xf32>
    %438 = math.exp %437 : vector<8x8xf32>
    %cst_199 = arith.constant dense<0.000000e+00> : vector<8xf32>
    %439 = vector.multi_reduction <add>, %438, %cst_199 [1] : vector<8x8xf32> to vector<8xf32>
    %440 = vector.shape_cast %439 : vector<8xf32> to vector<8x1xf32>
    %441 = tpu.reciprocal %440 {approx = true} : vector<8x1xf32> -> vector<8x1xf32>
    %442 = vector.broadcast %441 : vector<8x1xf32> to vector<8x8xf32>
    %443 = arith.mulf %438, %442 : vector<8x8xf32>
    %444 = arith.truncf %443 : vector<8x8xf32> to vector<8x8xbf16>
    %c2_200 = arith.constant 2 : index
    %c1_201 = arith.constant 1 : index
    %c0_202 = arith.constant 0 : index
    %c0_203 = arith.constant 0 : index
    %445 = vector.load %arg27[%c2_200, %c1_201, %c0_202, %c0_203] : memref<4x2x8x8xbf16, #tpu.memory_space<vmem>>, vector<1x1x8x8xbf16>
    %446 = vector.shape_cast %445 : vector<1x1x8x8xbf16> to vector<8x8xbf16>
    %447 = vector.shape_cast %444 : vector<8x8xbf16> to vector<1x1x8x8xbf16>
    tpu.vector_store %arg27[%c2_200, %c1_201, %c0_202, %c0_203], %447 {strides = array<i32>} : memref<4x2x8x8xbf16, #tpu.memory_space<vmem>>, vector<1x1x8x8xbf16>,
    %448 = arith.truncf %443 : vector<8x8xf32> to vector<8x8xbf16>
    %cst_204 = arith.constant dense<0.000000e+00> : vector<8x8xf32>
    %449 = tpu.matmul %448, %429, %cst_204 {dimension_numbers = #tpu.dot_dimension_numbers<[1], [0], [0], [1], [0, 0, 1, 1], [], []>} : vector<8x8xbf16>, vector<8x8xbf16>, vector<8x8xf32> -> vector<8x8xf32>
    %c8_205 = arith.constant 8 : index
    %c16_206 = arith.constant 16 : index
    %450 = vector.load %arg28[%c8_205, %c16_206] : memref<16x32xf32, #tpu.memory_space<vmem>>, vector<8x8xf32>
    tpu.vector_store %arg28[%c8_205, %c16_206], %449 {strides = array<i32>} : memref<16x32xf32, #tpu.memory_space<vmem>>, vector<8x8xf32>,
    %451 = vector.extract_strided_slice %270 {offsets = [8, 24], sizes = [8, 8], strides = [1, 1]} : vector<16x32xbf16> to vector<8x8xbf16>
    %452 = vector.extract_strided_slice %271 {offsets = [8, 24], sizes = [8, 8], strides = [1, 1]} : vector<16x32xbf16> to vector<8x8xbf16>
    %453 = vector.extract_strided_slice %272 {offsets = [8, 24], sizes = [8, 8], strides = [1, 1]} : vector<16x32xbf16> to vector<8x8xbf16>
    %454 = tpu.transpose %452, [1, 0] : vector<8x8xbf16> -> vector<8x8xbf16>
    %cst_207 = arith.constant dense<0.000000e+00> : vector<8x8xf32>
    %455 = tpu.matmul %451, %454, %cst_207 {dimension_numbers = #tpu.dot_dimension_numbers<[1], [0], [0], [1], [0, 0, 1, 1], [], []>} : vector<8x8xbf16>, vector<8x8xbf16>, vector<8x8xf32> -> vector<8x8xf32>
    %cst_208 = arith.constant -1.000000e+30 : f32
    %456 = vector.broadcast %cst_208 : f32 to vector<8x8xf32>
    %457 = arith.select %378, %456, %455 : vector<8x8xi1>, vector<8x8xf32>
    %cst_209 = arith.constant dense<0xFF800000> : vector<8xf32>
    %458 = vector.multi_reduction <maximumf>, %457, %cst_209 [1] : vector<8x8xf32> to vector<8xf32>
    %459 = vector.shape_cast %458 : vector<8xf32> to vector<8x1xf32>
    %460 = vector.broadcast %459 : vector<8x1xf32> to vector<8x8xf32>
    %461 = arith.subf %457, %460 : vector<8x8xf32>
    %462 = math.exp %461 : vector<8x8xf32>
    %cst_210 = arith.constant dense<0.000000e+00> : vector<8xf32>
    %463 = vector.multi_reduction <add>, %462, %cst_210 [1] : vector<8x8xf32> to vector<8xf32>
    %464 = vector.shape_cast %463 : vector<8xf32> to vector<8x1xf32>
    %465 = tpu.reciprocal %464 {approx = true} : vector<8x1xf32> -> vector<8x1xf32>
    %466 = vector.broadcast %465 : vector<8x1xf32> to vector<8x8xf32>
    %467 = arith.mulf %462, %466 : vector<8x8xf32>
    %468 = arith.truncf %467 : vector<8x8xf32> to vector<8x8xbf16>
    %c3_211 = arith.constant 3 : index
    %c1_212 = arith.constant 1 : index
    %c0_213 = arith.constant 0 : index
    %c0_214 = arith.constant 0 : index
    %469 = vector.load %arg27[%c3_211, %c1_212, %c0_213, %c0_214] : memref<4x2x8x8xbf16, #tpu.memory_space<vmem>>, vector<1x1x8x8xbf16>
    %470 = vector.shape_cast %469 : vector<1x1x8x8xbf16> to vector<8x8xbf16>
    %471 = vector.shape_cast %468 : vector<8x8xbf16> to vector<1x1x8x8xbf16>
    tpu.vector_store %arg27[%c3_211, %c1_212, %c0_213, %c0_214], %471 {strides = array<i32>} : memref<4x2x8x8xbf16, #tpu.memory_space<vmem>>, vector<1x1x8x8xbf16>,
    %472 = arith.truncf %467 : vector<8x8xf32> to vector<8x8xbf16>
    %cst_215 = arith.constant dense<0.000000e+00> : vector<8x8xf32>
    %473 = tpu.matmul %472, %453, %cst_215 {dimension_numbers = #tpu.dot_dimension_numbers<[1], [0], [0], [1], [0, 0, 1, 1], [], []>} : vector<8x8xbf16>, vector<8x8xbf16>, vector<8x8xf32> -> vector<8x8xf32>
    %c8_216 = arith.constant 8 : index
    %c24_217 = arith.constant 24 : index
    %474 = vector.load %arg28[%c8_216, %c24_217] : memref<16x32xf32, #tpu.memory_space<vmem>>, vector<8x8xf32>
    tpu.vector_store %arg28[%c8_216, %c24_217], %473 {strides = array<i32>} : memref<16x32xf32, #tpu.memory_space<vmem>>, vector<8x8xf32>,
    %c0_218 = arith.constant 0 : index
    %c0_219 = arith.constant 0 : index
    %475 = vector.load %arg28[%c0_218, %c0_219] : memref<16x32xf32, #tpu.memory_space<vmem>>, vector<16x32xf32>
    %476 = arith.truncf %475 : vector<16x32xf32> to vector<16x32xbf16>
    %c0_220 = arith.constant 0 : index
    %c0_221 = arith.constant 0 : index
    %477 = vector.load %arg15[%c0_220, %c0_221] : memref<32x32xbf16, #tpu.memory_space<vmem>>, vector<32x32xbf16>
    %cst_222 = arith.constant dense<0.000000e+00> : vector<16x32xf32>
    %478 = tpu.matmul %476, %477, %cst_222 {dimension_numbers = #tpu.dot_dimension_numbers<[1], [0], [0], [1], [0, 0, 1, 1], [], []>} : vector<16x32xbf16>, vector<32x32xbf16>, vector<16x32xf32> -> vector<16x32xf32>
    %c0_223 = arith.constant 0 : index
    %c0_224 = arith.constant 0 : index
    %479 = vector.load %arg16[%c0_223, %c0_224] : memref<1x32xf32, #tpu.memory_space<vmem>>, vector<1x32xf32>
    %480 = vector.broadcast %479 : vector<1x32xf32> to vector<16x32xf32>
    %481 = arith.addf %478, %480 : vector<16x32xf32>
    %482 = arith.addf %481, %259 : vector<16x32xf32>
    %c0_225 = arith.constant 0 : index
    %c0_226 = arith.constant 0 : index
    %483 = vector.load %arg17[%c0_225, %c0_226] : memref<1x32xf32, #tpu.memory_space<vmem>>, vector<1x32xf32>
    %c0_227 = arith.constant 0 : index
    %c0_228 = arith.constant 0 : index
    %484 = vector.load %arg18[%c0_227, %c0_228] : memref<1x32xf32, #tpu.memory_space<vmem>>, vector<1x32xf32>
    %cst_229 = arith.constant dense<0.000000e+00> : vector<16xf32>
    %485 = vector.multi_reduction <add>, %482, %cst_229 [1] : vector<16x32xf32> to vector<16xf32>
    %486 = vector.shape_cast %485 : vector<16xf32> to vector<16x1xf32>
    %cst_230 = arith.constant 3.200000e+01 : f32
    %487 = vector.broadcast %cst_230 : f32 to vector<16x1xf32>
    %488 = arith.divf %486, %487 : vector<16x1xf32>
    %489 = arith.mulf %482, %482 : vector<16x32xf32>
    %cst_231 = arith.constant dense<0.000000e+00> : vector<16xf32>
    %490 = vector.multi_reduction <add>, %489, %cst_231 [1] : vector<16x32xf32> to vector<16xf32>
    %491 = vector.shape_cast %490 : vector<16xf32> to vector<16x1xf32>
    %cst_232 = arith.constant 3.200000e+01 : f32
    %492 = vector.broadcast %cst_232 : f32 to vector<16x1xf32>
    %493 = arith.divf %491, %492 : vector<16x1xf32>
    %494 = arith.mulf %488, %488 : vector<16x1xf32>
    %495 = arith.subf %493, %494 : vector<16x1xf32>
    %cst_233 = arith.constant 0.000000e+00 : f32
    %496 = vector.broadcast %cst_233 : f32 to vector<16x1xf32>
    %497 = arith.maximumf %495, %496 : vector<16x1xf32>
    %498 = vector.broadcast %488 : vector<16x1xf32> to vector<16x32xf32>
    %499 = arith.subf %482, %498 : vector<16x32xf32>
    %cst_234 = arith.constant 9.99999974E-6 : f32
    %500 = vector.broadcast %cst_234 : f32 to vector<16x1xf32>
    %501 = arith.addf %497, %500 : vector<16x1xf32>
    %502 = math.rsqrt %501 : vector<16x1xf32>
    %503 = vector.broadcast %502 : vector<16x1xf32> to vector<16x32xf32>
    %504 = arith.mulf %499, %503 : vector<16x32xf32>
    %505 = vector.broadcast %483 : vector<1x32xf32> to vector<16x32xf32>
    %506 = arith.mulf %504, %505 : vector<16x32xf32>
    %507 = vector.broadcast %484 : vector<1x32xf32> to vector<16x32xf32>
    %508 = arith.addf %506, %507 : vector<16x32xf32>
    %509 = arith.truncf %508 : vector<16x32xf32> to vector<16x32xbf16>
    %c0_235 = arith.constant 0 : index
    %c0_236 = arith.constant 0 : index
    %510 = vector.load %arg19[%c0_235, %c0_236] : memref<32x64xbf16, #tpu.memory_space<vmem>>, vector<32x64xbf16>
    %cst_237 = arith.constant dense<0.000000e+00> : vector<16x64xf32>
    %511 = tpu.matmul %509, %510, %cst_237 {dimension_numbers = #tpu.dot_dimension_numbers<[1], [0], [0], [1], [0, 0, 1, 1], [], []>} : vector<16x32xbf16>, vector<32x64xbf16>, vector<16x64xf32> -> vector<16x64xf32>
    %c0_238 = arith.constant 0 : index
    %c0_239 = arith.constant 0 : index
    %512 = vector.load %arg20[%c0_238, %c0_239] : memref<1x64xf32, #tpu.memory_space<vmem>>, vector<1x64xf32>
    %513 = vector.broadcast %512 : vector<1x64xf32> to vector<16x64xf32>
    %514 = arith.addf %511, %513 : vector<16x64xf32>
    %cst_240 = arith.constant 0.000000e+00 : f32
    %515 = vector.broadcast %cst_240 : f32 to vector<16x64xf32>
    %516 = arith.maximumf %514, %515 : vector<16x64xf32>
    %517 = arith.truncf %516 : vector<16x64xf32> to vector<16x64xbf16>
    %c0_241 = arith.constant 0 : index
    %c0_242 = arith.constant 0 : index
    %518 = vector.load %arg21[%c0_241, %c0_242] : memref<64x32xbf16, #tpu.memory_space<vmem>>, vector<64x32xbf16>
    %cst_243 = arith.constant dense<0.000000e+00> : vector<16x32xf32>
    %519 = tpu.matmul %517, %518, %cst_243 {dimension_numbers = #tpu.dot_dimension_numbers<[1], [0], [0], [1], [0, 0, 1, 1], [], []>} : vector<16x64xbf16>, vector<64x32xbf16>, vector<16x32xf32> -> vector<16x32xf32>
    %c0_244 = arith.constant 0 : index
    %c0_245 = arith.constant 0 : index
    %520 = vector.load %arg22[%c0_244, %c0_245] : memref<1x32xf32, #tpu.memory_space<vmem>>, vector<1x32xf32>
    %521 = vector.broadcast %520 : vector<1x32xf32> to vector<16x32xf32>
    %522 = arith.addf %519, %521 : vector<16x32xf32>
    %523 = arith.addf %522, %508 : vector<16x32xf32>
    %c0_246 = arith.constant 0 : index
    %c0_247 = arith.constant 0 : index
    %524 = vector.load %arg23[%c0_246, %c0_247] : memref<1x32xf32, #tpu.memory_space<vmem>>, vector<1x32xf32>
    %c0_248 = arith.constant 0 : index
    %c0_249 = arith.constant 0 : index
    %525 = vector.load %arg24[%c0_248, %c0_249] : memref<1x32xf32, #tpu.memory_space<vmem>>, vector<1x32xf32>
    %cst_250 = arith.constant dense<0.000000e+00> : vector<16xf32>
    %526 = vector.multi_reduction <add>, %523, %cst_250 [1] : vector<16x32xf32> to vector<16xf32>
    %527 = vector.shape_cast %526 : vector<16xf32> to vector<16x1xf32>
    %cst_251 = arith.constant 3.200000e+01 : f32
    %528 = vector.broadcast %cst_251 : f32 to vector<16x1xf32>
    %529 = arith.divf %527, %528 : vector<16x1xf32>
    %530 = arith.mulf %523, %523 : vector<16x32xf32>
    %cst_252 = arith.constant dense<0.000000e+00> : vector<16xf32>
    %531 = vector.multi_reduction <add>, %530, %cst_252 [1] : vector<16x32xf32> to vector<16xf32>
    %532 = vector.shape_cast %531 : vector<16xf32> to vector<16x1xf32>
    %cst_253 = arith.constant 3.200000e+01 : f32
    %533 = vector.broadcast %cst_253 : f32 to vector<16x1xf32>
    %534 = arith.divf %532, %533 : vector<16x1xf32>
    %535 = arith.mulf %529, %529 : vector<16x1xf32>
    %536 = arith.subf %534, %535 : vector<16x1xf32>
    %cst_254 = arith.constant 0.000000e+00 : f32
    %537 = vector.broadcast %cst_254 : f32 to vector<16x1xf32>
    %538 = arith.maximumf %536, %537 : vector<16x1xf32>
    %539 = vector.broadcast %529 : vector<16x1xf32> to vector<16x32xf32>
    %540 = arith.subf %523, %539 : vector<16x32xf32>
    %cst_255 = arith.constant 9.99999974E-6 : f32
    %541 = vector.broadcast %cst_255 : f32 to vector<16x1xf32>
    %542 = arith.addf %538, %541 : vector<16x1xf32>
    %543 = math.rsqrt %542 : vector<16x1xf32>
    %544 = vector.broadcast %543 : vector<16x1xf32> to vector<16x32xf32>
    %545 = arith.mulf %540, %544 : vector<16x32xf32>
    %546 = vector.broadcast %524 : vector<1x32xf32> to vector<16x32xf32>
    %547 = arith.mulf %545, %546 : vector<16x32xf32>
    %548 = vector.broadcast %525 : vector<1x32xf32> to vector<16x32xf32>
    %549 = arith.addf %547, %548 : vector<16x32xf32>
    %550 = vector.shape_cast %549 : vector<16x32xf32> to vector<2x8x32xf32>
    %c0_256 = arith.constant 0 : index
    %c0_257 = arith.constant 0 : index
    %c0_258 = arith.constant 0 : index
    %551 = vector.load %arg25[%c0_256, %c0_257, %c0_258] : memref<2x8x32xf32, #tpu.memory_space<vmem>>, vector<2x8x32xf32>
    tpu.vector_store %arg25[%c0_256, %c0_257, %c0_258], %550 {strides = array<i32>} : memref<2x8x32xf32, #tpu.memory_space<vmem>>, vector<2x8x32xf32>,
    return
  }
  func.func @transform_0(%arg0: i32) -> (i32, i32) {
    %c0_i32 = arith.constant 0 : i32
    %c0_i32_0 = arith.constant 0 : i32
    return %arg0, %c0_i32 : i32, i32
  }
  func.func @transform_1(%arg0: i32) -> (i32, i32) {
    %c0_i32 = arith.constant 0 : i32
    %c0_i32_0 = arith.constant 0 : i32
    return %arg0, %c0_i32 : i32, i32
  }
  func.func @transform_2(%arg0: i32) -> (i32, i32, i32) {
    %c0_i32 = arith.constant 0 : i32
    %c0_i32_0 = arith.constant 0 : i32
    %c0_i32_1 = arith.constant 0 : i32
    return %arg0, %c0_i32, %c0_i32_0 : i32, i32, i32
  }
  func.func @transform_3(%arg0: i32) -> (i32, i32, i32) {
    %c0_i32 = arith.constant 0 : i32
    %c0_i32_0 = arith.constant 0 : i32
    %c0_i32_1 = arith.constant 0 : i32
    return %arg0, %c0_i32, %c0_i32_0 : i32, i32, i32
  }
  func.func @transform_4(%arg0: i32) -> (i32, i32) {
    %c0_i32 = arith.constant 0 : i32
    %c0_i32_0 = arith.constant 0 : i32
    %c0_i32_1 = arith.constant 0 : i32
    return %c0_i32, %c0_i32_0 : i32, i32
  }
  func.func @transform_5(%arg0: i32) -> (i32, i32) {
    %c0_i32 = arith.constant 0 : i32
    %c0_i32_0 = arith.constant 0 : i32
    %c0_i32_1 = arith.constant 0 : i32
    return %c0_i32, %c0_i32_0 : i32, i32
  }
  func.func @transform_6(%arg0: i32) -> (i32, i32) {
    %c0_i32 = arith.constant 0 : i32
    %c0_i32_0 = arith.constant 0 : i32
    %c0_i32_1 = arith.constant 0 : i32
    return %c0_i32, %c0_i32_0 : i32, i32
  }
  func.func @transform_7(%arg0: i32) -> (i32, i32) {
    %c0_i32 = arith.constant 0 : i32
    %c0_i32_0 = arith.constant 0 : i32
    %c0_i32_1 = arith.constant 0 : i32
    return %c0_i32, %c0_i32_0 : i32, i32
  }
  func.func @transform_8(%arg0: i32) -> (i32, i32) {
    %c0_i32 = arith.constant 0 : i32
    %c0_i32_0 = arith.constant 0 : i32
    %c0_i32_1 = arith.constant 0 : i32
    return %c0_i32, %c0_i32_0 : i32, i32
  }
  func.func @transform_9(%arg0: i32) -> (i32, i32) {
    %c0_i32 = arith.constant 0 : i32
    %c0_i32_0 = arith.constant 0 : i32
    %c0_i32_1 = arith.constant 0 : i32
    return %c0_i32, %c0_i32_0 : i32, i32
  }
  func.func @transform_10(%arg0: i32) -> (i32, i32) {
    %c0_i32 = arith.constant 0 : i32
    %c0_i32_0 = arith.constant 0 : i32
    %c0_i32_1 = arith.constant 0 : i32
    return %c0_i32, %c0_i32_0 : i32, i32
  }
  func.func @transform_11(%arg0: i32) -> (i32, i32) {
    %c0_i32 = arith.constant 0 : i32
    %c0_i32_0 = arith.constant 0 : i32
    %c0_i32_1 = arith.constant 0 : i32
    return %c0_i32, %c0_i32_0 : i32, i32
  }
  func.func @transform_12(%arg0: i32) -> (i32, i32) {
    %c0_i32 = arith.constant 0 : i32
    %c0_i32_0 = arith.constant 0 : i32
    %c0_i32_1 = arith.constant 0 : i32
    return %c0_i32, %c0_i32_0 : i32, i32
  }
  func.func @transform_13(%arg0: i32) -> (i32, i32) {
    %c0_i32 = arith.constant 0 : i32
    %c0_i32_0 = arith.constant 0 : i32
    %c0_i32_1 = arith.constant 0 : i32
    return %c0_i32, %c0_i32_0 : i32, i32
  }
  func.func @transform_14(%arg0: i32) -> (i32, i32) {
    %c0_i32 = arith.constant 0 : i32
    %c0_i32_0 = arith.constant 0 : i32
    %c0_i32_1 = arith.constant 0 : i32
    return %c0_i32, %c0_i32_0 : i32, i32
  }
  func.func @transform_15(%arg0: i32) -> (i32, i32) {
    %c0_i32 = arith.constant 0 : i32
    %c0_i32_0 = arith.constant 0 : i32
    %c0_i32_1 = arith.constant 0 : i32
    return %c0_i32, %c0_i32_0 : i32, i32
  }
  func.func @transform_16(%arg0: i32) -> (i32, i32) {
    %c0_i32 = arith.constant 0 : i32
    %c0_i32_0 = arith.constant 0 : i32
    %c0_i32_1 = arith.constant 0 : i32
    return %c0_i32, %c0_i32_0 : i32, i32
  }
  func.func @transform_17(%arg0: i32) -> (i32, i32) {
    %c0_i32 = arith.constant 0 : i32
    %c0_i32_0 = arith.constant 0 : i32
    %c0_i32_1 = arith.constant 0 : i32
    return %c0_i32, %c0_i32_0 : i32, i32
  }
  func.func @transform_18(%arg0: i32) -> (i32, i32) {
    %c0_i32 = arith.constant 0 : i32
    %c0_i32_0 = arith.constant 0 : i32
    %c0_i32_1 = arith.constant 0 : i32
    return %c0_i32, %c0_i32_0 : i32, i32
  }
  func.func @transform_19(%arg0: i32) -> (i32, i32) {
    %c0_i32 = arith.constant 0 : i32
    %c0_i32_0 = arith.constant 0 : i32
    %c0_i32_1 = arith.constant 0 : i32
    return %c0_i32, %c0_i32_0 : i32, i32
  }
  func.func @transform_20(%arg0: i32) -> (i32, i32) {
    %c0_i32 = arith.constant 0 : i32
    %c0_i32_0 = arith.constant 0 : i32
    %c0_i32_1 = arith.constant 0 : i32
    return %c0_i32, %c0_i32_0 : i32, i32
  }
  func.func @transform_21(%arg0: i32) -> (i32, i32) {
    %c0_i32 = arith.constant 0 : i32
    %c0_i32_0 = arith.constant 0 : i32
    %c0_i32_1 = arith.constant 0 : i32
    return %c0_i32, %c0_i32_0 : i32, i32
  }
  func.func @transform_22(%arg0: i32) -> (i32, i32) {
    %c0_i32 = arith.constant 0 : i32
    %c0_i32_0 = arith.constant 0 : i32
    %c0_i32_1 = arith.constant 0 : i32
    return %c0_i32, %c0_i32_0 : i32, i32
  }
  func.func @transform_23(%arg0: i32) -> (i32, i32) {
    %c0_i32 = arith.constant 0 : i32
    %c0_i32_0 = arith.constant 0 : i32
    %c0_i32_1 = arith.constant 0 : i32
    return %c0_i32, %c0_i32_0 : i32, i32
  }
  func.func @transform_24(%arg0: i32) -> (i32, i32, i32) {
    %c0_i32 = arith.constant 0 : i32
    %c0_i32_0 = arith.constant 0 : i32
    %c0_i32_1 = arith.constant 0 : i32
    return %arg0, %c0_i32, %c0_i32_0 : i32, i32, i32
  }
  func.func @transform_25(%arg0: i32) -> (i32, i32, i32, i32) {
    %c0_i32 = arith.constant 0 : i32
    %c0_i32_0 = arith.constant 0 : i32
    %c0_i32_1 = arith.constant 0 : i32
    %c0_i32_2 = arith.constant 0 : i32
    return %c0_i32, %arg0, %c0_i32_0, %c0_i32_1 : i32, i32, i32, i32
  }
  func.func @transform_26(%arg0: i32) -> (i32, i32, i32, i32) {
    %c0_i32 = arith.constant 0 : i32
    %c0_i32_0 = arith.constant 0 : i32
    %c0_i32_1 = arith.constant 0 : i32
    %c0_i32_2 = arith.constant 0 : i32
    return %c0_i32, %arg0, %c0_i32_0, %c0_i32_1 : i32, i32, i32, i32
  }
}

module attributes {stable_mosaic.version = 11 : i64} {
  func.func @_decoder_layer_kernel(%arg0: i32, %arg1: memref<2x8xi32, #tpu.memory_space<vmem>>, %arg2: memref<2x8xi32, #tpu.memory_space<vmem>>, %arg3: memref<2x8x32xf32, #tpu.memory_space<vmem>>, %arg4: memref<2x8x32xf32, #tpu.memory_space<vmem>>, %arg5: memref<32x32xbf16, #tpu.memory_space<vmem>>, %arg6: memref<32x32xbf16, #tpu.memory_space<vmem>>, %arg7: memref<32x32xbf16, #tpu.memory_space<vmem>>, %arg8: memref<32x32xbf16, #tpu.memory_space<vmem>>, %arg9: memref<1x32xf32, #tpu.memory_space<vmem>>, %arg10: memref<1x32xf32, #tpu.memory_space<vmem>>, %arg11: memref<1x32xf32, #tpu.memory_space<vmem>>, %arg12: memref<32x32xbf16, #tpu.memory_space<vmem>>, %arg13: memref<32x32xbf16, #tpu.memory_space<vmem>>, %arg14: memref<32x32xbf16, #tpu.memory_space<vmem>>, %arg15: memref<32x32xbf16, #tpu.memory_space<vmem>>, %arg16: memref<1x32xf32, #tpu.memory_space<vmem>>, %arg17: memref<1x32xf32, #tpu.memory_space<vmem>>, %arg18: memref<1x32xf32, #tpu.memory_space<vmem>>, %arg19: memref<32x64xbf16, #tpu.memory_space<vmem>>, %arg20: memref<1x64xf32, #tpu.memory_space<vmem>>, %arg21: memref<64x32xbf16, #tpu.memory_space<vmem>>, %arg22: memref<1x32xf32, #tpu.memory_space<vmem>>, %arg23: memref<1x32xf32, #tpu.memory_space<vmem>>, %arg24: memref<1x32xf32, #tpu.memory_space<vmem>>, %arg25: memref<2x8x32xf32, #tpu.memory_space<vmem>>, %arg26: memref<4x2x8x8xbf16, #tpu.memory_space<vmem>>, %arg27: memref<4x2x8x8xbf16, #tpu.memory_space<vmem>>, %arg28: memref<16x32xf32, #tpu.memory_space<vmem>>) attributes {dimension_semantics = [#tpu.dimension_semantics<parallel>], iteration_bounds = array<i64: 1>, scalar_prefetch = 0 : i64, scratch_operands = 1 : i64, tpu.core_type = #tpu.core_type<tc>, window_params = [{transform_indices = @transform_0, window_bounds = array<i64: 2, 8>}, {transform_indices = @transform_1, window_bounds = array<i64: 2, 8>}, {transform_indices = @transform_2, window_bounds = array<i64: 2, 8, 32>}, {transform_indices = @transform_3, window_bounds = array<i64: 2, 8, 32>}, {pipeline_mode = #tpu.pipeline_mode<synchronous>, transform_indices = @transform_4, window_bounds = array<i64: 32, 32>}, {pipeline_mode = #tpu.pipeline_mode<synchronous>, transform_indices = @transform_5, window_bounds = array<i64: 32, 32>}, {pipeline_mode = #tpu.pipeline_mode<synchronous>, transform_indices = @transform_6, window_bounds = array<i64: 32, 32>}, {pipeline_mode = #tpu.pipeline_mode<synchronous>, transform_indices = @transform_7, window_bounds = array<i64: 32, 32>}, {pipeline_mode = #tpu.pipeline_mode<synchronous>, transform_indices = @transform_8, window_bounds = array<i64: 1, 32>}, {pipeline_mode = #tpu.pipeline_mode<synchronous>, transform_indices = @transform_9, window_bounds = array<i64: 1, 32>}, {pipeline_mode = #tpu.pipeline_mode<synchronous>, transform_indices = @transform_10, window_bounds = array<i64: 1, 32>}, {pipeline_mode = #tpu.pipeline_mode<synchronous>, transform_indices = @transform_11, window_bounds = array<i64: 32, 32>}, {pipeline_mode = #tpu.pipeline_mode<synchronous>, transform_indices = @transform_12, window_bounds = array<i64: 32, 32>}, {pipeline_mode = #tpu.pipeline_mode<synchronous>, transform_indices = @transform_13, window_bounds = array<i64: 32, 32>}, {pipeline_mode = #tpu.pipeline_mode<synchronous>, transform_indices = @transform_14, window_bounds = array<i64: 32, 32>}, {pipeline_mode = #tpu.pipeline_mode<synchronous>, transform_indices = @transform_15, window_bounds = array<i64: 1, 32>}, {pipeline_mode = #tpu.pipeline_mode<synchronous>, transform_indices = @transform_16, window_bounds = array<i64: 1, 32>}, {pipeline_mode = #tpu.pipeline_mode<synchronous>, transform_indices = @transform_17, window_bounds = array<i64: 1, 32>}, {pipeline_mode = #tpu.pipeline_mode<synchronous>, transform_indices = @transform_18, window_bounds = array<i64: 32, 64>}, {pipeline_mode = #tpu.pipeline_mode<synchronous>, transform_indices = @transform_19, window_bounds = array<i64: 1, 64>}, {pipeline_mode = #tpu.pipeline_mode<synchronous>, transform_indices = @transform_20, window_bounds = array<i64: 64, 32>}, {pipeline_mode = #tpu.pipeline_mode<synchronous>, transform_indices = @transform_21, window_bounds = array<i64: 1, 32>}, {pipeline_mode = #tpu.pipeline_mode<synchronous>, transform_indices = @transform_22, window_bounds = array<i64: 1, 32>}, {pipeline_mode = #tpu.pipeline_mode<synchronous>, transform_indices = @transform_23, window_bounds = array<i64: 1, 32>}, {transform_indices = @transform_24, window_bounds = array<i64: 2, 8, 32>}, {transform_indices = @transform_25, window_bounds = array<i64: 4, 2, 8, 8>}, {transform_indices = @transform_26, window_bounds = array<i64: 4, 2, 8, 8>}]} {
    %c0 = arith.constant 0 : index
    %c0_0 = arith.constant 0 : index
    %c0_1 = arith.constant 0 : index
    %0 = vector.load %arg3[%c0, %c0_0, %c0_1] : memref<2x8x32xf32, #tpu.memory_space<vmem>>, vector<2x8x32xf32>
    %1 = vector.shape_cast %0 : vector<2x8x32xf32> to vector<16x32xf32>
    %c0_2 = arith.constant 0 : index
    %c0_3 = arith.constant 0 : index
    %c0_4 = arith.constant 0 : index
    %2 = vector.load %arg4[%c0_2, %c0_3, %c0_4] : memref<2x8x32xf32, #tpu.memory_space<vmem>>, vector<2x8x32xf32>
    %3 = vector.shape_cast %2 : vector<2x8x32xf32> to vector<16x32xf32>
    %c0_5 = arith.constant 0 : index
    %c0_6 = arith.constant 0 : index
    %4 = vector.load %arg1[%c0_5, %c0_6] : memref<2x8xi32, #tpu.memory_space<vmem>>, vector<2x8xi32>
    %c0_7 = arith.constant 0 : index
    %c0_8 = arith.constant 0 : index
    %5 = vector.load %arg2[%c0_7, %c0_8] : memref<2x8xi32, #tpu.memory_space<vmem>>, vector<2x8xi32>
    %6 = tpu.iota {dimensions = array<i32: 0>} : vector<8x8xi32>
    %7 = tpu.iota {dimensions = array<i32: 1>} : vector<8x8xi32>
    %8 = arith.cmpi sgt, %7, %6 : vector<8x8xi32>
    %9 = arith.truncf %1 : vector<16x32xf32> to vector<16x32xbf16>
    %10 = arith.truncf %1 : vector<16x32xf32> to vector<16x32xbf16>
    %c0_9 = arith.constant 0 : index
    %c0_10 = arith.constant 0 : index
    %11 = vector.load %arg5[%c0_9, %c0_10] : memref<32x32xbf16, #tpu.memory_space<vmem>>, vector<32x32xbf16>
    %cst = arith.constant dense<0.000000e+00> : vector<16x32xf32>
    %12 = tpu.matmul %9, %11, %cst {dimension_numbers = #tpu.dot_dimension_numbers<[1], [0], [0], [1], [0, 0, 1, 1], [], []>} : vector<16x32xbf16>, vector<32x32xbf16>, vector<16x32xf32> -> vector<16x32xf32>
    %cst_11 = arith.constant 0.176776692 : f32
    %13 = vector.broadcast %cst_11 : f32 to vector<16x32xf32>
    %14 = arith.mulf %12, %13 : vector<16x32xf32>
    %c0_12 = arith.constant 0 : index
    %c0_13 = arith.constant 0 : index
    %15 = vector.load %arg6[%c0_12, %c0_13] : memref<32x32xbf16, #tpu.memory_space<vmem>>, vector<32x32xbf16>
    %cst_14 = arith.constant dense<0.000000e+00> : vector<16x32xf32>
    %16 = tpu.matmul %10, %15, %cst_14 {dimension_numbers = #tpu.dot_dimension_numbers<[1], [0], [0], [1], [0, 0, 1, 1], [], []>} : vector<16x32xbf16>, vector<32x32xbf16>, vector<16x32xf32> -> vector<16x32xf32>
    %c0_15 = arith.constant 0 : index
    %c0_16 = arith.constant 0 : index
    %17 = vector.load %arg7[%c0_15, %c0_16] : memref<32x32xbf16, #tpu.memory_space<vmem>>, vector<32x32xbf16>
    %cst_17 = arith.constant dense<0.000000e+00> : vector<16x32xf32>
    %18 = tpu.matmul %10, %17, %cst_17 {dimension_numbers = #tpu.dot_dimension_numbers<[1], [0], [0], [1], [0, 0, 1, 1], [], []>} : vector<16x32xbf16>, vector<32x32xbf16>, vector<16x32xf32> -> vector<16x32xf32>
    %19 = arith.truncf %14 : vector<16x32xf32> to vector<16x32xbf16>
    %20 = arith.truncf %16 : vector<16x32xf32> to vector<16x32xbf16>
    %21 = arith.truncf %18 : vector<16x32xf32> to vector<16x32xbf16>
    %22 = vector.extract_strided_slice %4 {offsets = [0, 0], sizes = [1, 8], strides = [1, 1]} : vector<2x8xi32> to vector<1x8xi32>
    %c0_i32 = arith.constant 0 : i32
    %23 = vector.broadcast %c0_i32 : i32 to vector<1x8xi32>
    %24 = arith.cmpi eq, %22, %23 : vector<1x8xi32>
    %25 = vector.shape_cast %24 : vector<1x8xi1> to vector<1x8xi1>
    %26 = vector.broadcast %25 : vector<1x8xi1> to vector<8x8xi1>
    %27 = arith.ori %26, %8 : vector<8x8xi1>
    %28 = vector.extract_strided_slice %19 {offsets = [0, 0], sizes = [8, 8], strides = [1, 1]} : vector<16x32xbf16> to vector<8x8xbf16>
    %29 = vector.extract_strided_slice %20 {offsets = [0, 0], sizes = [8, 8], strides = [1, 1]} : vector<16x32xbf16> to vector<8x8xbf16>
    %30 = vector.extract_strided_slice %21 {offsets = [0, 0], sizes = [8, 8], strides = [1, 1]} : vector<16x32xbf16> to vector<8x8xbf16>
    %31 = tpu.transpose %29, [1, 0] : vector<8x8xbf16> -> vector<8x8xbf16>
    %cst_18 = arith.constant dense<0.000000e+00> : vector<8x8xf32>
    %32 = tpu.matmul %28, %31, %cst_18 {dimension_numbers = #tpu.dot_dimension_numbers<[1], [0], [0], [1], [0, 0, 1, 1], [], []>} : vector<8x8xbf16>, vector<8x8xbf16>, vector<8x8xf32> -> vector<8x8xf32>
    %cst_19 = arith.constant -1.000000e+30 : f32
    %33 = vector.broadcast %cst_19 : f32 to vector<8x8xf32>
    %34 = arith.select %27, %33, %32 : vector<8x8xi1>, vector<8x8xf32>
    %cst_20 = arith.constant dense<0xFF800000> : vector<8xf32>
    %35 = vector.multi_reduction <maximumf>, %34, %cst_20 [1] : vector<8x8xf32> to vector<8xf32>
    %36 = vector.shape_cast %35 : vector<8xf32> to vector<8x1xf32>
    %37 = vector.broadcast %36 : vector<8x1xf32> to vector<8x8xf32>
    %38 = arith.subf %34, %37 : vector<8x8xf32>
    %39 = math.exp %38 : vector<8x8xf32>
    %cst_21 = arith.constant dense<0.000000e+00> : vector<8xf32>
    %40 = vector.multi_reduction <add>, %39, %cst_21 [1] : vector<8x8xf32> to vector<8xf32>
    %41 = vector.shape_cast %40 : vector<8xf32> to vector<8x1xf32>
    %42 = tpu.reciprocal %41 {approx = true} : vector<8x1xf32> -> vector<8x1xf32>
    %43 = vector.broadcast %42 : vector<8x1xf32> to vector<8x8xf32>
    %44 = arith.mulf %39, %43 : vector<8x8xf32>
    %45 = arith.truncf %44 : vector<8x8xf32> to vector<8x8xbf16>
    %c0_22 = arith.constant 0 : index
    %c0_23 = arith.constant 0 : index
    %c0_24 = arith.constant 0 : index
    %c0_25 = arith.constant 0 : index
    %46 = vector.load %arg26[%c0_22, %c0_23, %c0_24, %c0_25] : memref<4x2x8x8xbf16, #tpu.memory_space<vmem>>, vector<1x1x8x8xbf16>
    %47 = vector.shape_cast %46 : vector<1x1x8x8xbf16> to vector<8x8xbf16>
    %48 = vector.shape_cast %45 : vector<8x8xbf16> to vector<1x1x8x8xbf16>
    tpu.vector_store %arg26[%c0_22, %c0_23, %c0_24, %c0_25], %48 {strides = array<i32>} : memref<4x2x8x8xbf16, #tpu.memory_space<vmem>>, vector<1x1x8x8xbf16>,
    %49 = arith.truncf %44 : vector<8x8xf32> to vector<8x8xbf16>
    %cst_26 = arith.constant dense<0.000000e+00> : vector<8x8xf32>
    %50 = tpu.matmul %49, %30, %cst_26 {dimension_numbers = #tpu.dot_dimension_numbers<[1], [0], [0], [1], [0, 0, 1, 1], [], []>} : vector<8x8xbf16>, vector<8x8xbf16>, vector<8x8xf32> -> vector<8x8xf32>
    %c0_27 = arith.constant 0 : index
    %c0_28 = arith.constant 0 : index
    %51 = vector.load %arg28[%c0_27, %c0_28] : memref<16x32xf32, #tpu.memory_space<vmem>>, vector<8x8xf32>
    tpu.vector_store %arg28[%c0_27, %c0_28], %50 {strides = array<i32>} : memref<16x32xf32, #tpu.memory_space<vmem>>, vector<8x8xf32>,
    %52 = vector.extract_strided_slice %19 {offsets = [0, 8], sizes = [8, 8], strides = [1, 1]} : vector<16x32xbf16> to vector<8x8xbf16>
    %53 = vector.extract_strided_slice %20 {offsets = [0, 8], sizes = [8, 8], strides = [1, 1]} : vector<16x32xbf16> to vector<8x8xbf16>
    %54 = vector.extract_strided_slice %21 {offsets = [0, 8], sizes = [8, 8], strides = [1, 1]} : vector<16x32xbf16> to vector<8x8xbf16>
    %55 = tpu.transpose %53, [1, 0] : vector<8x8xbf16> -> vector<8x8xbf16>
    %cst_29 = arith.constant dense<0.000000e+00> : vector<8x8xf32>
    %56 = tpu.matmul %52, %55, %cst_29 {dimension_numbers = #tpu.dot_dimension_numbers<[1], [0], [0], [1], [0, 0, 1, 1], [], []>} : vector<8x8xbf16>, vector<8x8xbf16>, vector<8x8xf32> -> vector<8x8xf32>
    %cst_30 = arith.constant -1.000000e+30 : f32
    %57 = vector.broadcast %cst_30 : f32 to vector<8x8xf32>
    %58 = arith.select %27, %57, %56 : vector<8x8xi1>, vector<8x8xf32>
    %cst_31 = arith.constant dense<0xFF800000> : vector<8xf32>
    %59 = vector.multi_reduction <maximumf>, %58, %cst_31 [1] : vector<8x8xf32> to vector<8xf32>
    %60 = vector.shape_cast %59 : vector<8xf32> to vector<8x1xf32>
    %61 = vector.broadcast %60 : vector<8x1xf32> to vector<8x8xf32>
    %62 = arith.subf %58, %61 : vector<8x8xf32>
    %63 = math.exp %62 : vector<8x8xf32>
    %cst_32 = arith.constant dense<0.000000e+00> : vector<8xf32>
    %64 = vector.multi_reduction <add>, %63, %cst_32 [1] : vector<8x8xf32> to vector<8xf32>
    %65 = vector.shape_cast %64 : vector<8xf32> to vector<8x1xf32>
    %66 = tpu.reciprocal %65 {approx = true} : vector<8x1xf32> -> vector<8x1xf32>
    %67 = vector.broadcast %66 : vector<8x1xf32> to vector<8x8xf32>
    %68 = arith.mulf %63, %67 : vector<8x8xf32>
    %69 = arith.truncf %68 : vector<8x8xf32> to vector<8x8xbf16>
    %c1 = arith.constant 1 : index
    %c0_33 = arith.constant 0 : index
    %c0_34 = arith.constant 0 : index
    %c0_35 = arith.constant 0 : index
    %70 = vector.load %arg26[%c1, %c0_33, %c0_34, %c0_35] : memref<4x2x8x8xbf16, #tpu.memory_space<vmem>>, vector<1x1x8x8xbf16>
    %71 = vector.shape_cast %70 : vector<1x1x8x8xbf16> to vector<8x8xbf16>
    %72 = vector.shape_cast %69 : vector<8x8xbf16> to vector<1x1x8x8xbf16>
    tpu.vector_store %arg26[%c1, %c0_33, %c0_34, %c0_35], %72 {strides = array<i32>} : memref<4x2x8x8xbf16, #tpu.memory_space<vmem>>, vector<1x1x8x8xbf16>,
    %73 = arith.truncf %68 : vector<8x8xf32> to vector<8x8xbf16>
    %cst_36 = arith.constant dense<0.000000e+00> : vector<8x8xf32>
    %74 = tpu.matmul %73, %54, %cst_36 {dimension_numbers = #tpu.dot_dimension_numbers<[1], [0], [0], [1], [0, 0, 1, 1], [], []>} : vector<8x8xbf16>, vector<8x8xbf16>, vector<8x8xf32> -> vector<8x8xf32>
    %c0_37 = arith.constant 0 : index
    %c8 = arith.constant 8 : index
    %75 = vector.load %arg28[%c0_37, %c8] : memref<16x32xf32, #tpu.memory_space<vmem>>, vector<8x8xf32>
    tpu.vector_store %arg28[%c0_37, %c8], %74 {strides = array<i32>} : memref<16x32xf32, #tpu.memory_space<vmem>>, vector<8x8xf32>,
    %76 = vector.extract_strided_slice %19 {offsets = [0, 16], sizes = [8, 8], strides = [1, 1]} : vector<16x32xbf16> to vector<8x8xbf16>
    %77 = vector.extract_strided_slice %20 {offsets = [0, 16], sizes = [8, 8], strides = [1, 1]} : vector<16x32xbf16> to vector<8x8xbf16>
    %78 = vector.extract_strided_slice %21 {offsets = [0, 16], sizes = [8, 8], strides = [1, 1]} : vector<16x32xbf16> to vector<8x8xbf16>
    %79 = tpu.transpose %77, [1, 0] : vector<8x8xbf16> -> vector<8x8xbf16>
    %cst_38 = arith.constant dense<0.000000e+00> : vector<8x8xf32>
    %80 = tpu.matmul %76, %79, %cst_38 {dimension_numbers = #tpu.dot_dimension_numbers<[1], [0], [0], [1], [0, 0, 1, 1], [], []>} : vector<8x8xbf16>, vector<8x8xbf16>, vector<8x8xf32> -> vector<8x8xf32>
    %cst_39 = arith.constant -1.000000e+30 : f32
    %81 = vector.broadcast %cst_39 : f32 to vector<8x8xf32>
    %82 = arith.select %27, %81, %80 : vector<8x8xi1>, vector<8x8xf32>
    %cst_40 = arith.constant dense<0xFF800000> : vector<8xf32>
    %83 = vector.multi_reduction <maximumf>, %82, %cst_40 [1] : vector<8x8xf32> to vector<8xf32>
    %84 = vector.shape_cast %83 : vector<8xf32> to vector<8x1xf32>
    %85 = vector.broadcast %84 : vector<8x1xf32> to vector<8x8xf32>
    %86 = arith.subf %82, %85 : vector<8x8xf32>
    %87 = math.exp %86 : vector<8x8xf32>
    %cst_41 = arith.constant dense<0.000000e+00> : vector<8xf32>
    %88 = vector.multi_reduction <add>, %87, %cst_41 [1] : vector<8x8xf32> to vector<8xf32>
    %89 = vector.shape_cast %88 : vector<8xf32> to vector<8x1xf32>
    %90 = tpu.reciprocal %89 {approx = true} : vector<8x1xf32> -> vector<8x1xf32>
    %91 = vector.broadcast %90 : vector<8x1xf32> to vector<8x8xf32>
    %92 = arith.mulf %87, %91 : vector<8x8xf32>
    %93 = arith.truncf %92 : vector<8x8xf32> to vector<8x8xbf16>
    %c2 = arith.constant 2 : index
    %c0_42 = arith.constant 0 : index
    %c0_43 = arith.constant 0 : index
    %c0_44 = arith.constant 0 : index
    %94 = vector.load %arg26[%c2, %c0_42, %c0_43, %c0_44] : memref<4x2x8x8xbf16, #tpu.memory_space<vmem>>, vector<1x1x8x8xbf16>
    %95 = vector.shape_cast %94 : vector<1x1x8x8xbf16> to vector<8x8xbf16>
    %96 = vector.shape_cast %93 : vector<8x8xbf16> to vector<1x1x8x8xbf16>
    tpu.vector_store %arg26[%c2, %c0_42, %c0_43, %c0_44], %96 {strides = array<i32>} : memref<4x2x8x8xbf16, #tpu.memory_space<vmem>>, vector<1x1x8x8xbf16>,
    %97 = arith.truncf %92 : vector<8x8xf32> to vector<8x8xbf16>
    %cst_45 = arith.constant dense<0.000000e+00> : vector<8x8xf32>
    %98 = tpu.matmul %97, %78, %cst_45 {dimension_numbers = #tpu.dot_dimension_numbers<[1], [0], [0], [1], [0, 0, 1, 1], [], []>} : vector<8x8xbf16>, vector<8x8xbf16>, vector<8x8xf32> -> vector<8x8xf32>
    %c0_46 = arith.constant 0 : index
    %c16 = arith.constant 16 : index
    %99 = vector.load %arg28[%c0_46, %c16] : memref<16x32xf32, #tpu.memory_space<vmem>>, vector<8x8xf32>
    tpu.vector_store %arg28[%c0_46, %c16], %98 {strides = array<i32>} : memref<16x32xf32, #tpu.memory_space<vmem>>, vector<8x8xf32>,
    %100 = vector.extract_strided_slice %19 {offsets = [0, 24], sizes = [8, 8], strides = [1, 1]} : vector<16x32xbf16> to vector<8x8xbf16>
    %101 = vector.extract_strided_slice %20 {offsets = [0, 24], sizes = [8, 8], strides = [1, 1]} : vector<16x32xbf16> to vector<8x8xbf16>
    %102 = vector.extract_strided_slice %21 {offsets = [0, 24], sizes = [8, 8], strides = [1, 1]} : vector<16x32xbf16> to vector<8x8xbf16>
    %103 = tpu.transpose %101, [1, 0] : vector<8x8xbf16> -> vector<8x8xbf16>
    %cst_47 = arith.constant dense<0.000000e+00> : vector<8x8xf32>
    %104 = tpu.matmul %100, %103, %cst_47 {dimension_numbers = #tpu.dot_dimension_numbers<[1], [0], [0], [1], [0, 0, 1, 1], [], []>} : vector<8x8xbf16>, vector<8x8xbf16>, vector<8x8xf32> -> vector<8x8xf32>
    %cst_48 = arith.constant -1.000000e+30 : f32
    %105 = vector.broadcast %cst_48 : f32 to vector<8x8xf32>
    %106 = arith.select %27, %105, %104 : vector<8x8xi1>, vector<8x8xf32>
    %cst_49 = arith.constant dense<0xFF800000> : vector<8xf32>
    %107 = vector.multi_reduction <maximumf>, %106, %cst_49 [1] : vector<8x8xf32> to vector<8xf32>
    %108 = vector.shape_cast %107 : vector<8xf32> to vector<8x1xf32>
    %109 = vector.broadcast %108 : vector<8x1xf32> to vector<8x8xf32>
    %110 = arith.subf %106, %109 : vector<8x8xf32>
    %111 = math.exp %110 : vector<8x8xf32>
    %cst_50 = arith.constant dense<0.000000e+00> : vector<8xf32>
    %112 = vector.multi_reduction <add>, %111, %cst_50 [1] : vector<8x8xf32> to vector<8xf32>
    %113 = vector.shape_cast %112 : vector<8xf32> to vector<8x1xf32>
    %114 = tpu.reciprocal %113 {approx = true} : vector<8x1xf32> -> vector<8x1xf32>
    %115 = vector.broadcast %114 : vector<8x1xf32> to vector<8x8xf32>
    %116 = arith.mulf %111, %115 : vector<8x8xf32>
    %117 = arith.truncf %116 : vector<8x8xf32> to vector<8x8xbf16>
    %c3 = arith.constant 3 : index
    %c0_51 = arith.constant 0 : index
    %c0_52 = arith.constant 0 : index
    %c0_53 = arith.constant 0 : index
    %118 = vector.load %arg26[%c3, %c0_51, %c0_52, %c0_53] : memref<4x2x8x8xbf16, #tpu.memory_space<vmem>>, vector<1x1x8x8xbf16>
    %119 = vector.shape_cast %118 : vector<1x1x8x8xbf16> to vector<8x8xbf16>
    %120 = vector.shape_cast %117 : vector<8x8xbf16> to vector<1x1x8x8xbf16>
    tpu.vector_store %arg26[%c3, %c0_51, %c0_52, %c0_53], %120 {strides = array<i32>} : memref<4x2x8x8xbf16, #tpu.memory_space<vmem>>, vector<1x1x8x8xbf16>,
    %121 = arith.truncf %116 : vector<8x8xf32> to vector<8x8xbf16>
    %cst_54 = arith.constant dense<0.000000e+00> : vector<8x8xf32>
    %122 = tpu.matmul %121, %102, %cst_54 {dimension_numbers = #tpu.dot_dimension_numbers<[1], [0], [0], [1], [0, 0, 1, 1], [], []>} : vector<8x8xbf16>, vector<8x8xbf16>, vector<8x8xf32> -> vector<8x8xf32>
    %c0_55 = arith.constant 0 : index
    %c24 = arith.constant 24 : index
    %123 = vector.load %arg28[%c0_55, %c24] : memref<16x32xf32, #tpu.memory_space<vmem>>, vector<8x8xf32>
    tpu.vector_store %arg28[%c0_55, %c24], %122 {strides = array<i32>} : memref<16x32xf32, #tpu.memory_space<vmem>>, vector<8x8xf32>,
    %124 = vector.extract_strided_slice %4 {offsets = [1, 0], sizes = [1, 8], strides = [1, 1]} : vector<2x8xi32> to vector<1x8xi32>
    %c0_i32_56 = arith.constant 0 : i32
    %125 = vector.broadcast %c0_i32_56 : i32 to vector<1x8xi32>
    %126 = arith.cmpi eq, %124, %125 : vector<1x8xi32>
    %127 = vector.shape_cast %126 : vector<1x8xi1> to vector<1x8xi1>
    %128 = vector.broadcast %127 : vector<1x8xi1> to vector<8x8xi1>
    %129 = arith.ori %128, %8 : vector<8x8xi1>
    %130 = vector.extract_strided_slice %19 {offsets = [8, 0], sizes = [8, 8], strides = [1, 1]} : vector<16x32xbf16> to vector<8x8xbf16>
    %131 = vector.extract_strided_slice %20 {offsets = [8, 0], sizes = [8, 8], strides = [1, 1]} : vector<16x32xbf16> to vector<8x8xbf16>
    %132 = vector.extract_strided_slice %21 {offsets = [8, 0], sizes = [8, 8], strides = [1, 1]} : vector<16x32xbf16> to vector<8x8xbf16>
    %133 = tpu.transpose %131, [1, 0] : vector<8x8xbf16> -> vector<8x8xbf16>
    %cst_57 = arith.constant dense<0.000000e+00> : vector<8x8xf32>
    %134 = tpu.matmul %130, %133, %cst_57 {dimension_numbers = #tpu.dot_dimension_numbers<[1], [0], [0], [1], [0, 0, 1, 1], [], []>} : vector<8x8xbf16>, vector<8x8xbf16>, vector<8x8xf32> -> vector<8x8xf32>
    %cst_58 = arith.constant -1.000000e+30 : f32
    %135 = vector.broadcast %cst_58 : f32 to vector<8x8xf32>
    %136 = arith.select %129, %135, %134 : vector<8x8xi1>, vector<8x8xf32>
    %cst_59 = arith.constant dense<0xFF800000> : vector<8xf32>
    %137 = vector.multi_reduction <maximumf>, %136, %cst_59 [1] : vector<8x8xf32> to vector<8xf32>
    %138 = vector.shape_cast %137 : vector<8xf32> to vector<8x1xf32>
    %139 = vector.broadcast %138 : vector<8x1xf32> to vector<8x8xf32>
    %140 = arith.subf %136, %139 : vector<8x8xf32>
    %141 = math.exp %140 : vector<8x8xf32>
    %cst_60 = arith.constant dense<0.000000e+00> : vector<8xf32>
    %142 = vector.multi_reduction <add>, %141, %cst_60 [1] : vector<8x8xf32> to vector<8xf32>
    %143 = vector.shape_cast %142 : vector<8xf32> to vector<8x1xf32>
    %144 = tpu.reciprocal %143 {approx = true} : vector<8x1xf32> -> vector<8x1xf32>
    %145 = vector.broadcast %144 : vector<8x1xf32> to vector<8x8xf32>
    %146 = arith.mulf %141, %145 : vector<8x8xf32>
    %147 = arith.truncf %146 : vector<8x8xf32> to vector<8x8xbf16>
    %c0_61 = arith.constant 0 : index
    %c1_62 = arith.constant 1 : index
    %c0_63 = arith.constant 0 : index
    %c0_64 = arith.constant 0 : index
    %148 = vector.load %arg26[%c0_61, %c1_62, %c0_63, %c0_64] : memref<4x2x8x8xbf16, #tpu.memory_space<vmem>>, vector<1x1x8x8xbf16>
    %149 = vector.shape_cast %148 : vector<1x1x8x8xbf16> to vector<8x8xbf16>
    %150 = vector.shape_cast %147 : vector<8x8xbf16> to vector<1x1x8x8xbf16>
    tpu.vector_store %arg26[%c0_61, %c1_62, %c0_63, %c0_64], %150 {strides = array<i32>} : memref<4x2x8x8xbf16, #tpu.memory_space<vmem>>, vector<1x1x8x8xbf16>,
    %151 = arith.truncf %146 : vector<8x8xf32> to vector<8x8xbf16>
    %cst_65 = arith.constant dense<0.000000e+00> : vector<8x8xf32>
    %152 = tpu.matmul %151, %132, %cst_65 {dimension_numbers = #tpu.dot_dimension_numbers<[1], [0], [0], [1], [0, 0, 1, 1], [], []>} : vector<8x8xbf16>, vector<8x8xbf16>, vector<8x8xf32> -> vector<8x8xf32>
    %c8_66 = arith.constant 8 : index
    %c0_67 = arith.constant 0 : index
    %153 = vector.load %arg28[%c8_66, %c0_67] : memref<16x32xf32, #tpu.memory_space<vmem>>, vector<8x8xf32>
    tpu.vector_store %arg28[%c8_66, %c0_67], %152 {strides = array<i32>} : memref<16x32xf32, #tpu.memory_space<vmem>>, vector<8x8xf32>,
    %154 = vector.extract_strided_slice %19 {offsets = [8, 8], sizes = [8, 8], strides = [1, 1]} : vector<16x32xbf16> to vector<8x8xbf16>
    %155 = vector.extract_strided_slice %20 {offsets = [8, 8], sizes = [8, 8], strides = [1, 1]} : vector<16x32xbf16> to vector<8x8xbf16>
    %156 = vector.extract_strided_slice %21 {offsets = [8, 8], sizes = [8, 8], strides = [1, 1]} : vector<16x32xbf16> to vector<8x8xbf16>
    %157 = tpu.transpose %155, [1, 0] : vector<8x8xbf16> -> vector<8x8xbf16>
    %cst_68 = arith.constant dense<0.000000e+00> : vector<8x8xf32>
    %158 = tpu.matmul %154, %157, %cst_68 {dimension_numbers = #tpu.dot_dimension_numbers<[1], [0], [0], [1], [0, 0, 1, 1], [], []>} : vector<8x8xbf16>, vector<8x8xbf16>, vector<8x8xf32> -> vector<8x8xf32>
    %cst_69 = arith.constant -1.000000e+30 : f32
    %159 = vector.broadcast %cst_69 : f32 to vector<8x8xf32>
    %160 = arith.select %129, %159, %158 : vector<8x8xi1>, vector<8x8xf32>
    %cst_70 = arith.constant dense<0xFF800000> : vector<8xf32>
    %161 = vector.multi_reduction <maximumf>, %160, %cst_70 [1] : vector<8x8xf32> to vector<8xf32>
    %162 = vector.shape_cast %161 : vector<8xf32> to vector<8x1xf32>
    %163 = vector.broadcast %162 : vector<8x1xf32> to vector<8x8xf32>
    %164 = arith.subf %160, %163 : vector<8x8xf32>
    %165 = math.exp %164 : vector<8x8xf32>
    %cst_71 = arith.constant dense<0.000000e+00> : vector<8xf32>
    %166 = vector.multi_reduction <add>, %165, %cst_71 [1] : vector<8x8xf32> to vector<8xf32>
    %167 = vector.shape_cast %166 : vector<8xf32> to vector<8x1xf32>
    %168 = tpu.reciprocal %167 {approx = true} : vector<8x1xf32> -> vector<8x1xf32>
    %169 = vector.broadcast %168 : vector<8x1xf32> to vector<8x8xf32>
    %170 = arith.mulf %165, %169 : vector<8x8xf32>
    %171 = arith.truncf %170 : vector<8x8xf32> to vector<8x8xbf16>
    %c1_72 = arith.constant 1 : index
    %c1_73 = arith.constant 1 : index
    %c0_74 = arith.constant 0 : index
    %c0_75 = arith.constant 0 : index
    %172 = vector.load %arg26[%c1_72, %c1_73, %c0_74, %c0_75] : memref<4x2x8x8xbf16, #tpu.memory_space<vmem>>, vector<1x1x8x8xbf16>
    %173 = vector.shape_cast %172 : vector<1x1x8x8xbf16> to vector<8x8xbf16>
    %174 = vector.shape_cast %171 : vector<8x8xbf16> to vector<1x1x8x8xbf16>
    tpu.vector_store %arg26[%c1_72, %c1_73, %c0_74, %c0_75], %174 {strides = array<i32>} : memref<4x2x8x8xbf16, #tpu.memory_space<vmem>>, vector<1x1x8x8xbf16>,
    %175 = arith.truncf %170 : vector<8x8xf32> to vector<8x8xbf16>
    %cst_76 = arith.constant dense<0.000000e+00> : vector<8x8xf32>
    %176 = tpu.matmul %175, %156, %cst_76 {dimension_numbers = #tpu.dot_dimension_numbers<[1], [0], [0], [1], [0, 0, 1, 1], [], []>} : vector<8x8xbf16>, vector<8x8xbf16>, vector<8x8xf32> -> vector<8x8xf32>
    %c8_77 = arith.constant 8 : index
    %c8_78 = arith.constant 8 : index
    %177 = vector.load %arg28[%c8_77, %c8_78] : memref<16x32xf32, #tpu.memory_space<vmem>>, vector<8x8xf32>
    tpu.vector_store %arg28[%c8_77, %c8_78], %176 {strides = array<i32>} : memref<16x32xf32, #tpu.memory_space<vmem>>, vector<8x8xf32>,
    %178 = vector.extract_strided_slice %19 {offsets = [8, 16], sizes = [8, 8], strides = [1, 1]} : vector<16x32xbf16> to vector<8x8xbf16>
    %179 = vector.extract_strided_slice %20 {offsets = [8, 16], sizes = [8, 8], strides = [1, 1]} : vector<16x32xbf16> to vector<8x8xbf16>
    %180 = vector.extract_strided_slice %21 {offsets = [8, 16], sizes = [8, 8], strides = [1, 1]} : vector<16x32xbf16> to vector<8x8xbf16>
    %181 = tpu.transpose %179, [1, 0] : vector<8x8xbf16> -> vector<8x8xbf16>
    %cst_79 = arith.constant dense<0.000000e+00> : vector<8x8xf32>
    %182 = tpu.matmul %178, %181, %cst_79 {dimension_numbers = #tpu.dot_dimension_numbers<[1], [0], [0], [1], [0, 0, 1, 1], [], []>} : vector<8x8xbf16>, vector<8x8xbf16>, vector<8x8xf32> -> vector<8x8xf32>
    %cst_80 = arith.constant -1.000000e+30 : f32
    %183 = vector.broadcast %cst_80 : f32 to vector<8x8xf32>
    %184 = arith.select %129, %183, %182 : vector<8x8xi1>, vector<8x8xf32>
    %cst_81 = arith.constant dense<0xFF800000> : vector<8xf32>
    %185 = vector.multi_reduction <maximumf>, %184, %cst_81 [1] : vector<8x8xf32> to vector<8xf32>
    %186 = vector.shape_cast %185 : vector<8xf32> to vector<8x1xf32>
    %187 = vector.broadcast %186 : vector<8x1xf32> to vector<8x8xf32>
    %188 = arith.subf %184, %187 : vector<8x8xf32>
    %189 = math.exp %188 : vector<8x8xf32>
    %cst_82 = arith.constant dense<0.000000e+00> : vector<8xf32>
    %190 = vector.multi_reduction <add>, %189, %cst_82 [1] : vector<8x8xf32> to vector<8xf32>
    %191 = vector.shape_cast %190 : vector<8xf32> to vector<8x1xf32>
    %192 = tpu.reciprocal %191 {approx = true} : vector<8x1xf32> -> vector<8x1xf32>
    %193 = vector.broadcast %192 : vector<8x1xf32> to vector<8x8xf32>
    %194 = arith.mulf %189, %193 : vector<8x8xf32>
    %195 = arith.truncf %194 : vector<8x8xf32> to vector<8x8xbf16>
    %c2_83 = arith.constant 2 : index
    %c1_84 = arith.constant 1 : index
    %c0_85 = arith.constant 0 : index
    %c0_86 = arith.constant 0 : index
    %196 = vector.load %arg26[%c2_83, %c1_84, %c0_85, %c0_86] : memref<4x2x8x8xbf16, #tpu.memory_space<vmem>>, vector<1x1x8x8xbf16>
    %197 = vector.shape_cast %196 : vector<1x1x8x8xbf16> to vector<8x8xbf16>
    %198 = vector.shape_cast %195 : vector<8x8xbf16> to vector<1x1x8x8xbf16>
    tpu.vector_store %arg26[%c2_83, %c1_84, %c0_85, %c0_86], %198 {strides = array<i32>} : memref<4x2x8x8xbf16, #tpu.memory_space<vmem>>, vector<1x1x8x8xbf16>,
    %199 = arith.truncf %194 : vector<8x8xf32> to vector<8x8xbf16>
    %cst_87 = arith.constant dense<0.000000e+00> : vector<8x8xf32>
    %200 = tpu.matmul %199, %180, %cst_87 {dimension_numbers = #tpu.dot_dimension_numbers<[1], [0], [0], [1], [0, 0, 1, 1], [], []>} : vector<8x8xbf16>, vector<8x8xbf16>, vector<8x8xf32> -> vector<8x8xf32>
    %c8_88 = arith.constant 8 : index
    %c16_89 = arith.constant 16 : index
    %201 = vector.load %arg28[%c8_88, %c16_89] : memref<16x32xf32, #tpu.memory_space<vmem>>, vector<8x8xf32>
    tpu.vector_store %arg28[%c8_88, %c16_89], %200 {strides = array<i32>} : memref<16x32xf32, #tpu.memory_space<vmem>>, vector<8x8xf32>,
    %202 = vector.extract_strided_slice %19 {offsets = [8, 24], sizes = [8, 8], strides = [1, 1]} : vector<16x32xbf16> to vector<8x8xbf16>
    %203 = vector.extract_strided_slice %20 {offsets = [8, 24], sizes = [8, 8], strides = [1, 1]} : vector<16x32xbf16> to vector<8x8xbf16>
    %204 = vector.extract_strided_slice %21 {offsets = [8, 24], sizes = [8, 8], strides = [1, 1]} : vector<16x32xbf16> to vector<8x8xbf16>
    %205 = tpu.transpose %203, [1, 0] : vector<8x8xbf16> -> vector<8x8xbf16>
    %cst_90 = arith.constant dense<0.000000e+00> : vector<8x8xf32>
    %206 = tpu.matmul %202, %205, %cst_90 {dimension_numbers = #tpu.dot_dimension_numbers<[1], [0], [0], [1], [0, 0, 1, 1], [], []>} : vector<8x8xbf16>, vector<8x8xbf16>, vector<8x8xf32> -> vector<8x8xf32>
    %cst_91 = arith.constant -1.000000e+30 : f32
    %207 = vector.broadcast %cst_91 : f32 to vector<8x8xf32>
    %208 = arith.select %129, %207, %206 : vector<8x8xi1>, vector<8x8xf32>
    %cst_92 = arith.constant dense<0xFF800000> : vector<8xf32>
    %209 = vector.multi_reduction <maximumf>, %208, %cst_92 [1] : vector<8x8xf32> to vector<8xf32>
    %210 = vector.shape_cast %209 : vector<8xf32> to vector<8x1xf32>
    %211 = vector.broadcast %210 : vector<8x1xf32> to vector<8x8xf32>
    %212 = arith.subf %208, %211 : vector<8x8xf32>
    %213 = math.exp %212 : vector<8x8xf32>
    %cst_93 = arith.constant dense<0.000000e+00> : vector<8xf32>
    %214 = vector.multi_reduction <add>, %213, %cst_93 [1] : vector<8x8xf32> to vector<8xf32>
    %215 = vector.shape_cast %214 : vector<8xf32> to vector<8x1xf32>
    %216 = tpu.reciprocal %215 {approx = true} : vector<8x1xf32> -> vector<8x1xf32>
    %217 = vector.broadcast %216 : vector<8x1xf32> to vector<8x8xf32>
    %218 = arith.mulf %213, %217 : vector<8x8xf32>
    %219 = arith.truncf %218 : vector<8x8xf32> to vector<8x8xbf16>
    %c3_94 = arith.constant 3 : index
    %c1_95 = arith.constant 1 : index
    %c0_96 = arith.constant 0 : index
    %c0_97 = arith.constant 0 : index
    %220 = vector.load %arg26[%c3_94, %c1_95, %c0_96, %c0_97] : memref<4x2x8x8xbf16, #tpu.memory_space<vmem>>, vector<1x1x8x8xbf16>
    %221 = vector.shape_cast %220 : vector<1x1x8x8xbf16> to vector<8x8xbf16>
    %222 = vector.shape_cast %219 : vector<8x8xbf16> to vector<1x1x8x8xbf16>
    tpu.vector_store %arg26[%c3_94, %c1_95, %c0_96, %c0_97], %222 {strides = array<i32>} : memref<4x2x8x8xbf16, #tpu.memory_space<vmem>>, vector<1x1x8x8xbf16>,
    %223 = arith.truncf %218 : vector<8x8xf32> to vector<8x8xbf16>
    %cst_98 = arith.constant dense<0.000000e+00> : vector<8x8xf32>
    %224 = tpu.matmul %223, %204, %cst_98 {dimension_numbers = #tpu.dot_dimension_numbers<[1], [0], [0], [1], [0, 0, 1, 1], [], []>} : vector<8x8xbf16>, vector<8x8xbf16>, vector<8x8xf32> -> vector<8x8xf32>
    %c8_99 = arith.constant 8 : index
    %c24_100 = arith.constant 24 : index
    %225 = vector.load %arg28[%c8_99, %c24_100] : memref<16x32xf32, #tpu.memory_space<vmem>>, vector<8x8xf32>
    tpu.vector_store %arg28[%c8_99, %c24_100], %224 {strides = array<i32>} : memref<16x32xf32, #tpu.memory_space<vmem>>, vector<8x8xf32>,
    %c0_101 = arith.constant 0 : index
    %c0_102 = arith.constant 0 : index
    %226 = vector.load %arg28[%c0_101, %c0_102] : memref<16x32xf32, #tpu.memory_space<vmem>>, vector<16x32xf32>
    %227 = arith.truncf %226 : vector<16x32xf32> to vector<16x32xbf16>
    %c0_103 = arith.constant 0 : index
    %c0_104 = arith.constant 0 : index
    %228 = vector.load %arg8[%c0_103, %c0_104] : memref<32x32xbf16, #tpu.memory_space<vmem>>, vector<32x32xbf16>
    %cst_105 = arith.constant dense<0.000000e+00> : vector<16x32xf32>
    %229 = tpu.matmul %227, %228, %cst_105 {dimension_numbers = #tpu.dot_dimension_numbers<[1], [0], [0], [1], [0, 0, 1, 1], [], []>} : vector<16x32xbf16>, vector<32x32xbf16>, vector<16x32xf32> -> vector<16x32xf32>
    %c0_106 = arith.constant 0 : index
    %c0_107 = arith.constant 0 : index
    %230 = vector.load %arg9[%c0_106, %c0_107] : memref<1x32xf32, #tpu.memory_space<vmem>>, vector<1x32xf32>
    %231 = vector.broadcast %230 : vector<1x32xf32> to vector<16x32xf32>
    %232 = arith.addf %229, %231 : vector<16x32xf32>
    %233 = arith.addf %232, %1 : vector<16x32xf32>
    %c0_108 = arith.constant 0 : index
    %c0_109 = arith.constant 0 : index
    %234 = vector.load %arg10[%c0_108, %c0_109] : memref<1x32xf32, #tpu.memory_space<vmem>>, vector<1x32xf32>
    %c0_110 = arith.constant 0 : index
    %c0_111 = arith.constant 0 : index
    %235 = vector.load %arg11[%c0_110, %c0_111] : memref<1x32xf32, #tpu.memory_space<vmem>>, vector<1x32xf32>
    %cst_112 = arith.constant dense<0.000000e+00> : vector<16xf32>
    %236 = vector.multi_reduction <add>, %233, %cst_112 [1] : vector<16x32xf32> to vector<16xf32>
    %237 = vector.shape_cast %236 : vector<16xf32> to vector<16x1xf32>
    %cst_113 = arith.constant 3.200000e+01 : f32
    %238 = vector.broadcast %cst_113 : f32 to vector<16x1xf32>
    %239 = arith.divf %237, %238 : vector<16x1xf32>
    %240 = arith.mulf %233, %233 : vector<16x32xf32>
    %cst_114 = arith.constant dense<0.000000e+00> : vector<16xf32>
    %241 = vector.multi_reduction <add>, %240, %cst_114 [1] : vector<16x32xf32> to vector<16xf32>
    %242 = vector.shape_cast %241 : vector<16xf32> to vector<16x1xf32>
    %cst_115 = arith.constant 3.200000e+01 : f32
    %243 = vector.broadcast %cst_115 : f32 to vector<16x1xf32>
    %244 = arith.divf %242, %243 : vector<16x1xf32>
    %245 = arith.mulf %239, %239 : vector<16x1xf32>
    %246 = arith.subf %244, %245 : vector<16x1xf32>
    %cst_116 = arith.constant 0.000000e+00 : f32
    %247 = vector.broadcast %cst_116 : f32 to vector<16x1xf32>
    %248 = arith.maximumf %246, %247 : vector<16x1xf32>
    %249 = vector.broadcast %239 : vector<16x1xf32> to vector<16x32xf32>
    %250 = arith.subf %233, %249 : vector<16x32xf32>
    %cst_117 = arith.constant 9.99999974E-6 : f32
    %251 = vector.broadcast %cst_117 : f32 to vector<16x1xf32>
    %252 = arith.addf %248, %251 : vector<16x1xf32>
    %253 = math.rsqrt %252 : vector<16x1xf32>
    %254 = vector.broadcast %253 : vector<16x1xf32> to vector<16x32xf32>
    %255 = arith.mulf %250, %254 : vector<16x32xf32>
    %256 = vector.broadcast %234 : vector<1x32xf32> to vector<16x32xf32>
    %257 = arith.mulf %255, %256 : vector<16x32xf32>
    %258 = vector.broadcast %235 : vector<1x32xf32> to vector<16x32xf32>
    %259 = arith.addf %257, %258 : vector<16x32xf32>
    %260 = arith.truncf %259 : vector<16x32xf32> to vector<16x32xbf16>
    %261 = arith.truncf %3 : vector<16x32xf32> to vector<16x32xbf16>
    %c0_118 = arith.constant 0 : index
    %c0_119 = arith.constant 0 : index
    %262 = vector.load %arg12[%c0_118, %c0_119] : memref<32x32xbf16, #tpu.memory_space<vmem>>, vector<32x32xbf16>
    %cst_120 = arith.constant dense<0.000000e+00> : vector<16x32xf32>
    %263 = tpu.matmul %260, %262, %cst_120 {dimension_numbers = #tpu.dot_dimension_numbers<[1], [0], [0], [1], [0, 0, 1, 1], [], []>} : vector<16x32xbf16>, vector<32x32xbf16>, vector<16x32xf32> -> vector<16x32xf32>
    %cst_121 = arith.constant 0.176776692 : f32
    %264 = vector.broadcast %cst_121 : f32 to vector<16x32xf32>
    %265 = arith.mulf %263, %264 : vector<16x32xf32>
    %c0_122 = arith.constant 0 : index
    %c0_123 = arith.constant 0 : index
    %266 = vector.load %arg13[%c0_122, %c0_123] : memref<32x32xbf16, #tpu.memory_space<vmem>>, vector<32x32xbf16>
    %cst_124 = arith.constant dense<0.000000e+00> : vector<16x32xf32>
    %267 = tpu.matmul %261, %266, %cst_124 {dimension_numbers = #tpu.dot_dimension_numbers<[1], [0], [0], [1], [0, 0, 1, 1], [], []>} : vector<16x32xbf16>, vector<32x32xbf16>, vector<16x32xf32> -> vector<16x32xf32>
    %c0_125 = arith.constant 0 : index
    %c0_126 = arith.constant 0 : index
    %268 = vector.load %arg14[%c0_125, %c0_126] : memref<32x32xbf16, #tpu.memory_space<vmem>>, vector<32x32xbf16>
    %cst_127 = arith.constant dense<0.000000e+00> : vector<16x32xf32>
    %269 = tpu.matmul %261, %268, %cst_127 {dimension_numbers = #tpu.dot_dimension_numbers<[1], [0], [0], [1], [0, 0, 1, 1], [], []>} : vector<16x32xbf16>, vector<32x32xbf16>, vector<16x32xf32> -> vector<16x32xf32>
    %270 = arith.truncf %265 : vector<16x32xf32> to vector<16x32xbf16>
    %271 = arith.truncf %267 : vector<16x32xf32> to vector<16x32xbf16>
    %272 = arith.truncf %269 : vector<16x32xf32> to vector<16x32xbf16>
    %273 = vector.extract_strided_slice %5 {offsets = [0, 0], sizes = [1, 8], strides = [1, 1]} : vector<2x8xi32> to vector<1x8xi32>
    %c0_i32_128 = arith.constant 0 : i32
    %274 = vector.broadcast %c0_i32_128 : i32 to vector<1x8xi32>
    %275 = arith.cmpi eq, %273, %274 : vector<1x8xi32>
    %276 = vector.shape_cast %275 : vector<1x8xi1> to vector<1x8xi1>
    %277 = vector.broadcast %276 : vector<1x8xi1> to vector<8x8xi1>
    %278 = vector.extract_strided_slice %270 {offsets = [0, 0], sizes = [8, 8], strides = [1, 1]} : vector<16x32xbf16> to vector<8x8xbf16>
    %279 = vector.extract_strided_slice %271 {offsets = [0, 0], sizes = [8, 8], strides = [1, 1]} : vector<16x32xbf16> to vector<8x8xbf16>
    %280 = vector.extract_strided_slice %272 {offsets = [0, 0], sizes = [8, 8], strides = [1, 1]} : vector<16x32xbf16> to vector<8x8xbf16>
    %281 = tpu.transpose %279, [1, 0] : vector<8x8xbf16> -> vector<8x8xbf16>
    %cst_129 = arith.constant dense<0.000000e+00> : vector<8x8xf32>
    %282 = tpu.matmul %278, %281, %cst_129 {dimension_numbers = #tpu.dot_dimension_numbers<[1], [0], [0], [1], [0, 0, 1, 1], [], []>} : vector<8x8xbf16>, vector<8x8xbf16>, vector<8x8xf32> -> vector<8x8xf32>
    %cst_130 = arith.constant -1.000000e+30 : f32
    %283 = vector.broadcast %cst_130 : f32 to vector<8x8xf32>
    %284 = arith.select %277, %283, %282 : vector<8x8xi1>, vector<8x8xf32>
    %cst_131 = arith.constant dense<0xFF800000> : vector<8xf32>
    %285 = vector.multi_reduction <maximumf>, %284, %cst_131 [1] : vector<8x8xf32> to vector<8xf32>
    %286 = vector.shape_cast %285 : vector<8xf32> to vector<8x1xf32>
    %287 = vector.broadcast %286 : vector<8x1xf32> to vector<8x8xf32>
    %288 = arith.subf %284, %287 : vector<8x8xf32>
    %289 = math.exp %288 : vector<8x8xf32>
    %cst_132 = arith.constant dense<0.000000e+00> : vector<8xf32>
    %290 = vector.multi_reduction <add>, %289, %cst_132 [1] : vector<8x8xf32> to vector<8xf32>
    %291 = vector.shape_cast %290 : vector<8xf32> to vector<8x1xf32>
    %292 = tpu.reciprocal %291 {approx = true} : vector<8x1xf32> -> vector<8x1xf32>
    %293 = vector.broadcast %292 : vector<8x1xf32> to vector<8x8xf32>
    %294 = arith.mulf %289, %293 : vector<8x8xf32>
    %295 = arith.truncf %294 : vector<8x8xf32> to vector<8x8xbf16>
    %c0_133 = arith.constant 0 : index
    %c0_134 = arith.constant 0 : index
    %c0_135 = arith.constant 0 : index
    %c0_136 = arith.constant 0 : index
    %296 = vector.load %arg27[%c0_133, %c0_134, %c0_135, %c0_136] : memref<4x2x8x8xbf16, #tpu.memory_space<vmem>>, vector<1x1x8x8xbf16>
    %297 = vector.shape_cast %296 : vector<1x1x8x8xbf16> to vector<8x8xbf16>
    %298 = vector.shape_cast %295 : vector<8x8xbf16> to vector<1x1x8x8xbf16>
    tpu.vector_store %arg27[%c0_133, %c0_134, %c0_135, %c0_136], %298 {strides = array<i32>} : memref<4x2x8x8xbf16, #tpu.memory_space<vmem>>, vector<1x1x8x8xbf16>,
    %299 = arith.truncf %294 : vector<8x8xf32> to vector<8x8xbf16>
    %cst_137 = arith.constant dense<0.000000e+00> : vector<8x8xf32>
    %300 = tpu.matmul %299, %280, %cst_137 {dimension_numbers = #tpu.dot_dimension_numbers<[1], [0], [0], [1], [0, 0, 1, 1], [], []>} : vector<8x8xbf16>, vector<8x8xbf16>, vector<8x8xf32> -> vector<8x8xf32>
    %c0_138 = arith.constant 0 : index
    %c0_139 = arith.constant 0 : index
    %301 = vector.load %arg28[%c0_138, %c0_139] : memref<16x32xf32, #tpu.memory_space<vmem>>, vector<8x8xf32>
    tpu.vector_store %arg28[%c0_138, %c0_139], %300 {strides = array<i32>} : memref<16x32xf32, #tpu.memory_space<vmem>>, vector<8x8xf32>,
    %302 = vector.extract_strided_slice %270 {offsets = [0, 8], sizes = [8, 8], strides = [1, 1]} : vector<16x32xbf16> to vector<8x8xbf16>
    %303 = vector.extract_strided_slice %271 {offsets = [0, 8], sizes = [8, 8], strides = [1, 1]} : vector<16x32xbf16> to vector<8x8xbf16>
    %304 = vector.extract_strided_slice %272 {offsets = [0, 8], sizes = [8, 8], strides = [1, 1]} : vector<16x32xbf16> to vector<8x8xbf16>
    %305 = tpu.transpose %303, [1, 0] : vector<8x8xbf16> -> vector<8x8xbf16>
    %cst_140 = arith.constant dense<0.000000e+00> : vector<8x8xf32>
    %306 = tpu.matmul %302, %305, %cst_140 {dimension_numbers = #tpu.dot_dimension_numbers<[1], [0], [0], [1], [0, 0, 1, 1], [], []>} : vector<8x8xbf16>, vector<8x8xbf16>, vector<8x8xf32> -> vector<8x8xf32>
    %cst_141 = arith.constant -1.000000e+30 : f32
    %307 = vector.broadcast %cst_141 : f32 to vector<8x8xf32>
    %308 = arith.select %277, %307, %306 : vector<8x8xi1>, vector<8x8xf32>
    %cst_142 = arith.constant dense<0xFF800000> : vector<8xf32>
    %309 = vector.multi_reduction <maximumf>, %308, %cst_142 [1] : vector<8x8xf32> to vector<8xf32>
    %310 = vector.shape_cast %309 : vector<8xf32> to vector<8x1xf32>
    %311 = vector.broadcast %310 : vector<8x1xf32> to vector<8x8xf32>
    %312 = arith.subf %308, %311 : vector<8x8xf32>
    %313 = math.exp %312 : vector<8x8xf32>
    %cst_143 = arith.constant dense<0.000000e+00> : vector<8xf32>
    %314 = vector.multi_reduction <add>, %313, %cst_143 [1] : vector<8x8xf32> to vector<8xf32>
    %315 = vector.shape_cast %314 : vector<8xf32> to vector<8x1xf32>
    %316 = tpu.reciprocal %315 {approx = true} : vector<8x1xf32> -> vector<8x1xf32>
    %317 = vector.broadcast %316 : vector<8x1xf32> to vector<8x8xf32>
    %318 = arith.mulf %313, %317 : vector<8x8xf32>
    %319 = arith.truncf %318 : vector<8x8xf32> to vector<8x8xbf16>
    %c1_144 = arith.constant 1 : index
    %c0_145 = arith.constant 0 : index
    %c0_146 = arith.constant 0 : index
    %c0_147 = arith.constant 0 : index
    %320 = vector.load %arg27[%c1_144, %c0_145, %c0_146, %c0_147] : memref<4x2x8x8xbf16, #tpu.memory_space<vmem>>, vector<1x1x8x8xbf16>
    %321 = vector.shape_cast %320 : vector<1x1x8x8xbf16> to vector<8x8xbf16>
    %322 = vector.shape_cast %319 : vector<8x8xbf16> to vector<1x1x8x8xbf16>
    tpu.vector_store %arg27[%c1_144, %c0_145, %c0_146, %c0_147], %322 {strides = array<i32>} : memref<4x2x8x8xbf16, #tpu.memory_space<vmem>>, vector<1x1x8x8xbf16>,
    %323 = arith.truncf %318 : vector<8x8xf32> to vector<8x8xbf16>
    %cst_148 = arith.constant dense<0.000000e+00> : vector<8x8xf32>
    %324 = tpu.matmul %323, %304, %cst_148 {dimension_numbers = #tpu.dot_dimension_numbers<[1], [0], [0], [1], [0, 0, 1, 1], [], []>} : vector<8x8xbf16>, vector<8x8xbf16>, vector<8x8xf32> -> vector<8x8xf32>
    %c0_149 = arith.constant 0 : index
    %c8_150 = arith.constant 8 : index
    %325 = vector.load %arg28[%c0_149, %c8_150] : memref<16x32xf32, #tpu.memory_space<vmem>>, vector<8x8xf32>
    tpu.vector_store %arg28[%c0_149, %c8_150], %324 {strides = array<i32>} : memref<16x32xf32, #tpu.memory_space<vmem>>, vector<8x8xf32>,
    %326 = vector.extract_strided_slice %270 {offsets = [0, 16], sizes = [8, 8], strides = [1, 1]} : vector<16x32xbf16> to vector<8x8xbf16>
    %327 = vector.extract_strided_slice %271 {offsets = [0, 16], sizes = [8, 8], strides = [1, 1]} : vector<16x32xbf16> to vector<8x8xbf16>
    %328 = vector.extract_strided_slice %272 {offsets = [0, 16], sizes = [8, 8], strides = [1, 1]} : vector<16x32xbf16> to vector<8x8xbf16>
    %329 = tpu.transpose %327, [1, 0] : vector<8x8xbf16> -> vector<8x8xbf16>
    %cst_151 = arith.constant dense<0.000000e+00> : vector<8x8xf32>
    %330 = tpu.matmul %326, %329, %cst_151 {dimension_numbers = #tpu.dot_dimension_numbers<[1], [0], [0], [1], [0, 0, 1, 1], [], []>} : vector<8x8xbf16>, vector<8x8xbf16>, vector<8x8xf32> -> vector<8x8xf32>
    %cst_152 = arith.constant -1.000000e+30 : f32
    %331 = vector.broadcast %cst_152 : f32 to vector<8x8xf32>
    %332 = arith.select %277, %331, %330 : vector<8x8xi1>, vector<8x8xf32>
    %cst_153 = arith.constant dense<0xFF800000> : vector<8xf32>
    %333 = vector.multi_reduction <maximumf>, %332, %cst_153 [1] : vector<8x8xf32> to vector<8xf32>
    %334 = vector.shape_cast %333 : vector<8xf32> to vector<8x1xf32>
    %335 = vector.broadcast %334 : vector<8x1xf32> to vector<8x8xf32>
    %336 = arith.subf %332, %335 : vector<8x8xf32>
    %337 = math.exp %336 : vector<8x8xf32>
    %cst_154 = arith.constant dense<0.000000e+00> : vector<8xf32>
    %338 = vector.multi_reduction <add>, %337, %cst_154 [1] : vector<8x8xf32> to vector<8xf32>
    %339 = vector.shape_cast %338 : vector<8xf32> to vector<8x1xf32>
    %340 = tpu.reciprocal %339 {approx = true} : vector<8x1xf32> -> vector<8x1xf32>
    %341 = vector.broadcast %340 : vector<8x1xf32> to vector<8x8xf32>
    %342 = arith.mulf %337, %341 : vector<8x8xf32>
    %343 = arith.truncf %342 : vector<8x8xf32> to vector<8x8xbf16>
    %c2_155 = arith.constant 2 : index
    %c0_156 = arith.constant 0 : index
    %c0_157 = arith.constant 0 : index
    %c0_158 = arith.constant 0 : index
    %344 = vector.load %arg27[%c2_155, %c0_156, %c0_157, %c0_158] : memref<4x2x8x8xbf16, #tpu.memory_space<vmem>>, vector<1x1x8x8xbf16>
    %345 = vector.shape_cast %344 : vector<1x1x8x8xbf16> to vector<8x8xbf16>
    %346 = vector.shape_cast %343 : vector<8x8xbf16> to vector<1x1x8x8xbf16>
    tpu.vector_store %arg27[%c2_155, %c0_156, %c0_157, %c0_158], %346 {strides = array<i32>} : memref<4x2x8x8xbf16, #tpu.memory_space<vmem>>, vector<1x1x8x8xbf16>,
    %347 = arith.truncf %342 : vector<8x8xf32> to vector<8x8xbf16>
    %cst_159 = arith.constant dense<0.000000e+00> : vector<8x8xf32>
    %348 = tpu.matmul %347, %328, %cst_159 {dimension_numbers = #tpu.dot_dimension_numbers<[1], [0], [0], [1], [0, 0, 1, 1], [], []>} : vector<8x8xbf16>, vector<8x8xbf16>, vector<8x8xf32> -> vector<8x8xf32>
    %c0_160 = arith.constant 0 : index
    %c16_161 = arith.constant 16 : index
    %349 = vector.load %arg28[%c0_160, %c16_161] : memref<16x32xf32, #tpu.memory_space<vmem>>, vector<8x8xf32>
    tpu.vector_store %arg28[%c0_160, %c16_161], %348 {strides = array<i32>} : memref<16x32xf32, #tpu.memory_space<vmem>>, vector<8x8xf32>,
    %350 = vector.extract_strided_slice %270 {offsets = [0, 24], sizes = [8, 8], strides = [1, 1]} : vector<16x32xbf16> to vector<8x8xbf16>
    %351 = vector.extract_strided_slice %271 {offsets = [0, 24], sizes = [8, 8], strides = [1, 1]} : vector<16x32xbf16> to vector<8x8xbf16>
    %352 = vector.extract_strided_slice %272 {offsets = [0, 24], sizes = [8, 8], strides = [1, 1]} : vector<16x32xbf16> to vector<8x8xbf16>
    %353 = tpu.transpose %351, [1, 0] : vector<8x8xbf16> -> vector<8x8xbf16>
    %cst_162 = arith.constant dense<0.000000e+00> : vector<8x8xf32>
    %354 = tpu.matmul %350, %353, %cst_162 {dimension_numbers = #tpu.dot_dimension_numbers<[1], [0], [0], [1], [0, 0, 1, 1], [], []>} : vector<8x8xbf16>, vector<8x8xbf16>, vector<8x8xf32> -> vector<8x8xf32>
    %cst_163 = arith.constant -1.000000e+30 : f32
    %355 = vector.broadcast %cst_163 : f32 to vector<8x8xf32>
    %356 = arith.select %277, %355, %354 : vector<8x8xi1>, vector<8x8xf32>
    %cst_164 = arith.constant dense<0xFF800000> : vector<8xf32>
    %357 = vector.multi_reduction <maximumf>, %356, %cst_164 [1] : vector<8x8xf32> to vector<8xf32>
    %358 = vector.shape_cast %357 : vector<8xf32> to vector<8x1xf32>
    %359 = vector.broadcast %358 : vector<8x1xf32> to vector<8x8xf32>
    %360 = arith.subf %356, %359 : vector<8x8xf32>
    %361 = math.exp %360 : vector<8x8xf32>
    %cst_165 = arith.constant dense<0.000000e+00> : vector<8xf32>
    %362 = vector.multi_reduction <add>, %361, %cst_165 [1] : vector<8x8xf32> to vector<8xf32>
    %363 = vector.shape_cast %362 : vector<8xf32> to vector<8x1xf32>
    %364 = tpu.reciprocal %363 {approx = true} : vector<8x1xf32> -> vector<8x1xf32>
    %365 = vector.broadcast %364 : vector<8x1xf32> to vector<8x8xf32>
    %366 = arith.mulf %361, %365 : vector<8x8xf32>
    %367 = arith.truncf %366 : vector<8x8xf32> to vector<8x8xbf16>
    %c3_166 = arith.constant 3 : index
    %c0_167 = arith.constant 0 : index
    %c0_168 = arith.constant 0 : index
    %c0_169 = arith.constant 0 : index
    %368 = vector.load %arg27[%c3_166, %c0_167, %c0_168, %c0_169] : memref<4x2x8x8xbf16, #tpu.memory_space<vmem>>, vector<1x1x8x8xbf16>
    %369 = vector.shape_cast %368 : vector<1x1x8x8xbf16> to vector<8x8xbf16>
    %370 = vector.shape_cast %367 : vector<8x8xbf16> to vector<1x1x8x8xbf16>
    tpu.vector_store %arg27[%c3_166, %c0_167, %c0_168, %c0_169], %370 {strides = array<i32>} : memref<4x2x8x8xbf16, #tpu.memory_space<vmem>>, vector<1x1x8x8xbf16>,
    %371 = arith.truncf %366 : vector<8x8xf32> to vector<8x8xbf16>
    %cst_170 = arith.constant dense<0.000000e+00> : vector<8x8xf32>
    %372 = tpu.matmul %371, %352, %cst_170 {dimension_numbers = #tpu.dot_dimension_numbers<[1], [0], [0], [1], [0, 0, 1, 1], [], []>} : vector<8x8xbf16>, vector<8x8xbf16>, vector<8x8xf32> -> vector<8x8xf32>
    %c0_171 = arith.constant 0 : index
    %c24_172 = arith.constant 24 : index
    %373 = vector.load %arg28[%c0_171, %c24_172] : memref<16x32xf32, #tpu.memory_space<vmem>>, vector<8x8xf32>
    tpu.vector_store %arg28[%c0_171, %c24_172], %372 {strides = array<i32>} : memref<16x32xf32, #tpu.memory_space<vmem>>, vector<8x8xf32>,
    %374 = vector.extract_strided_slice %5 {offsets = [1, 0], sizes = [1, 8], strides = [1, 1]} : vector<2x8xi32> to vector<1x8xi32>
    %c0_i32_173 = arith.constant 0 : i32
    %375 = vector.broadcast %c0_i32_173 : i32 to vector<1x8xi32>
    %376 = arith.cmpi eq, %374, %375 : vector<1x8xi32>
    %377 = vector.shape_cast %376 : vector<1x8xi1> to vector<1x8xi1>
    %378 = vector.broadcast %377 : vector<1x8xi1> to vector<8x8xi1>
    %379 = vector.extract_strided_slice %270 {offsets = [8, 0], sizes = [8, 8], strides = [1, 1]} : vector<16x32xbf16> to vector<8x8xbf16>
    %380 = vector.extract_strided_slice %271 {offsets = [8, 0], sizes = [8, 8], strides = [1, 1]} : vector<16x32xbf16> to vector<8x8xbf16>
    %381 = vector.extract_strided_slice %272 {offsets = [8, 0], sizes = [8, 8], strides = [1, 1]} : vector<16x32xbf16> to vector<8x8xbf16>
    %382 = tpu.transpose %380, [1, 0] : vector<8x8xbf16> -> vector<8x8xbf16>
    %cst_174 = arith.constant dense<0.000000e+00> : vector<8x8xf32>
    %383 = tpu.matmul %379, %382, %cst_174 {dimension_numbers = #tpu.dot_dimension_numbers<[1], [0], [0], [1], [0, 0, 1, 1], [], []>} : vector<8x8xbf16>, vector<8x8xbf16>, vector<8x8xf32> -> vector<8x8xf32>
    %cst_175 = arith.constant -1.000000e+30 : f32
    %384 = vector.broadcast %cst_175 : f32 to vector<8x8xf32>
    %385 = arith.select %378, %384, %383 : vector<8x8xi1>, vector<8x8xf32>
    %cst_176 = arith.constant dense<0xFF800000> : vector<8xf32>
    %386 = vector.multi_reduction <maximumf>, %385, %cst_176 [1] : vector<8x8xf32> to vector<8xf32>
    %387 = vector.shape_cast %386 : vector<8xf32> to vector<8x1xf32>
    %388 = vector.broadcast %387 : vector<8x1xf32> to vector<8x8xf32>
    %389 = arith.subf %385, %388 : vector<8x8xf32>
    %390 = math.exp %389 : vector<8x8xf32>
    %cst_177 = arith.constant dense<0.000000e+00> : vector<8xf32>
    %391 = vector.multi_reduction <add>, %390, %cst_177 [1] : vector<8x8xf32> to vector<8xf32>
    %392 = vector.shape_cast %391 : vector<8xf32> to vector<8x1xf32>
    %393 = tpu.reciprocal %392 {approx = true} : vector<8x1xf32> -> vector<8x1xf32>
    %394 = vector.broadcast %393 : vector<8x1xf32> to vector<8x8xf32>
    %395 = arith.mulf %390, %394 : vector<8x8xf32>
    %396 = arith.truncf %395 : vector<8x8xf32> to vector<8x8xbf16>
    %c0_178 = arith.constant 0 : index
    %c1_179 = arith.constant 1 : index
    %c0_180 = arith.constant 0 : index
    %c0_181 = arith.constant 0 : index
    %397 = vector.load %arg27[%c0_178, %c1_179, %c0_180, %c0_181] : memref<4x2x8x8xbf16, #tpu.memory_space<vmem>>, vector<1x1x8x8xbf16>
    %398 = vector.shape_cast %397 : vector<1x1x8x8xbf16> to vector<8x8xbf16>
    %399 = vector.shape_cast %396 : vector<8x8xbf16> to vector<1x1x8x8xbf16>
    tpu.vector_store %arg27[%c0_178, %c1_179, %c0_180, %c0_181], %399 {strides = array<i32>} : memref<4x2x8x8xbf16, #tpu.memory_space<vmem>>, vector<1x1x8x8xbf16>,
    %400 = arith.truncf %395 : vector<8x8xf32> to vector<8x8xbf16>
    %cst_182 = arith.constant dense<0.000000e+00> : vector<8x8xf32>
    %401 = tpu.matmul %400, %381, %cst_182 {dimension_numbers = #tpu.dot_dimension_numbers<[1], [0], [0], [1], [0, 0, 1, 1], [], []>} : vector<8x8xbf16>, vector<8x8xbf16>, vector<8x8xf32> -> vector<8x8xf32>
    %c8_183 = arith.constant 8 : index
    %c0_184 = arith.constant 0 : index
    %402 = vector.load %arg28[%c8_183, %c0_184] : memref<16x32xf32, #tpu.memory_space<vmem>>, vector<8x8xf32>
    tpu.vector_store %arg28[%c8_183, %c0_184], %401 {strides = array<i32>} : memref<16x32xf32, #tpu.memory_space<vmem>>, vector<8x8xf32>,
    %403 = vector.extract_strided_slice %270 {offsets = [8, 8], sizes = [8, 8], strides = [1, 1]} : vector<16x32xbf16> to vector<8x8xbf16>
    %404 = vector.extract_strided_slice %271 {offsets = [8, 8], sizes = [8, 8], strides = [1, 1]} : vector<16x32xbf16> to vector<8x8xbf16>
    %405 = vector.extract_strided_slice %272 {offsets = [8, 8], sizes = [8, 8], strides = [1, 1]} : vector<16x32xbf16> to vector<8x8xbf16>
    %406 = tpu.transpose %404, [1, 0] : vector<8x8xbf16> -> vector<8x8xbf16>
    %cst_185 = arith.constant dense<0.000000e+00> : vector<8x8xf32>
    %407 = tpu.matmul %403, %406, %cst_185 {dimension_numbers = #tpu.dot_dimension_numbers<[1], [0], [0], [1], [0, 0, 1, 1], [], []>} : vector<8x8xbf16>, vector<8x8xbf16>, vector<8x8xf32> -> vector<8x8xf32>
    %cst_186 = arith.constant -1.000000e+30 : f32
    %408 = vector.broadcast %cst_186 : f32 to vector<8x8xf32>
    %409 = arith.select %378, %408, %407 : vector<8x8xi1>, vector<8x8xf32>
    %cst_187 = arith.constant dense<0xFF800000> : vector<8xf32>
    %410 = vector.multi_reduction <maximumf>, %409, %cst_187 [1] : vector<8x8xf32> to vector<8xf32>
    %411 = vector.shape_cast %410 : vector<8xf32> to vector<8x1xf32>
    %412 = vector.broadcast %411 : vector<8x1xf32> to vector<8x8xf32>
    %413 = arith.subf %409, %412 : vector<8x8xf32>
    %414 = math.exp %413 : vector<8x8xf32>
    %cst_188 = arith.constant dense<0.000000e+00> : vector<8xf32>
    %415 = vector.multi_reduction <add>, %414, %cst_188 [1] : vector<8x8xf32> to vector<8xf32>
    %416 = vector.shape_cast %415 : vector<8xf32> to vector<8x1xf32>
    %417 = tpu.reciprocal %416 {approx = true} : vector<8x1xf32> -> vector<8x1xf32>
    %418 = vector.broadcast %417 : vector<8x1xf32> to vector<8x8xf32>
    %419 = arith.mulf %414, %418 : vector<8x8xf32>
    %420 = arith.truncf %419 : vector<8x8xf32> to vector<8x8xbf16>
    %c1_189 = arith.constant 1 : index
    %c1_190 = arith.constant 1 : index
    %c0_191 = arith.constant 0 : index
    %c0_192 = arith.constant 0 : index
    %421 = vector.load %arg27[%c1_189, %c1_190, %c0_191, %c0_192] : memref<4x2x8x8xbf16, #tpu.memory_space<vmem>>, vector<1x1x8x8xbf16>
    %422 = vector.shape_cast %421 : vector<1x1x8x8xbf16> to vector<8x8xbf16>
    %423 = vector.shape_cast %420 : vector<8x8xbf16> to vector<1x1x8x8xbf16>
    tpu.vector_store %arg27[%c1_189, %c1_190, %c0_191, %c0_192], %423 {strides = array<i32>} : memref<4x2x8x8xbf16, #tpu.memory_space<vmem>>, vector<1x1x8x8xbf16>,
    %424 = arith.truncf %419 : vector<8x8xf32> to vector<8x8xbf16>
    %cst_193 = arith.constant dense<0.000000e+00> : vector<8x8xf32>
    %425 = tpu.matmul %424, %405, %cst_193 {dimension_numbers = #tpu.dot_dimension_numbers<[1], [0], [0], [1], [0, 0, 1, 1], [], []>} : vector<8x8xbf16>, vector<8x8xbf16>, vector<8x8xf32> -> vector<8x8xf32>
    %c8_194 = arith.constant 8 : index
    %c8_195 = arith.constant 8 : index
    %426 = vector.load %arg28[%c8_194, %c8_195] : memref<16x32xf32, #tpu.memory_space<vmem>>, vector<8x8xf32>
    tpu.vector_store %arg28[%c8_194, %c8_195], %425 {strides = array<i32>} : memref<16x32xf32, #tpu.memory_space<vmem>>, vector<8x8xf32>,
    %427 = vector.extract_strided_slice %270 {offsets = [8, 16], sizes = [8, 8], strides = [1, 1]} : vector<16x32xbf16> to vector<8x8xbf16>
    %428 = vector.extract_strided_slice %271 {offsets = [8, 16], sizes = [8, 8], strides = [1, 1]} : vector<16x32xbf16> to vector<8x8xbf16>
    %429 = vector.extract_strided_slice %272 {offsets = [8, 16], sizes = [8, 8], strides = [1, 1]} : vector<16x32xbf16> to vector<8x8xbf16>
    %430 = tpu.transpose %428, [1, 0] : vector<8x8xbf16> -> vector<8x8xbf16>
    %cst_196 = arith.constant dense<0.000000e+00> : vector<8x8xf32>
    %431 = tpu.matmul %427, %430, %cst_196 {dimension_numbers = #tpu.dot_dimension_numbers<[1], [0], [0], [1], [0, 0, 1, 1], [], []>} : vector<8x8xbf16>, vector<8x8xbf16>, vector<8x8xf32> -> vector<8x8xf32>
    %cst_197 = arith.constant -1.000000e+30 : f32
    %432 = vector.broadcast %cst_197 : f32 to vector<8x8xf32>
    %433 = arith.select %378, %432, %431 : vector<8x8xi1>, vector<8x8xf32>
    %cst_198 = arith.constant dense<0xFF800000> : vector<8xf32>
    %434 = vector.multi_reduction <maximumf>, %433, %cst_198 [1] : vector<8x8xf32> to vector<8xf32>
    %435 = vector.shape_cast %434 : vector<8xf32> to vector<8x1xf32>
    %436 = vector.broadcast %435 : vector<8x1xf32> to vector<8x8xf32>
    %437 = arith.subf %433, %436 : vector<8x8xf32>
    %438 = math.exp %437 : vector<8x8xf32>
    %cst_199 = arith.constant dense<0.000000e+00> : vector<8xf32>
    %439 = vector.multi_reduction <add>, %438, %cst_199 [1] : vector<8x8xf32> to vector<8xf32>
    %440 = vector.shape_cast %439 : vector<8xf32> to vector<8x1xf32>
    %441 = tpu.reciprocal %440 {approx = true} : vector<8x1xf32> -> vector<8x1xf32>
    %442 = vector.broadcast %441 : vector<8x1xf32> to vector<8x8xf32>
    %443 = arith.mulf %438, %442 : vector<8x8xf32>
    %444 = arith.truncf %443 : vector<8x8xf32> to vector<8x8xbf16>
    %c2_200 = arith.constant 2 : index
    %c1_201 = arith.constant 1 : index
    %c0_202 = arith.constant 0 : index
    %c0_203 = arith.constant 0 : index
    %445 = vector.load %arg27[%c2_200, %c1_201, %c0_202, %c0_203] : memref<4x2x8x8xbf16, #tpu.memory_space<vmem>>, vector<1x1x8x8xbf16>
    %446 = vector.shape_cast %445 : vector<1x1x8x8xbf16> to vector<8x8xbf16>
    %447 = vector.shape_cast %444 : vector<8x8xbf16> to vector<1x1x8x8xbf16>
    tpu.vector_store %arg27[%c2_200, %c1_201, %c0_202, %c0_203], %447 {strides = array<i32>} : memref<4x2x8x8xbf16, #tpu.memory_space<vmem>>, vector<1x1x8x8xbf16>,
    %448 = arith.truncf %443 : vector<8x8xf32> to vector<8x8xbf16>
    %cst_204 = arith.constant dense<0.000000e+00> : vector<8x8xf32>
    %449 = tpu.matmul %448, %429, %cst_204 {dimension_numbers = #tpu.dot_dimension_numbers<[1], [0], [0], [1], [0, 0, 1, 1], [], []>} : vector<8x8xbf16>, vector<8x8xbf16>, vector<8x8xf32> -> vector<8x8xf32>
    %c8_205 = arith.constant 8 : index
    %c16_206 = arith.constant 16 : index
    %450 = vector.load %arg28[%c8_205, %c16_206] : memref<16x32xf32, #tpu.memory_space<vmem>>, vector<8x8xf32>
    tpu.vector_store %arg28[%c8_205, %c16_206], %449 {strides = array<i32>} : memref<16x32xf32, #tpu.memory_space<vmem>>, vector<8x8xf32>,
    %451 = vector.extract_strided_slice %270 {offsets = [8, 24], sizes = [8, 8], strides = [1, 1]} : vector<16x32xbf16> to vector<8x8xbf16>
    %452 = vector.extract_strided_slice %271 {offsets = [8, 24], sizes = [8, 8], strides = [1, 1]} : vector<16x32xbf16> to vector<8x8xbf16>
    %453 = vector.extract_strided_slice %272 {offsets = [8, 24], sizes = [8, 8], strides = [1, 1]} : vector<16x32xbf16> to vector<8x8xbf16>
    %454 = tpu.transpose %452, [1, 0] : vector<8x8xbf16> -> vector<8x8xbf16>
    %cst_207 = arith.constant dense<0.000000e+00> : vector<8x8xf32>
    %455 = tpu.matmul %451, %454, %cst_207 {dimension_numbers = #tpu.dot_dimension_numbers<[1], [0], [0], [1], [0, 0, 1, 1], [], []>} : vector<8x8xbf16>, vector<8x8xbf16>, vector<8x8xf32> -> vector<8x8xf32>
    %cst_208 = arith.constant -1.000000e+30 : f32
    %456 = vector.broadcast %cst_208 : f32 to vector<8x8xf32>
    %457 = arith.select %378, %456, %455 : vector<8x8xi1>, vector<8x8xf32>
    %cst_209 = arith.constant dense<0xFF800000> : vector<8xf32>
    %458 = vector.multi_reduction <maximumf>, %457, %cst_209 [1] : vector<8x8xf32> to vector<8xf32>
    %459 = vector.shape_cast %458 : vector<8xf32> to vector<8x1xf32>
    %460 = vector.broadcast %459 : vector<8x1xf32> to vector<8x8xf32>
    %461 = arith.subf %457, %460 : vector<8x8xf32>
    %462 = math.exp %461 : vector<8x8xf32>
    %cst_210 = arith.constant dense<0.000000e+00> : vector<8xf32>
    %463 = vector.multi_reduction <add>, %462, %cst_210 [1] : vector<8x8xf32> to vector<8xf32>
    %464 = vector.shape_cast %463 : vector<8xf32> to vector<8x1xf32>
    %465 = tpu.reciprocal %464 {approx = true} : vector<8x1xf32> -> vector<8x1xf32>
    %466 = vector.broadcast %465 : vector<8x1xf32> to vector<8x8xf32>
    %467 = arith.mulf %462, %466 : vector<8x8xf32>
    %468 = arith.truncf %467 : vector<8x8xf32> to vector<8x8xbf16>
    %c3_211 = arith.constant 3 : index
    %c1_212 = arith.constant 1 : index
    %c0_213 = arith.constant 0 : index
    %c0_214 = arith.constant 0 : index
    %469 = vector.load %arg27[%c3_211, %c1_212, %c0_213, %c0_214] : memref<4x2x8x8xbf16, #tpu.memory_space<vmem>>, vector<1x1x8x8xbf16>
    %470 = vector.shape_cast %469 : vector<1x1x8x8xbf16> to vector<8x8xbf16>
    %471 = vector.shape_cast %468 : vector<8x8xbf16> to vector<1x1x8x8xbf16>
    tpu.vector_store %arg27[%c3_211, %c1_212, %c0_213, %c0_214], %471 {strides = array<i32>} : memref<4x2x8x8xbf16, #tpu.memory_space<vmem>>, vector<1x1x8x8xbf16>,
    %472 = arith.truncf %467 : vector<8x8xf32> to vector<8x8xbf16>
    %cst_215 = arith.constant dense<0.000000e+00> : vector<8x8xf32>
    %473 = tpu.matmul %472, %453, %cst_215 {dimension_numbers = #tpu.dot_dimension_numbers<[1], [0], [0], [1], [0, 0, 1, 1], [], []>} : vector<8x8xbf16>, vector<8x8xbf16>, vector<8x8xf32> -> vector<8x8xf32>
    %c8_216 = arith.constant 8 : index
    %c24_217 = arith.constant 24 : index
    %474 = vector.load %arg28[%c8_216, %c24_217] : memref<16x32xf32, #tpu.memory_space<vmem>>, vector<8x8xf32>
    tpu.vector_store %arg28[%c8_216, %c24_217], %473 {strides = array<i32>} : memref<16x32xf32, #tpu.memory_space<vmem>>, vector<8x8xf32>,
    %c0_218 = arith.constant 0 : index
    %c0_219 = arith.constant 0 : index
    %475 = vector.load %arg28[%c0_218, %c0_219] : memref<16x32xf32, #tpu.memory_space<vmem>>, vector<16x32xf32>
    %476 = arith.truncf %475 : vector<16x32xf32> to vector<16x32xbf16>
    %c0_220 = arith.constant 0 : index
    %c0_221 = arith.constant 0 : index
    %477 = vector.load %arg15[%c0_220, %c0_221] : memref<32x32xbf16, #tpu.memory_space<vmem>>, vector<32x32xbf16>
    %cst_222 = arith.constant dense<0.000000e+00> : vector<16x32xf32>
    %478 = tpu.matmul %476, %477, %cst_222 {dimension_numbers = #tpu.dot_dimension_numbers<[1], [0], [0], [1], [0, 0, 1, 1], [], []>} : vector<16x32xbf16>, vector<32x32xbf16>, vector<16x32xf32> -> vector<16x32xf32>
    %c0_223 = arith.constant 0 : index
    %c0_224 = arith.constant 0 : index
    %479 = vector.load %arg16[%c0_223, %c0_224] : memref<1x32xf32, #tpu.memory_space<vmem>>, vector<1x32xf32>
    %480 = vector.broadcast %479 : vector<1x32xf32> to vector<16x32xf32>
    %481 = arith.addf %478, %480 : vector<16x32xf32>
    %482 = arith.addf %481, %259 : vector<16x32xf32>
    %c0_225 = arith.constant 0 : index
    %c0_226 = arith.constant 0 : index
    %483 = vector.load %arg17[%c0_225, %c0_226] : memref<1x32xf32, #tpu.memory_space<vmem>>, vector<1x32xf32>
    %c0_227 = arith.constant 0 : index
    %c0_228 = arith.constant 0 : index
    %484 = vector.load %arg18[%c0_227, %c0_228] : memref<1x32xf32, #tpu.memory_space<vmem>>, vector<1x32xf32>
    %cst_229 = arith.constant dense<0.000000e+00> : vector<16xf32>
    %485 = vector.multi_reduction <add>, %482, %cst_229 [1] : vector<16x32xf32> to vector<16xf32>
    %486 = vector.shape_cast %485 : vector<16xf32> to vector<16x1xf32>
    %cst_230 = arith.constant 3.200000e+01 : f32
    %487 = vector.broadcast %cst_230 : f32 to vector<16x1xf32>
    %488 = arith.divf %486, %487 : vector<16x1xf32>
    %489 = arith.mulf %482, %482 : vector<16x32xf32>
    %cst_231 = arith.constant dense<0.000000e+00> : vector<16xf32>
    %490 = vector.multi_reduction <add>, %489, %cst_231 [1] : vector<16x32xf32> to vector<16xf32>
    %491 = vector.shape_cast %490 : vector<16xf32> to vector<16x1xf32>
    %cst_232 = arith.constant 3.200000e+01 : f32
    %492 = vector.broadcast %cst_232 : f32 to vector<16x1xf32>
    %493 = arith.divf %491, %492 : vector<16x1xf32>
    %494 = arith.mulf %488, %488 : vector<16x1xf32>
    %495 = arith.subf %493, %494 : vector<16x1xf32>
    %cst_233 = arith.constant 0.000000e+00 : f32
    %496 = vector.broadcast %cst_233 : f32 to vector<16x1xf32>
    %497 = arith.maximumf %495, %496 : vector<16x1xf32>
    %498 = vector.broadcast %488 : vector<16x1xf32> to vector<16x32xf32>
    %499 = arith.subf %482, %498 : vector<16x32xf32>
    %cst_234 = arith.constant 9.99999974E-6 : f32
    %500 = vector.broadcast %cst_234 : f32 to vector<16x1xf32>
    %501 = arith.addf %497, %500 : vector<16x1xf32>
    %502 = math.rsqrt %501 : vector<16x1xf32>
    %503 = vector.broadcast %502 : vector<16x1xf32> to vector<16x32xf32>
    %504 = arith.mulf %499, %503 : vector<16x32xf32>
    %505 = vector.broadcast %483 : vector<1x32xf32> to vector<16x32xf32>
    %506 = arith.mulf %504, %505 : vector<16x32xf32>
    %507 = vector.broadcast %484 : vector<1x32xf32> to vector<16x32xf32>
    %508 = arith.addf %506, %507 : vector<16x32xf32>
    %509 = arith.truncf %508 : vector<16x32xf32> to vector<16x32xbf16>
    %c0_235 = arith.constant 0 : index
    %c0_236 = arith.constant 0 : index
    %510 = vector.load %arg19[%c0_235, %c0_236] : memref<32x64xbf16, #tpu.memory_space<vmem>>, vector<32x64xbf16>
    %cst_237 = arith.constant dense<0.000000e+00> : vector<16x64xf32>
    %511 = tpu.matmul %509, %510, %cst_237 {dimension_numbers = #tpu.dot_dimension_numbers<[1], [0], [0], [1], [0, 0, 1, 1], [], []>} : vector<16x32xbf16>, vector<32x64xbf16>, vector<16x64xf32> -> vector<16x64xf32>
    %c0_238 = arith.constant 0 : index
    %c0_239 = arith.constant 0 : index
    %512 = vector.load %arg20[%c0_238, %c0_239] : memref<1x64xf32, #tpu.memory_space<vmem>>, vector<1x64xf32>
    %513 = vector.broadcast %512 : vector<1x64xf32> to vector<16x64xf32>
    %514 = arith.addf %511, %513 : vector<16x64xf32>
    %cst_240 = arith.constant 0.000000e+00 : f32
    %515 = vector.broadcast %cst_240 : f32 to vector<16x64xf32>
    %516 = arith.maximumf %514, %515 : vector<16x64xf32>
    %517 = arith.truncf %516 : vector<16x64xf32> to vector<16x64xbf16>
    %c0_241 = arith.constant 0 : index
    %c0_242 = arith.constant 0 : index
    %518 = vector.load %arg21[%c0_241, %c0_242] : memref<64x32xbf16, #tpu.memory_space<vmem>>, vector<64x32xbf16>
    %cst_243 = arith.constant dense<0.000000e+00> : vector<16x32xf32>
    %519 = tpu.matmul %517, %518, %cst_243 {dimension_numbers = #tpu.dot_dimension_numbers<[1], [0], [0], [1], [0, 0, 1, 1], [], []>} : vector<16x64xbf16>, vector<64x32xbf16>, vector<16x32xf32> -> vector<16x32xf32>
    %c0_244 = arith.constant 0 : index
    %c0_245 = arith.constant 0 : index
    %520 = vector.load %arg22[%c0_244, %c0_245] : memref<1x32xf32, #tpu.memory_space<vmem>>, vector<1x32xf32>
    %521 = vector.broadcast %520 : vector<1x32xf32> to vector<16x32xf32>
    %522 = arith.addf %519, %521 : vector<16x32xf32>
    %523 = arith.addf %522, %508 : vector<16x32xf32>
    %c0_246 = arith.constant 0 : index
    %c0_247 = arith.constant 0 : index
    %524 = vector.load %arg23[%c0_246, %c0_247] : memref<1x32xf32, #tpu.memory_space<vmem>>, vector<1x32xf32>
    %c0_248 = arith.constant 0 : index
    %c0_249 = arith.constant 0 : index
    %525 = vector.load %arg24[%c0_248, %c0_249] : memref<1x32xf32, #tpu.memory_space<vmem>>, vector<1x32xf32>
    %cst_250 = arith.constant dense<0.000000e+00> : vector<16xf32>
    %526 = vector.multi_reduction <add>, %523, %cst_250 [1] : vector<16x32xf32> to vector<16xf32>
    %527 = vector.shape_cast %526 : vector<16xf32> to vector<16x1xf32>
    %cst_251 = arith.constant 3.200000e+01 : f32
    %528 = vector.broadcast %cst_251 : f32 to vector<16x1xf32>
    %529 = arith.divf %527, %528 : vector<16x1xf32>
    %530 = arith.mulf %523, %523 : vector<16x32xf32>
    %cst_252 = arith.constant dense<0.000000e+00> : vector<16xf32>
    %531 = vector.multi_reduction <add>, %530, %cst_252 [1] : vector<16x32xf32> to vector<16xf32>
    %532 = vector.shape_cast %531 : vector<16xf32> to vector<16x1xf32>
    %cst_253 = arith.constant 3.200000e+01 : f32
    %533 = vector.broadcast %cst_253 : f32 to vector<16x1xf32>
    %534 = arith.divf %532, %533 : vector<16x1xf32>
    %535 = arith.mulf %529, %529 : vector<16x1xf32>
    %536 = arith.subf %534, %535 : vector<16x1xf32>
    %cst_254 = arith.constant 0.000000e+00 : f32
    %537 = vector.broadcast %cst_254 : f32 to vector<16x1xf32>
    %538 = arith.maximumf %536, %537 : vector<16x1xf32>
    %539 = vector.broadcast %529 : vector<16x1xf32> to vector<16x32xf32>
    %540 = arith.subf %523, %539 : vector<16x32xf32>
    %cst_255 = arith.constant 9.99999974E-6 : f32
    %541 = vector.broadcast %cst_255 : f32 to vector<16x1xf32>
    %542 = arith.addf %538, %541 : vector<16x1xf32>
    %543 = math.rsqrt %542 : vector<16x1xf32>
    %544 = vector.broadcast %543 : vector<16x1xf32> to vector<16x32xf32>
    %545 = arith.mulf %540, %544 : vector<16x32xf32>
    %546 = vector.broadcast %524 : vector<1x32xf32> to vector<16x32xf32>
    %547 = arith.mulf %545, %546 : vector<16x32xf32>
    %548 = vector.broadcast %525 : vector<1x32xf32> to vector<16x32xf32>
    %549 = arith.addf %547, %548 : vector<16x32xf32>
    %550 = vector.shape_cast %549 : vector<16x32xf32> to vector<2x8x32xf32>
    %c0_256 = arith.constant 0 : index
    %c0_257 = arith.constant 0 : index
    %c0_258 = arith.constant 0 : index
    %551 = vector.load %arg25[%c0_256, %c0_257, %c0_258] : memref<2x8x32xf32, #tpu.memory_space<vmem>>, vector<2x8x32xf32>
    tpu.vector_store %arg25[%c0_256, %c0_257, %c0_258], %550 {strides = array<i32>} : memref<2x8x32xf32, #tpu.memory_space<vmem>>, vector<2x8x32xf32>,
    return
  }
  func.func @transform_0(%arg0: i32) -> (i32, i32) {
    %c0_i32 = arith.constant 0 : i32
    %c0_i32_0 = arith.constant 0 : i32
    return %arg0, %c0_i32 : i32, i32
  }
  func.func @transform_1(%arg0: i32) -> (i32, i32) {
    %c0_i32 = arith.constant 0 : i32
    %c0_i32_0 = arith.constant 0 : i32
    return %arg0, %c0_i32 : i32, i32
  }
  func.func @transform_2(%arg0: i32) -> (i32, i32, i32) {
    %c0_i32 = arith.constant 0 : i32
    %c0_i32_0 = arith.constant 0 : i32
    %c0_i32_1 = arith.constant 0 : i32
    return %arg0, %c0_i32, %c0_i32_0 : i32, i32, i32
  }
  func.func @transform_3(%arg0: i32) -> (i32, i32, i32) {
    %c0_i32 = arith.constant 0 : i32
    %c0_i32_0 = arith.constant 0 : i32
    %c0_i32_1 = arith.constant 0 : i32
    return %arg0, %c0_i32, %c0_i32_0 : i32, i32, i32
  }
  func.func @transform_4(%arg0: i32) -> (i32, i32) {
    %c0_i32 = arith.constant 0 : i32
    %c0_i32_0 = arith.constant 0 : i32
    %c0_i32_1 = arith.constant 0 : i32
    return %c0_i32, %c0_i32_0 : i32, i32
  }
  func.func @transform_5(%arg0: i32) -> (i32, i32) {
    %c0_i32 = arith.constant 0 : i32
    %c0_i32_0 = arith.constant 0 : i32
    %c0_i32_1 = arith.constant 0 : i32
    return %c0_i32, %c0_i32_0 : i32, i32
  }
  func.func @transform_6(%arg0: i32) -> (i32, i32) {
    %c0_i32 = arith.constant 0 : i32
    %c0_i32_0 = arith.constant 0 : i32
    %c0_i32_1 = arith.constant 0 : i32
    return %c0_i32, %c0_i32_0 : i32, i32
  }
  func.func @transform_7(%arg0: i32) -> (i32, i32) {
    %c0_i32 = arith.constant 0 : i32
    %c0_i32_0 = arith.constant 0 : i32
    %c0_i32_1 = arith.constant 0 : i32
    return %c0_i32, %c0_i32_0 : i32, i32
  }
  func.func @transform_8(%arg0: i32) -> (i32, i32) {
    %c0_i32 = arith.constant 0 : i32
    %c0_i32_0 = arith.constant 0 : i32
    %c0_i32_1 = arith.constant 0 : i32
    return %c0_i32, %c0_i32_0 : i32, i32
  }
  func.func @transform_9(%arg0: i32) -> (i32, i32) {
    %c0_i32 = arith.constant 0 : i32
    %c0_i32_0 = arith.constant 0 : i32
    %c0_i32_1 = arith.constant 0 : i32
    return %c0_i32, %c0_i32_0 : i32, i32
  }
  func.func @transform_10(%arg0: i32) -> (i32, i32) {
    %c0_i32 = arith.constant 0 : i32
    %c0_i32_0 = arith.constant 0 : i32
    %c0_i32_1 = arith.constant 0 : i32
    return %c0_i32, %c0_i32_0 : i32, i32
  }
  func.func @transform_11(%arg0: i32) -> (i32, i32) {
    %c0_i32 = arith.constant 0 : i32
    %c0_i32_0 = arith.constant 0 : i32
    %c0_i32_1 = arith.constant 0 : i32
    return %c0_i32, %c0_i32_0 : i32, i32
  }
  func.func @transform_12(%arg0: i32) -> (i32, i32) {
    %c0_i32 = arith.constant 0 : i32
    %c0_i32_0 = arith.constant 0 : i32
    %c0_i32_1 = arith.constant 0 : i32
    return %c0_i32, %c0_i32_0 : i32, i32
  }
  func.func @transform_13(%arg0: i32) -> (i32, i32) {
    %c0_i32 = arith.constant 0 : i32
    %c0_i32_0 = arith.constant 0 : i32
    %c0_i32_1 = arith.constant 0 : i32
    return %c0_i32, %c0_i32_0 : i32, i32
  }
  func.func @transform_14(%arg0: i32) -> (i32, i32) {
    %c0_i32 = arith.constant 0 : i32
    %c0_i32_0 = arith.constant 0 : i32
    %c0_i32_1 = arith.constant 0 : i32
    return %c0_i32, %c0_i32_0 : i32, i32
  }
  func.func @transform_15(%arg0: i32) -> (i32, i32) {
    %c0_i32 = arith.constant 0 : i32
    %c0_i32_0 = arith.constant 0 : i32
    %c0_i32_1 = arith.constant 0 : i32
    return %c0_i32, %c0_i32_0 : i32, i32
  }
  func.func @transform_16(%arg0: i32) -> (i32, i32) {
    %c0_i32 = arith.constant 0 : i32
    %c0_i32_0 = arith.constant 0 : i32
    %c0_i32_1 = arith.constant 0 : i32
    return %c0_i32, %c0_i32_0 : i32, i32
  }
  func.func @transform_17(%arg0: i32) -> (i32, i32) {
    %c0_i32 = arith.constant 0 : i32
    %c0_i32_0 = arith.constant 0 : i32
    %c0_i32_1 = arith.constant 0 : i32
    return %c0_i32, %c0_i32_0 : i32, i32
  }
  func.func @transform_18(%arg0: i32) -> (i32, i32) {
    %c0_i32 = arith.constant 0 : i32
    %c0_i32_0 = arith.constant 0 : i32
    %c0_i32_1 = arith.constant 0 : i32
    return %c0_i32, %c0_i32_0 : i32, i32
  }
  func.func @transform_19(%arg0: i32) -> (i32, i32) {
    %c0_i32 = arith.constant 0 : i32
    %c0_i32_0 = arith.constant 0 : i32
    %c0_i32_1 = arith.constant 0 : i32
    return %c0_i32, %c0_i32_0 : i32, i32
  }
  func.func @transform_20(%arg0: i32) -> (i32, i32) {
    %c0_i32 = arith.constant 0 : i32
    %c0_i32_0 = arith.constant 0 : i32
    %c0_i32_1 = arith.constant 0 : i32
    return %c0_i32, %c0_i32_0 : i32, i32
  }
  func.func @transform_21(%arg0: i32) -> (i32, i32) {
    %c0_i32 = arith.constant 0 : i32
    %c0_i32_0 = arith.constant 0 : i32
    %c0_i32_1 = arith.constant 0 : i32
    return %c0_i32, %c0_i32_0 : i32, i32
  }
  func.func @transform_22(%arg0: i32) -> (i32, i32) {
    %c0_i32 = arith.constant 0 : i32
    %c0_i32_0 = arith.constant 0 : i32
    %c0_i32_1 = arith.constant 0 : i32
    return %c0_i32, %c0_i32_0 : i32, i32
  }
  func.func @transform_23(%arg0: i32) -> (i32, i32) {
    %c0_i32 = arith.constant 0 : i32
    %c0_i32_0 = arith.constant 0 : i32
    %c0_i32_1 = arith.constant 0 : i32
    return %c0_i32, %c0_i32_0 : i32, i32
  }
  func.func @transform_24(%arg0: i32) -> (i32, i32, i32) {
    %c0_i32 = arith.constant 0 : i32
    %c0_i32_0 = arith.constant 0 : i32
    %c0_i32_1 = arith.constant 0 : i32
    return %arg0, %c0_i32, %c0_i32_0 : i32, i32, i32
  }
  func.func @transform_25(%arg0: i32) -> (i32, i32, i32, i32) {
    %c0_i32 = arith.constant 0 : i32
    %c0_i32_0 = arith.constant 0 : i32
    %c0_i32_1 = arith.constant 0 : i32
    %c0_i32_2 = arith.constant 0 : i32
    return %c0_i32, %arg0, %c0_i32_0, %c0_i32_1 : i32, i32, i32, i32
  }
  func.func @transform_26(%arg0: i32) -> (i32, i32, i32, i32) {
    %c0_i32 = arith.constant 0 : i32
    %c0_i32_0 = arith.constant 0 : i32
    %c0_i32_1 = arith.constant 0 : i32
    %c0_i32_2 = arith.constant 0 : i32
    return %c0_i32, %arg0, %c0_i32_0, %c0_i32_1 : i32, i32, i32, i32
  }
}

</mosaic_0001>

<bundles_post_ra>
// kernel: tpu_custom_call.1
= control target key start
LH: loop header
LB: loop body
LE: loop exit
PB: predicated region body
PF: predicated region fallthrough
CT: control target
= control target key end

     0   :  { %6 = vsyncpa [#allocation3], 0  ;;  %s341_s0 = inlined_call_operand.hbm [shape: f32[8,128], index: 0, kind: input, shape index: {}]   ;;  %s342_s1 = inlined_call_operand.hbm [shape: f32[8,128], index: 1, kind: output, shape index: {}]  }
   0x1   :  { %7 = vsyncpa [#allocation4], 0  ;;  %s262_s6 = smov 0  }
   0x2 LB: > { %s145_s7 = sadd.s32 4294967295, %s248_s6   ;;  %p146_p0 = scmp.ge.s32.totalorder %s248_s6, 1  ;;  %s248_s6 = sphi %s262_s6, %s13_s6  }
   0x3   : > { %p60_p1 = scmp.lt.s32.totalorder %s248_s6, 3  ;;  %p276_p3 = scmp.eq.s32.totalorder %s145_s7, 0 }
   0x4   : > { %s250_s10 = smov [#allocation2]   ;;  %s180_s15 = scalar_lea.hbm %s341_s0, 128 }
   0x5   : > { %p270_p2 = pnand %p146_p0, %p60_p1  ;;  %s73_s11 = sshll.u32 %s250_s10, 4  ;;  %s74_s11 = int_to_ptr.vmem [resolvable:$true] %s73_s11 }
   0x6   : > { %s347_s9 = scalar_select %p276_p3, 1, 0 }
   0x7   : > { %s346_s8 = scalar_select %p270_p2, 1, 0 }
   0x8   : > { %p162_p4 = pneg %p270_p2  ;;  %p181_p6 = scmp.ne.s32.totalorder %s341_s0, %s180_s15 }
   0x9   : > { %p187_p10 = scmp.lt.u32.totalorder %s180_s15, %s341_s0 }
   0xa   : > { %p284_p5 = pnand %p276_p3, %p162_p4 }
   0xc   : > { %p182_p7 = pneg %p284_p5 }
   0xe   : > { %p183_p8 = pnand %p182_p7, %p181_p6 }
  0x10   : > { %p184_p9 = pneg %p183_p8 }
  0x12   : > { %p189_p11 = pnand %p187_p10, %p184_p9 }
  0x14   : > { %192 = shalt.err (!%p189_p11)
}
  0x15   : > { %s193_s20 = scalar_lea.vmem %s74_s11, 128  ;;  %p201_p1 = scmp.lt.s32.totalorder %s74_s11, %s74_s11 }
  0x16   : > { %p194_p12 = scmp.ne.s32.totalorder %s74_s11, %s193_s20  ;;  %p202_p4 = scmp.lt.s32.totalorder %s193_s20, %s193_s20 }
  0x18   : > { %p196_p13 = pnand %p194_p12, %p182_p7  ;;  %p203_p3 = por %p202_p4, %p201_p1 }
  0x1a   : > { %p197_p0 = pneg %p196_p13 }
  0x1c   : > { %p204_p2 = pnand %p203_p3, %p197_p0 }
  0x1e   : > { %207 = shalt.err (!%p204_p2)
}
  0x1f   : > { %165 = dma.hbm_to_vmem [thread:$0]  (!%p284_p5), %s341_s0, 128, %s74_s11, [#allocation3]  }
  0x20   : > { %p349_p6 = scmp.ne.s32.totalorder %s346_s8, 0 }
  0x21   : > { %p350_p8 = scmp.ne.s32.totalorder (!%p349_p6), %s347_s9, 0 }
  0x22   : > { %86 = sbr.rel (%p349_p6) target bundleno = 67 (0x43), region = 24 }
  0x29   : > { %239 = dma.done.wait (%p350_p8), [#allocation3], 128  }
  0x2a   : > { %241 = vsyncadd (%p350_p8), [#allocation3], 4294967168  ;;  %s251_s23 = smov [#allocation5]   ;;  %v96_v0 = vld [vmem:[#allocation2] sm:$0xff]  ;;  %p312_p2 = scmp.eq.s32.totalorder %s145_s7, 1 }
  0x2b   : > { %s106_s24 = sshll.u32 %s251_s23, 4  ;;  %v97_v1 = vadd.f32 1.0, %v96_v0  ;;  %s107_s24 = int_to_ptr.vmem [resolvable:$true] %s106_s24 }
  0x2c   : > { %s208_s26 = scalar_lea.vmem %s107_s24, 128  ;;  %p215_p9 = scmp.lt.s32.totalorder %s107_s24, %s107_s24 }
  0x2d   : > { %98 = vst [vmem:[#allocation5] sm:$0xff] %v97_v1  ;;  %p209_p3 = scmp.ne.s32.totalorder %s107_s24, %s208_s26  ;;  %p216_p10 = scmp.lt.s32.totalorder %s208_s26, %s208_s26 }
  0x2f   : > { %p210_p5 = pnand %p209_p3, %p312_p2  ;;  %p217_p11 = por %p216_p10, %p215_p9 }
  0x31   : > { %p211_p7 = pneg %p210_p5 }
  0x33   : > { %p218_p12 = pnand %p217_p11, %p211_p7 }
  0x35   : > { %221 = shalt.err (!%p218_p12)
}
  0x36   : > { %s222_s29 = scalar_lea.hbm %s342_s1, 128 }
  0x37   : > { %p223_p13 = scmp.ne.s32.totalorder %s342_s1, %s222_s29  ;;  %p228_p4 = scmp.lt.u32.totalorder %s222_s29, %s342_s1 }
  0x39   : > { %p224_p0 = pnand %p223_p13, %p312_p2 }
  0x3b   : > { %p225_p1 = pneg %p224_p0 }
  0x3d   : > { %p230_p6 = pnand %p228_p4, %p225_p1 }
  0x3f   : > { %233 = shalt.err (!%p230_p6)
}
  0x40   : > { %159 = dma.vmem_to_hbm [thread:$0]  (%p312_p2), %s107_s24, 128, %s342_s1, [#allocation4]  }
  0x41   : > { %243 = dma.done.wait (%p312_p2), [#allocation4], 128  }
  0x42   : > { %245 = vsyncadd (%p312_p2), [#allocation4], 4294967168 }
  0x43 PF: > { %s13_s6 = sadd.s32 1, %s248_s6  }
  0x44   : > { %p10_p8 = scmp.ge.s32.totalorder %s13_s6, 4  }
  0x46   :  { %12 = sbr.rel (!%p10_p8) target bundleno = 2 (0x2), region = 53 }
  0x4d   :  { %119 = vsyncpa [#allocation3], 1 }
  0x4e   :  { %121 = vsyncpa [#allocation3 + $0x1], 1 }
  0x4f   :  { %122 = vsyncpa [#allocation4], 1 }
  0x50   :  { %124 = vsyncpa [#allocation4 + $0x1], 1 }

// kernel: decoder_forward.3
= control target key start
LH: loop header
LB: loop body
LE: loop exit
PB: predicated region body
PF: predicated region fallthrough
CT: control target
= control target key end

     0   :  { %s4302_s0 = inlined_call_operand.vmem [shape: s32[2,8], index: 0, kind: input, shape index: {}]   ;;  %s4303_s1 = inlined_call_operand.vmem [shape: s32[2,8], index: 1, kind: input, shape index: {}]   ;;  %s4304_s2 = inlined_call_operand.vmem [shape: f32[2,8,32], index: 2, kind: input, shape index: {}]   ;;  %s4305_s3 = inlined_call_operand.vmem [shape: f32[2,8,32], index: 3, kind: input, shape index: {}]   ;;  %s4306_s4 = inlined_call_operand.vmem [shape: bf16[32,32], index: 4, kind: input, shape index: {}]   ;;  %s4307_s5 = inlined_call_operand.vmem [shape: bf16[32,32], index: 5, kind: input, shape index: {}]   ;;  %s4308_s6 = inlined_call_operand.vmem [shape: bf16[32,32], index: 6, kind: input, shape index: {}]   ;;  %s4309_s7 = inlined_call_operand.vmem [shape: bf16[32,32], index: 7, kind: input, shape index: {}]   ;;  %s4310_s8 = inlined_call_operand.vmem [shape: f32[1,32], index: 8, kind: input, shape index: {}]   ;;  %s4311_s9 = inlined_call_operand.vmem [shape: f32[1,32], index: 9, kind: input, shape index: {}]   ;;  %s4312_s10 = inlined_call_operand.vmem [shape: f32[1,32], index: 10, kind: input, shape index: {}]   ;;  %s4313_s11 = inlined_call_operand.vmem [shape: bf16[32,32], index: 11, kind: input, shape index: {}]   ;;  %s4314_s12 = inlined_call_operand.vmem [shape: bf16[32,32], index: 12, kind: input, shape index: {}]   ;;  %s4315_s13 = inlined_call_operand.vmem [shape: bf16[32,32], index: 13, kind: input, shape index: {}]   ;;  %s4316_s14 = inlined_call_operand.vmem [shape: bf16[32,32], index: 14, kind: input, shape index: {}]   ;;  %s4317_s15 = inlined_call_operand.vmem [shape: f32[1,32], index: 15, kind: input, shape index: {}]   ;;  %s4318_s16 = inlined_call_operand.vmem [shape: f32[1,32], index: 16, kind: input, shape index: {}]   ;;  %s4319_s17 = inlined_call_operand.vmem [shape: f32[1,32], index: 17, kind: input, shape index: {}]   ;;  %s4320_s18 = inlined_call_operand.vmem [shape: bf16[32,64], index: 18, kind: input, shape index: {}]   ;;  %s4321_s19 = inlined_call_operand.vmem [shape: f32[1,64], index: 19, kind: input, shape index: {}]   ;;  %s4322_s20 = inlined_call_operand.vmem [shape: bf16[64,32], index: 20, kind: input, shape index: {}]   ;;  %s4323_s21 = inlined_call_operand.vmem [shape: f32[1,32], index: 21, kind: input, shape index: {}]   ;;  %s4324_s22 = inlined_call_operand.vmem [shape: f32[1,32], index: 22, kind: input, shape index: {}]   ;;  %s4325_s23 = inlined_call_operand.vmem [shape: f32[1,32], index: 23, kind: input, shape index: {}]   ;;  %s4326_s24 = inlined_call_operand.hbm [shape: f32[2,8,32], index: 24, kind: output, shape index: {0}]   ;;  %s4327_s25 = inlined_call_operand.hbm [shape: bf16[4,2,8,8], index: 25, kind: output, shape index: {1}]   ;;  %s4328_s26 = inlined_call_operand.hbm [shape: bf16[4,2,8,8], index: 26, kind: output, shape index: {2}]  }
   0x1   :  { %4335 = sst [smem:[#allocation10_spill]] %s4302_s0 }
   0x2   :  { %4336 = sst [smem:[#allocation11_spill]] %s4303_s1 }
   0x3   :  { %4337 = sst [smem:[#allocation12_spill]] %s4304_s2 }
   0x4   :  { %4338 = sst [smem:[#allocation13_spill]] %s4305_s3 }
   0x5   :  { %4339 = sst [smem:[#allocation14_spill]] %s4306_s4 }
   0x6   :  { %4340 = sst [smem:[#allocation15_spill]] %s4307_s5 }
   0x7   :  { %4341 = sst [smem:[#allocation16_spill]] %s4308_s6 }
   0x8   :  { %4342 = sst [smem:[#allocation17_spill]] %s4309_s7 }
   0x9   :  { %4343 = sst [smem:[#allocation18_spill]] %s4310_s8 }
   0xa   :  { %4344 = sst [smem:[#allocation19_spill]] %s4311_s9 }
   0xb   :  { %4345 = sst [smem:[#allocation20_spill]] %s4312_s10 }
   0xc   :  { %32 = vsyncpa [#allocation4], 0  ;;  %s4346_s7 = sld [smem:[#allocation15_spill]]  ;;  %v3479_v1 = vmov 0.0   ;;  %s4347_s4 = sld [smem:[#allocation14_spill]]  ;;  %vm3480_vm0 = vmmov 0  }
   0xd   :  { %3028 = vmatprep.subr.bf16.mxu1 %v3479_v1  ;;  %3020 = vmatprep.subr.bf16.mxu0 %v3479_v1  ;;  %s4348_s10 = sld [smem:[#allocation12_spill]]  ;;  %vm111_vm1 = vcmask 261120  }
   0xe   :  { %3032 = vmatprep.mubr.msk.bf16.mxu1 %vm3480_vm0, %v3479_v1  ;;  %3024 = vmatprep.mubr.msk.bf16.mxu0 %vm3480_vm0, %v3479_v1 }
  0x12   :  { %v3311_v0 = vld [vmem:[%s4346_s7] sm:$0xff]   ;;  %v3313_v3 = vld [vmem:[%s4346_s7 + $0x8] sm:$0xff]  }
  0x13   :  { %v3312_v2 = vld [vmem:[%s4347_s4] sm:$0xff]   ;;  %3029 = vmatpush3.bf16.msra.mxu1 %v3311_v0  ;;  %v3314_v4 = vld [vmem:[%s4347_s4 + $0x8] sm:$0xff]  }
  0x14   :  { %3021 = vmatpush3.bf16.msra.mxu0 %v3312_v2  ;;  %3030 = vmatprep.subr.bf16.mxu1 %v3479_v1  ;;  %v3650_v5 = vld [vmem:[%s4348_s10] sm:$0xff]  ;;  %v3655_v6 = vld [vmem:[%s4348_s10 + $0x8] sm:$0xff] }
  0x15   :  { %3022 = vmatprep.subr.bf16.mxu0 %v3479_v1  ;;  %v94_v7 = vpack.c.bf16 %v3655_v6, %v3650_v5 }
  0x17   :  { %3031 = vmatpush3.bf16.msra.mxu1 %v3313_v3 }
  0x18   :  { %3023 = vmatpush3.bf16.msra.mxu0 %v3314_v4  ;;  %3044 = vmatprep.subr.bf16.mxu1 %v3479_v1 }
  0x19   :  { %3036 = vmatprep.subr.bf16.mxu0 %v3479_v1 }
  0x1a   :  { %3033 = vmatmul.mubr.msk.bf16.vlgmr.msra.gmra.mrb[0].mxu1 %vm111_vm1, %v94_v7 }
  0x1b   :  { %3025 = vmatmul.mubr.msk.bf16.vlgmr.msra.gmra.mrb[0].mxu0 %vm111_vm1, %v94_v7  ;;  %3046 = vmatprep.mubr.msk.bf16.mxu1 %vm3480_vm0, %v3479_v1 }
  0x1c   :  { %3040 = vmatprep.mubr.msk.bf16.mxu0 %vm3480_vm0, %v3479_v1 }
  0x1d   :  { %33 = vsyncpa [#allocation6], 0  ;;  %vm283_vm2 = vcmask 64512   ;;  %s3481_s27 = smov 112   ;;  %s3482_s3 = smov 120   ;;  %v89_v44 = vlaneseq  ;;  %v3484_v48 = vmov 0  }
  0x1e   :  { %s3483_s7 = smov 104   ;;  %s4349_s4 = sld [smem:[#allocation16_spill]]  ;;  %vm348_vm9 = vcmask 1043456   ;;  %vm343_vm10 = vcmask 60416   ;;  %vm513_vm11 = vcmask 130112   ;;  %vm632_vm12 = vcmask 195712  }
  0x1f   :  { %s4350_s2 = sld [smem:[#allocation10_spill]]  ;;  %v3735_v46 = vshrl.u32 %v89_v44, 7  ;;  %v92_v50 = vand.u32 127, %v89_v44  ;;  %s3485_s5 = smov 8   ;;  %vm751_vm13 = vcmask 261312  }
  0x20   :  { %s3486_s10 = smov 16   ;;  %s3487_s6 = smov 24  }
  0x21   :  { %v279_v47 = vsub.s32 0, %v3735_v46  ;;  %vm93_vm4 = vcmp.gt.s32.totalorder %v92_v50, %v3735_v46  ;;  %s4355_s8 = sld [smem:[#allocation17_spill]]  ;;  %s4356_s30 = sld [smem:[#allocation18_spill]] }
  0x22   :  { %s4357_s0 = sld [smem:[#allocation13_spill]]  ;;  %s4359_s9 = sld [smem:[#allocation20_spill]] }
  0x24   :  { %v3315_v23 = vld [vmem:[%s4349_s4] sm:$0xff]   ;;  %v3316_v24 = vld [vmem:[%s4349_s4 + $0x8] sm:$0xff]   ;;  %s4358_s4 = sld [smem:[#allocation19_spill]] }
  0x25   :  { %3037 = vmatpush3.bf16.msra.mxu0 %v3315_v23  ;;  %v87_v45 = vld [vmem:[%s4350_s2] sm:$0x3] }
  0x26   :  { %3038 = vmatprep.subr.bf16.mxu0 %v3479_v1  ;;  %vm275_vm3 = vcmp.eq.s32.totalorder %v87_v45, 0 }
  0x27   :  { %v276_v49 = vsel %vm275_vm3, 1, %v3484_v48 }
  0x28   :  { %v280_v51 = vrot.slane %v276_v49, %v279_v47 }
  0x29   :  { %3039 = vmatpush3.bf16.msra.mxu0 %v3316_v24 }
  0x2a   :  { %3050 = vmatprep.subr.bf16.mxu0 %v3479_v1  ;;  %vm281_vm5 = vcmp.eq.s32.totalorder %v280_v51, 1 }
  0x2b   :  { %vm3744_vm6 = vmor %vm281_vm5, %vm93_vm4 }
  0x2c   :  { %3041 = vmatmul.mubr.msk.bf16.vlgmr.msra.gmra.mrb[4].mxu0 %vm111_vm1, %v94_v7 }
  0x2d   :  { %3052 = vmatprep.mubr.msk.bf16.mxu0 %vm3480_vm0, %v3479_v1 }
  0xed   :  { %v208_v8 = vpop.f32.mrb[0].mxu1 }
  0xee   :  { %v3034_v9 = vpop.f32.mrb[1].mxu1  ;;  %v149_v10 = vpop.f32.mrb[0].mxu0 }
  0xef   :  { %v156_v11 = vmul.f32 0.17677669, %v149_v10  ;;  %v211_v12 = vpop.f32.mrb[2].mxu1  ;;  %v3026_v13 = vpop.f32.mrb[1].mxu0  ;;  %v755_v10 = vsub.s32 1, %v3735_v46 }
  0xf0   :  { %v273_v14 = vpack.c.bf16 %v211_v12, %v208_v8  ;;  %v3035_v15 = vpop.f32.mrb[3].mxu1  ;;  %v152_v16 = vpop.f32.mrb[2].mxu0 }
  0xf1   :  { %v157_v17 = vmul.f32 0.17677669, %v152_v16  ;;  %v3027_v18 = vpop.f32.mrb[3].mxu0 }
  0xf2   :  { %517 = vrot.lane.b32.xlu1 %v273_v14, %s3481_s27  ;;  %397 = vrot.lane.b32.xlu0 %v273_v14, %s3482_s3  ;;  %v288_v19 = vsel %vm283_vm2, %v273_v14, 0  ;;  %v760_v21 = vrot.slane %v273_v14, 4 }
  0xf3   :  { %v272_v20 = vpack.c.bf16 %v157_v17, %v156_v11  ;;  %3045 = vmatpush3.bf16.xpose.msra.mxu1 %v288_v19  ;;  %v756_v11 = vrot.slane %v276_v49, %v755_v10 }
  0xf4   :  { %3056 = vmatprep.subr.bf16.mxu1 %v3479_v1  ;;  %v765_v34 = vsel %vm283_vm2, %v760_v21, 0 }
  0xf5   :  { %v759_v22 = vrot.slane %v272_v20, 4  ;;  %vm757_vm7 = vcmp.eq.s32.totalorder %v756_v11, 1 }
  0xf6   :  { %515 = vrot.lane.b32.xlu1 %v272_v20, %s3481_s27  ;;  %394 = vrot.lane.b32.xlu0 %v272_v20, %s3482_s3  ;;  %vm3774_vm8 = vmor %vm757_vm7, %vm93_vm4 }
  0xfa   :  { %634 = vrot.lane.b32.xlu1 %v272_v20, %s3483_s7  ;;  %636 = vrot.lane.b32.xlu0 %v273_v14, %s3483_s7 }
  0xfb   :  { %3047 = vmatmul.mubr.msk.bf16.vlgmr.msra.gmra.mrb[4].mxu1 %vm283_vm2, %v272_v20 }
  0xfc   :  { %3058 = vmatprep.mubr.msk.bf16.mxu1 %vm3480_vm0, %v3479_v1 }
  0xfe   :  { %872 = vrot.lane.b32.xlu0 %v760_v21, %s3482_s3  ;;  %870 = vrot.lane.b32.xlu1 %v759_v22, %s3482_s3 }
  0xff   :  { %v265_v51 = vpop.f32.mrb[4].mxu0 }
 0x100   :  { %v3042_v52 = vpop.f32.mrb[5].mxu0 }
 0x102   :  { %990 = vrot.lane.b32.xlu0 %v760_v21, %s3481_s27  ;;  %988 = vrot.lane.b32.xlu1 %v759_v22, %s3481_s27 }
 0x106   :  { %1108 = vrot.lane.b32.xlu0 %v760_v21, %s3483_s7  ;;  %1106 = vrot.lane.b32.xlu1 %v759_v22, %s3483_s7 }
 0x164   :  { %v398_v25 = vpop.permute.xlu0 %397  ;;  %v518_v27 = vpop.permute.xlu1 %517 }
 0x165   :  { %v403_v26 = vsel %vm283_vm2, %v398_v25, 0  ;;  %v523_v29 = vsel %vm283_vm2, %v518_v27, 0 }
 0x166   :  { %3057 = vmatpush3.bf16.xpose.msra.mxu1 %v403_v26 }
 0x167   :  { %3068 = vmatprep.subr.bf16.mxu1 %v3479_v1 }
 0x168   :  { %v395_v28 = vpop.permute.xlu0 %394  ;;  %v516_v31 = vpop.permute.xlu1 %515 }
 0x16c   :  { %v637_v30 = vpop.permute.xlu0 %636  ;;  %v635_v33 = vpop.permute.xlu1 %634 }
 0x16d   :  { %3059 = vmatmul.mubr.msk.bf16.vlgmr.msra.gmra.mrb[8].mxu1 %vm283_vm2, %v395_v28  ;;  %v642_v32 = vsel %vm283_vm2, %v637_v30, 0 }
 0x16e   :  { %3069 = vmatpush3.bf16.xpose.msra.mxu1 %v523_v29  ;;  %3070 = vmatprep.mubr.msk.bf16.mxu1 %vm3480_vm0, %v3479_v1 }
 0x16f   :  { %3080 = vmatprep.subr.bf16.mxu1 %v3479_v1 }
 0x170   :  { %v873_v35 = vpop.permute.xlu0 %872  ;;  %v871_v38 = vpop.permute.xlu1 %870 }
 0x171   :  { %v878_v36 = vsel %vm283_vm2, %v873_v35, 0 }
 0x174   :  { %v991_v37 = vpop.permute.xlu0 %990  ;;  %v989_v41 = vpop.permute.xlu1 %988 }
 0x175   :  { %3071 = vmatmul.mubr.msk.bf16.vlgmr.msra.gmra.mrb[12].mxu1 %vm283_vm2, %v516_v31  ;;  %v996_v39 = vsel %vm283_vm2, %v991_v37, 0 }
 0x176   :  { %3081 = vmatpush3.bf16.xpose.msra.mxu1 %v642_v32  ;;  %3082 = vmatprep.mubr.msk.bf16.mxu1 %vm3480_vm0, %v3479_v1 }
 0x177   :  { %3092 = vmatprep.subr.bf16.mxu1 %v3479_v1 }
 0x178   :  { %v1109_v40 = vpop.permute.xlu0 %1108  ;;  %v1107_v43 = vpop.permute.xlu1 %1106 }
 0x179   :  { %v1114_v42 = vsel %vm283_vm2, %v1109_v40, 0 }
 0x17d   :  { %3083 = vmatmul.mubr.msk.bf16.vlgmr.msra.gmra.mrb[16].mxu1 %vm283_vm2, %v635_v33 }
 0x17e   :  { %3093 = vmatpush3.bf16.xpose.msra.mxu1 %v765_v34  ;;  %3094 = vmatprep.mubr.msk.bf16.mxu1 %vm3480_vm0, %v3479_v1 }
 0x17f   :  { %3104 = vmatprep.subr.bf16.mxu1 %v3479_v1 }
 0x185   :  { %3095 = vmatmul.mubr.msk.bf16.vlgmr.msra.gmra.mrb[20].mxu1 %vm283_vm2, %v759_v22 }
 0x186   :  { %3105 = vmatpush3.bf16.xpose.msra.mxu1 %v878_v36  ;;  %3106 = vmatprep.mubr.msk.bf16.mxu1 %vm3480_vm0, %v3479_v1 }
 0x187   :  { %3116 = vmatprep.subr.bf16.mxu1 %v3479_v1 }
 0x18d   :  { %3107 = vmatmul.mubr.msk.bf16.vlgmr.msra.gmra.mrb[24].mxu1 %vm283_vm2, %v871_v38 }
 0x18e   :  { %3117 = vmatpush3.bf16.xpose.msra.mxu1 %v996_v39  ;;  %3118 = vmatprep.mubr.msk.bf16.mxu1 %vm3480_vm0, %v3479_v1 }
 0x18f   :  { %3128 = vmatprep.subr.bf16.mxu1 %v3479_v1 }
 0x195   :  { %3119 = vmatmul.mubr.msk.bf16.vlgmr.msra.gmra.mrb[28].mxu1 %vm283_vm2, %v989_v41 }
 0x196   :  { %3129 = vmatpush3.bf16.xpose.msra.mxu1 %v1114_v42  ;;  %3130 = vmatprep.mubr.msk.bf16.mxu1 %vm3480_vm0, %v3479_v1 }
 0x197   :  { %3140 = vmatprep.subr.bf16.mxu1 %v3479_v1 }
 0x19d   :  { %3131 = vmatmul.mubr.msk.bf16.vlgmr.msra.gmra.mrb[32].mxu1 %vm283_vm2, %v1107_v43 }
 0x19e   :  { %3144 = vmatprep.mubr.msk.bf16.mxu1 %vm3480_vm0, %v3479_v1 }
 0x1ce   :  { %v324_v53 = vpop.f32.mrb[4].mxu1 }
 0x1cf   :  { %v330_v54 = vsel %vm3744_vm6, -1e+30, %v324_v53  ;;  %v3048_v55 = vpop.f32.mrb[5].mxu1  ;;  %v268_v53 = vpop.f32.mrb[6].mxu0 }
 0x1d0   :  { %v327_v56 = vpop.f32.mrb[6].mxu1  ;;  %v331_v57 = vsel %vm283_vm2, %v330_v54, -inf  ;;  %v3043_v55 = vpop.f32.mrb[7].mxu0 }
 0x1d1   :  { %332 = vmax.xlane.f32.xlu0 %v331_v57  ;;  %v3049_v58 = vpop.f32.mrb[7].mxu1 }
 0x240   :  { %v439_v59 = vpop.f32.mrb[8].mxu1 }
 0x241   :  { %v3753_v60 = vsel %vm3744_vm6, -1e+30, %v439_v59  ;;  %v3060_v61 = vpop.f32.mrb[9].mxu1 }
 0x242   :  { %v442_v62 = vpop.f32.mrb[10].mxu1  ;;  %v446_v63 = vsel %vm283_vm2, %v3753_v60, -inf }
 0x243   :  { %447 = vmax.xlane.f32.xlu1 %v446_v63  ;;  %v3061_v0 = vpop.f32.mrb[11].mxu1 }
 0x248   :  { %v559_v2 = vpop.f32.mrb[12].mxu1 }
 0x249   :  { %v3759_v3 = vsel %vm3744_vm6, -1e+30, %v559_v2  ;;  %v3072_v4 = vpop.f32.mrb[13].mxu1 }
 0x24a   :  { %v562_v7 = vpop.f32.mrb[14].mxu1  ;;  %v566_v8 = vsel %vm283_vm2, %v3759_v3, -inf }
 0x24b   :  { %567 = vmax.xlane.f32.xlu0 %v566_v8  ;;  %v3073_v9 = vpop.f32.mrb[15].mxu1 }
 0x250   :  { %v678_v12 = vpop.f32.mrb[16].mxu1 }
 0x251   :  { %v3768_v13 = vsel %vm3744_vm6, -1e+30, %v678_v12  ;;  %v3084_v14 = vpop.f32.mrb[17].mxu1 }
 0x252   :  { %v681_v15 = vpop.f32.mrb[18].mxu1  ;;  %v685_v16 = vsel %vm283_vm2, %v3768_v13, -inf }
 0x253   :  { %686 = vmax.xlane.f32.xlu0 %v685_v16  ;;  %v3085_v17 = vpop.f32.mrb[19].mxu1 }
 0x258   :  { %v801_v19 = vpop.f32.mrb[20].mxu1 }
 0x259   :  { %v3780_v20 = vsel %vm3774_vm8, -1e+30, %v801_v19  ;;  %v3096_v21 = vpop.f32.mrb[21].mxu1 }
 0x25a   :  { %v804_v22 = vpop.f32.mrb[22].mxu1  ;;  %v808_v23 = vsel %vm283_vm2, %v3780_v20, -inf }
 0x25b   :  { %809 = vmax.xlane.f32.xlu1 %v808_v23  ;;  %v3097_v24 = vpop.f32.mrb[23].mxu1 }
 0x25e   :  { %v333_v25 = vpop.xlane.xlu0 %332 }
 0x25f   :  { %v334_v26 = vsub.f32 %v330_v54, %v333_v25  ;;  %v3800_v54 = vpack.c.bf16 %v268_v53, %v265_v51 }
 0x260   :  { %v914_v27 = vpop.f32.mrb[24].mxu1 }
 0x261   :  { %v335_v28 = vmul.f32 1.442695, %v334_v26  ;;  %v3786_v29 = vsel %vm3774_vm8, -1e+30, %v914_v27  ;;  %v3108_v30 = vpop.f32.mrb[25].mxu1  ;;  %v350_v56 = vsel %vm348_vm9, %v3800_v54, 0 }
 0x262   :  { %v917_v31 = vpop.f32.mrb[26].mxu1  ;;  %v921_v32 = vsel %vm283_vm2, %v3786_v29, -inf  ;;  %3051 = vmatpush3.bf16.msra.mxu0 %v350_v56 }
 0x263   :  { %3333 = vpow2.f32 %v335_v28  ;;  %922 = vmax.xlane.f32.xlu0 %v921_v32  ;;  %v3109_v33 = vpop.f32.mrb[27].mxu1  ;;  %3062 = vmatprep.subr.bf16.mxu0 %v3479_v1 }
 0x268   :  { %v1032_v34 = vpop.f32.mrb[28].mxu1 }
 0x269   :  { %v3792_v35 = vsel %vm3774_vm8, -1e+30, %v1032_v34  ;;  %v3120_v36 = vpop.f32.mrb[29].mxu1 }
 0x26a   :  { %v1035_v37 = vpop.f32.mrb[30].mxu1  ;;  %v1039_v38 = vsel %vm283_vm2, %v3792_v35, -inf  ;;  %v822_v36 = vrot.slane %v3800_v54, 4 }
 0x26b   :  { %1040 = vmax.xlane.f32.xlu1 %v1039_v38  ;;  %v3121_v39 = vpop.f32.mrb[31].mxu1 }
 0x26d   :  { %v3334_v40 = vpop.eup %3333 }
 0x26e   :  { %v337_v41 = vsel %vm283_vm2, %v3334_v40, 0.0 }
 0x26f   :  { %338 = vadd.xlane.f32.xlu1 %v337_v41 }
 0x270   :  { %v1150_v42 = vpop.f32.mrb[32].mxu1 }
 0x271   :  { %v1156_v43 = vsel %vm3774_vm8, -1e+30, %v1150_v42  ;;  %v3132_v44 = vpop.f32.mrb[33].mxu1 }
 0x272   :  { %v1153_v45 = vpop.f32.mrb[34].mxu1  ;;  %v1157_v49 = vsel %vm283_vm2, %v1156_v43, -inf }
 0x273   :  { %1158 = vmax.xlane.f32.xlu0 %v1157_v49  ;;  %v3133_v50 = vpop.f32.mrb[35].mxu1 }
 0x2d0   :  { %v448_v57 = vpop.xlane.xlu1 %447 }
 0x2d1   :  { %v449_v58 = vsub.f32 %v3753_v60, %v448_v57 }
 0x2d3   :  { %v450_v59 = vmul.f32 1.442695, %v449_v58  ;;  %v827_v58 = vsel %vm348_vm9, %v822_v36, 0 }
 0x2d5   :  { %3335 = vpow2.f32 %v450_v59 }
 0x2d8   :  { %v568_v61 = vpop.xlane.xlu0 %567 }
 0x2d9   :  { %v569_v62 = vsub.f32 %v3759_v3, %v568_v61 }
 0x2db   :  { %v570_v63 = vmul.f32 1.442695, %v569_v62 }
 0x2dd   :  { %3337 = vpow2.f32 %v570_v63 }
 0x2df   :  { %v3336_v0 = vpop.eup %3335 }
 0x2e0   :  { %v687_v2 = vpop.xlane.xlu0 %686  ;;  %v452_v4 = vsel %vm283_vm2, %v3336_v0, 0.0 }
 0x2e1   :  { %v688_v7 = vsub.f32 %v3768_v13, %v687_v2  ;;  %453 = vadd.xlane.f32.xlu0 %v452_v4 }
 0x2e3   :  { %v689_v8 = vmul.f32 1.442695, %v688_v7 }
 0x2e5   :  { %3339 = vpow2.f32 %v689_v8 }
 0x2e7   :  { %v3338_v9 = vpop.eup %3337 }
 0x2e8   :  { %v572_v11 = vsel %vm283_vm2, %v3338_v9, 0.0  ;;  %v810_v12 = vpop.xlane.xlu1 %809 }
 0x2e9   :  { %573 = vadd.xlane.f32.xlu1 %v572_v11  ;;  %v811_v18 = vsub.f32 %v3780_v20, %v810_v12 }
 0x2eb   :  { %v812_v22 = vmul.f32 1.442695, %v811_v18 }
 0x2ef   :  { %v3810_v60 = vpop.eup %3339 }
 0x2f0   :  { %v691_v3 = vsel %vm283_vm2, %v3810_v60, 0.0  ;;  %v923_v19 = vpop.xlane.xlu0 %922 }
 0x2f1   :  { %692 = vadd.xlane.f32.xlu0 %v691_v3  ;;  %v924_v21 = vsub.f32 %v3786_v29, %v923_v19 }
 0x2f3   :  { %v925_v25 = vmul.f32 1.442695, %v924_v21 }
 0x2f8   :  { %v1041_v14 = vpop.xlane.xlu1 %1040 }
 0x2f9   :  { %v1042_v23 = vsub.f32 %v3792_v35, %v1041_v14 }
 0x2fa   :  { %580 = vrot.lane.b32.xlu1 %v3800_v54, %s3481_s27 }
 0x2fb   :  { %v1043_v26 = vmul.f32 1.442695, %v1042_v23 }
 0x2fc   :  { %v339_v15 = vpop.xlane.xlu1 %338 }
 0x2fd   :  { %3341 = vrcp.f32 %v339_v15 }
 0x2fe   :  { %699 = vrot.lane.b32.xlu1 %v3800_v54, %s3483_s7  ;;  %3343 = vpow2.f32 %v812_v22 }
 0x2ff   :  { %3345 = vpow2.f32 %v925_v25 }
 0x300   :  { %v1159_v24 = vpop.xlane.xlu0 %1158  ;;  %3347 = vpow2.f32 %v1043_v26 }
 0x301   :  { %v1160_v27 = vsub.f32 %v1156_v43, %v1159_v24 }
 0x303   :  { %v1161_v20 = vmul.f32 1.442695, %v1160_v27 }
 0x305   :  { %3349 = vpow2.f32 %v1161_v20 }
 0x307   :  { %461 = vrot.lane.b32.xlu0 %v3800_v54, %s3482_s3  ;;  %v3342_v13 = vpop.eup %3341 }
 0x308   :  { %v341_v16 = vmul.f32 %v3342_v13, %v3334_v40  ;;  %v3827_v28 = vpop.eup %3343 }
 0x309   :  { %v3829_v30 = vpop.eup %3345  ;;  %v814_v31 = vsel %vm283_vm2, %v3827_v28, 0.0 }
 0x30a   :  { %v342_v17 = vpack.c.bf16 %v341_v16, %v341_v16  ;;  %v3833_v29 = vpop.eup %3347  ;;  %v927_v32 = vsel %vm283_vm2, %v3829_v30, 0.0 }
 0x30b   :  { %v1045_v33 = vsel %vm283_vm2, %v3833_v29, 0.0 }
 0x30c   :  { %344 = vst.msk [vmem:[#allocation5] sm:$0xf] %vm343_vm10, %v342_v17  ;;  %3053 = vmatmul.mubr.msk.bf16.vlgmr.msra.gmra.mrb[8].mxu0 %vm283_vm2, %v342_v17 }
 0x30d   :  { %3064 = vmatprep.mubr.msk.bf16.mxu0 %vm3480_vm0, %v3479_v1 }
 0x30f   :  { %v3839_v34 = vpop.eup %3349 }
 0x310   :  { %v1163_v35 = vsel %vm283_vm2, %v3839_v34, 0.0 }
 0x322   :  { %815 = vadd.xlane.f32.xlu1 %v814_v31 }
 0x326   :  { %928 = vadd.xlane.f32.xlu1 %v927_v32  ;;  %1046 = vadd.xlane.f32.xlu0 %v1045_v33 }
 0x32a   :  { %1164 = vadd.xlane.f32.xlu1 %v1163_v35 }
 0x33b   :  { %1053 = vrot.lane.b32.xlu1 %v822_v36, %s3481_s27 }
 0x33c   :  { %935 = vrot.lane.b32.xlu0 %v822_v36, %s3482_s3 }
 0x340   :  { %1171 = vrot.lane.b32.xlu0 %v822_v36, %s3483_s7 }
 0x36e   :  { %v454_v37 = vpop.xlane.xlu0 %453 }
 0x36f   :  { %3351 = vrcp.f32 %v454_v37 }
 0x376   :  { %v574_v38 = vpop.xlane.xlu1 %573 }
 0x377   :  { %3353 = vrcp.f32 %v574_v38 }
 0x379   :  { %v3352_v39 = vpop.eup %3351 }
 0x37a   :  { %v456_v40 = vmul.f32 %v3352_v39, %v3336_v0  ;;  %v581_v50 = vpop.permute.xlu1 %580 }
 0x37b   :  { %v586_v52 = vsel %vm348_vm9, %v581_v50, 0 }
 0x37c   :  { %v457_v41 = vpack.c.bf16 %v456_v40, %v456_v40 }
 0x37e   :  { %v693_v42 = vpop.xlane.xlu0 %692  ;;  %459 = vst.msk [vmem:[#allocation5 + $0x8] sm:$0xf] %vm343_vm10, %v457_v41  ;;  %v700_v55 = vpop.permute.xlu1 %699 }
 0x37f   :  { %3355 = vrcp.f32 %v693_v42  ;;  %v705_v57 = vsel %vm348_vm9, %v700_v55, 0 }
 0x381   :  { %v3354_v43 = vpop.eup %3353 }
 0x382   :  { %v576_v44 = vmul.f32 %v3354_v43, %v3338_v9  ;;  %v462_v45 = vpop.permute.xlu0 %461 }
 0x383   :  { %v467_v49 = vsel %vm348_vm9, %v462_v45, 0  ;;  %v3317_v45 = vld [vmem:[%s4355_s8] sm:$0xff]  }
 0x384   :  { %3063 = vmatpush3.bf16.msra.mxu0 %v467_v49  ;;  %v577_v51 = vpack.c.bf16 %v576_v44, %v576_v44  ;;  %3141 = vmatpush3.bf16.msra.mxu1 %v3317_v45  ;;  %v3318_v49 = vld [vmem:[%s4355_s8 + $0x8] sm:$0xff]  }
 0x385   :  { %3074 = vmatprep.subr.bf16.mxu0 %v3479_v1  ;;  %3142 = vmatprep.subr.bf16.mxu1 %v3479_v1 }
 0x386   :  { %579 = vst.msk [vmem:[#allocation5 + $0x10] sm:$0xf] %vm343_vm10, %v577_v51 }
 0x387   :  { %3065 = vmatmul.mubr.msk.bf16.vlgmr.msra.gmra.mrb[12].mxu0 %vm283_vm2, %v457_v41 }
 0x388   :  { %3075 = vmatpush3.bf16.msra.mxu0 %v586_v52  ;;  %3076 = vmatprep.mubr.msk.bf16.mxu0 %vm3480_vm0, %v3479_v1 }
 0x389   :  { %v3356_v53 = vpop.eup %3355  ;;  %3086 = vmatprep.subr.bf16.mxu0 %v3479_v1  ;;  %3143 = vmatpush3.bf16.msra.mxu1 %v3318_v49  ;;  %v2879_v49 = vld [vmem:[%s4358_s4] ss:$0 sm:$0xff] }
 0x38a   :  { %v695_v54 = vmul.f32 %v3356_v53, %v3810_v60  ;;  %3156 = vmatprep.subr.bf16.mxu1 %v3479_v1 }
 0x38c   :  { %v696_v56 = vpack.c.bf16 %v695_v54, %v695_v54 }
 0x38e   :  { %698 = vst.msk [vmem:[#allocation5 + $0x18] sm:$0xf] %vm343_vm10, %v696_v56 }
 0x38f   :  { %3077 = vmatmul.mubr.msk.bf16.vlgmr.msra.gmra.mrb[16].mxu0 %vm283_vm2, %v577_v51 }
 0x390   :  { %3087 = vmatpush3.bf16.msra.mxu0 %v705_v57  ;;  %3088 = vmatprep.mubr.msk.bf16.mxu0 %vm3480_vm0, %v3479_v1 }
 0x391   :  { %3098 = vmatprep.subr.bf16.mxu0 %v3479_v1 }
 0x397   :  { %3089 = vmatmul.mubr.msk.bf16.vlgmr.msra.gmra.mrb[20].mxu0 %vm283_vm2, %v696_v56 }
 0x398   :  { %3099 = vmatpush3.bf16.msra.mxu0 %v827_v58  ;;  %3100 = vmatprep.mubr.msk.bf16.mxu0 %vm3480_vm0, %v3479_v1 }
 0x399   :  { %3110 = vmatprep.subr.bf16.mxu0 %v3479_v1 }
 0x3af   :  { %v816_v59 = vpop.xlane.xlu1 %815 }
 0x3b0   :  { %3357 = vrcp.f32 %v816_v59 }
 0x3b3   :  { %v929_v61 = vpop.xlane.xlu1 %928  ;;  %v1047_v62 = vpop.xlane.xlu0 %1046 }
 0x3b4   :  { %3359 = vrcp.f32 %v929_v61 }
 0x3b5   :  { %3361 = vrcp.f32 %v1047_v62 }
 0x3b7   :  { %v1165_v63 = vpop.xlane.xlu1 %1164  ;;  %v936_v4 = vpop.permute.xlu0 %935 }
 0x3b8   :  { %3363 = vrcp.f32 %v1165_v63  ;;  %v941_v60 = vsel %vm348_vm9, %v936_v4, 0 }
 0x3ba   :  { %v3358_v0 = vpop.eup %3357 }
 0x3bb   :  { %v818_v2 = vmul.f32 %v3358_v0, %v3827_v28  ;;  %v1054_v16 = vpop.permute.xlu1 %1053  ;;  %v1172_v19 = vpop.permute.xlu0 %1171 }
 0x3bc   :  { %v1059_v18 = vsel %vm348_vm9, %v1054_v16, 0  ;;  %v1177_v21 = vsel %vm348_vm9, %v1172_v19, 0 }
 0x3bd   :  { %v819_v7 = vpack.c.bf16 %v818_v2, %v818_v2 }
 0x3be   :  { %v3360_v8 = vpop.eup %3359 }
 0x3bf   :  { %v3362_v9 = vpop.eup %3361  ;;  %v931_v11 = vmul.f32 %v3360_v8, %v3829_v30  ;;  %821 = vst.msk [vmem:[#allocation5 + $0x4] sm:$0xf] %vm343_vm10, %v819_v7  ;;  %3101 = vmatmul.mubr.msk.bf16.vlgmr.msra.gmra.mrb[24].mxu0 %vm283_vm2, %v819_v7  ;;  %v2875_v8 = vld [vmem:[%s4356_s30] ss:$0 sm:$0xff] }
 0x3c0   :  { %v1049_v3 = vmul.f32 %v3362_v9, %v3833_v29  ;;  %3111 = vmatpush3.bf16.msra.mxu0 %v941_v60  ;;  %3112 = vmatprep.mubr.msk.bf16.mxu0 %vm3480_vm0, %v3479_v1 }
 0x3c1   :  { %3122 = vmatprep.subr.bf16.mxu0 %v3479_v1  ;;  %v932_v12 = vpack.c.bf16 %v931_v11, %v931_v11 }
 0x3c2   :  { %v3364_v14 = vpop.eup %3363  ;;  %v1050_v15 = vpack.c.bf16 %v1049_v3, %v1049_v3 }
 0x3c3   :  { %v1167_v13 = vmul.f32 %v3364_v14, %v3839_v34  ;;  %934 = vst.msk [vmem:[#allocation5 + $0xc] sm:$0xf] %vm343_vm10, %v932_v12 }
 0x3c4   :  { %1052 = vst.msk [vmem:[#allocation5 + $0x14] sm:$0xf] %vm343_vm10, %v1050_v15 }
 0x3c5   :  { %v1168_v17 = vpack.c.bf16 %v1167_v13, %v1167_v13 }
 0x3c7   :  { %3113 = vmatmul.mubr.msk.bf16.vlgmr.msra.gmra.mrb[28].mxu0 %vm283_vm2, %v932_v12  ;;  %1170 = vst.msk [vmem:[#allocation5 + $0x1c] sm:$0xf] %vm343_vm10, %v1168_v17 }
 0x3c8   :  { %3123 = vmatpush3.bf16.msra.mxu0 %v1059_v18  ;;  %3124 = vmatprep.mubr.msk.bf16.mxu0 %vm3480_vm0, %v3479_v1 }
 0x3c9   :  { %3134 = vmatprep.subr.bf16.mxu0 %v3479_v1 }
 0x3cf   :  { %3125 = vmatmul.mubr.msk.bf16.vlgmr.msra.gmra.mrb[32].mxu0 %vm283_vm2, %v1050_v15 }
 0x3d0   :  { %3135 = vmatpush3.bf16.msra.mxu0 %v1177_v21  ;;  %3136 = vmatprep.mubr.msk.bf16.mxu0 %vm3480_vm0, %v3479_v1 }
 0x3d1   :  { %3148 = vmatprep.subr.bf16.mxu0 %v3479_v1 }
 0x3d7   :  { %3137 = vmatmul.mubr.msk.bf16.vlgmr.msra.gmra.mrb[36].mxu0 %vm283_vm2, %v1168_v17 }
 0x3d8   :  { %3152 = vmatprep.mubr.msk.bf16.mxu0 %vm3480_vm0, %v3479_v1 }
 0x3df   :  { %v386_v22 = vpop.f32.mrb[8].mxu0 }
 0x3e0   :  { %392 = vst.msk [vmem:[#allocation2] sm:$0xff] %vm283_vm2, %v386_v22  ;;  %v3054_v23 = vpop.f32.mrb[9].mxu0 }
 0x3e1   :  { %v389_v24 = vpop.f32.mrb[10].mxu0  ;;  %v85_v23 = vld [vmem:[%s4357_s0] sm:$0xff] }
 0x3e2   :  { %v3055_v25 = vpop.f32.mrb[11].mxu0  ;;  %v86_v24 = vld [vmem:[%s4357_s0 + $0x8] sm:$0xff] }
 0x3e3   :  { %v3941_v25 = vpack.c.bf16 %v86_v24, %v85_v23 }
 0x45a   :  { %v503_v26 = vpop.f32.mrb[12].mxu0 }
 0x45b   :  { %510 = vrot.lane.b32.xlu0 %v503_v26, %s3485_s5  ;;  %v3066_v27 = vpop.f32.mrb[13].mxu0  ;;  %v3321_v26 = vld [vmem:[%s4313_s11] sm:$0xff]  }
 0x45c   :  { %v506_v20 = vpop.f32.mrb[14].mxu0  ;;  %3149 = vmatpush3.bf16.msra.mxu0 %v3321_v26  ;;  %v3322_v27 = vld [vmem:[%s4313_s11 + $0x8] sm:$0xff]   ;;  %s4360_s11 = sld [smem:[#allocation11_spill]] }
 0x45d   :  { %v3067_v28 = vpop.f32.mrb[15].mxu0  ;;  %3150 = vmatprep.subr.bf16.mxu0 %v3479_v1 }
 0x460   :  { %3151 = vmatpush3.bf16.msra.mxu0 %v3322_v27 }
 0x461   :  { %3164 = vmatprep.subr.bf16.mxu0 %v3479_v1 }
 0x462   :  { %v622_v30 = vpop.f32.mrb[16].mxu0 }
 0x463   :  { %629 = vrot.lane.b32.xlu0 %v622_v30, %s3486_s10  ;;  %v3078_v31 = vpop.f32.mrb[17].mxu0 }
 0x464   :  { %v625_v29 = vpop.f32.mrb[18].mxu0 }
 0x465   :  { %v3079_v32 = vpop.f32.mrb[19].mxu0 }
 0x46a   :  { %v741_v33 = vpop.f32.mrb[20].mxu0 }
 0x46b   :  { %748 = vrot.lane.b32.xlu0 %v741_v33, %s3487_s6  ;;  %v3090_v34 = vpop.f32.mrb[21].mxu0 }
 0x46c   :  { %v744_v35 = vpop.f32.mrb[22].mxu0 }
 0x46d   :  { %v3091_v36 = vpop.f32.mrb[23].mxu0 }
 0x492   :  { %v863_v37 = vpop.f32.mrb[24].mxu0 }
 0x493   :  { %869 = vst.msk [vmem:[#allocation2 + $0x8] sm:$0xff] %vm283_vm2, %v863_v37  ;;  %v3102_v38 = vpop.f32.mrb[25].mxu0 }
 0x494   :  { %v866_v39 = vpop.f32.mrb[26].mxu0 }
 0x495   :  { %v3103_v40 = vpop.f32.mrb[27].mxu0 }
 0x49a   :  { %v977_v41 = vpop.f32.mrb[28].mxu0 }
 0x49b   :  { %984 = vrot.lane.b32.xlu1 %v977_v41, %s3485_s5  ;;  %v3114_v42 = vpop.f32.mrb[29].mxu0 }
 0x49c   :  { %v980_v43 = vpop.f32.mrb[30].mxu0 }
 0x49d   :  { %v3115_v44 = vpop.f32.mrb[31].mxu0 }
 0x4a2   :  { %v1095_v50 = vpop.f32.mrb[32].mxu0 }
 0x4a3   :  { %1102 = vrot.lane.b32.xlu1 %v1095_v50, %s3486_s10  ;;  %v3126_v51 = vpop.f32.mrb[33].mxu0 }
 0x4a4   :  { %v1098_v52 = vpop.f32.mrb[34].mxu0 }
 0x4a5   :  { %v3127_v53 = vpop.f32.mrb[35].mxu0 }
 0x4aa   :  { %v1213_v54 = vpop.f32.mrb[36].mxu0 }
 0x4ab   :  { %1220 = vrot.lane.b32.xlu1 %v1213_v54, %s3487_s6  ;;  %v3138_v55 = vpop.f32.mrb[37].mxu0  ;;  %v2880_v54 = vld [vmem:[%s4359_s9] ss:$0 sm:$0xff] }
 0x4ac   :  { %v1216_v56 = vpop.f32.mrb[38].mxu0 }
 0x4ad   :  { %v3139_v57 = vpop.f32.mrb[39].mxu0 }
 0x4cd   :  { %v511_v58 = vpop.permute.xlu0 %510 }
 0x4ce   :  { %514 = vst.msk [vmem:[#allocation2] sm:$0xff] %vm513_vm11, %v511_v58 }
 0x4d5   :  { %v630_v59 = vpop.permute.xlu0 %629 }
 0x4d6   :  { %633 = vst.msk [vmem:[#allocation2] sm:$0xff] %vm632_vm12, %v630_v59 }
 0x4dd   :  { %v749_v61 = vpop.permute.xlu0 %748 }
 0x4de   :  { %752 = vst.msk [vmem:[#allocation2] sm:$0xff] %vm751_vm13, %v749_v61 }
 0x4e5   :  { %v1224_v2 = vld [vmem:[#allocation2] sm:$0xff] }
 0x50d   :  { %v985_v62 = vpop.permute.xlu1 %984 }
 0x50e   :  { %987 = vst.msk [vmem:[#allocation2 + $0x8] sm:$0xff] %vm513_vm11, %v985_v62 }
 0x515   :  { %v1103_v63 = vpop.permute.xlu1 %1102 }
 0x516   :  { %1105 = vst.msk [vmem:[#allocation2 + $0x8] sm:$0xff] %vm632_vm12, %v1103_v63 }
 0x51d   :  { %v1221_v0 = vpop.permute.xlu1 %1220 }
 0x51e   :  { %1223 = vst.msk [vmem:[#allocation2 + $0x8] sm:$0xff] %vm751_vm13, %v1221_v0 }
 0x525   :  { %v1225_v4 = vld [vmem:[#allocation2 + $0x8] sm:$0xff] }
 0x526   :  { %v1226_v7 = vpack.c.bf16 %v1225_v4, %v1224_v2 }
 0x528   :  { %3145 = vmatmul.mubr.msk.bf16.vlgmr.msra.gmra.mrb[36].mxu1 %vm111_vm1, %v1226_v7 }
 0x529   :  { %3160 = vmatprep.mubr.msk.bf16.mxu1 %vm3480_vm0, %v3479_v1 }
 0x5fb   :  { %v1287_v9 = vpop.f32.mrb[36].mxu1 }
 0x5fc   :  { %v1288_v11 = vadd.f32 %v2875_v8, %v1287_v9  ;;  %v3146_v60 = vpop.f32.mrb[37].mxu1 }
 0x5fd   :  { %v1290_v3 = vpop.f32.mrb[38].mxu1 }
 0x5fe   :  { %v1294_v12 = vadd.f32 %v1288_v11, %v3650_v5  ;;  %v1291_v14 = vadd.f32 %v2875_v8, %v1290_v3  ;;  %v3147_v15 = vpop.f32.mrb[39].mxu1  ;;  %v3319_v5 = vld [vmem:[%s4314_s12] sm:$0xff]  }
 0x5ff   :  { %3157 = vmatpush3.bf16.msra.mxu1 %v3319_v5 }
 0x600   :  { %v1295_v13 = vadd.f32 %v1291_v14, %v3655_v6  ;;  %v1298_v16 = vsel %vm111_vm1, %v1294_v12, 0.0  ;;  %v1307_v17 = vmul.f32 %v1294_v12, %v1294_v12  ;;  %3158 = vmatprep.subr.bf16.mxu1 %v3479_v1  ;;  %v3320_v6 = vld [vmem:[%s4314_s12 + $0x8] sm:$0xff]  }
 0x601   :  { %1299 = vadd.xlane.f32.xlu0 %v1298_v16  ;;  %v3323_v16 = vld [vmem:[%s4315_s13] sm:$0xff]  }
 0x602   :  { %v1301_v18 = vsel %vm111_vm1, %v1295_v13, 0.0  ;;  %v1309_v19 = vsel %vm111_vm1, %v1307_v17, 0.0  ;;  %v1308_v21 = vmul.f32 %v1295_v13, %v1295_v13  ;;  %v3324_v17 = vld [vmem:[%s4315_s13 + $0x8] sm:$0xff]  }
 0x603   :  { %1302 = vadd.xlane.f32.xlu1 %v1301_v18  ;;  %3159 = vmatpush3.bf16.msra.mxu1 %v3320_v6 }
 0x604   :  { %v1312_v22 = vsel %vm111_vm1, %v1308_v21, 0.0  ;;  %3172 = vmatprep.subr.bf16.mxu1 %v3479_v1 }
 0x605   :  { %1310 = vadd.xlane.f32.xlu0 %v1309_v19 }
 0x606   :  { %3161 = vmatmul.mubr.msk.bf16.vlgmr.msra.gmra.mrb[40].mxu1 %vm111_vm1, %v3941_v25 }
 0x607   :  { %3174 = vmatprep.mubr.msk.bf16.mxu1 %vm3480_vm0, %v3479_v1 }
 0x609   :  { %1313 = vadd.xlane.f32.xlu0 %v1312_v22 }
 0x68e   :  { %v1300_v20 = vpop.xlane.xlu0 %1299 }
 0x68f   :  { %v1305_v28 = vmul.f32 0.03125, %v1300_v20 }
 0x690   :  { %v1303_v30 = vpop.xlane.xlu1 %1302 }
 0x691   :  { %v1317_v29 = vmul.f32 %v1305_v28, %v1305_v28  ;;  %v1306_v32 = vmul.f32 0.03125, %v1303_v30  ;;  %v1323_v43 = vsub.f32 %v1294_v12, %v1305_v28 }
 0x692   :  { %v1311_v31 = vpop.xlane.xlu0 %1310 }
 0x693   :  { %v1315_v33 = vmul.f32 0.03125, %v1311_v31  ;;  %v1318_v36 = vmul.f32 %v1306_v32, %v1306_v32  ;;  %v1324_v50 = vsub.f32 %v1295_v13, %v1306_v32 }
 0x695   :  { %v1319_v34 = vsub.f32 %v1315_v33, %v1317_v29  ;;  %v88_v33 = vld [vmem:[%s4360_s11] sm:$0x3] }
 0x696   :  { %v1314_v35 = vpop.xlane.xlu0 %1313  ;;  %vm1531_vm14 = vcmp.eq.s32.totalorder %v88_v33, 0 }
 0x697   :  { %v1321_v37 = vmax.f32 %v1319_v34, 0.0  ;;  %v1316_v38 = vmul.f32 0.03125, %v1314_v35  ;;  %v1532_v34 = vsel %vm1531_vm14, 1, %v3484_v48 }
 0x698   :  { %v1536_v35 = vrot.slane %v1532_v34, %v279_v47 }
 0x699   :  { %v1325_v39 = vadd.f32 1e-05, %v1321_v37  ;;  %v1320_v40 = vsub.f32 %v1316_v38, %v1318_v36 }
 0x69a   :  { %vm1537_vm15 = vcmp.eq.s32.totalorder %v1536_v35, 1 }
 0x69b   :  { %3365 = vrsqrt.f32 %v1325_v39  ;;  %v1322_v41 = vmax.f32 %v1320_v40, 0.0 }
 0x69d   :  { %v1326_v42 = vadd.f32 1e-05, %v1322_v41 }
 0x69f   :  { %3367 = vrsqrt.f32 %v1326_v42 }
 0x6a5   :  { %v3366_v44 = vpop.eup %3365 }
 0x6a6   :  { %v1329_v45 = vmul.f32 %v3366_v44, %v1323_v43 }
 0x6a8   :  { %v1337_v53 = vmul.f32 %v2879_v49, %v1329_v45 }
 0x6a9   :  { %v3368_v51 = vpop.eup %3367 }
 0x6aa   :  { %v1330_v52 = vmul.f32 %v3368_v51, %v1324_v50  ;;  %v3962_v56 = vadd.f32 %v2880_v54, %v1337_v53 }
 0x6ac   :  { %v1338_v55 = vmul.f32 %v2879_v49, %v1330_v52 }
 0x6ae   :  { %v3964_v57 = vadd.f32 %v2880_v54, %v1338_v55 }
 0x6b0   :  { %v1347_v58 = vpack.c.bf16 %v3964_v57, %v3962_v56 }
 0x6b2   :  { %3153 = vmatmul.mubr.msk.bf16.vlgmr.msra.gmra.mrb[40].mxu0 %vm111_vm1, %v1347_v58 }
 0x6b3   :  { %3168 = vmatprep.mubr.msk.bf16.mxu0 %vm3480_vm0, %v3479_v1  ;;  %3165 = vmatpush3.bf16.msra.mxu0 %v3323_v16 }
 0x6b4   :  { %3166 = vmatprep.subr.bf16.mxu0 %v3479_v1 }
 0x6b7   :  { %3167 = vmatpush3.bf16.msra.mxu0 %v3324_v17 }
 0x6b8   :  { %3178 = vmatprep.subr.bf16.mxu0 %v3479_v1 }
 0x6ba   :  { %3169 = vmatmul.mubr.msk.bf16.vlgmr.msra.gmra.mrb[44].mxu0 %vm111_vm1, %v3941_v25 }
 0x6bb   :  { %3180 = vmatprep.mubr.msk.bf16.mxu0 %vm3480_vm0, %v3479_v1 }
 0x6d9   :  { %v1464_v59 = vpop.f32.mrb[40].mxu1 }
 0x6da   :  { %v3162_v61 = vpop.f32.mrb[41].mxu1 }
 0x6db   :  { %v1467_v62 = vpop.f32.mrb[42].mxu1 }
 0x6dc   :  { %v1529_v63 = vpack.c.bf16 %v1467_v62, %v1464_v59  ;;  %v3163_v0 = vpop.f32.mrb[43].mxu1 }
 0x6de   :  { %1649 = vrot.lane.b32.xlu1 %v1529_v63, %s3482_s3  ;;  %v1542_v2 = vsel %vm283_vm2, %v1529_v63, 0  ;;  %v2008_v15 = vrot.slane %v1529_v63, 4 }
 0x6df   :  { %3173 = vmatpush3.bf16.xpose.msra.mxu1 %v1542_v2 }
 0x6e0   :  { %3184 = vmatprep.subr.bf16.mxu1 %v3479_v1  ;;  %v2013_v24 = vsel %vm283_vm2, %v2008_v15, 0 }
 0x6e2   :  { %1768 = vrot.lane.b32.xlu1 %v1529_v63, %s3481_s27 }
 0x750   :  { %v1650_v12 = vpop.permute.xlu1 %1649 }
 0x751   :  { %v1655_v14 = vsel %vm283_vm2, %v1650_v12, 0 }
 0x754   :  { %v1769_v18 = vpop.permute.xlu1 %1768 }
 0x755   :  { %v1774_v21 = vsel %vm283_vm2, %v1769_v18, 0 }
 0x785   :  { %v1402_v4 = vpop.f32.mrb[40].mxu0 }
 0x786   :  { %v3154_v7 = vpop.f32.mrb[41].mxu0  ;;  %v1409_v9 = vmul.f32 0.17677669, %v1402_v4 }
 0x787   :  { %v1405_v8 = vpop.f32.mrb[42].mxu0 }
 0x788   :  { %v1410_v11 = vmul.f32 0.17677669, %v1405_v8  ;;  %v3155_v60 = vpop.f32.mrb[43].mxu0 }
 0x78a   :  { %v1528_v3 = vpack.c.bf16 %v1410_v11, %v1409_v9 }
 0x78c   :  { %1766 = vrot.lane.b32.xlu1 %v1528_v3, %s3481_s27  ;;  %1646 = vrot.lane.b32.xlu0 %v1528_v3, %s3482_s3  ;;  %v2007_v13 = vrot.slane %v1528_v3, 4 }
 0x78d   :  { %3175 = vmatmul.mubr.msk.bf16.vlgmr.msra.gmra.mrb[44].mxu1 %vm283_vm2, %v1528_v3 }
 0x78e   :  { %3185 = vmatpush3.bf16.xpose.msra.mxu1 %v1655_v14  ;;  %3186 = vmatprep.mubr.msk.bf16.mxu1 %vm3480_vm0, %v3479_v1 }
 0x78f   :  { %3196 = vmatprep.subr.bf16.mxu1 %v3479_v1 }
 0x790   :  { %1884 = vrot.lane.b32.xlu1 %v1528_v3, %s3483_s7  ;;  %1886 = vrot.lane.b32.xlu0 %v1529_v63, %s3483_s7  ;;  %v2005_v63 = vrot.slane %v1532_v34, %v755_v10 }
 0x792   :  { %vm2006_vm3 = vcmp.eq.s32.totalorder %v2005_v63, 1 }
 0x794   :  { %2120 = vrot.lane.b32.xlu0 %v2008_v15, %s3482_s3  ;;  %2118 = vrot.lane.b32.xlu1 %v2007_v13, %s3482_s3 }
 0x798   :  { %2238 = vrot.lane.b32.xlu0 %v2008_v15, %s3481_s27  ;;  %2236 = vrot.lane.b32.xlu1 %v2007_v13, %s3481_s27 }
 0x79c   :  { %2356 = vrot.lane.b32.xlu0 %v2008_v15, %s3483_s7  ;;  %2354 = vrot.lane.b32.xlu1 %v2007_v13, %s3483_s7 }
 0x7fe   :  { %v1647_v19 = vpop.permute.xlu0 %1646  ;;  %v1767_v5 = vpop.permute.xlu1 %1766 }
 0x7ff   :  { %3187 = vmatmul.mubr.msk.bf16.vlgmr.msra.gmra.mrb[48].mxu1 %vm283_vm2, %v1647_v19 }
 0x800   :  { %3197 = vmatpush3.bf16.xpose.msra.mxu1 %v1774_v21  ;;  %3198 = vmatprep.mubr.msk.bf16.mxu1 %vm3480_vm0, %v3479_v1 }
 0x801   :  { %3208 = vmatprep.subr.bf16.mxu1 %v3479_v1 }
 0x802   :  { %v1887_v22 = vpop.permute.xlu0 %1886  ;;  %v1885_v23 = vpop.permute.xlu1 %1884 }
 0x803   :  { %v1892_v6 = vsel %vm283_vm2, %v1887_v22, 0 }
 0x806   :  { %v2121_v25 = vpop.permute.xlu0 %2120  ;;  %v2119_v20 = vpop.permute.xlu1 %2118 }
 0x807   :  { %3199 = vmatmul.mubr.msk.bf16.vlgmr.msra.gmra.mrb[52].mxu1 %vm283_vm2, %v1767_v5  ;;  %v2126_v26 = vsel %vm283_vm2, %v2121_v25, 0 }
 0x808   :  { %3209 = vmatpush3.bf16.xpose.msra.mxu1 %v1892_v6  ;;  %3210 = vmatprep.mubr.msk.bf16.mxu1 %vm3480_vm0, %v3479_v1 }
 0x809   :  { %3220 = vmatprep.subr.bf16.mxu1 %v3479_v1 }
 0x80a   :  { %v2239_v27 = vpop.permute.xlu0 %2238  ;;  %v2237_v31 = vpop.permute.xlu1 %2236 }
 0x80b   :  { %v2244_v28 = vsel %vm283_vm2, %v2239_v27, 0 }
 0x80e   :  { %v2357_v30 = vpop.permute.xlu0 %2356  ;;  %v2355_v32 = vpop.permute.xlu1 %2354 }
 0x80f   :  { %3211 = vmatmul.mubr.msk.bf16.vlgmr.msra.gmra.mrb[56].mxu1 %vm283_vm2, %v1885_v23  ;;  %v2362_v29 = vsel %vm283_vm2, %v2357_v30, 0  ;;  %v1521_v30 = vpop.f32.mrb[44].mxu0 }
 0x810   :  { %3221 = vmatpush3.bf16.xpose.msra.mxu1 %v2013_v24  ;;  %3222 = vmatprep.mubr.msk.bf16.mxu1 %vm3480_vm0, %v3479_v1 }
 0x811   :  { %3232 = vmatprep.subr.bf16.mxu1 %v3479_v1 }
 0x817   :  { %3223 = vmatmul.mubr.msk.bf16.vlgmr.msra.gmra.mrb[60].mxu1 %vm283_vm2, %v2007_v13 }
 0x818   :  { %3233 = vmatpush3.bf16.xpose.msra.mxu1 %v2126_v26  ;;  %3234 = vmatprep.mubr.msk.bf16.mxu1 %vm3480_vm0, %v3479_v1 }
 0x819   :  { %3244 = vmatprep.subr.bf16.mxu1 %v3479_v1 }
 0x81f   :  { %3235 = vmatmul.mubr.msk.bf16.vlgmr.msra.gmra.mrb[64].mxu1 %vm283_vm2, %v2119_v20 }
 0x820   :  { %3245 = vmatpush3.bf16.xpose.msra.mxu1 %v2244_v28  ;;  %3246 = vmatprep.mubr.msk.bf16.mxu1 %vm3480_vm0, %v3479_v1 }
 0x821   :  { %3256 = vmatprep.subr.bf16.mxu1 %v3479_v1 }
 0x827   :  { %3247 = vmatmul.mubr.msk.bf16.vlgmr.msra.gmra.mrb[68].mxu1 %vm283_vm2, %v2237_v31  ;;  %v3170_v31 = vpop.f32.mrb[45].mxu0 }
 0x828   :  { %3257 = vmatpush3.bf16.xpose.msra.mxu1 %v2362_v29  ;;  %3258 = vmatprep.mubr.msk.bf16.mxu1 %vm3480_vm0, %v3479_v1  ;;  %v1524_v29 = vpop.f32.mrb[46].mxu0 }
 0x829   :  { %3268 = vmatprep.subr.bf16.mxu1 %v3479_v1  ;;  %v3171_v33 = vpop.f32.mrb[47].mxu0 }
 0x82f   :  { %3259 = vmatmul.mubr.msk.bf16.vlgmr.msra.gmra.mrb[72].mxu1 %vm283_vm2, %v2355_v32  ;;  %v4078_v32 = vpack.c.bf16 %v1524_v29, %v1521_v30 }
 0x830   :  { %3272 = vmatprep.mubr.msk.bf16.mxu1 %vm3480_vm0, %v3479_v1 }
 0x831   :  { %v1602_v34 = vsel %vm348_vm9, %v4078_v32, 0 }
 0x832   :  { %3179 = vmatpush3.bf16.msra.mxu0 %v1602_v34 }
 0x833   :  { %3190 = vmatprep.subr.bf16.mxu0 %v3479_v1 }
 0x860   :  { %v1578_v36 = vpop.f32.mrb[44].mxu1 }
 0x861   :  { %v1584_v37 = vsel %vm1537_vm15, -1e+30, %v1578_v36  ;;  %v3176_v38 = vpop.f32.mrb[45].mxu1 }
 0x862   :  { %v1581_v39 = vpop.f32.mrb[46].mxu1  ;;  %v1585_v40 = vsel %vm283_vm2, %v1584_v37, -inf }
 0x863   :  { %1586 = vmax.xlane.f32.xlu0 %v1585_v40  ;;  %v3177_v41 = vpop.f32.mrb[47].mxu1 }
 0x8d2   :  { %v1691_v42 = vpop.f32.mrb[48].mxu1 }
 0x8d3   :  { %v4044_v43 = vsel %vm1537_vm15, -1e+30, %v1691_v42  ;;  %v3188_v44 = vpop.f32.mrb[49].mxu1 }
 0x8d4   :  { %v1694_v45 = vpop.f32.mrb[50].mxu1  ;;  %v1698_v48 = vsel %vm283_vm2, %v4044_v43, -inf }
 0x8d5   :  { %1699 = vmax.xlane.f32.xlu1 %v1698_v48  ;;  %v3189_v47 = vpop.f32.mrb[51].mxu1 }
 0x8da   :  { %v1810_v49 = vpop.f32.mrb[52].mxu1 }
 0x8db   :  { %v4049_v50 = vsel %vm1537_vm15, -1e+30, %v1810_v49  ;;  %v3200_v51 = vpop.f32.mrb[53].mxu1 }
 0x8dc   :  { %v1813_v52 = vpop.f32.mrb[54].mxu1  ;;  %v1817_v53 = vsel %vm283_vm2, %v4049_v50, -inf }
 0x8dd   :  { %1818 = vmax.xlane.f32.xlu0 %v1817_v53  ;;  %v3201_v54 = vpop.f32.mrb[55].mxu1 }
 0x8e2   :  { %v1928_v55 = vpop.f32.mrb[56].mxu1 }
 0x8e3   :  { %v4054_v58 = vsel %vm1537_vm15, -1e+30, %v1928_v55  ;;  %v3212_v59 = vpop.f32.mrb[57].mxu1 }
 0x8e4   :  { %v1931_v61 = vpop.f32.mrb[58].mxu1  ;;  %v1935_v62 = vsel %vm283_vm2, %v4054_v58, -inf }
 0x8e5   :  { %1936 = vmax.xlane.f32.xlu0 %v1935_v62  ;;  %v3213_v0 = vpop.f32.mrb[59].mxu1 }
 0x8ea   :  { %v2049_v2 = vpop.f32.mrb[60].mxu1 }
 0x8eb   :  { %v4061_v4 = vsel %vm2006_vm3, -1e+30, %v2049_v2  ;;  %v3224_v7 = vpop.f32.mrb[61].mxu1 }
 0x8ec   :  { %v2052_v8 = vpop.f32.mrb[62].mxu1  ;;  %v2056_v9 = vsel %vm283_vm2, %v4061_v4, -inf }
 0x8ed   :  { %2057 = vmax.xlane.f32.xlu1 %v2056_v9  ;;  %v3225_v11 = vpop.f32.mrb[63].mxu1 }
 0x8f0   :  { %v1587_v60 = vpop.xlane.xlu0 %1586 }
 0x8f1   :  { %v1588_v3 = vsub.f32 %v1584_v37, %v1587_v60 }
 0x8f2   :  { %v2162_v12 = vpop.f32.mrb[64].mxu1 }
 0x8f3   :  { %v1589_v14 = vmul.f32 1.442695, %v1588_v3  ;;  %v4066_v46 = vsel %vm2006_vm3, -1e+30, %v2162_v12  ;;  %v3236_v10 = vpop.f32.mrb[65].mxu1 }
 0x8f4   :  { %v2165_v15 = vpop.f32.mrb[66].mxu1  ;;  %v2169_v13 = vsel %vm283_vm2, %v4066_v46, -inf }
 0x8f5   :  { %3369 = vpow2.f32 %v1589_v14  ;;  %2170 = vmax.xlane.f32.xlu0 %v2169_v13  ;;  %v3237_v16 = vpop.f32.mrb[67].mxu1  ;;  %v2070_v13 = vrot.slane %v4078_v32, 4 }
 0x8fa   :  { %v2280_v17 = vpop.f32.mrb[68].mxu1 }
 0x8fb   :  { %v4071_v18 = vsel %vm2006_vm3, -1e+30, %v2280_v17  ;;  %v3248_v19 = vpop.f32.mrb[69].mxu1 }
 0x8fc   :  { %v2283_v21 = vpop.f32.mrb[70].mxu1  ;;  %v2287_v22 = vsel %vm283_vm2, %v4071_v18, -inf }
 0x8fd   :  { %2288 = vmax.xlane.f32.xlu1 %v2287_v22  ;;  %v3249_v5 = vpop.f32.mrb[71].mxu1 }
 0x8ff   :  { %v3370_v6 = vpop.eup %3369 }
 0x900   :  { %v1591_v23 = vsel %vm283_vm2, %v3370_v6, 0.0 }
 0x901   :  { %1592 = vadd.xlane.f32.xlu1 %v1591_v23 }
 0x902   :  { %v2398_v24 = vpop.f32.mrb[72].mxu1 }
 0x903   :  { %v2404_v25 = vsel %vm2006_vm3, -1e+30, %v2398_v24  ;;  %v3260_v26 = vpop.f32.mrb[73].mxu1 }
 0x904   :  { %v2401_v27 = vpop.f32.mrb[74].mxu1  ;;  %v2405_v20 = vsel %vm283_vm2, %v2404_v25, -inf }
 0x905   :  { %2406 = vmax.xlane.f32.xlu0 %v2405_v20  ;;  %v3261_v28 = vpop.f32.mrb[75].mxu1 }
 0x962   :  { %v1700_v35 = vpop.xlane.xlu1 %1699 }
 0x963   :  { %v1701_v36 = vsub.f32 %v4044_v43, %v1700_v35 }
 0x965   :  { %v1702_v37 = vmul.f32 1.442695, %v1701_v36 }
 0x967   :  { %3371 = vpow2.f32 %v1702_v37 }
 0x96a   :  { %v1819_v38 = vpop.xlane.xlu0 %1818 }
 0x96b   :  { %v1820_v39 = vsub.f32 %v4049_v50, %v1819_v38 }
 0x96d   :  { %v1821_v40 = vmul.f32 1.442695, %v1820_v39 }
 0x96f   :  { %3373 = vpow2.f32 %v1821_v40 }
 0x971   :  { %v3372_v41 = vpop.eup %3371 }
 0x972   :  { %v1937_v42 = vpop.xlane.xlu0 %1936  ;;  %v1704_v44 = vsel %vm283_vm2, %v3372_v41, 0.0 }
 0x973   :  { %v1938_v45 = vsub.f32 %v4054_v58, %v1937_v42  ;;  %1705 = vadd.xlane.f32.xlu0 %v1704_v44 }
 0x975   :  { %v1939_v48 = vmul.f32 1.442695, %v1938_v45 }
 0x977   :  { %3375 = vpow2.f32 %v1939_v48 }
 0x979   :  { %v3374_v47 = vpop.eup %3373 }
 0x97a   :  { %v1823_v49 = vsel %vm283_vm2, %v3374_v47, 0.0  ;;  %v2058_v51 = vpop.xlane.xlu1 %2057 }
 0x97b   :  { %1824 = vadd.xlane.f32.xlu1 %v1823_v49  ;;  %v2059_v59 = vsub.f32 %v4061_v4, %v2058_v51 }
 0x97d   :  { %v2060_v63 = vmul.f32 1.442695, %v2059_v59 }
 0x981   :  { %v4088_v43 = vpop.eup %3375 }
 0x982   :  { %v1941_v50 = vsel %vm283_vm2, %v4088_v43, 0.0  ;;  %v2171_v61 = vpop.xlane.xlu0 %2170 }
 0x983   :  { %1942 = vadd.xlane.f32.xlu0 %v1941_v50  ;;  %v2172_v62 = vsub.f32 %v4066_v46, %v2171_v61 }
 0x985   :  { %v2173_v7 = vmul.f32 1.442695, %v2172_v62 }
 0x98a   :  { %v2289_v52 = vpop.xlane.xlu1 %2288 }
 0x98b   :  { %v2290_v0 = vsub.f32 %v4071_v18, %v2289_v52 }
 0x98c   :  { %1831 = vrot.lane.b32.xlu1 %v4078_v32, %s3481_s27 }
 0x98d   :  { %v2291_v8 = vmul.f32 1.442695, %v2290_v0 }
 0x98e   :  { %v1593_v53 = vpop.xlane.xlu1 %1592 }
 0x98f   :  { %3377 = vrcp.f32 %v1593_v53 }
 0x990   :  { %1949 = vrot.lane.b32.xlu1 %v4078_v32, %s3483_s7  ;;  %3379 = vpow2.f32 %v2060_v63 }
 0x991   :  { %3381 = vpow2.f32 %v2173_v7 }
 0x992   :  { %v2407_v2 = vpop.xlane.xlu0 %2406  ;;  %3383 = vpow2.f32 %v2291_v8 }
 0x993   :  { %v2408_v9 = vsub.f32 %v2404_v25, %v2407_v2 }
 0x995   :  { %v2409_v4 = vmul.f32 1.442695, %v2408_v9 }
 0x997   :  { %3385 = vpow2.f32 %v2409_v4 }
 0x999   :  { %1713 = vrot.lane.b32.xlu0 %v4078_v32, %s3482_s3  ;;  %v3378_v54 = vpop.eup %3377  ;;  %v2075_v32 = vsel %vm348_vm9, %v2070_v13, 0 }
 0x99a   :  { %v1595_v55 = vmul.f32 %v3378_v54, %v3370_v6  ;;  %v4105_v11 = vpop.eup %3379 }
 0x99b   :  { %v4107_v60 = vpop.eup %3381  ;;  %v2062_v3 = vsel %vm283_vm2, %v4105_v11, 0.0 }
 0x99c   :  { %v1596_v58 = vpack.c.bf16 %v1595_v55, %v1595_v55  ;;  %v4111_v12 = vpop.eup %3383  ;;  %v2175_v14 = vsel %vm283_vm2, %v4107_v60, 0.0 }
 0x99d   :  { %v2293_v46 = vsel %vm283_vm2, %v4111_v12, 0.0 }
 0x99e   :  { %1597 = vst.msk [vmem:[#allocation7] sm:$0xf] %vm343_vm10, %v1596_v58  ;;  %3181 = vmatmul.mubr.msk.bf16.vlgmr.msra.gmra.mrb[48].mxu0 %vm283_vm2, %v1596_v58 }
 0x99f   :  { %3192 = vmatprep.mubr.msk.bf16.mxu0 %vm3480_vm0, %v3479_v1 }
 0x9a1   :  { %v4117_v10 = vpop.eup %3385 }
 0x9a2   :  { %v2411_v15 = vsel %vm283_vm2, %v4117_v10, 0.0 }
 0x9b4   :  { %2063 = vadd.xlane.f32.xlu1 %v2062_v3 }
 0x9b8   :  { %2176 = vadd.xlane.f32.xlu1 %v2175_v14  ;;  %2294 = vadd.xlane.f32.xlu0 %v2293_v46 }
 0x9bc   :  { %2412 = vadd.xlane.f32.xlu1 %v2411_v15 }
 0x9cd   :  { %2301 = vrot.lane.b32.xlu1 %v2070_v13, %s3481_s27 }
 0x9ce   :  { %2183 = vrot.lane.b32.xlu0 %v2070_v13, %s3482_s3 }
 0x9d2   :  { %2419 = vrot.lane.b32.xlu0 %v2070_v13, %s3483_s7 }
 0xa00   :  { %v1706_v16 = vpop.xlane.xlu0 %1705 }
 0xa01   :  { %3387 = vrcp.f32 %v1706_v16 }
 0xa08   :  { %v1825_v17 = vpop.xlane.xlu1 %1824 }
 0xa09   :  { %3389 = vrcp.f32 %v1825_v17 }
 0xa0b   :  { %v3388_v18 = vpop.eup %3387 }
 0xa0c   :  { %v1708_v19 = vmul.f32 %v3388_v18, %v3372_v41  ;;  %v1832_v25 = vpop.permute.xlu1 %1831 }
 0xa0d   :  { %v1837_v27 = vsel %vm348_vm9, %v1832_v25, 0 }
 0xa0e   :  { %v1709_v21 = vpack.c.bf16 %v1708_v19, %v1708_v19 }
 0xa10   :  { %v1943_v22 = vpop.xlane.xlu0 %1942  ;;  %1711 = vst.msk [vmem:[#allocation7 + $0x8] sm:$0xf] %vm343_vm10, %v1709_v21  ;;  %v1950_v30 = vpop.permute.xlu1 %1949 }
 0xa11   :  { %3391 = vrcp.f32 %v1943_v22  ;;  %v1955_v29 = vsel %vm348_vm9, %v1950_v30, 0  ;;  %v3326_v22 = vld [vmem:[%s4316_s14 + $0x8] sm:$0xff]  }
 0xa13   :  { %v3390_v5 = vpop.eup %3389 }
 0xa14   :  { %v1827_v6 = vmul.f32 %v3390_v5, %v3374_v47  ;;  %v1714_v23 = vpop.permute.xlu0 %1713 }
 0xa15   :  { %v1719_v24 = vsel %vm348_vm9, %v1714_v23, 0 }
 0xa16   :  { %3191 = vmatpush3.bf16.msra.mxu0 %v1719_v24  ;;  %v1828_v26 = vpack.c.bf16 %v1827_v6, %v1827_v6 }
 0xa17   :  { %3202 = vmatprep.subr.bf16.mxu0 %v3479_v1 }
 0xa18   :  { %1830 = vst.msk [vmem:[#allocation7 + $0x10] sm:$0xf] %vm343_vm10, %v1828_v26 }
 0xa19   :  { %3193 = vmatmul.mubr.msk.bf16.vlgmr.msra.gmra.mrb[52].mxu0 %vm283_vm2, %v1709_v21  ;;  %v3325_v21 = vld [vmem:[%s4316_s14] sm:$0xff]  }
 0xa1a   :  { %3203 = vmatpush3.bf16.msra.mxu0 %v1837_v27  ;;  %3204 = vmatprep.mubr.msk.bf16.mxu0 %vm3480_vm0, %v3479_v1 }
 0xa1b   :  { %v3392_v20 = vpop.eup %3391  ;;  %3214 = vmatprep.subr.bf16.mxu0 %v3479_v1  ;;  %3269 = vmatpush3.bf16.msra.mxu1 %v3325_v21 }
 0xa1c   :  { %v1945_v28 = vmul.f32 %v3392_v20, %v4088_v43  ;;  %3270 = vmatprep.subr.bf16.mxu1 %v3479_v1 }
 0xa1e   :  { %v1946_v31 = vpack.c.bf16 %v1945_v28, %v1945_v28 }
 0xa1f   :  { %3271 = vmatpush3.bf16.msra.mxu1 %v3326_v22 }
 0xa20   :  { %1948 = vst.msk [vmem:[#allocation7 + $0x18] sm:$0xf] %vm343_vm10, %v1946_v31  ;;  %3284 = vmatprep.subr.bf16.mxu1 %v3479_v1 }
 0xa21   :  { %3205 = vmatmul.mubr.msk.bf16.vlgmr.msra.gmra.mrb[56].mxu0 %vm283_vm2, %v1828_v26 }
 0xa22   :  { %3215 = vmatpush3.bf16.msra.mxu0 %v1955_v29  ;;  %3216 = vmatprep.mubr.msk.bf16.mxu0 %vm3480_vm0, %v3479_v1 }
 0xa23   :  { %3226 = vmatprep.subr.bf16.mxu0 %v3479_v1 }
 0xa29   :  { %3217 = vmatmul.mubr.msk.bf16.vlgmr.msra.gmra.mrb[60].mxu0 %vm283_vm2, %v1946_v31 }
 0xa2a   :  { %3227 = vmatpush3.bf16.msra.mxu0 %v2075_v32  ;;  %3228 = vmatprep.mubr.msk.bf16.mxu0 %vm3480_vm0, %v3479_v1 }
 0xa2b   :  { %3238 = vmatprep.subr.bf16.mxu0 %v3479_v1 }
 0xa41   :  { %v2064_v33 = vpop.xlane.xlu1 %2063 }
 0xa42   :  { %3393 = vrcp.f32 %v2064_v33 }
 0xa45   :  { %v2177_v34 = vpop.xlane.xlu1 %2176  ;;  %v2295_v35 = vpop.xlane.xlu0 %2294 }
 0xa46   :  { %3395 = vrcp.f32 %v2177_v34 }
 0xa47   :  { %3397 = vrcp.f32 %v2295_v35 }
 0xa49   :  { %v2413_v36 = vpop.xlane.xlu1 %2412  ;;  %v2184_v39 = vpop.permute.xlu0 %2183 }
 0xa4a   :  { %3399 = vrcp.f32 %v2413_v36  ;;  %v2189_v45 = vsel %vm348_vm9, %v2184_v39, 0 }
 0xa4c   :  { %v3394_v37 = vpop.eup %3393 }
 0xa4d   :  { %v2066_v38 = vmul.f32 %v3394_v37, %v4105_v11  ;;  %v2302_v51 = vpop.permute.xlu1 %2301  ;;  %v2420_v54 = vpop.permute.xlu0 %2419  ;;  %v2906_v37 = vld [vmem:[%s4317_s15] ss:$0 sm:$0xff] }
 0xa4e   :  { %v2307_v53 = vsel %vm348_vm9, %v2302_v51, 0  ;;  %v2425_v55 = vsel %vm348_vm9, %v2420_v54, 0  ;;  %v3330_v54 = vld [vmem:[%s4322_s20 + $0x8] sm:$0xff]  }
 0xa4f   :  { %v2067_v40 = vpack.c.bf16 %v2066_v38, %v2066_v38 }
 0xa50   :  { %v3396_v41 = vpop.eup %3395 }
 0xa51   :  { %v3398_v42 = vpop.eup %3397  ;;  %v2179_v44 = vmul.f32 %v3396_v41, %v4107_v60  ;;  %2069 = vst.msk [vmem:[#allocation7 + $0x4] sm:$0xf] %vm343_vm10, %v2067_v40  ;;  %3229 = vmatmul.mubr.msk.bf16.vlgmr.msra.gmra.mrb[64].mxu0 %vm283_vm2, %v2067_v40 }
 0xa52   :  { %v2297_v48 = vmul.f32 %v3398_v42, %v4111_v12  ;;  %3239 = vmatpush3.bf16.msra.mxu0 %v2189_v45  ;;  %3240 = vmatprep.mubr.msk.bf16.mxu0 %vm3480_vm0, %v3479_v1 }
 0xa53   :  { %3250 = vmatprep.subr.bf16.mxu0 %v3479_v1  ;;  %v2180_v47 = vpack.c.bf16 %v2179_v44, %v2179_v44 }
 0xa54   :  { %v3400_v49 = vpop.eup %3399  ;;  %v2298_v43 = vpack.c.bf16 %v2297_v48, %v2297_v48 }
 0xa55   :  { %v2415_v50 = vmul.f32 %v3400_v49, %v4117_v10  ;;  %2182 = vst.msk [vmem:[#allocation7 + $0xc] sm:$0xf] %vm343_vm10, %v2180_v47 }
 0xa56   :  { %2300 = vst.msk [vmem:[#allocation7 + $0x14] sm:$0xf] %vm343_vm10, %v2298_v43 }
 0xa57   :  { %v2416_v52 = vpack.c.bf16 %v2415_v50, %v2415_v50 }
 0xa59   :  { %3241 = vmatmul.mubr.msk.bf16.vlgmr.msra.gmra.mrb[68].mxu0 %vm283_vm2, %v2180_v47  ;;  %2418 = vst.msk [vmem:[#allocation7 + $0x1c] sm:$0xf] %vm343_vm10, %v2416_v52 }
 0xa5a   :  { %3251 = vmatpush3.bf16.msra.mxu0 %v2307_v53  ;;  %3252 = vmatprep.mubr.msk.bf16.mxu0 %vm3480_vm0, %v3479_v1  ;;  %v3329_v53 = vld [vmem:[%s4322_s20] sm:$0xff]  }
 0xa5b   :  { %3262 = vmatprep.subr.bf16.mxu0 %v3479_v1 }
 0xa61   :  { %3253 = vmatmul.mubr.msk.bf16.vlgmr.msra.gmra.mrb[72].mxu0 %vm283_vm2, %v2298_v43 }
 0xa62   :  { %3263 = vmatpush3.bf16.msra.mxu0 %v2425_v55  ;;  %3264 = vmatprep.mubr.msk.bf16.mxu0 %vm3480_vm0, %v3479_v1 }
 0xa63   :  { %3276 = vmatprep.subr.bf16.mxu0 %v3479_v1 }
 0xa69   :  { %3265 = vmatmul.mubr.msk.bf16.vlgmr.msra.gmra.mrb[76].mxu0 %vm283_vm2, %v2416_v52 }
 0xa6a   :  { %3280 = vmatprep.mubr.msk.bf16.mxu0 %vm3480_vm0, %v3479_v1 }
 0xa71   :  { %v1638_v58 = vpop.f32.mrb[48].mxu0 }
 0xa72   :  { %1644 = vst.msk [vmem:[#allocation2] sm:$0xff] %vm283_vm2, %v1638_v58  ;;  %v3182_v59 = vpop.f32.mrb[49].mxu0 }
 0xa73   :  { %v1641_v61 = vpop.f32.mrb[50].mxu0 }
 0xa74   :  { %v3183_v62 = vpop.f32.mrb[51].mxu0 }
 0xaec   :  { %v1755_v63 = vpop.f32.mrb[52].mxu0 }
 0xaed   :  { %1762 = vrot.lane.b32.xlu0 %v1755_v63, %s3485_s5  ;;  %v3194_v0 = vpop.f32.mrb[53].mxu0 }
 0xaee   :  { %v1758_v2 = vpop.f32.mrb[54].mxu0 }
 0xaef   :  { %v3195_v7 = vpop.f32.mrb[55].mxu0 }
 0xaf4   :  { %v1873_v8 = vpop.f32.mrb[56].mxu0 }
 0xaf5   :  { %1880 = vrot.lane.b32.xlu0 %v1873_v8, %s3486_s10  ;;  %v3206_v9 = vpop.f32.mrb[57].mxu0 }
 0xaf6   :  { %v1876_v4 = vpop.f32.mrb[58].mxu0 }
 0xaf7   :  { %v3207_v11 = vpop.f32.mrb[59].mxu0 }
 0xafc   :  { %v1991_v60 = vpop.f32.mrb[60].mxu0 }
 0xafd   :  { %1998 = vrot.lane.b32.xlu0 %v1991_v60, %s3487_s6  ;;  %v3218_v3 = vpop.f32.mrb[61].mxu0 }
 0xafe   :  { %v1994_v12 = vpop.f32.mrb[62].mxu0 }
 0xaff   :  { %v3219_v14 = vpop.f32.mrb[63].mxu0 }
 0xb24   :  { %v2111_v46 = vpop.f32.mrb[64].mxu0 }
 0xb25   :  { %2117 = vst.msk [vmem:[#allocation2 + $0x8] sm:$0xff] %vm283_vm2, %v2111_v46  ;;  %v3230_v10 = vpop.f32.mrb[65].mxu0 }
 0xb26   :  { %v2114_v15 = vpop.f32.mrb[66].mxu0 }
 0xb27   :  { %v3231_v13 = vpop.f32.mrb[67].mxu0  ;;  %v2910_v15 = vld [vmem:[%s4318_s16] ss:$0 sm:$0xff] }
 0xb2c   :  { %v2225_v16 = vpop.f32.mrb[68].mxu0 }
 0xb2d   :  { %2232 = vrot.lane.b32.xlu1 %v2225_v16, %s3485_s5  ;;  %v3242_v17 = vpop.f32.mrb[69].mxu0 }
 0xb2e   :  { %v2228_v18 = vpop.f32.mrb[70].mxu0 }
 0xb2f   :  { %v3243_v19 = vpop.f32.mrb[71].mxu0 }
 0xb30   :  { %v2911_v19 = vld [vmem:[%s4319_s17] ss:$0 sm:$0xff] }
 0xb34   :  { %v2343_v5 = vpop.f32.mrb[72].mxu0 }
 0xb35   :  { %2350 = vrot.lane.b32.xlu1 %v2343_v5, %s3486_s10  ;;  %v3254_v6 = vpop.f32.mrb[73].mxu0 }
 0xb36   :  { %v2346_v23 = vpop.f32.mrb[74].mxu0 }
 0xb37   :  { %v3255_v24 = vpop.f32.mrb[75].mxu0  ;;  %v3331_v23 = vld [vmem:[%s4322_s20 + $0x10] sm:$0xff]  }
 0xb38   :  { %v3332_v24 = vld [vmem:[%s4322_s20 + $0x18] sm:$0xff]  }
 0xb3c   :  { %v2461_v25 = vpop.f32.mrb[76].mxu0 }
 0xb3d   :  { %2468 = vrot.lane.b32.xlu1 %v2461_v25, %s3487_s6  ;;  %v3266_v26 = vpop.f32.mrb[77].mxu0  ;;  %v2912_v25 = vld [vmem:[%s4321_s19] ss:$0 sm:$0xff]  ;;  %s3488_s19 = smov [#allocation5]  }
 0xb3e   :  { %v2464_v27 = vpop.f32.mrb[78].mxu0  ;;  %s2820_s20 = sshll.u32 %s3488_s19, 4  ;;  %s2821_s20 = int_to_ptr.vmem [resolvable:$true] %s2820_s20 }
 0xb3f   :  { %v3267_v20 = vpop.f32.mrb[79].mxu0  ;;  %p3414_p1 = scmp.lt.s32.totalorder %s2821_s20, %s2821_s20 }
 0xb5f   :  { %v1763_v28 = vpop.permute.xlu0 %1762 }
 0xb60   :  { %1765 = vst.msk [vmem:[#allocation2] sm:$0xff] %vm513_vm11, %v1763_v28 }
 0xb67   :  { %v1881_v30 = vpop.permute.xlu0 %1880 }
 0xb68   :  { %1883 = vst.msk [vmem:[#allocation2] sm:$0xff] %vm632_vm12, %v1881_v30 }
 0xb6f   :  { %v1999_v31 = vpop.permute.xlu0 %1998 }
 0xb70   :  { %2001 = vst.msk [vmem:[#allocation2] sm:$0xff] %vm751_vm13, %v1999_v31 }
 0xb77   :  { %v2472_v34 = vld [vmem:[#allocation2] sm:$0xff] }
 0xb9f   :  { %v2233_v29 = vpop.permute.xlu1 %2232 }
 0xba0   :  { %2235 = vst.msk [vmem:[#allocation2 + $0x8] sm:$0xff] %vm513_vm11, %v2233_v29 }
 0xba7   :  { %v2351_v32 = vpop.permute.xlu1 %2350 }
 0xba8   :  { %2353 = vst.msk [vmem:[#allocation2 + $0x8] sm:$0xff] %vm632_vm12, %v2351_v32 }
 0xbaf   :  { %v2469_v33 = vpop.permute.xlu1 %2468 }
 0xbb0   :  { %2471 = vst.msk [vmem:[#allocation2 + $0x8] sm:$0xff] %vm751_vm13, %v2469_v33 }
 0xbb7   :  { %v2473_v35 = vld [vmem:[#allocation2 + $0x8] sm:$0xff] }
 0xbb8   :  { %v2474_v36 = vpack.c.bf16 %v2473_v35, %v2472_v34 }
 0xbba   :  { %3273 = vmatmul.mubr.msk.bf16.vlgmr.msra.gmra.mrb[76].mxu1 %vm111_vm1, %v2474_v36 }
 0xbbb   :  { %3292 = vmatprep.mubr.msk.bf16.mxu1 %vm3480_vm0, %v3479_v1  ;;  %3285 = vmatpush3.bf16.msra.mxu1 %v3329_v53  ;;  %vm2704_vm0 = vcmask 523264  }
 0xbbc   :  { %3286 = vmatprep.subr.bf16.mxu1 %v3479_v1 }
 0xbbf   :  { %3287 = vmatpush3.bf16.msra.mxu1 %v3330_v54 }
 0xbc0   :  { %3288 = vmatprep.subr.bf16.mxu1 %v3479_v1 }
 0xbc3   :  { %3289 = vmatpush3.bf16.msra.mxu1 %v3331_v23 }
 0xbc4   :  { %3290 = vmatprep.subr.bf16.mxu1 %v3479_v1 }
 0xbc7   :  { %3291 = vmatpush3.bf16.msra.mxu1 %v3332_v24 }
 0xc8d   :  { %v2535_v38 = vpop.f32.mrb[76].mxu1 }
 0xc8e   :  { %v2536_v39 = vadd.f32 %v2906_v37, %v2535_v38  ;;  %v3274_v40 = vpop.f32.mrb[77].mxu1 }
 0xc8f   :  { %v2538_v41 = vpop.f32.mrb[78].mxu1 }
 0xc90   :  { %v2542_v42 = vadd.f32 %v2536_v39, %v3962_v56  ;;  %v2539_v44 = vadd.f32 %v2906_v37, %v2538_v41  ;;  %v3275_v45 = vpop.f32.mrb[79].mxu1  ;;  %v3327_v56 = vld [vmem:[%s4320_s18] sm:$0xff]  }
 0xc91   :  { %3277 = vmatpush3.bf16.msra.mxu0 %v3327_v56 }
 0xc92   :  { %v2543_v48 = vadd.f32 %v2539_v44, %v3964_v57  ;;  %v2546_v47 = vsel %vm111_vm1, %v2542_v42, 0.0  ;;  %v2554_v49 = vmul.f32 %v2542_v42, %v2542_v42  ;;  %v3328_v57 = vld [vmem:[%s4320_s18 + $0x8] sm:$0xff]   ;;  %3278 = vmatprep.subr.bf16.mxu0 %v3479_v1  ;;  %v2916_v1 = vld [vmem:[%s4323_s21] ss:$0 sm:$0xff]  ;;  %s3409_s21 = scalar_lea.vmem %s2821_s20, 512 }
 0xc93   :  { %2547 = vadd.xlane.f32.xlu0 %v2546_v47  ;;  %p3410_p0 = scmp.ne.s32.totalorder %s2821_s20, %s3409_s21  ;;  %p3415_p2 = scmp.lt.s32.totalorder %s3409_s21, %s3409_s21 }
 0xc94   :  { %v2549_v43 = vsel %vm111_vm1, %v2543_v48, 0.0  ;;  %v2556_v50 = vsel %vm111_vm1, %v2554_v49, 0.0  ;;  %v2555_v51 = vmul.f32 %v2543_v48, %v2543_v48 }
 0xc95   :  { %2550 = vadd.xlane.f32.xlu1 %v2549_v43  ;;  %3279 = vmatpush3.bf16.msra.mxu0 %v3328_v57  ;;  %p3416_p3 = por %p3415_p2, %p3414_p1 }
 0xc96   :  { %v2559_v52 = vsel %vm111_vm1, %v2555_v51, 0.0 }
 0xc97   :  { %2557 = vadd.xlane.f32.xlu0 %v2556_v50  ;;  %p3417_p4 = pnand %p3416_p3, %p3410_p0 }
 0xc9b   :  { %2560 = vadd.xlane.f32.xlu0 %v2559_v52 }
 0xd20   :  { %v2548_v55 = vpop.xlane.xlu0 %2547 }
 0xd21   :  { %v2552_v58 = vmul.f32 0.03125, %v2548_v55 }
 0xd22   :  { %v2551_v59 = vpop.xlane.xlu1 %2550 }
 0xd23   :  { %v2564_v62 = vmul.f32 %v2552_v58, %v2552_v58  ;;  %v2553_v63 = vmul.f32 0.03125, %v2551_v59  ;;  %v2570_v14 = vsub.f32 %v2542_v42, %v2552_v58 }
 0xd24   :  { %v2558_v61 = vpop.xlane.xlu0 %2557 }
 0xd25   :  { %v2562_v0 = vmul.f32 0.03125, %v2558_v61  ;;  %v2565_v8 = vmul.f32 %v2553_v63, %v2553_v63  ;;  %v2571_v13 = vsub.f32 %v2543_v48, %v2553_v63 }
 0xd27   :  { %v2566_v2 = vsub.f32 %v2562_v0, %v2564_v62 }
 0xd28   :  { %v2561_v7 = vpop.xlane.xlu0 %2560 }
 0xd29   :  { %v2568_v9 = vmax.f32 %v2566_v2, 0.0  ;;  %v2563_v4 = vmul.f32 0.03125, %v2561_v7 }
 0xd2b   :  { %v2572_v11 = vadd.f32 1e-05, %v2568_v9  ;;  %v2567_v60 = vsub.f32 %v2563_v4, %v2565_v8 }
 0xd2d   :  { %3401 = vrsqrt.f32 %v2572_v11  ;;  %v2569_v3 = vmax.f32 %v2567_v60, 0.0 }
 0xd2f   :  { %v2573_v12 = vadd.f32 1e-05, %v2569_v3 }
 0xd31   :  { %3403 = vrsqrt.f32 %v2573_v12 }
 0xd37   :  { %v3402_v46 = vpop.eup %3401 }
 0xd38   :  { %v2576_v10 = vmul.f32 %v3402_v46, %v2570_v14 }
 0xd3a   :  { %v2584_v18 = vmul.f32 %v2910_v15, %v2576_v10 }
 0xd3b   :  { %v3404_v16 = vpop.eup %3403 }
 0xd3c   :  { %v2577_v17 = vmul.f32 %v3404_v16, %v2571_v13  ;;  %v2592_v22 = vadd.f32 %v2911_v19, %v2584_v18 }
 0xd3e   :  { %v2585_v21 = vmul.f32 %v2910_v15, %v2577_v17 }
 0xd40   :  { %v2593_v5 = vadd.f32 %v2911_v19, %v2585_v21 }
 0xd42   :  { %v2594_v6 = vpack.c.bf16 %v2593_v5, %v2592_v22 }
 0xd44   :  { %3281 = vmatmul.mubr.msk.bf16.vlgmr.msra.gmra.mrb[80].mxu0 %vm111_vm1, %v2594_v6 }
 0xe17   :  { %v2655_v26 = vpop.f32.mrb[80].mxu0 }
 0xe18   :  { %v2656_v27 = vadd.f32 %v2912_v25, %v2655_v26  ;;  %v3282_v20 = vpop.f32.mrb[81].mxu0 }
 0xe19   :  { %v2658_v28 = vpop.f32.mrb[82].mxu0 }
 0xe1a   :  { %v2659_v30 = vadd.f32 %v2912_v25, %v2658_v28  ;;  %v3283_v31 = vpop.f32.mrb[83].mxu0  ;;  %v2662_v29 = vmax.f32 %v2656_v27, 0.0 }
 0xe1c   :  { %v2663_v32 = vmax.f32 %v2659_v30, 0.0 }
 0xe1e   :  { %v2664_v33 = vpack.c.bf16 %v2663_v32, %v2662_v29 }
 0xe20   :  { %3293 = vmatmul.mubr.msk.bf16.vlgmr.msra.gmra.mrb[80].mxu1 %vm2704_vm0, %v2664_v33 }
 0xef3   :  { %v2742_v34 = vpop.f32.mrb[80].mxu1 }
 0xef4   :  { %v2743_v35 = vadd.f32 %v2916_v1, %v2742_v34  ;;  %v3294_v36 = vpop.f32.mrb[81].mxu1 }
 0xef5   :  { %v2745_v37 = vpop.f32.mrb[82].mxu1 }
 0xef6   :  { %v4241_v38 = vadd.f32 %v2743_v35, %v2592_v22  ;;  %v2746_v39 = vadd.f32 %v2916_v1, %v2745_v37  ;;  %v3295_v40 = vpop.f32.mrb[83].mxu1 }
 0xef8   :  { %v4243_v41 = vadd.f32 %v2746_v39, %v2593_v5  ;;  %v2753_v42 = vsel %vm111_vm1, %v4241_v38, 0.0  ;;  %v2761_v44 = vmul.f32 %v4241_v38, %v4241_v38 }
 0xef9   :  { %2754 = vadd.xlane.f32.xlu1 %v2753_v42 }
 0xefa   :  { %v2756_v45 = vsel %vm111_vm1, %v4243_v41, 0.0  ;;  %v2762_v48 = vmul.f32 %v4243_v41, %v4243_v41  ;;  %v2763_v47 = vsel %vm111_vm1, %v2761_v44, 0.0 }
 0xefb   :  { %2757 = vadd.xlane.f32.xlu0 %v2756_v45 }
 0xefc   :  { %v2766_v49 = vsel %vm111_vm1, %v2762_v48, 0.0 }
 0xefd   :  { %2764 = vadd.xlane.f32.xlu1 %v2763_v47 }
 0xeff   :  { %2767 = vadd.xlane.f32.xlu0 %v2766_v49 }
 0xf00   :  { %3420 = shalt.err (!%p3417_p4)
}
 0xf01   :  { %s3421_s15 = scalar_lea.hbm %s4327_s25, 512 }
 0xf02   :  { %p3422_p5 = scmp.ne.s32.totalorder %s4327_s25, %s3421_s15  ;;  %p3425_p6 = scmp.lt.u32.totalorder %s3421_s15, %s4327_s25 }
 0xf04   :  { %p3427_p7 = pnand %p3425_p6, %p3422_p5 }
 0xf06   :  { %3430 = shalt.err (!%p3427_p7)
}
 0xf07   :  { %s3489_s9 = smov 64   ;;  %s3490_s30 = smov 4  }
 0xf08   :  { %2826 = dma.vmem_to_hbm [thread:$0]  %s2821_s20, 512, %s4327_s25, [#allocation6], %s3489_s9, %s3489_s9, %s3490_s30  }
 0xf09   :  { %s3491_s2 = smov [#allocation7]  }
 0xf0a   :  { %s2832_s1 = sshll.u32 %s3491_s2, 4  ;;  %s2833_s1 = int_to_ptr.vmem [resolvable:$true] %s2832_s1 }
 0xf0b   :  { %s3431_s13 = scalar_lea.vmem %s2833_s1, 512  ;;  %p3436_p9 = scmp.lt.s32.totalorder %s2833_s1, %s2833_s1 }
 0xf0c   :  { %p3432_p8 = scmp.ne.s32.totalorder %s2833_s1, %s3431_s13  ;;  %p3437_p10 = scmp.lt.s32.totalorder %s3431_s13, %s3431_s13 }
 0xf0e   :  { %p3438_p11 = por %p3437_p10, %p3436_p9 }
 0xf10   :  { %p3439_p12 = pnand %p3438_p11, %p3432_p8 }
 0xf12   :  { %3442 = shalt.err (!%p3439_p12)
}
 0xf13   :  { %s3443_s16 = scalar_lea.hbm %s4328_s26, 512 }
 0xf14   :  { %p3444_p13 = scmp.ne.s32.totalorder %s4328_s26, %s3443_s16  ;;  %p3447_p0 = scmp.lt.u32.totalorder %s3443_s16, %s4328_s26 }
 0xf16   :  { %p3449_p1 = pnand %p3447_p0, %p3444_p13 }
 0xf18   :  { %3452 = shalt.err (!%p3449_p1)
}
 0xf19   :  { %2838 = dma.vmem_to_hbm [thread:$0]  %s2833_s1, 512, %s4328_s26, [#allocation6], %s3489_s9, %s3489_s9, %s3490_s30  }
 0xf1a   :  { %v2922_v9 = vld [vmem:[%s4324_s22] ss:$0 sm:$0xff]  ;;  %s3492_s14 = smov [#allocation3]  }
 0xf1b   :  { %v2923_v3 = vld [vmem:[%s4325_s23] ss:$0 sm:$0xff]  ;;  %s2808_s10 = sshll.u32 %s3492_s14, 4  ;;  %s2809_s10 = int_to_ptr.vmem [resolvable:$true] %s2808_s10 }
 0xf1c   :  { %s3453_s22 = scalar_lea.vmem %s2809_s10, 256  ;;  %p3458_p3 = scmp.lt.s32.totalorder %s2809_s10, %s2809_s10 }
 0xf1d   :  { %p3454_p2 = scmp.ne.s32.totalorder %s2809_s10, %s3453_s22  ;;  %p3459_p4 = scmp.lt.s32.totalorder %s3453_s22, %s3453_s22 }
 0xf1f   :  { %p3460_p5 = por %p3459_p4, %p3458_p3 }
 0xf21   :  { %p3461_p6 = pnand %p3460_p5, %p3454_p2 }
 0xf86   :  { %v2755_v43 = vpop.xlane.xlu1 %2754 }
 0xf87   :  { %v2759_v50 = vmul.f32 0.03125, %v2755_v43 }
 0xf88   :  { %v2758_v51 = vpop.xlane.xlu0 %2757 }
 0xf89   :  { %v2760_v52 = vmul.f32 0.03125, %v2758_v51  ;;  %v2771_v57 = vmul.f32 %v2759_v50, %v2759_v50  ;;  %v2777_v7 = vsub.f32 %v4241_v38, %v2759_v50 }
 0xf8a   :  { %v2765_v56 = vpop.xlane.xlu1 %2764 }
 0xf8b   :  { %v2769_v53 = vmul.f32 0.03125, %v2765_v56  ;;  %v2772_v55 = vmul.f32 %v2760_v52, %v2760_v52  ;;  %v2778_v4 = vsub.f32 %v4243_v41, %v2760_v52 }
 0xf8c   :  { %v2768_v54 = vpop.xlane.xlu0 %2767 }
 0xf8d   :  { %v2773_v58 = vsub.f32 %v2769_v53, %v2771_v57  ;;  %v2770_v59 = vmul.f32 0.03125, %v2768_v54 }
 0xf8f   :  { %v2775_v61 = vmax.f32 %v2773_v58, 0.0  ;;  %v2774_v62 = vsub.f32 %v2770_v59, %v2772_v55 }
 0xf91   :  { %v2779_v63 = vadd.f32 1e-05, %v2775_v61  ;;  %v2776_v0 = vmax.f32 %v2774_v62, 0.0 }
 0xf93   :  { %3405 = vrsqrt.f32 %v2779_v63  ;;  %v2780_v2 = vadd.f32 1e-05, %v2776_v0 }
 0xf95   :  { %3407 = vrsqrt.f32 %v2780_v2 }
 0xf9d   :  { %v3406_v8 = vpop.eup %3405 }
 0xf9e   :  { %v2783_v11 = vmul.f32 %v3406_v8, %v2777_v7 }
 0xf9f   :  { %v3408_v60 = vpop.eup %3407 }
 0xfa0   :  { %v2784_v12 = vmul.f32 %v3408_v60, %v2778_v4  ;;  %v2791_v14 = vmul.f32 %v2922_v9, %v2783_v11 }
 0xfa2   :  { %v2792_v46 = vmul.f32 %v2922_v9, %v2784_v12  ;;  %v2799_v10 = vadd.f32 %v2923_v3, %v2791_v14 }
 0xfa4   :  { %v2800_v15 = vadd.f32 %v2923_v3, %v2792_v46  ;;  %2801 = vst.msk [vmem:[#allocation3] sm:$0xff] %vm111_vm1, %v2799_v10 }
 0xfa6   :  { %2802 = vst.msk [vmem:[#allocation3 + $0x8] sm:$0xff] %vm111_vm1, %v2800_v15 }
 0xfa7   :  { %3464 = shalt.err (!%p3461_p6)
}
 0xfa8   :  { %s3465_s6 = scalar_lea.hbm %s4326_s24, 256 }
 0xfa9   :  { %p3466_p7 = scmp.ne.s32.totalorder %s4326_s24, %s3465_s6  ;;  %p3469_p8 = scmp.lt.u32.totalorder %s3465_s6, %s4326_s24 }
 0xfab   :  { %p3471_p9 = pnand %p3469_p8, %p3466_p7 }
 0xfad   :  { %3474 = shalt.err (!%p3471_p9)
}
 0xfae   :  { %s3493_s30 = smov 128  }
 0xfaf   :  { %2814 = dma.vmem_to_hbm [thread:$0]  %s2809_s10, 256, %s4326_s24, [#allocation4], %s3493_s30, %s3493_s30, %s3485_s5  }
 0xfb0   :  { %3475 = dma.done.wait [#allocation4], 256  }
 0xfb1   :  { %3476 = vsyncadd [#allocation4], 4294967040 }
 0xfb2   :  { %3477 = dma.done.wait [#allocation6], 1024  }
 0xfb3   :  { %3478 = vsyncadd [#allocation6], 4294966272 }
 0xfb4   :  { %2848 = vsyncpa [#allocation4], 1 }
 0xfb5   :  { %2849 = vsyncpa [#allocation6], 1 }

// kernel: decoder_forward.2
= control target key start
LH: loop header
LB: loop body
LE: loop exit
PB: predicated region body
PF: predicated region fallthrough
CT: control target
= control target key end

     0   :  { %s4265_s0 = inlined_call_operand.vmem [shape: s32[2,8], index: 0, kind: input, shape index: {}]   ;;  %s4266_s1 = inlined_call_operand.vmem [shape: s32[2,8], index: 1, kind: input, shape index: {}]   ;;  %s4267_s2 = inlined_call_operand.vmem [shape: f32[2,8,32], index: 2, kind: input, shape index: {}]   ;;  %s4268_s3 = inlined_call_operand.vmem [shape: f32[2,8,32], index: 3, kind: input, shape index: {}]   ;;  %s4269_s4 = inlined_call_operand.vmem [shape: bf16[32,32], index: 4, kind: input, shape index: {}]   ;;  %s4270_s5 = inlined_call_operand.vmem [shape: bf16[32,32], index: 5, kind: input, shape index: {}]   ;;  %s4271_s6 = inlined_call_operand.vmem [shape: bf16[32,32], index: 6, kind: input, shape index: {}]   ;;  %s4272_s7 = inlined_call_operand.vmem [shape: bf16[32,32], index: 7, kind: input, shape index: {}]   ;;  %s4273_s8 = inlined_call_operand.vmem [shape: f32[1,32], index: 8, kind: input, shape index: {}]   ;;  %s4274_s9 = inlined_call_operand.vmem [shape: f32[1,32], index: 9, kind: input, shape index: {}]   ;;  %s4275_s10 = inlined_call_operand.vmem [shape: f32[1,32], index: 10, kind: input, shape index: {}]   ;;  %s4276_s11 = inlined_call_operand.vmem [shape: bf16[32,32], index: 11, kind: input, shape index: {}]   ;;  %s4277_s12 = inlined_call_operand.vmem [shape: bf16[32,32], index: 12, kind: input, shape index: {}]   ;;  %s4278_s13 = inlined_call_operand.vmem [shape: bf16[32,32], index: 13, kind: input, shape index: {}]   ;;  %s4279_s14 = inlined_call_operand.vmem [shape: bf16[32,32], index: 14, kind: input, shape index: {}]   ;;  %s4280_s15 = inlined_call_operand.vmem [shape: f32[1,32], index: 15, kind: input, shape index: {}]   ;;  %s4281_s16 = inlined_call_operand.vmem [shape: f32[1,32], index: 16, kind: input, shape index: {}]   ;;  %s4282_s17 = inlined_call_operand.vmem [shape: f32[1,32], index: 17, kind: input, shape index: {}]   ;;  %s4283_s18 = inlined_call_operand.vmem [shape: bf16[32,64], index: 18, kind: input, shape index: {}]   ;;  %s4284_s19 = inlined_call_operand.vmem [shape: f32[1,64], index: 19, kind: input, shape index: {}]   ;;  %s4285_s20 = inlined_call_operand.vmem [shape: bf16[64,32], index: 20, kind: input, shape index: {}]   ;;  %s4286_s21 = inlined_call_operand.vmem [shape: f32[1,32], index: 21, kind: input, shape index: {}]   ;;  %s4287_s22 = inlined_call_operand.vmem [shape: f32[1,32], index: 22, kind: input, shape index: {}]   ;;  %s4288_s23 = inlined_call_operand.vmem [shape: f32[1,32], index: 23, kind: input, shape index: {}]   ;;  %s4289_s24 = inlined_call_operand.vmem [shape: f32[2,8,32], index: 24, kind: output, shape index: {0}]   ;;  %s4290_s25 = inlined_call_operand.hbm [shape: bf16[4,2,8,8], index: 25, kind: output, shape index: {1}]   ;;  %s4291_s26 = inlined_call_operand.hbm [shape: bf16[4,2,8,8], index: 26, kind: output, shape index: {2}]  }
   0x1   :  { %4298 = sst [smem:[#allocation9_spill]] %s4265_s0 }
   0x2   :  { %4299 = sst [smem:[#allocation10_spill]] %s4266_s1 }
   0x3   :  { %4300 = sst [smem:[#allocation11_spill]] %s4267_s2 }
   0x4   :  { %4301 = sst [smem:[#allocation12_spill]] %s4268_s3 }
   0x5   :  { %4302 = sst [smem:[#allocation13_spill]] %s4269_s4 }
   0x6   :  { %4303 = sst [smem:[#allocation14_spill]] %s4270_s5 }
   0x7   :  { %4304 = sst [smem:[#allocation15_spill]] %s4271_s6 }
   0x8   :  { %4305 = sst [smem:[#allocation16_spill]] %s4272_s7 }
   0x9   :  { %4306 = sst [smem:[#allocation17_spill]] %s4273_s8 }
   0xa   :  { %4307 = sst [smem:[#allocation18_spill]] %s4274_s9 }
   0xb   :  { %4308 = sst [smem:[#allocation19_spill]] %s4275_s10 }
   0xc   :  { %32 = vsyncpa [#allocation4], 0  ;;  %s4309_s7 = sld [smem:[#allocation14_spill]]  ;;  %v3444_v1 = vmov 0.0   ;;  %s4310_s4 = sld [smem:[#allocation13_spill]]  ;;  %vm3445_vm0 = vmmov 0  }
   0xd   :  { %3017 = vmatprep.subr.bf16.mxu1 %v3444_v1  ;;  %3009 = vmatprep.subr.bf16.mxu0 %v3444_v1  ;;  %s4311_s10 = sld [smem:[#allocation11_spill]]  ;;  %vm111_vm1 = vcmask 261120  }
   0xe   :  { %3021 = vmatprep.mubr.msk.bf16.mxu1 %vm3445_vm0, %v3444_v1  ;;  %3013 = vmatprep.mubr.msk.bf16.mxu0 %vm3445_vm0, %v3444_v1 }
  0x12   :  { %v3298_v0 = vld [vmem:[%s4309_s7] sm:$0xff]   ;;  %v3300_v3 = vld [vmem:[%s4309_s7 + $0x8] sm:$0xff]  }
  0x13   :  { %v3299_v2 = vld [vmem:[%s4310_s4] sm:$0xff]   ;;  %3018 = vmatpush3.bf16.msra.mxu1 %v3298_v0  ;;  %v3301_v4 = vld [vmem:[%s4310_s4 + $0x8] sm:$0xff]  }
  0x14   :  { %3010 = vmatpush3.bf16.msra.mxu0 %v3299_v2  ;;  %3019 = vmatprep.subr.bf16.mxu1 %v3444_v1  ;;  %v3613_v5 = vld [vmem:[%s4311_s10] sm:$0xff]  ;;  %v3618_v6 = vld [vmem:[%s4311_s10 + $0x8] sm:$0xff] }
  0x15   :  { %3011 = vmatprep.subr.bf16.mxu0 %v3444_v1  ;;  %v94_v7 = vpack.c.bf16 %v3618_v6, %v3613_v5 }
  0x17   :  { %3020 = vmatpush3.bf16.msra.mxu1 %v3300_v3 }
  0x18   :  { %3012 = vmatpush3.bf16.msra.mxu0 %v3301_v4  ;;  %3033 = vmatprep.subr.bf16.mxu1 %v3444_v1 }
  0x19   :  { %3025 = vmatprep.subr.bf16.mxu0 %v3444_v1 }
  0x1a   :  { %3022 = vmatmul.mubr.msk.bf16.vlgmr.msra.gmra.mrb[0].mxu1 %vm111_vm1, %v94_v7 }
  0x1b   :  { %3014 = vmatmul.mubr.msk.bf16.vlgmr.msra.gmra.mrb[0].mxu0 %vm111_vm1, %v94_v7  ;;  %3035 = vmatprep.mubr.msk.bf16.mxu1 %vm3445_vm0, %v3444_v1 }
  0x1c   :  { %3029 = vmatprep.mubr.msk.bf16.mxu0 %vm3445_vm0, %v3444_v1 }
  0x1d   :  { %33 = vsyncpa [#allocation6], 0  ;;  %vm283_vm2 = vcmask 64512   ;;  %s3446_s27 = smov 112   ;;  %s3447_s3 = smov 120   ;;  %v89_v44 = vlaneseq  ;;  %v3449_v48 = vmov 0  }
  0x1e   :  { %s3448_s7 = smov 104   ;;  %s4312_s4 = sld [smem:[#allocation15_spill]]  ;;  %vm348_vm9 = vcmask 1043456   ;;  %vm343_vm10 = vcmask 60416   ;;  %vm513_vm11 = vcmask 130112   ;;  %vm632_vm12 = vcmask 195712  }
  0x1f   :  { %s4313_s2 = sld [smem:[#allocation9_spill]]  ;;  %v3698_v46 = vshrl.u32 %v89_v44, 7  ;;  %v92_v50 = vand.u32 127, %v89_v44  ;;  %s3450_s5 = smov 8   ;;  %vm751_vm13 = vcmask 261312  }
  0x20   :  { %s3451_s10 = smov 16   ;;  %s3452_s6 = smov 24  }
  0x21   :  { %v279_v47 = vsub.s32 0, %v3698_v46  ;;  %vm93_vm4 = vcmp.gt.s32.totalorder %v92_v50, %v3698_v46  ;;  %s4318_s8 = sld [smem:[#allocation16_spill]]  ;;  %s4319_s30 = sld [smem:[#allocation17_spill]] }
  0x22   :  { %s4320_s0 = sld [smem:[#allocation12_spill]]  ;;  %s4322_s9 = sld [smem:[#allocation19_spill]] }
  0x24   :  { %v3302_v23 = vld [vmem:[%s4312_s4] sm:$0xff]   ;;  %v3303_v24 = vld [vmem:[%s4312_s4 + $0x8] sm:$0xff]   ;;  %s4321_s4 = sld [smem:[#allocation18_spill]] }
  0x25   :  { %3026 = vmatpush3.bf16.msra.mxu0 %v3302_v23  ;;  %v87_v45 = vld [vmem:[%s4313_s2] sm:$0x3] }
  0x26   :  { %3027 = vmatprep.subr.bf16.mxu0 %v3444_v1  ;;  %vm275_vm3 = vcmp.eq.s32.totalorder %v87_v45, 0 }
  0x27   :  { %v276_v49 = vsel %vm275_vm3, 1, %v3449_v48 }
  0x28   :  { %v280_v51 = vrot.slane %v276_v49, %v279_v47 }
  0x29   :  { %3028 = vmatpush3.bf16.msra.mxu0 %v3303_v24 }
  0x2a   :  { %3039 = vmatprep.subr.bf16.mxu0 %v3444_v1  ;;  %vm281_vm5 = vcmp.eq.s32.totalorder %v280_v51, 1 }
  0x2b   :  { %vm3707_vm6 = vmor %vm281_vm5, %vm93_vm4 }
  0x2c   :  { %3030 = vmatmul.mubr.msk.bf16.vlgmr.msra.gmra.mrb[4].mxu0 %vm111_vm1, %v94_v7 }
  0x2d   :  { %3041 = vmatprep.mubr.msk.bf16.mxu0 %vm3445_vm0, %v3444_v1 }
  0xed   :  { %v208_v8 = vpop.f32.mrb[0].mxu1 }
  0xee   :  { %v3023_v9 = vpop.f32.mrb[1].mxu1  ;;  %v149_v10 = vpop.f32.mrb[0].mxu0 }
  0xef   :  { %v156_v11 = vmul.f32 0.17677669, %v149_v10  ;;  %v211_v12 = vpop.f32.mrb[2].mxu1  ;;  %v3015_v13 = vpop.f32.mrb[1].mxu0  ;;  %v755_v10 = vsub.s32 1, %v3698_v46 }
  0xf0   :  { %v273_v14 = vpack.c.bf16 %v211_v12, %v208_v8  ;;  %v3024_v15 = vpop.f32.mrb[3].mxu1  ;;  %v152_v16 = vpop.f32.mrb[2].mxu0 }
  0xf1   :  { %v157_v17 = vmul.f32 0.17677669, %v152_v16  ;;  %v3016_v18 = vpop.f32.mrb[3].mxu0 }
  0xf2   :  { %517 = vrot.lane.b32.xlu1 %v273_v14, %s3446_s27  ;;  %397 = vrot.lane.b32.xlu0 %v273_v14, %s3447_s3  ;;  %v288_v19 = vsel %vm283_vm2, %v273_v14, 0  ;;  %v760_v21 = vrot.slane %v273_v14, 4 }
  0xf3   :  { %v272_v20 = vpack.c.bf16 %v157_v17, %v156_v11  ;;  %3034 = vmatpush3.bf16.xpose.msra.mxu1 %v288_v19  ;;  %v756_v11 = vrot.slane %v276_v49, %v755_v10 }
  0xf4   :  { %3045 = vmatprep.subr.bf16.mxu1 %v3444_v1  ;;  %v765_v34 = vsel %vm283_vm2, %v760_v21, 0 }
  0xf5   :  { %v759_v22 = vrot.slane %v272_v20, 4  ;;  %vm757_vm7 = vcmp.eq.s32.totalorder %v756_v11, 1 }
  0xf6   :  { %515 = vrot.lane.b32.xlu1 %v272_v20, %s3446_s27  ;;  %394 = vrot.lane.b32.xlu0 %v272_v20, %s3447_s3  ;;  %vm3737_vm8 = vmor %vm757_vm7, %vm93_vm4 }
  0xfa   :  { %634 = vrot.lane.b32.xlu1 %v272_v20, %s3448_s7  ;;  %636 = vrot.lane.b32.xlu0 %v273_v14, %s3448_s7 }
  0xfb   :  { %3036 = vmatmul.mubr.msk.bf16.vlgmr.msra.gmra.mrb[4].mxu1 %vm283_vm2, %v272_v20 }
  0xfc   :  { %3047 = vmatprep.mubr.msk.bf16.mxu1 %vm3445_vm0, %v3444_v1 }
  0xfe   :  { %872 = vrot.lane.b32.xlu0 %v760_v21, %s3447_s3  ;;  %870 = vrot.lane.b32.xlu1 %v759_v22, %s3447_s3 }
  0xff   :  { %v265_v51 = vpop.f32.mrb[4].mxu0 }
 0x100   :  { %v3031_v52 = vpop.f32.mrb[5].mxu0 }
 0x102   :  { %990 = vrot.lane.b32.xlu0 %v760_v21, %s3446_s27  ;;  %988 = vrot.lane.b32.xlu1 %v759_v22, %s3446_s27 }
 0x106   :  { %1108 = vrot.lane.b32.xlu0 %v760_v21, %s3448_s7  ;;  %1106 = vrot.lane.b32.xlu1 %v759_v22, %s3448_s7 }
 0x164   :  { %v398_v25 = vpop.permute.xlu0 %397  ;;  %v518_v27 = vpop.permute.xlu1 %517 }
 0x165   :  { %v403_v26 = vsel %vm283_vm2, %v398_v25, 0  ;;  %v523_v29 = vsel %vm283_vm2, %v518_v27, 0 }
 0x166   :  { %3046 = vmatpush3.bf16.xpose.msra.mxu1 %v403_v26 }
 0x167   :  { %3057 = vmatprep.subr.bf16.mxu1 %v3444_v1 }
 0x168   :  { %v395_v28 = vpop.permute.xlu0 %394  ;;  %v516_v31 = vpop.permute.xlu1 %515 }
 0x16c   :  { %v637_v30 = vpop.permute.xlu0 %636  ;;  %v635_v33 = vpop.permute.xlu1 %634 }
 0x16d   :  { %3048 = vmatmul.mubr.msk.bf16.vlgmr.msra.gmra.mrb[8].mxu1 %vm283_vm2, %v395_v28  ;;  %v642_v32 = vsel %vm283_vm2, %v637_v30, 0 }
 0x16e   :  { %3058 = vmatpush3.bf16.xpose.msra.mxu1 %v523_v29  ;;  %3059 = vmatprep.mubr.msk.bf16.mxu1 %vm3445_vm0, %v3444_v1 }
 0x16f   :  { %3069 = vmatprep.subr.bf16.mxu1 %v3444_v1 }
 0x170   :  { %v873_v35 = vpop.permute.xlu0 %872  ;;  %v871_v38 = vpop.permute.xlu1 %870 }
 0x171   :  { %v878_v36 = vsel %vm283_vm2, %v873_v35, 0 }
 0x174   :  { %v991_v37 = vpop.permute.xlu0 %990  ;;  %v989_v41 = vpop.permute.xlu1 %988 }
 0x175   :  { %3060 = vmatmul.mubr.msk.bf16.vlgmr.msra.gmra.mrb[12].mxu1 %vm283_vm2, %v516_v31  ;;  %v996_v39 = vsel %vm283_vm2, %v991_v37, 0 }
 0x176   :  { %3070 = vmatpush3.bf16.xpose.msra.mxu1 %v642_v32  ;;  %3071 = vmatprep.mubr.msk.bf16.mxu1 %vm3445_vm0, %v3444_v1 }
 0x177   :  { %3081 = vmatprep.subr.bf16.mxu1 %v3444_v1 }
 0x178   :  { %v1109_v40 = vpop.permute.xlu0 %1108  ;;  %v1107_v43 = vpop.permute.xlu1 %1106 }
 0x179   :  { %v1114_v42 = vsel %vm283_vm2, %v1109_v40, 0 }
 0x17d   :  { %3072 = vmatmul.mubr.msk.bf16.vlgmr.msra.gmra.mrb[16].mxu1 %vm283_vm2, %v635_v33 }
 0x17e   :  { %3082 = vmatpush3.bf16.xpose.msra.mxu1 %v765_v34  ;;  %3083 = vmatprep.mubr.msk.bf16.mxu1 %vm3445_vm0, %v3444_v1 }
 0x17f   :  { %3093 = vmatprep.subr.bf16.mxu1 %v3444_v1 }
 0x185   :  { %3084 = vmatmul.mubr.msk.bf16.vlgmr.msra.gmra.mrb[20].mxu1 %vm283_vm2, %v759_v22 }
 0x186   :  { %3094 = vmatpush3.bf16.xpose.msra.mxu1 %v878_v36  ;;  %3095 = vmatprep.mubr.msk.bf16.mxu1 %vm3445_vm0, %v3444_v1 }
 0x187   :  { %3105 = vmatprep.subr.bf16.mxu1 %v3444_v1 }
 0x18d   :  { %3096 = vmatmul.mubr.msk.bf16.vlgmr.msra.gmra.mrb[24].mxu1 %vm283_vm2, %v871_v38 }
 0x18e   :  { %3106 = vmatpush3.bf16.xpose.msra.mxu1 %v996_v39  ;;  %3107 = vmatprep.mubr.msk.bf16.mxu1 %vm3445_vm0, %v3444_v1 }
 0x18f   :  { %3117 = vmatprep.subr.bf16.mxu1 %v3444_v1 }
 0x195   :  { %3108 = vmatmul.mubr.msk.bf16.vlgmr.msra.gmra.mrb[28].mxu1 %vm283_vm2, %v989_v41 }
 0x196   :  { %3118 = vmatpush3.bf16.xpose.msra.mxu1 %v1114_v42  ;;  %3119 = vmatprep.mubr.msk.bf16.mxu1 %vm3445_vm0, %v3444_v1 }
 0x197   :  { %3129 = vmatprep.subr.bf16.mxu1 %v3444_v1 }
 0x19d   :  { %3120 = vmatmul.mubr.msk.bf16.vlgmr.msra.gmra.mrb[32].mxu1 %vm283_vm2, %v1107_v43 }
 0x19e   :  { %3133 = vmatprep.mubr.msk.bf16.mxu1 %vm3445_vm0, %v3444_v1 }
 0x1ce   :  { %v324_v53 = vpop.f32.mrb[4].mxu1 }
 0x1cf   :  { %v330_v54 = vsel %vm3707_vm6, -1e+30, %v324_v53  ;;  %v3037_v55 = vpop.f32.mrb[5].mxu1  ;;  %v268_v53 = vpop.f32.mrb[6].mxu0 }
 0x1d0   :  { %v327_v56 = vpop.f32.mrb[6].mxu1  ;;  %v331_v57 = vsel %vm283_vm2, %v330_v54, -inf  ;;  %v3032_v55 = vpop.f32.mrb[7].mxu0 }
 0x1d1   :  { %332 = vmax.xlane.f32.xlu0 %v331_v57  ;;  %v3038_v58 = vpop.f32.mrb[7].mxu1 }
 0x240   :  { %v439_v59 = vpop.f32.mrb[8].mxu1 }
 0x241   :  { %v3716_v60 = vsel %vm3707_vm6, -1e+30, %v439_v59  ;;  %v3049_v61 = vpop.f32.mrb[9].mxu1 }
 0x242   :  { %v442_v62 = vpop.f32.mrb[10].mxu1  ;;  %v446_v63 = vsel %vm283_vm2, %v3716_v60, -inf }
 0x243   :  { %447 = vmax.xlane.f32.xlu1 %v446_v63  ;;  %v3050_v0 = vpop.f32.mrb[11].mxu1 }
 0x248   :  { %v559_v2 = vpop.f32.mrb[12].mxu1 }
 0x249   :  { %v3722_v3 = vsel %vm3707_vm6, -1e+30, %v559_v2  ;;  %v3061_v4 = vpop.f32.mrb[13].mxu1 }
 0x24a   :  { %v562_v7 = vpop.f32.mrb[14].mxu1  ;;  %v566_v8 = vsel %vm283_vm2, %v3722_v3, -inf }
 0x24b   :  { %567 = vmax.xlane.f32.xlu0 %v566_v8  ;;  %v3062_v9 = vpop.f32.mrb[15].mxu1 }
 0x250   :  { %v678_v12 = vpop.f32.mrb[16].mxu1 }
 0x251   :  { %v3731_v13 = vsel %vm3707_vm6, -1e+30, %v678_v12  ;;  %v3073_v14 = vpop.f32.mrb[17].mxu1 }
 0x252   :  { %v681_v15 = vpop.f32.mrb[18].mxu1  ;;  %v685_v16 = vsel %vm283_vm2, %v3731_v13, -inf }
 0x253   :  { %686 = vmax.xlane.f32.xlu0 %v685_v16  ;;  %v3074_v17 = vpop.f32.mrb[19].mxu1 }
 0x258   :  { %v801_v19 = vpop.f32.mrb[20].mxu1 }
 0x259   :  { %v3743_v20 = vsel %vm3737_vm8, -1e+30, %v801_v19  ;;  %v3085_v21 = vpop.f32.mrb[21].mxu1 }
 0x25a   :  { %v804_v22 = vpop.f32.mrb[22].mxu1  ;;  %v808_v23 = vsel %vm283_vm2, %v3743_v20, -inf }
 0x25b   :  { %809 = vmax.xlane.f32.xlu1 %v808_v23  ;;  %v3086_v24 = vpop.f32.mrb[23].mxu1 }
 0x25e   :  { %v333_v25 = vpop.xlane.xlu0 %332 }
 0x25f   :  { %v334_v26 = vsub.f32 %v330_v54, %v333_v25  ;;  %v3763_v54 = vpack.c.bf16 %v268_v53, %v265_v51 }
 0x260   :  { %v914_v27 = vpop.f32.mrb[24].mxu1 }
 0x261   :  { %v335_v28 = vmul.f32 1.442695, %v334_v26  ;;  %v3749_v29 = vsel %vm3737_vm8, -1e+30, %v914_v27  ;;  %v3097_v30 = vpop.f32.mrb[25].mxu1  ;;  %v350_v56 = vsel %vm348_vm9, %v3763_v54, 0 }
 0x262   :  { %v917_v31 = vpop.f32.mrb[26].mxu1  ;;  %v921_v32 = vsel %vm283_vm2, %v3749_v29, -inf  ;;  %3040 = vmatpush3.bf16.msra.mxu0 %v350_v56 }
 0x263   :  { %3320 = vpow2.f32 %v335_v28  ;;  %922 = vmax.xlane.f32.xlu0 %v921_v32  ;;  %v3098_v33 = vpop.f32.mrb[27].mxu1  ;;  %3051 = vmatprep.subr.bf16.mxu0 %v3444_v1 }
 0x268   :  { %v1032_v34 = vpop.f32.mrb[28].mxu1 }
 0x269   :  { %v3755_v35 = vsel %vm3737_vm8, -1e+30, %v1032_v34  ;;  %v3109_v36 = vpop.f32.mrb[29].mxu1 }
 0x26a   :  { %v1035_v37 = vpop.f32.mrb[30].mxu1  ;;  %v1039_v38 = vsel %vm283_vm2, %v3755_v35, -inf  ;;  %v822_v36 = vrot.slane %v3763_v54, 4 }
 0x26b   :  { %1040 = vmax.xlane.f32.xlu1 %v1039_v38  ;;  %v3110_v39 = vpop.f32.mrb[31].mxu1 }
 0x26d   :  { %v3321_v40 = vpop.eup %3320 }
 0x26e   :  { %v337_v41 = vsel %vm283_vm2, %v3321_v40, 0.0 }
 0x26f   :  { %338 = vadd.xlane.f32.xlu1 %v337_v41 }
 0x270   :  { %v1150_v42 = vpop.f32.mrb[32].mxu1 }
 0x271   :  { %v1156_v43 = vsel %vm3737_vm8, -1e+30, %v1150_v42  ;;  %v3121_v44 = vpop.f32.mrb[33].mxu1 }
 0x272   :  { %v1153_v45 = vpop.f32.mrb[34].mxu1  ;;  %v1157_v49 = vsel %vm283_vm2, %v1156_v43, -inf }
 0x273   :  { %1158 = vmax.xlane.f32.xlu0 %v1157_v49  ;;  %v3122_v50 = vpop.f32.mrb[35].mxu1 }
 0x2d0   :  { %v448_v57 = vpop.xlane.xlu1 %447 }
 0x2d1   :  { %v449_v58 = vsub.f32 %v3716_v60, %v448_v57 }
 0x2d3   :  { %v450_v59 = vmul.f32 1.442695, %v449_v58  ;;  %v827_v58 = vsel %vm348_vm9, %v822_v36, 0 }
 0x2d5   :  { %3322 = vpow2.f32 %v450_v59 }
 0x2d8   :  { %v568_v61 = vpop.xlane.xlu0 %567 }
 0x2d9   :  { %v569_v62 = vsub.f32 %v3722_v3, %v568_v61 }
 0x2db   :  { %v570_v63 = vmul.f32 1.442695, %v569_v62 }
 0x2dd   :  { %3324 = vpow2.f32 %v570_v63 }
 0x2df   :  { %v3323_v0 = vpop.eup %3322 }
 0x2e0   :  { %v687_v2 = vpop.xlane.xlu0 %686  ;;  %v452_v4 = vsel %vm283_vm2, %v3323_v0, 0.0 }
 0x2e1   :  { %v688_v7 = vsub.f32 %v3731_v13, %v687_v2  ;;  %453 = vadd.xlane.f32.xlu0 %v452_v4 }
 0x2e3   :  { %v689_v8 = vmul.f32 1.442695, %v688_v7 }
 0x2e5   :  { %3326 = vpow2.f32 %v689_v8 }
 0x2e7   :  { %v3325_v9 = vpop.eup %3324 }
 0x2e8   :  { %v572_v11 = vsel %vm283_vm2, %v3325_v9, 0.0  ;;  %v810_v12 = vpop.xlane.xlu1 %809 }
 0x2e9   :  { %573 = vadd.xlane.f32.xlu1 %v572_v11  ;;  %v811_v18 = vsub.f32 %v3743_v20, %v810_v12 }
 0x2eb   :  { %v812_v22 = vmul.f32 1.442695, %v811_v18 }
 0x2ef   :  { %v3773_v60 = vpop.eup %3326 }
 0x2f0   :  { %v691_v3 = vsel %vm283_vm2, %v3773_v60, 0.0  ;;  %v923_v19 = vpop.xlane.xlu0 %922 }
 0x2f1   :  { %692 = vadd.xlane.f32.xlu0 %v691_v3  ;;  %v924_v21 = vsub.f32 %v3749_v29, %v923_v19 }
 0x2f3   :  { %v925_v25 = vmul.f32 1.442695, %v924_v21 }
 0x2f8   :  { %v1041_v14 = vpop.xlane.xlu1 %1040 }
 0x2f9   :  { %v1042_v23 = vsub.f32 %v3755_v35, %v1041_v14 }
 0x2fa   :  { %580 = vrot.lane.b32.xlu1 %v3763_v54, %s3446_s27 }
 0x2fb   :  { %v1043_v26 = vmul.f32 1.442695, %v1042_v23 }
 0x2fc   :  { %v339_v15 = vpop.xlane.xlu1 %338 }
 0x2fd   :  { %3328 = vrcp.f32 %v339_v15 }
 0x2fe   :  { %699 = vrot.lane.b32.xlu1 %v3763_v54, %s3448_s7  ;;  %3330 = vpow2.f32 %v812_v22 }
 0x2ff   :  { %3332 = vpow2.f32 %v925_v25 }
 0x300   :  { %v1159_v24 = vpop.xlane.xlu0 %1158  ;;  %3334 = vpow2.f32 %v1043_v26 }
 0x301   :  { %v1160_v27 = vsub.f32 %v1156_v43, %v1159_v24 }
 0x303   :  { %v1161_v20 = vmul.f32 1.442695, %v1160_v27 }
 0x305   :  { %3336 = vpow2.f32 %v1161_v20 }
 0x307   :  { %461 = vrot.lane.b32.xlu0 %v3763_v54, %s3447_s3  ;;  %v3329_v13 = vpop.eup %3328 }
 0x308   :  { %v341_v16 = vmul.f32 %v3329_v13, %v3321_v40  ;;  %v3790_v28 = vpop.eup %3330 }
 0x309   :  { %v3792_v30 = vpop.eup %3332  ;;  %v814_v31 = vsel %vm283_vm2, %v3790_v28, 0.0 }
 0x30a   :  { %v342_v17 = vpack.c.bf16 %v341_v16, %v341_v16  ;;  %v3796_v29 = vpop.eup %3334  ;;  %v927_v32 = vsel %vm283_vm2, %v3792_v30, 0.0 }
 0x30b   :  { %v1045_v33 = vsel %vm283_vm2, %v3796_v29, 0.0 }
 0x30c   :  { %344 = vst.msk [vmem:[#allocation3] sm:$0xf] %vm343_vm10, %v342_v17  ;;  %3042 = vmatmul.mubr.msk.bf16.vlgmr.msra.gmra.mrb[8].mxu0 %vm283_vm2, %v342_v17 }
 0x30d   :  { %3053 = vmatprep.mubr.msk.bf16.mxu0 %vm3445_vm0, %v3444_v1 }
 0x30f   :  { %v3802_v34 = vpop.eup %3336 }
 0x310   :  { %v1163_v35 = vsel %vm283_vm2, %v3802_v34, 0.0 }
 0x322   :  { %815 = vadd.xlane.f32.xlu1 %v814_v31 }
 0x326   :  { %928 = vadd.xlane.f32.xlu1 %v927_v32  ;;  %1046 = vadd.xlane.f32.xlu0 %v1045_v33 }
 0x32a   :  { %1164 = vadd.xlane.f32.xlu1 %v1163_v35 }
 0x33b   :  { %1053 = vrot.lane.b32.xlu1 %v822_v36, %s3446_s27 }
 0x33c   :  { %935 = vrot.lane.b32.xlu0 %v822_v36, %s3447_s3 }
 0x340   :  { %1171 = vrot.lane.b32.xlu0 %v822_v36, %s3448_s7 }
 0x36e   :  { %v454_v37 = vpop.xlane.xlu0 %453 }
 0x36f   :  { %3338 = vrcp.f32 %v454_v37 }
 0x376   :  { %v574_v38 = vpop.xlane.xlu1 %573 }
 0x377   :  { %3340 = vrcp.f32 %v574_v38 }
 0x379   :  { %v3339_v39 = vpop.eup %3338 }
 0x37a   :  { %v456_v40 = vmul.f32 %v3339_v39, %v3323_v0  ;;  %v581_v50 = vpop.permute.xlu1 %580 }
 0x37b   :  { %v586_v52 = vsel %vm348_vm9, %v581_v50, 0 }
 0x37c   :  { %v457_v41 = vpack.c.bf16 %v456_v40, %v456_v40 }
 0x37e   :  { %v693_v42 = vpop.xlane.xlu0 %692  ;;  %459 = vst.msk [vmem:[#allocation3 + $0x8] sm:$0xf] %vm343_vm10, %v457_v41  ;;  %v700_v55 = vpop.permute.xlu1 %699 }
 0x37f   :  { %3342 = vrcp.f32 %v693_v42  ;;  %v705_v57 = vsel %vm348_vm9, %v700_v55, 0 }
 0x381   :  { %v3341_v43 = vpop.eup %3340 }
 0x382   :  { %v576_v44 = vmul.f32 %v3341_v43, %v3325_v9  ;;  %v462_v45 = vpop.permute.xlu0 %461 }
 0x383   :  { %v467_v49 = vsel %vm348_vm9, %v462_v45, 0  ;;  %v3304_v45 = vld [vmem:[%s4318_s8] sm:$0xff]  }
 0x384   :  { %3052 = vmatpush3.bf16.msra.mxu0 %v467_v49  ;;  %v577_v51 = vpack.c.bf16 %v576_v44, %v576_v44  ;;  %3130 = vmatpush3.bf16.msra.mxu1 %v3304_v45  ;;  %v3305_v49 = vld [vmem:[%s4318_s8 + $0x8] sm:$0xff]  }
 0x385   :  { %3063 = vmatprep.subr.bf16.mxu0 %v3444_v1  ;;  %3131 = vmatprep.subr.bf16.mxu1 %v3444_v1 }
 0x386   :  { %579 = vst.msk [vmem:[#allocation3 + $0x10] sm:$0xf] %vm343_vm10, %v577_v51 }
 0x387   :  { %3054 = vmatmul.mubr.msk.bf16.vlgmr.msra.gmra.mrb[12].mxu0 %vm283_vm2, %v457_v41 }
 0x388   :  { %3064 = vmatpush3.bf16.msra.mxu0 %v586_v52  ;;  %3065 = vmatprep.mubr.msk.bf16.mxu0 %vm3445_vm0, %v3444_v1 }
 0x389   :  { %v3343_v53 = vpop.eup %3342  ;;  %3075 = vmatprep.subr.bf16.mxu0 %v3444_v1  ;;  %3132 = vmatpush3.bf16.msra.mxu1 %v3305_v49  ;;  %v2868_v49 = vld [vmem:[%s4321_s4] ss:$0 sm:$0xff] }
 0x38a   :  { %v695_v54 = vmul.f32 %v3343_v53, %v3773_v60  ;;  %3145 = vmatprep.subr.bf16.mxu1 %v3444_v1 }
 0x38c   :  { %v696_v56 = vpack.c.bf16 %v695_v54, %v695_v54 }
 0x38e   :  { %698 = vst.msk [vmem:[#allocation3 + $0x18] sm:$0xf] %vm343_vm10, %v696_v56 }
 0x38f   :  { %3066 = vmatmul.mubr.msk.bf16.vlgmr.msra.gmra.mrb[16].mxu0 %vm283_vm2, %v577_v51 }
 0x390   :  { %3076 = vmatpush3.bf16.msra.mxu0 %v705_v57  ;;  %3077 = vmatprep.mubr.msk.bf16.mxu0 %vm3445_vm0, %v3444_v1 }
 0x391   :  { %3087 = vmatprep.subr.bf16.mxu0 %v3444_v1 }
 0x397   :  { %3078 = vmatmul.mubr.msk.bf16.vlgmr.msra.gmra.mrb[20].mxu0 %vm283_vm2, %v696_v56 }
 0x398   :  { %3088 = vmatpush3.bf16.msra.mxu0 %v827_v58  ;;  %3089 = vmatprep.mubr.msk.bf16.mxu0 %vm3445_vm0, %v3444_v1 }
 0x399   :  { %3099 = vmatprep.subr.bf16.mxu0 %v3444_v1 }
 0x3af   :  { %v816_v59 = vpop.xlane.xlu1 %815 }
 0x3b0   :  { %3344 = vrcp.f32 %v816_v59 }
 0x3b3   :  { %v929_v61 = vpop.xlane.xlu1 %928  ;;  %v1047_v62 = vpop.xlane.xlu0 %1046 }
 0x3b4   :  { %3346 = vrcp.f32 %v929_v61 }
 0x3b5   :  { %3348 = vrcp.f32 %v1047_v62 }
 0x3b7   :  { %v1165_v63 = vpop.xlane.xlu1 %1164  ;;  %v936_v4 = vpop.permute.xlu0 %935 }
 0x3b8   :  { %3350 = vrcp.f32 %v1165_v63  ;;  %v941_v60 = vsel %vm348_vm9, %v936_v4, 0 }
 0x3ba   :  { %v3345_v0 = vpop.eup %3344 }
 0x3bb   :  { %v818_v2 = vmul.f32 %v3345_v0, %v3790_v28  ;;  %v1054_v16 = vpop.permute.xlu1 %1053  ;;  %v1172_v19 = vpop.permute.xlu0 %1171 }
 0x3bc   :  { %v1059_v18 = vsel %vm348_vm9, %v1054_v16, 0  ;;  %v1177_v21 = vsel %vm348_vm9, %v1172_v19, 0 }
 0x3bd   :  { %v819_v7 = vpack.c.bf16 %v818_v2, %v818_v2 }
 0x3be   :  { %v3347_v8 = vpop.eup %3346 }
 0x3bf   :  { %v3349_v9 = vpop.eup %3348  ;;  %v931_v11 = vmul.f32 %v3347_v8, %v3792_v30  ;;  %821 = vst.msk [vmem:[#allocation3 + $0x4] sm:$0xf] %vm343_vm10, %v819_v7  ;;  %3090 = vmatmul.mubr.msk.bf16.vlgmr.msra.gmra.mrb[24].mxu0 %vm283_vm2, %v819_v7  ;;  %v2864_v8 = vld [vmem:[%s4319_s30] ss:$0 sm:$0xff] }
 0x3c0   :  { %v1049_v3 = vmul.f32 %v3349_v9, %v3796_v29  ;;  %3100 = vmatpush3.bf16.msra.mxu0 %v941_v60  ;;  %3101 = vmatprep.mubr.msk.bf16.mxu0 %vm3445_vm0, %v3444_v1 }
 0x3c1   :  { %3111 = vmatprep.subr.bf16.mxu0 %v3444_v1  ;;  %v932_v12 = vpack.c.bf16 %v931_v11, %v931_v11 }
 0x3c2   :  { %v3351_v14 = vpop.eup %3350  ;;  %v1050_v15 = vpack.c.bf16 %v1049_v3, %v1049_v3 }
 0x3c3   :  { %v1167_v13 = vmul.f32 %v3351_v14, %v3802_v34  ;;  %934 = vst.msk [vmem:[#allocation3 + $0xc] sm:$0xf] %vm343_vm10, %v932_v12 }
 0x3c4   :  { %1052 = vst.msk [vmem:[#allocation3 + $0x14] sm:$0xf] %vm343_vm10, %v1050_v15 }
 0x3c5   :  { %v1168_v17 = vpack.c.bf16 %v1167_v13, %v1167_v13 }
 0x3c7   :  { %3102 = vmatmul.mubr.msk.bf16.vlgmr.msra.gmra.mrb[28].mxu0 %vm283_vm2, %v932_v12  ;;  %1170 = vst.msk [vmem:[#allocation3 + $0x1c] sm:$0xf] %vm343_vm10, %v1168_v17 }
 0x3c8   :  { %3112 = vmatpush3.bf16.msra.mxu0 %v1059_v18  ;;  %3113 = vmatprep.mubr.msk.bf16.mxu0 %vm3445_vm0, %v3444_v1 }
 0x3c9   :  { %3123 = vmatprep.subr.bf16.mxu0 %v3444_v1 }
 0x3cf   :  { %3114 = vmatmul.mubr.msk.bf16.vlgmr.msra.gmra.mrb[32].mxu0 %vm283_vm2, %v1050_v15 }
 0x3d0   :  { %3124 = vmatpush3.bf16.msra.mxu0 %v1177_v21  ;;  %3125 = vmatprep.mubr.msk.bf16.mxu0 %vm3445_vm0, %v3444_v1 }
 0x3d1   :  { %3137 = vmatprep.subr.bf16.mxu0 %v3444_v1 }
 0x3d7   :  { %3126 = vmatmul.mubr.msk.bf16.vlgmr.msra.gmra.mrb[36].mxu0 %vm283_vm2, %v1168_v17 }
 0x3d8   :  { %3141 = vmatprep.mubr.msk.bf16.mxu0 %vm3445_vm0, %v3444_v1 }
 0x3df   :  { %v386_v22 = vpop.f32.mrb[8].mxu0 }
 0x3e0   :  { %392 = vst.msk [vmem:[#allocation2] sm:$0xff] %vm283_vm2, %v386_v22  ;;  %v3043_v23 = vpop.f32.mrb[9].mxu0 }
 0x3e1   :  { %v389_v24 = vpop.f32.mrb[10].mxu0  ;;  %v85_v23 = vld [vmem:[%s4320_s0] sm:$0xff] }
 0x3e2   :  { %v3044_v25 = vpop.f32.mrb[11].mxu0  ;;  %v86_v24 = vld [vmem:[%s4320_s0 + $0x8] sm:$0xff] }
 0x3e3   :  { %v3904_v25 = vpack.c.bf16 %v86_v24, %v85_v23 }
 0x45a   :  { %v503_v26 = vpop.f32.mrb[12].mxu0 }
 0x45b   :  { %510 = vrot.lane.b32.xlu0 %v503_v26, %s3450_s5  ;;  %v3055_v27 = vpop.f32.mrb[13].mxu0  ;;  %v3308_v26 = vld [vmem:[%s4276_s11] sm:$0xff]  }
 0x45c   :  { %v506_v20 = vpop.f32.mrb[14].mxu0  ;;  %3138 = vmatpush3.bf16.msra.mxu0 %v3308_v26  ;;  %v3309_v27 = vld [vmem:[%s4276_s11 + $0x8] sm:$0xff]   ;;  %s4323_s11 = sld [smem:[#allocation10_spill]] }
 0x45d   :  { %v3056_v28 = vpop.f32.mrb[15].mxu0  ;;  %3139 = vmatprep.subr.bf16.mxu0 %v3444_v1 }
 0x460   :  { %3140 = vmatpush3.bf16.msra.mxu0 %v3309_v27 }
 0x461   :  { %3153 = vmatprep.subr.bf16.mxu0 %v3444_v1 }
 0x462   :  { %v622_v30 = vpop.f32.mrb[16].mxu0 }
 0x463   :  { %629 = vrot.lane.b32.xlu0 %v622_v30, %s3451_s10  ;;  %v3067_v31 = vpop.f32.mrb[17].mxu0 }
 0x464   :  { %v625_v29 = vpop.f32.mrb[18].mxu0 }
 0x465   :  { %v3068_v32 = vpop.f32.mrb[19].mxu0 }
 0x46a   :  { %v741_v33 = vpop.f32.mrb[20].mxu0 }
 0x46b   :  { %748 = vrot.lane.b32.xlu0 %v741_v33, %s3452_s6  ;;  %v3079_v34 = vpop.f32.mrb[21].mxu0 }
 0x46c   :  { %v744_v35 = vpop.f32.mrb[22].mxu0 }
 0x46d   :  { %v3080_v36 = vpop.f32.mrb[23].mxu0 }
 0x492   :  { %v863_v37 = vpop.f32.mrb[24].mxu0 }
 0x493   :  { %869 = vst.msk [vmem:[#allocation2 + $0x8] sm:$0xff] %vm283_vm2, %v863_v37  ;;  %v3091_v38 = vpop.f32.mrb[25].mxu0 }
 0x494   :  { %v866_v39 = vpop.f32.mrb[26].mxu0 }
 0x495   :  { %v3092_v40 = vpop.f32.mrb[27].mxu0 }
 0x49a   :  { %v977_v41 = vpop.f32.mrb[28].mxu0 }
 0x49b   :  { %984 = vrot.lane.b32.xlu1 %v977_v41, %s3450_s5  ;;  %v3103_v42 = vpop.f32.mrb[29].mxu0 }
 0x49c   :  { %v980_v43 = vpop.f32.mrb[30].mxu0 }
 0x49d   :  { %v3104_v44 = vpop.f32.mrb[31].mxu0 }
 0x4a2   :  { %v1095_v50 = vpop.f32.mrb[32].mxu0 }
 0x4a3   :  { %1102 = vrot.lane.b32.xlu1 %v1095_v50, %s3451_s10  ;;  %v3115_v51 = vpop.f32.mrb[33].mxu0 }
 0x4a4   :  { %v1098_v52 = vpop.f32.mrb[34].mxu0 }
 0x4a5   :  { %v3116_v53 = vpop.f32.mrb[35].mxu0 }
 0x4aa   :  { %v1213_v54 = vpop.f32.mrb[36].mxu0 }
 0x4ab   :  { %1220 = vrot.lane.b32.xlu1 %v1213_v54, %s3452_s6  ;;  %v3127_v55 = vpop.f32.mrb[37].mxu0  ;;  %v2869_v54 = vld [vmem:[%s4322_s9] ss:$0 sm:$0xff] }
 0x4ac   :  { %v1216_v56 = vpop.f32.mrb[38].mxu0 }
 0x4ad   :  { %v3128_v57 = vpop.f32.mrb[39].mxu0 }
 0x4cd   :  { %v511_v58 = vpop.permute.xlu0 %510 }
 0x4ce   :  { %514 = vst.msk [vmem:[#allocation2] sm:$0xff] %vm513_vm11, %v511_v58 }
 0x4d5   :  { %v630_v59 = vpop.permute.xlu0 %629 }
 0x4d6   :  { %633 = vst.msk [vmem:[#allocation2] sm:$0xff] %vm632_vm12, %v630_v59 }
 0x4dd   :  { %v749_v61 = vpop.permute.xlu0 %748 }
 0x4de   :  { %752 = vst.msk [vmem:[#allocation2] sm:$0xff] %vm751_vm13, %v749_v61 }
 0x4e5   :  { %v1224_v2 = vld [vmem:[#allocation2] sm:$0xff] }
 0x50d   :  { %v985_v62 = vpop.permute.xlu1 %984 }
 0x50e   :  { %987 = vst.msk [vmem:[#allocation2 + $0x8] sm:$0xff] %vm513_vm11, %v985_v62 }
 0x515   :  { %v1103_v63 = vpop.permute.xlu1 %1102 }
 0x516   :  { %1105 = vst.msk [vmem:[#allocation2 + $0x8] sm:$0xff] %vm632_vm12, %v1103_v63 }
 0x51d   :  { %v1221_v0 = vpop.permute.xlu1 %1220 }
 0x51e   :  { %1223 = vst.msk [vmem:[#allocation2 + $0x8] sm:$0xff] %vm751_vm13, %v1221_v0 }
 0x525   :  { %v1225_v4 = vld [vmem:[#allocation2 + $0x8] sm:$0xff] }
 0x526   :  { %v1226_v7 = vpack.c.bf16 %v1225_v4, %v1224_v2 }
 0x528   :  { %3134 = vmatmul.mubr.msk.bf16.vlgmr.msra.gmra.mrb[36].mxu1 %vm111_vm1, %v1226_v7 }
 0x529   :  { %3149 = vmatprep.mubr.msk.bf16.mxu1 %vm3445_vm0, %v3444_v1 }
 0x5fb   :  { %v1287_v9 = vpop.f32.mrb[36].mxu1 }
 0x5fc   :  { %v1288_v11 = vadd.f32 %v2864_v8, %v1287_v9  ;;  %v3135_v60 = vpop.f32.mrb[37].mxu1 }
 0x5fd   :  { %v1290_v3 = vpop.f32.mrb[38].mxu1 }
 0x5fe   :  { %v1294_v12 = vadd.f32 %v1288_v11, %v3613_v5  ;;  %v1291_v14 = vadd.f32 %v2864_v8, %v1290_v3  ;;  %v3136_v15 = vpop.f32.mrb[39].mxu1  ;;  %v3306_v5 = vld [vmem:[%s4277_s12] sm:$0xff]  }
 0x5ff   :  { %3146 = vmatpush3.bf16.msra.mxu1 %v3306_v5 }
 0x600   :  { %v1295_v13 = vadd.f32 %v1291_v14, %v3618_v6  ;;  %v1298_v16 = vsel %vm111_vm1, %v1294_v12, 0.0  ;;  %v1307_v17 = vmul.f32 %v1294_v12, %v1294_v12  ;;  %3147 = vmatprep.subr.bf16.mxu1 %v3444_v1  ;;  %v3307_v6 = vld [vmem:[%s4277_s12 + $0x8] sm:$0xff]  }
 0x601   :  { %1299 = vadd.xlane.f32.xlu0 %v1298_v16  ;;  %v3310_v16 = vld [vmem:[%s4278_s13] sm:$0xff]  }
 0x602   :  { %v1301_v18 = vsel %vm111_vm1, %v1295_v13, 0.0  ;;  %v1309_v19 = vsel %vm111_vm1, %v1307_v17, 0.0  ;;  %v1308_v21 = vmul.f32 %v1295_v13, %v1295_v13  ;;  %v3311_v17 = vld [vmem:[%s4278_s13 + $0x8] sm:$0xff]  }
 0x603   :  { %1302 = vadd.xlane.f32.xlu1 %v1301_v18  ;;  %3148 = vmatpush3.bf16.msra.mxu1 %v3307_v6 }
 0x604   :  { %v1312_v22 = vsel %vm111_vm1, %v1308_v21, 0.0  ;;  %3161 = vmatprep.subr.bf16.mxu1 %v3444_v1 }
 0x605   :  { %1310 = vadd.xlane.f32.xlu0 %v1309_v19 }
 0x606   :  { %3150 = vmatmul.mubr.msk.bf16.vlgmr.msra.gmra.mrb[40].mxu1 %vm111_vm1, %v3904_v25 }
 0x607   :  { %3163 = vmatprep.mubr.msk.bf16.mxu1 %vm3445_vm0, %v3444_v1 }
 0x609   :  { %1313 = vadd.xlane.f32.xlu0 %v1312_v22 }
 0x68e   :  { %v1300_v20 = vpop.xlane.xlu0 %1299 }
 0x68f   :  { %v1305_v28 = vmul.f32 0.03125, %v1300_v20 }
 0x690   :  { %v1303_v30 = vpop.xlane.xlu1 %1302 }
 0x691   :  { %v1317_v29 = vmul.f32 %v1305_v28, %v1305_v28  ;;  %v1306_v32 = vmul.f32 0.03125, %v1303_v30  ;;  %v1323_v43 = vsub.f32 %v1294_v12, %v1305_v28 }
 0x692   :  { %v1311_v31 = vpop.xlane.xlu0 %1310 }
 0x693   :  { %v1315_v33 = vmul.f32 0.03125, %v1311_v31  ;;  %v1318_v36 = vmul.f32 %v1306_v32, %v1306_v32  ;;  %v1324_v50 = vsub.f32 %v1295_v13, %v1306_v32 }
 0x695   :  { %v1319_v34 = vsub.f32 %v1315_v33, %v1317_v29  ;;  %v88_v33 = vld [vmem:[%s4323_s11] sm:$0x3] }
 0x696   :  { %v1314_v35 = vpop.xlane.xlu0 %1313  ;;  %vm1531_vm14 = vcmp.eq.s32.totalorder %v88_v33, 0 }
 0x697   :  { %v1321_v37 = vmax.f32 %v1319_v34, 0.0  ;;  %v1316_v38 = vmul.f32 0.03125, %v1314_v35  ;;  %v1532_v34 = vsel %vm1531_vm14, 1, %v3449_v48 }
 0x698   :  { %v1536_v35 = vrot.slane %v1532_v34, %v279_v47 }
 0x699   :  { %v1325_v39 = vadd.f32 1e-05, %v1321_v37  ;;  %v1320_v40 = vsub.f32 %v1316_v38, %v1318_v36 }
 0x69a   :  { %vm1537_vm15 = vcmp.eq.s32.totalorder %v1536_v35, 1 }
 0x69b   :  { %3352 = vrsqrt.f32 %v1325_v39  ;;  %v1322_v41 = vmax.f32 %v1320_v40, 0.0 }
 0x69d   :  { %v1326_v42 = vadd.f32 1e-05, %v1322_v41 }
 0x69f   :  { %3354 = vrsqrt.f32 %v1326_v42 }
 0x6a5   :  { %v3353_v44 = vpop.eup %3352 }
 0x6a6   :  { %v1329_v45 = vmul.f32 %v3353_v44, %v1323_v43 }
 0x6a8   :  { %v1337_v53 = vmul.f32 %v2868_v49, %v1329_v45 }
 0x6a9   :  { %v3355_v51 = vpop.eup %3354 }
 0x6aa   :  { %v1330_v52 = vmul.f32 %v3355_v51, %v1324_v50  ;;  %v3925_v56 = vadd.f32 %v2869_v54, %v1337_v53 }
 0x6ac   :  { %v1338_v55 = vmul.f32 %v2868_v49, %v1330_v52 }
 0x6ae   :  { %v3927_v57 = vadd.f32 %v2869_v54, %v1338_v55 }
 0x6b0   :  { %v1347_v58 = vpack.c.bf16 %v3927_v57, %v3925_v56 }
 0x6b2   :  { %3142 = vmatmul.mubr.msk.bf16.vlgmr.msra.gmra.mrb[40].mxu0 %vm111_vm1, %v1347_v58 }
 0x6b3   :  { %3157 = vmatprep.mubr.msk.bf16.mxu0 %vm3445_vm0, %v3444_v1  ;;  %3154 = vmatpush3.bf16.msra.mxu0 %v3310_v16 }
 0x6b4   :  { %3155 = vmatprep.subr.bf16.mxu0 %v3444_v1 }
 0x6b7   :  { %3156 = vmatpush3.bf16.msra.mxu0 %v3311_v17 }
 0x6b8   :  { %3167 = vmatprep.subr.bf16.mxu0 %v3444_v1 }
 0x6ba   :  { %3158 = vmatmul.mubr.msk.bf16.vlgmr.msra.gmra.mrb[44].mxu0 %vm111_vm1, %v3904_v25 }
 0x6bb   :  { %3169 = vmatprep.mubr.msk.bf16.mxu0 %vm3445_vm0, %v3444_v1 }
 0x6d9   :  { %v1464_v59 = vpop.f32.mrb[40].mxu1 }
 0x6da   :  { %v3151_v61 = vpop.f32.mrb[41].mxu1 }
 0x6db   :  { %v1467_v62 = vpop.f32.mrb[42].mxu1 }
 0x6dc   :  { %v1529_v63 = vpack.c.bf16 %v1467_v62, %v1464_v59  ;;  %v3152_v0 = vpop.f32.mrb[43].mxu1 }
 0x6de   :  { %1649 = vrot.lane.b32.xlu1 %v1529_v63, %s3447_s3  ;;  %v1542_v2 = vsel %vm283_vm2, %v1529_v63, 0  ;;  %v2008_v15 = vrot.slane %v1529_v63, 4 }
 0x6df   :  { %3162 = vmatpush3.bf16.xpose.msra.mxu1 %v1542_v2 }
 0x6e0   :  { %3173 = vmatprep.subr.bf16.mxu1 %v3444_v1  ;;  %v2013_v24 = vsel %vm283_vm2, %v2008_v15, 0 }
 0x6e2   :  { %1768 = vrot.lane.b32.xlu1 %v1529_v63, %s3446_s27 }
 0x750   :  { %v1650_v12 = vpop.permute.xlu1 %1649 }
 0x751   :  { %v1655_v14 = vsel %vm283_vm2, %v1650_v12, 0 }
 0x754   :  { %v1769_v18 = vpop.permute.xlu1 %1768 }
 0x755   :  { %v1774_v21 = vsel %vm283_vm2, %v1769_v18, 0 }
 0x785   :  { %v1402_v4 = vpop.f32.mrb[40].mxu0 }
 0x786   :  { %v3143_v7 = vpop.f32.mrb[41].mxu0  ;;  %v1409_v9 = vmul.f32 0.17677669, %v1402_v4 }
 0x787   :  { %v1405_v8 = vpop.f32.mrb[42].mxu0 }
 0x788   :  { %v1410_v11 = vmul.f32 0.17677669, %v1405_v8  ;;  %v3144_v60 = vpop.f32.mrb[43].mxu0 }
 0x78a   :  { %v1528_v3 = vpack.c.bf16 %v1410_v11, %v1409_v9 }
 0x78c   :  { %1766 = vrot.lane.b32.xlu1 %v1528_v3, %s3446_s27  ;;  %1646 = vrot.lane.b32.xlu0 %v1528_v3, %s3447_s3  ;;  %v2007_v13 = vrot.slane %v1528_v3, 4 }
 0x78d   :  { %3164 = vmatmul.mubr.msk.bf16.vlgmr.msra.gmra.mrb[44].mxu1 %vm283_vm2, %v1528_v3 }
 0x78e   :  { %3174 = vmatpush3.bf16.xpose.msra.mxu1 %v1655_v14  ;;  %3175 = vmatprep.mubr.msk.bf16.mxu1 %vm3445_vm0, %v3444_v1 }
 0x78f   :  { %3185 = vmatprep.subr.bf16.mxu1 %v3444_v1 }
 0x790   :  { %1884 = vrot.lane.b32.xlu1 %v1528_v3, %s3448_s7  ;;  %1886 = vrot.lane.b32.xlu0 %v1529_v63, %s3448_s7  ;;  %v2005_v63 = vrot.slane %v1532_v34, %v755_v10 }
 0x792   :  { %vm2006_vm3 = vcmp.eq.s32.totalorder %v2005_v63, 1 }
 0x794   :  { %2120 = vrot.lane.b32.xlu0 %v2008_v15, %s3447_s3  ;;  %2118 = vrot.lane.b32.xlu1 %v2007_v13, %s3447_s3 }
 0x798   :  { %2238 = vrot.lane.b32.xlu0 %v2008_v15, %s3446_s27  ;;  %2236 = vrot.lane.b32.xlu1 %v2007_v13, %s3446_s27 }
 0x79c   :  { %2356 = vrot.lane.b32.xlu0 %v2008_v15, %s3448_s7  ;;  %2354 = vrot.lane.b32.xlu1 %v2007_v13, %s3448_s7 }
 0x7fe   :  { %v1647_v19 = vpop.permute.xlu0 %1646  ;;  %v1767_v5 = vpop.permute.xlu1 %1766 }
 0x7ff   :  { %3176 = vmatmul.mubr.msk.bf16.vlgmr.msra.gmra.mrb[48].mxu1 %vm283_vm2, %v1647_v19 }
 0x800   :  { %3186 = vmatpush3.bf16.xpose.msra.mxu1 %v1774_v21  ;;  %3187 = vmatprep.mubr.msk.bf16.mxu1 %vm3445_vm0, %v3444_v1 }
 0x801   :  { %3197 = vmatprep.subr.bf16.mxu1 %v3444_v1 }
 0x802   :  { %v1887_v22 = vpop.permute.xlu0 %1886  ;;  %v1885_v23 = vpop.permute.xlu1 %1884 }
 0x803   :  { %v1892_v6 = vsel %vm283_vm2, %v1887_v22, 0 }
 0x806   :  { %v2121_v25 = vpop.permute.xlu0 %2120  ;;  %v2119_v20 = vpop.permute.xlu1 %2118 }
 0x807   :  { %3188 = vmatmul.mubr.msk.bf16.vlgmr.msra.gmra.mrb[52].mxu1 %vm283_vm2, %v1767_v5  ;;  %v2126_v26 = vsel %vm283_vm2, %v2121_v25, 0 }
 0x808   :  { %3198 = vmatpush3.bf16.xpose.msra.mxu1 %v1892_v6  ;;  %3199 = vmatprep.mubr.msk.bf16.mxu1 %vm3445_vm0, %v3444_v1 }
 0x809   :  { %3209 = vmatprep.subr.bf16.mxu1 %v3444_v1 }
 0x80a   :  { %v2239_v27 = vpop.permute.xlu0 %2238  ;;  %v2237_v31 = vpop.permute.xlu1 %2236 }
 0x80b   :  { %v2244_v28 = vsel %vm283_vm2, %v2239_v27, 0 }
 0x80e   :  { %v2357_v30 = vpop.permute.xlu0 %2356  ;;  %v2355_v32 = vpop.permute.xlu1 %2354 }
 0x80f   :  { %3200 = vmatmul.mubr.msk.bf16.vlgmr.msra.gmra.mrb[56].mxu1 %vm283_vm2, %v1885_v23  ;;  %v2362_v29 = vsel %vm283_vm2, %v2357_v30, 0  ;;  %v1521_v30 = vpop.f32.mrb[44].mxu0 }
 0x810   :  { %3210 = vmatpush3.bf16.xpose.msra.mxu1 %v2013_v24  ;;  %3211 = vmatprep.mubr.msk.bf16.mxu1 %vm3445_vm0, %v3444_v1 }
 0x811   :  { %3221 = vmatprep.subr.bf16.mxu1 %v3444_v1 }
 0x817   :  { %3212 = vmatmul.mubr.msk.bf16.vlgmr.msra.gmra.mrb[60].mxu1 %vm283_vm2, %v2007_v13 }
 0x818   :  { %3222 = vmatpush3.bf16.xpose.msra.mxu1 %v2126_v26  ;;  %3223 = vmatprep.mubr.msk.bf16.mxu1 %vm3445_vm0, %v3444_v1 }
 0x819   :  { %3233 = vmatprep.subr.bf16.mxu1 %v3444_v1 }
 0x81f   :  { %3224 = vmatmul.mubr.msk.bf16.vlgmr.msra.gmra.mrb[64].mxu1 %vm283_vm2, %v2119_v20 }
 0x820   :  { %3234 = vmatpush3.bf16.xpose.msra.mxu1 %v2244_v28  ;;  %3235 = vmatprep.mubr.msk.bf16.mxu1 %vm3445_vm0, %v3444_v1 }
 0x821   :  { %3245 = vmatprep.subr.bf16.mxu1 %v3444_v1 }
 0x827   :  { %3236 = vmatmul.mubr.msk.bf16.vlgmr.msra.gmra.mrb[68].mxu1 %vm283_vm2, %v2237_v31  ;;  %v3159_v31 = vpop.f32.mrb[45].mxu0 }
 0x828   :  { %3246 = vmatpush3.bf16.xpose.msra.mxu1 %v2362_v29  ;;  %3247 = vmatprep.mubr.msk.bf16.mxu1 %vm3445_vm0, %v3444_v1  ;;  %v1524_v29 = vpop.f32.mrb[46].mxu0 }
 0x829   :  { %3257 = vmatprep.subr.bf16.mxu1 %v3444_v1  ;;  %v3160_v33 = vpop.f32.mrb[47].mxu0 }
 0x82f   :  { %3248 = vmatmul.mubr.msk.bf16.vlgmr.msra.gmra.mrb[72].mxu1 %vm283_vm2, %v2355_v32  ;;  %v4041_v32 = vpack.c.bf16 %v1524_v29, %v1521_v30 }
 0x830   :  { %3261 = vmatprep.mubr.msk.bf16.mxu1 %vm3445_vm0, %v3444_v1 }
 0x831   :  { %v1602_v34 = vsel %vm348_vm9, %v4041_v32, 0 }
 0x832   :  { %3168 = vmatpush3.bf16.msra.mxu0 %v1602_v34 }
 0x833   :  { %3179 = vmatprep.subr.bf16.mxu0 %v3444_v1 }
 0x860   :  { %v1578_v36 = vpop.f32.mrb[44].mxu1 }
 0x861   :  { %v1584_v37 = vsel %vm1537_vm15, -1e+30, %v1578_v36  ;;  %v3165_v38 = vpop.f32.mrb[45].mxu1 }
 0x862   :  { %v1581_v39 = vpop.f32.mrb[46].mxu1  ;;  %v1585_v40 = vsel %vm283_vm2, %v1584_v37, -inf }
 0x863   :  { %1586 = vmax.xlane.f32.xlu0 %v1585_v40  ;;  %v3166_v41 = vpop.f32.mrb[47].mxu1 }
 0x8d2   :  { %v1691_v42 = vpop.f32.mrb[48].mxu1 }
 0x8d3   :  { %v4007_v43 = vsel %vm1537_vm15, -1e+30, %v1691_v42  ;;  %v3177_v44 = vpop.f32.mrb[49].mxu1 }
 0x8d4   :  { %v1694_v45 = vpop.f32.mrb[50].mxu1  ;;  %v1698_v48 = vsel %vm283_vm2, %v4007_v43, -inf }
 0x8d5   :  { %1699 = vmax.xlane.f32.xlu1 %v1698_v48  ;;  %v3178_v47 = vpop.f32.mrb[51].mxu1 }
 0x8da   :  { %v1810_v49 = vpop.f32.mrb[52].mxu1 }
 0x8db   :  { %v4012_v50 = vsel %vm1537_vm15, -1e+30, %v1810_v49  ;;  %v3189_v51 = vpop.f32.mrb[53].mxu1 }
 0x8dc   :  { %v1813_v52 = vpop.f32.mrb[54].mxu1  ;;  %v1817_v53 = vsel %vm283_vm2, %v4012_v50, -inf }
 0x8dd   :  { %1818 = vmax.xlane.f32.xlu0 %v1817_v53  ;;  %v3190_v54 = vpop.f32.mrb[55].mxu1 }
 0x8e2   :  { %v1928_v55 = vpop.f32.mrb[56].mxu1 }
 0x8e3   :  { %v4017_v58 = vsel %vm1537_vm15, -1e+30, %v1928_v55  ;;  %v3201_v59 = vpop.f32.mrb[57].mxu1 }
 0x8e4   :  { %v1931_v61 = vpop.f32.mrb[58].mxu1  ;;  %v1935_v62 = vsel %vm283_vm2, %v4017_v58, -inf }
 0x8e5   :  { %1936 = vmax.xlane.f32.xlu0 %v1935_v62  ;;  %v3202_v0 = vpop.f32.mrb[59].mxu1 }
 0x8ea   :  { %v2049_v2 = vpop.f32.mrb[60].mxu1 }
 0x8eb   :  { %v4024_v4 = vsel %vm2006_vm3, -1e+30, %v2049_v2  ;;  %v3213_v7 = vpop.f32.mrb[61].mxu1 }
 0x8ec   :  { %v2052_v8 = vpop.f32.mrb[62].mxu1  ;;  %v2056_v9 = vsel %vm283_vm2, %v4024_v4, -inf }
 0x8ed   :  { %2057 = vmax.xlane.f32.xlu1 %v2056_v9  ;;  %v3214_v11 = vpop.f32.mrb[63].mxu1 }
 0x8f0   :  { %v1587_v60 = vpop.xlane.xlu0 %1586 }
 0x8f1   :  { %v1588_v3 = vsub.f32 %v1584_v37, %v1587_v60 }
 0x8f2   :  { %v2162_v12 = vpop.f32.mrb[64].mxu1 }
 0x8f3   :  { %v1589_v14 = vmul.f32 1.442695, %v1588_v3  ;;  %v4029_v46 = vsel %vm2006_vm3, -1e+30, %v2162_v12  ;;  %v3225_v10 = vpop.f32.mrb[65].mxu1 }
 0x8f4   :  { %v2165_v15 = vpop.f32.mrb[66].mxu1  ;;  %v2169_v13 = vsel %vm283_vm2, %v4029_v46, -inf }
 0x8f5   :  { %3356 = vpow2.f32 %v1589_v14  ;;  %2170 = vmax.xlane.f32.xlu0 %v2169_v13  ;;  %v3226_v16 = vpop.f32.mrb[67].mxu1  ;;  %v2070_v13 = vrot.slane %v4041_v32, 4 }
 0x8fa   :  { %v2280_v17 = vpop.f32.mrb[68].mxu1 }
 0x8fb   :  { %v4034_v18 = vsel %vm2006_vm3, -1e+30, %v2280_v17  ;;  %v3237_v19 = vpop.f32.mrb[69].mxu1 }
 0x8fc   :  { %v2283_v21 = vpop.f32.mrb[70].mxu1  ;;  %v2287_v22 = vsel %vm283_vm2, %v4034_v18, -inf }
 0x8fd   :  { %2288 = vmax.xlane.f32.xlu1 %v2287_v22  ;;  %v3238_v5 = vpop.f32.mrb[71].mxu1 }
 0x8ff   :  { %v3357_v6 = vpop.eup %3356 }
 0x900   :  { %v1591_v23 = vsel %vm283_vm2, %v3357_v6, 0.0 }
 0x901   :  { %1592 = vadd.xlane.f32.xlu1 %v1591_v23 }
 0x902   :  { %v2398_v24 = vpop.f32.mrb[72].mxu1 }
 0x903   :  { %v2404_v25 = vsel %vm2006_vm3, -1e+30, %v2398_v24  ;;  %v3249_v26 = vpop.f32.mrb[73].mxu1 }
 0x904   :  { %v2401_v27 = vpop.f32.mrb[74].mxu1  ;;  %v2405_v20 = vsel %vm283_vm2, %v2404_v25, -inf }
 0x905   :  { %2406 = vmax.xlane.f32.xlu0 %v2405_v20  ;;  %v3250_v28 = vpop.f32.mrb[75].mxu1 }
 0x962   :  { %v1700_v35 = vpop.xlane.xlu1 %1699 }
 0x963   :  { %v1701_v36 = vsub.f32 %v4007_v43, %v1700_v35 }
 0x965   :  { %v1702_v37 = vmul.f32 1.442695, %v1701_v36 }
 0x967   :  { %3358 = vpow2.f32 %v1702_v37 }
 0x96a   :  { %v1819_v38 = vpop.xlane.xlu0 %1818 }
 0x96b   :  { %v1820_v39 = vsub.f32 %v4012_v50, %v1819_v38 }
 0x96d   :  { %v1821_v40 = vmul.f32 1.442695, %v1820_v39 }
 0x96f   :  { %3360 = vpow2.f32 %v1821_v40 }
 0x971   :  { %v3359_v41 = vpop.eup %3358 }
 0x972   :  { %v1937_v42 = vpop.xlane.xlu0 %1936  ;;  %v1704_v44 = vsel %vm283_vm2, %v3359_v41, 0.0 }
 0x973   :  { %v1938_v45 = vsub.f32 %v4017_v58, %v1937_v42  ;;  %1705 = vadd.xlane.f32.xlu0 %v1704_v44 }
 0x975   :  { %v1939_v48 = vmul.f32 1.442695, %v1938_v45 }
 0x977   :  { %3362 = vpow2.f32 %v1939_v48 }
 0x979   :  { %v3361_v47 = vpop.eup %3360 }
 0x97a   :  { %v1823_v49 = vsel %vm283_vm2, %v3361_v47, 0.0  ;;  %v2058_v51 = vpop.xlane.xlu1 %2057 }
 0x97b   :  { %1824 = vadd.xlane.f32.xlu1 %v1823_v49  ;;  %v2059_v59 = vsub.f32 %v4024_v4, %v2058_v51 }
 0x97d   :  { %v2060_v63 = vmul.f32 1.442695, %v2059_v59 }
 0x981   :  { %v4051_v43 = vpop.eup %3362 }
 0x982   :  { %v1941_v50 = vsel %vm283_vm2, %v4051_v43, 0.0  ;;  %v2171_v61 = vpop.xlane.xlu0 %2170 }
 0x983   :  { %1942 = vadd.xlane.f32.xlu0 %v1941_v50  ;;  %v2172_v62 = vsub.f32 %v4029_v46, %v2171_v61 }
 0x985   :  { %v2173_v7 = vmul.f32 1.442695, %v2172_v62 }
 0x98a   :  { %v2289_v52 = vpop.xlane.xlu1 %2288 }
 0x98b   :  { %v2290_v0 = vsub.f32 %v4034_v18, %v2289_v52 }
 0x98c   :  { %1831 = vrot.lane.b32.xlu1 %v4041_v32, %s3446_s27 }
 0x98d   :  { %v2291_v8 = vmul.f32 1.442695, %v2290_v0 }
 0x98e   :  { %v1593_v53 = vpop.xlane.xlu1 %1592 }
 0x98f   :  { %3364 = vrcp.f32 %v1593_v53 }
 0x990   :  { %1949 = vrot.lane.b32.xlu1 %v4041_v32, %s3448_s7  ;;  %3366 = vpow2.f32 %v2060_v63 }
 0x991   :  { %3368 = vpow2.f32 %v2173_v7 }
 0x992   :  { %v2407_v2 = vpop.xlane.xlu0 %2406  ;;  %3370 = vpow2.f32 %v2291_v8 }
 0x993   :  { %v2408_v9 = vsub.f32 %v2404_v25, %v2407_v2 }
 0x995   :  { %v2409_v4 = vmul.f32 1.442695, %v2408_v9 }
 0x997   :  { %3372 = vpow2.f32 %v2409_v4 }
 0x999   :  { %1713 = vrot.lane.b32.xlu0 %v4041_v32, %s3447_s3  ;;  %v3365_v54 = vpop.eup %3364  ;;  %v2075_v32 = vsel %vm348_vm9, %v2070_v13, 0 }
 0x99a   :  { %v1595_v55 = vmul.f32 %v3365_v54, %v3357_v6  ;;  %v4068_v11 = vpop.eup %3366 }
 0x99b   :  { %v4070_v60 = vpop.eup %3368  ;;  %v2062_v3 = vsel %vm283_vm2, %v4068_v11, 0.0 }
 0x99c   :  { %v1596_v58 = vpack.c.bf16 %v1595_v55, %v1595_v55  ;;  %v4074_v12 = vpop.eup %3370  ;;  %v2175_v14 = vsel %vm283_vm2, %v4070_v60, 0.0 }
 0x99d   :  { %v2293_v46 = vsel %vm283_vm2, %v4074_v12, 0.0 }
 0x99e   :  { %1597 = vst.msk [vmem:[#allocation5] sm:$0xf] %vm343_vm10, %v1596_v58  ;;  %3170 = vmatmul.mubr.msk.bf16.vlgmr.msra.gmra.mrb[48].mxu0 %vm283_vm2, %v1596_v58 }
 0x99f   :  { %3181 = vmatprep.mubr.msk.bf16.mxu0 %vm3445_vm0, %v3444_v1 }
 0x9a1   :  { %v4080_v10 = vpop.eup %3372 }
 0x9a2   :  { %v2411_v15 = vsel %vm283_vm2, %v4080_v10, 0.0 }
 0x9b4   :  { %2063 = vadd.xlane.f32.xlu1 %v2062_v3 }
 0x9b8   :  { %2176 = vadd.xlane.f32.xlu1 %v2175_v14  ;;  %2294 = vadd.xlane.f32.xlu0 %v2293_v46 }
 0x9bc   :  { %2412 = vadd.xlane.f32.xlu1 %v2411_v15 }
 0x9cd   :  { %2301 = vrot.lane.b32.xlu1 %v2070_v13, %s3446_s27 }
 0x9ce   :  { %2183 = vrot.lane.b32.xlu0 %v2070_v13, %s3447_s3 }
 0x9d2   :  { %2419 = vrot.lane.b32.xlu0 %v2070_v13, %s3448_s7 }
 0xa00   :  { %v1706_v16 = vpop.xlane.xlu0 %1705 }
 0xa01   :  { %3374 = vrcp.f32 %v1706_v16 }
 0xa08   :  { %v1825_v17 = vpop.xlane.xlu1 %1824 }
 0xa09   :  { %3376 = vrcp.f32 %v1825_v17 }
 0xa0b   :  { %v3375_v18 = vpop.eup %3374 }
 0xa0c   :  { %v1708_v19 = vmul.f32 %v3375_v18, %v3359_v41  ;;  %v1832_v25 = vpop.permute.xlu1 %1831 }
 0xa0d   :  { %v1837_v27 = vsel %vm348_vm9, %v1832_v25, 0 }
 0xa0e   :  { %v1709_v21 = vpack.c.bf16 %v1708_v19, %v1708_v19 }
 0xa10   :  { %v1943_v22 = vpop.xlane.xlu0 %1942  ;;  %1711 = vst.msk [vmem:[#allocation5 + $0x8] sm:$0xf] %vm343_vm10, %v1709_v21  ;;  %v1950_v30 = vpop.permute.xlu1 %1949 }
 0xa11   :  { %3378 = vrcp.f32 %v1943_v22  ;;  %v1955_v29 = vsel %vm348_vm9, %v1950_v30, 0  ;;  %v3313_v22 = vld [vmem:[%s4279_s14 + $0x8] sm:$0xff]  }
 0xa13   :  { %v3377_v5 = vpop.eup %3376 }
 0xa14   :  { %v1827_v6 = vmul.f32 %v3377_v5, %v3361_v47  ;;  %v1714_v23 = vpop.permute.xlu0 %1713 }
 0xa15   :  { %v1719_v24 = vsel %vm348_vm9, %v1714_v23, 0 }
 0xa16   :  { %3180 = vmatpush3.bf16.msra.mxu0 %v1719_v24  ;;  %v1828_v26 = vpack.c.bf16 %v1827_v6, %v1827_v6 }
 0xa17   :  { %3191 = vmatprep.subr.bf16.mxu0 %v3444_v1 }
 0xa18   :  { %1830 = vst.msk [vmem:[#allocation5 + $0x10] sm:$0xf] %vm343_vm10, %v1828_v26 }
 0xa19   :  { %3182 = vmatmul.mubr.msk.bf16.vlgmr.msra.gmra.mrb[52].mxu0 %vm283_vm2, %v1709_v21  ;;  %v3312_v21 = vld [vmem:[%s4279_s14] sm:$0xff]  }
 0xa1a   :  { %3192 = vmatpush3.bf16.msra.mxu0 %v1837_v27  ;;  %3193 = vmatprep.mubr.msk.bf16.mxu0 %vm3445_vm0, %v3444_v1 }
 0xa1b   :  { %v3379_v20 = vpop.eup %3378  ;;  %3203 = vmatprep.subr.bf16.mxu0 %v3444_v1  ;;  %3258 = vmatpush3.bf16.msra.mxu1 %v3312_v21 }
 0xa1c   :  { %v1945_v28 = vmul.f32 %v3379_v20, %v4051_v43  ;;  %3259 = vmatprep.subr.bf16.mxu1 %v3444_v1 }
 0xa1e   :  { %v1946_v31 = vpack.c.bf16 %v1945_v28, %v1945_v28 }
 0xa1f   :  { %3260 = vmatpush3.bf16.msra.mxu1 %v3313_v22 }
 0xa20   :  { %1948 = vst.msk [vmem:[#allocation5 + $0x18] sm:$0xf] %vm343_vm10, %v1946_v31  ;;  %3273 = vmatprep.subr.bf16.mxu1 %v3444_v1 }
 0xa21   :  { %3194 = vmatmul.mubr.msk.bf16.vlgmr.msra.gmra.mrb[56].mxu0 %vm283_vm2, %v1828_v26 }
 0xa22   :  { %3204 = vmatpush3.bf16.msra.mxu0 %v1955_v29  ;;  %3205 = vmatprep.mubr.msk.bf16.mxu0 %vm3445_vm0, %v3444_v1 }
 0xa23   :  { %3215 = vmatprep.subr.bf16.mxu0 %v3444_v1 }
 0xa29   :  { %3206 = vmatmul.mubr.msk.bf16.vlgmr.msra.gmra.mrb[60].mxu0 %vm283_vm2, %v1946_v31 }
 0xa2a   :  { %3216 = vmatpush3.bf16.msra.mxu0 %v2075_v32  ;;  %3217 = vmatprep.mubr.msk.bf16.mxu0 %vm3445_vm0, %v3444_v1 }
 0xa2b   :  { %3227 = vmatprep.subr.bf16.mxu0 %v3444_v1 }
 0xa41   :  { %v2064_v33 = vpop.xlane.xlu1 %2063 }
 0xa42   :  { %3380 = vrcp.f32 %v2064_v33 }
 0xa45   :  { %v2177_v34 = vpop.xlane.xlu1 %2176  ;;  %v2295_v35 = vpop.xlane.xlu0 %2294 }
 0xa46   :  { %3382 = vrcp.f32 %v2177_v34 }
 0xa47   :  { %3384 = vrcp.f32 %v2295_v35 }
 0xa49   :  { %v2413_v36 = vpop.xlane.xlu1 %2412  ;;  %v2184_v39 = vpop.permute.xlu0 %2183 }
 0xa4a   :  { %3386 = vrcp.f32 %v2413_v36  ;;  %v2189_v45 = vsel %vm348_vm9, %v2184_v39, 0 }
 0xa4c   :  { %v3381_v37 = vpop.eup %3380 }
 0xa4d   :  { %v2066_v38 = vmul.f32 %v3381_v37, %v4068_v11  ;;  %v2302_v51 = vpop.permute.xlu1 %2301  ;;  %v2420_v54 = vpop.permute.xlu0 %2419  ;;  %v2895_v37 = vld [vmem:[%s4280_s15] ss:$0 sm:$0xff] }
 0xa4e   :  { %v2307_v53 = vsel %vm348_vm9, %v2302_v51, 0  ;;  %v2425_v55 = vsel %vm348_vm9, %v2420_v54, 0  ;;  %v3317_v54 = vld [vmem:[%s4285_s20 + $0x8] sm:$0xff]  }
 0xa4f   :  { %v2067_v40 = vpack.c.bf16 %v2066_v38, %v2066_v38 }
 0xa50   :  { %v3383_v41 = vpop.eup %3382 }
 0xa51   :  { %v3385_v42 = vpop.eup %3384  ;;  %v2179_v44 = vmul.f32 %v3383_v41, %v4070_v60  ;;  %2069 = vst.msk [vmem:[#allocation5 + $0x4] sm:$0xf] %vm343_vm10, %v2067_v40  ;;  %3218 = vmatmul.mubr.msk.bf16.vlgmr.msra.gmra.mrb[64].mxu0 %vm283_vm2, %v2067_v40 }
 0xa52   :  { %v2297_v48 = vmul.f32 %v3385_v42, %v4074_v12  ;;  %3228 = vmatpush3.bf16.msra.mxu0 %v2189_v45  ;;  %3229 = vmatprep.mubr.msk.bf16.mxu0 %vm3445_vm0, %v3444_v1 }
 0xa53   :  { %3239 = vmatprep.subr.bf16.mxu0 %v3444_v1  ;;  %v2180_v47 = vpack.c.bf16 %v2179_v44, %v2179_v44 }
 0xa54   :  { %v3387_v49 = vpop.eup %3386  ;;  %v2298_v43 = vpack.c.bf16 %v2297_v48, %v2297_v48 }
 0xa55   :  { %v2415_v50 = vmul.f32 %v3387_v49, %v4080_v10  ;;  %2182 = vst.msk [vmem:[#allocation5 + $0xc] sm:$0xf] %vm343_vm10, %v2180_v47 }
 0xa56   :  { %2300 = vst.msk [vmem:[#allocation5 + $0x14] sm:$0xf] %vm343_vm10, %v2298_v43 }
 0xa57   :  { %v2416_v52 = vpack.c.bf16 %v2415_v50, %v2415_v50 }
 0xa59   :  { %3230 = vmatmul.mubr.msk.bf16.vlgmr.msra.gmra.mrb[68].mxu0 %vm283_vm2, %v2180_v47  ;;  %2418 = vst.msk [vmem:[#allocation5 + $0x1c] sm:$0xf] %vm343_vm10, %v2416_v52 }
 0xa5a   :  { %3240 = vmatpush3.bf16.msra.mxu0 %v2307_v53  ;;  %3241 = vmatprep.mubr.msk.bf16.mxu0 %vm3445_vm0, %v3444_v1  ;;  %v3316_v53 = vld [vmem:[%s4285_s20] sm:$0xff]  }
 0xa5b   :  { %3251 = vmatprep.subr.bf16.mxu0 %v3444_v1 }
 0xa61   :  { %3242 = vmatmul.mubr.msk.bf16.vlgmr.msra.gmra.mrb[72].mxu0 %vm283_vm2, %v2298_v43 }
 0xa62   :  { %3252 = vmatpush3.bf16.msra.mxu0 %v2425_v55  ;;  %3253 = vmatprep.mubr.msk.bf16.mxu0 %vm3445_vm0, %v3444_v1 }
 0xa63   :  { %3265 = vmatprep.subr.bf16.mxu0 %v3444_v1 }
 0xa69   :  { %3254 = vmatmul.mubr.msk.bf16.vlgmr.msra.gmra.mrb[76].mxu0 %vm283_vm2, %v2416_v52 }
 0xa6a   :  { %3269 = vmatprep.mubr.msk.bf16.mxu0 %vm3445_vm0, %v3444_v1 }
 0xa71   :  { %v1638_v58 = vpop.f32.mrb[48].mxu0 }
 0xa72   :  { %1644 = vst.msk [vmem:[#allocation2] sm:$0xff] %vm283_vm2, %v1638_v58  ;;  %v3171_v59 = vpop.f32.mrb[49].mxu0 }
 0xa73   :  { %v1641_v61 = vpop.f32.mrb[50].mxu0 }
 0xa74   :  { %v3172_v62 = vpop.f32.mrb[51].mxu0 }
 0xaec   :  { %v1755_v63 = vpop.f32.mrb[52].mxu0 }
 0xaed   :  { %1762 = vrot.lane.b32.xlu0 %v1755_v63, %s3450_s5  ;;  %v3183_v0 = vpop.f32.mrb[53].mxu0 }
 0xaee   :  { %v1758_v2 = vpop.f32.mrb[54].mxu0 }
 0xaef   :  { %v3184_v7 = vpop.f32.mrb[55].mxu0 }
 0xaf4   :  { %v1873_v8 = vpop.f32.mrb[56].mxu0 }
 0xaf5   :  { %1880 = vrot.lane.b32.xlu0 %v1873_v8, %s3451_s10  ;;  %v3195_v9 = vpop.f32.mrb[57].mxu0 }
 0xaf6   :  { %v1876_v4 = vpop.f32.mrb[58].mxu0 }
 0xaf7   :  { %v3196_v11 = vpop.f32.mrb[59].mxu0 }
 0xafc   :  { %v1991_v60 = vpop.f32.mrb[60].mxu0 }
 0xafd   :  { %1998 = vrot.lane.b32.xlu0 %v1991_v60, %s3452_s6  ;;  %v3207_v3 = vpop.f32.mrb[61].mxu0 }
 0xafe   :  { %v1994_v12 = vpop.f32.mrb[62].mxu0 }
 0xaff   :  { %v3208_v14 = vpop.f32.mrb[63].mxu0 }
 0xb24   :  { %v2111_v46 = vpop.f32.mrb[64].mxu0 }
 0xb25   :  { %2117 = vst.msk [vmem:[#allocation2 + $0x8] sm:$0xff] %vm283_vm2, %v2111_v46  ;;  %v3219_v10 = vpop.f32.mrb[65].mxu0 }
 0xb26   :  { %v2114_v15 = vpop.f32.mrb[66].mxu0 }
 0xb27   :  { %v3220_v13 = vpop.f32.mrb[67].mxu0  ;;  %v2899_v15 = vld [vmem:[%s4281_s16] ss:$0 sm:$0xff] }
 0xb2c   :  { %v2225_v16 = vpop.f32.mrb[68].mxu0 }
 0xb2d   :  { %2232 = vrot.lane.b32.xlu1 %v2225_v16, %s3450_s5  ;;  %v3231_v17 = vpop.f32.mrb[69].mxu0 }
 0xb2e   :  { %v2228_v18 = vpop.f32.mrb[70].mxu0 }
 0xb2f   :  { %v3232_v19 = vpop.f32.mrb[71].mxu0 }
 0xb30   :  { %v2900_v19 = vld [vmem:[%s4282_s17] ss:$0 sm:$0xff] }
 0xb34   :  { %v2343_v5 = vpop.f32.mrb[72].mxu0 }
 0xb35   :  { %2350 = vrot.lane.b32.xlu1 %v2343_v5, %s3451_s10  ;;  %v3243_v6 = vpop.f32.mrb[73].mxu0 }
 0xb36   :  { %v2346_v23 = vpop.f32.mrb[74].mxu0 }
 0xb37   :  { %v3244_v24 = vpop.f32.mrb[75].mxu0  ;;  %v3318_v23 = vld [vmem:[%s4285_s20 + $0x10] sm:$0xff]  }
 0xb38   :  { %v3319_v24 = vld [vmem:[%s4285_s20 + $0x18] sm:$0xff]  }
 0xb3c   :  { %v2461_v25 = vpop.f32.mrb[76].mxu0 }
 0xb3d   :  { %2468 = vrot.lane.b32.xlu1 %v2461_v25, %s3452_s6  ;;  %v3255_v26 = vpop.f32.mrb[77].mxu0  ;;  %v2901_v25 = vld [vmem:[%s4284_s19] ss:$0 sm:$0xff]  ;;  %s3453_s19 = smov [#allocation3]  }
 0xb3e   :  { %v2464_v27 = vpop.f32.mrb[78].mxu0  ;;  %s2810_s20 = sshll.u32 %s3453_s19, 4  ;;  %s2811_s20 = int_to_ptr.vmem [resolvable:$true] %s2810_s20 }
 0xb3f   :  { %v3256_v20 = vpop.f32.mrb[79].mxu0  ;;  %s3396_s14 = scalar_lea.vmem %s2811_s20, 512  ;;  %p3401_p1 = scmp.lt.s32.totalorder %s2811_s20, %s2811_s20 }
 0xb40   :  { %p3397_p0 = scmp.ne.s32.totalorder %s2811_s20, %s3396_s14  ;;  %p3402_p2 = scmp.lt.s32.totalorder %s3396_s14, %s3396_s14 }
 0xb42   :  { %p3403_p3 = por %p3402_p2, %p3401_p1 }
 0xb44   :  { %p3404_p4 = pnand %p3403_p3, %p3397_p0 }
 0xb5f   :  { %v1763_v28 = vpop.permute.xlu0 %1762 }
 0xb60   :  { %1765 = vst.msk [vmem:[#allocation2] sm:$0xff] %vm513_vm11, %v1763_v28 }
 0xb67   :  { %v1881_v30 = vpop.permute.xlu0 %1880 }
 0xb68   :  { %1883 = vst.msk [vmem:[#allocation2] sm:$0xff] %vm632_vm12, %v1881_v30 }
 0xb6f   :  { %v1999_v31 = vpop.permute.xlu0 %1998 }
 0xb70   :  { %2001 = vst.msk [vmem:[#allocation2] sm:$0xff] %vm751_vm13, %v1999_v31 }
 0xb77   :  { %v2472_v34 = vld [vmem:[#allocation2] sm:$0xff] }
 0xb9f   :  { %v2233_v29 = vpop.permute.xlu1 %2232 }
 0xba0   :  { %2235 = vst.msk [vmem:[#allocation2 + $0x8] sm:$0xff] %vm513_vm11, %v2233_v29 }
 0xba7   :  { %v2351_v32 = vpop.permute.xlu1 %2350 }
 0xba8   :  { %2353 = vst.msk [vmem:[#allocation2 + $0x8] sm:$0xff] %vm632_vm12, %v2351_v32 }
 0xbaf   :  { %v2469_v33 = vpop.permute.xlu1 %2468 }
 0xbb0   :  { %2471 = vst.msk [vmem:[#allocation2 + $0x8] sm:$0xff] %vm751_vm13, %v2469_v33 }
 0xbb7   :  { %v2473_v35 = vld [vmem:[#allocation2 + $0x8] sm:$0xff] }
 0xbb8   :  { %v2474_v36 = vpack.c.bf16 %v2473_v35, %v2472_v34 }
 0xbba   :  { %3262 = vmatmul.mubr.msk.bf16.vlgmr.msra.gmra.mrb[76].mxu1 %vm111_vm1, %v2474_v36 }
 0xbbb   :  { %3281 = vmatprep.mubr.msk.bf16.mxu1 %vm3445_vm0, %v3444_v1  ;;  %3274 = vmatpush3.bf16.msra.mxu1 %v3316_v53  ;;  %vm2704_vm0 = vcmask 523264  }
 0xbbc   :  { %3275 = vmatprep.subr.bf16.mxu1 %v3444_v1 }
 0xbbf   :  { %3276 = vmatpush3.bf16.msra.mxu1 %v3317_v54 }
 0xbc0   :  { %3277 = vmatprep.subr.bf16.mxu1 %v3444_v1 }
 0xbc3   :  { %3278 = vmatpush3.bf16.msra.mxu1 %v3318_v23 }
 0xbc4   :  { %3279 = vmatprep.subr.bf16.mxu1 %v3444_v1 }
 0xbc7   :  { %3280 = vmatpush3.bf16.msra.mxu1 %v3319_v24 }
 0xc8d   :  { %v2535_v38 = vpop.f32.mrb[76].mxu1 }
 0xc8e   :  { %v2536_v39 = vadd.f32 %v2895_v37, %v2535_v38  ;;  %v3263_v40 = vpop.f32.mrb[77].mxu1 }
 0xc8f   :  { %v2538_v41 = vpop.f32.mrb[78].mxu1 }
 0xc90   :  { %v2542_v42 = vadd.f32 %v2536_v39, %v3925_v56  ;;  %v2539_v44 = vadd.f32 %v2895_v37, %v2538_v41  ;;  %v3264_v45 = vpop.f32.mrb[79].mxu1  ;;  %v3314_v56 = vld [vmem:[%s4283_s18] sm:$0xff]  }
 0xc91   :  { %3266 = vmatpush3.bf16.msra.mxu0 %v3314_v56 }
 0xc92   :  { %v2543_v48 = vadd.f32 %v2539_v44, %v3927_v57  ;;  %v2546_v47 = vsel %vm111_vm1, %v2542_v42, 0.0  ;;  %v2554_v49 = vmul.f32 %v2542_v42, %v2542_v42  ;;  %v3315_v57 = vld [vmem:[%s4283_s18 + $0x8] sm:$0xff]   ;;  %3267 = vmatprep.subr.bf16.mxu0 %v3444_v1  ;;  %v2905_v1 = vld [vmem:[%s4286_s21] ss:$0 sm:$0xff]  ;;  %s3454_s21 = smov [#allocation5]  }
 0xc93   :  { %2547 = vadd.xlane.f32.xlu0 %v2546_v47  ;;  %s2822_s8 = sshll.u32 %s3454_s21, 4  ;;  %s4218_s8 = int_to_ptr.vmem [resolvable:$true] %s2822_s8 }
 0xc94   :  { %v2549_v43 = vsel %vm111_vm1, %v2543_v48, 0.0  ;;  %v2556_v50 = vsel %vm111_vm1, %v2554_v49, 0.0  ;;  %v2555_v51 = vmul.f32 %v2543_v48, %v2543_v48 }
 0xc95   :  { %2550 = vadd.xlane.f32.xlu1 %v2549_v43  ;;  %3268 = vmatpush3.bf16.msra.mxu0 %v3315_v57 }
 0xc96   :  { %v2559_v52 = vsel %vm111_vm1, %v2555_v51, 0.0 }
 0xc97   :  { %2557 = vadd.xlane.f32.xlu0 %v2556_v50 }
 0xc9b   :  { %2560 = vadd.xlane.f32.xlu0 %v2559_v52 }
 0xd20   :  { %v2548_v55 = vpop.xlane.xlu0 %2547 }
 0xd21   :  { %v2552_v58 = vmul.f32 0.03125, %v2548_v55 }
 0xd22   :  { %v2551_v59 = vpop.xlane.xlu1 %2550 }
 0xd23   :  { %v2564_v62 = vmul.f32 %v2552_v58, %v2552_v58  ;;  %v2553_v63 = vmul.f32 0.03125, %v2551_v59  ;;  %v2570_v14 = vsub.f32 %v2542_v42, %v2552_v58 }
 0xd24   :  { %v2558_v61 = vpop.xlane.xlu0 %2557 }
 0xd25   :  { %v2562_v0 = vmul.f32 0.03125, %v2558_v61  ;;  %v2565_v8 = vmul.f32 %v2553_v63, %v2553_v63  ;;  %v2571_v13 = vsub.f32 %v2543_v48, %v2553_v63 }
 0xd27   :  { %v2566_v2 = vsub.f32 %v2562_v0, %v2564_v62 }
 0xd28   :  { %v2561_v7 = vpop.xlane.xlu0 %2560 }
 0xd29   :  { %v2568_v9 = vmax.f32 %v2566_v2, 0.0  ;;  %v2563_v4 = vmul.f32 0.03125, %v2561_v7 }
 0xd2b   :  { %v2572_v11 = vadd.f32 1e-05, %v2568_v9  ;;  %v2567_v60 = vsub.f32 %v2563_v4, %v2565_v8 }
 0xd2d   :  { %3388 = vrsqrt.f32 %v2572_v11  ;;  %v2569_v3 = vmax.f32 %v2567_v60, 0.0 }
 0xd2f   :  { %v2573_v12 = vadd.f32 1e-05, %v2569_v3 }
 0xd31   :  { %3390 = vrsqrt.f32 %v2573_v12 }
 0xd37   :  { %v3389_v46 = vpop.eup %3388 }
 0xd38   :  { %v2576_v10 = vmul.f32 %v3389_v46, %v2570_v14 }
 0xd3a   :  { %v2584_v18 = vmul.f32 %v2899_v15, %v2576_v10 }
 0xd3b   :  { %v3391_v16 = vpop.eup %3390 }
 0xd3c   :  { %v2577_v17 = vmul.f32 %v3391_v16, %v2571_v13  ;;  %v2592_v22 = vadd.f32 %v2900_v19, %v2584_v18 }
 0xd3e   :  { %v2585_v21 = vmul.f32 %v2899_v15, %v2577_v17 }
 0xd40   :  { %v2593_v5 = vadd.f32 %v2900_v19, %v2585_v21 }
 0xd42   :  { %v2594_v6 = vpack.c.bf16 %v2593_v5, %v2592_v22 }
 0xd44   :  { %3270 = vmatmul.mubr.msk.bf16.vlgmr.msra.gmra.mrb[80].mxu0 %vm111_vm1, %v2594_v6 }
 0xe17   :  { %v2655_v26 = vpop.f32.mrb[80].mxu0 }
 0xe18   :  { %v2656_v27 = vadd.f32 %v2901_v25, %v2655_v26  ;;  %v3271_v20 = vpop.f32.mrb[81].mxu0 }
 0xe19   :  { %v2658_v28 = vpop.f32.mrb[82].mxu0 }
 0xe1a   :  { %v2659_v30 = vadd.f32 %v2901_v25, %v2658_v28  ;;  %v3272_v31 = vpop.f32.mrb[83].mxu0  ;;  %v2662_v29 = vmax.f32 %v2656_v27, 0.0 }
 0xe1c   :  { %v2663_v32 = vmax.f32 %v2659_v30, 0.0 }
 0xe1e   :  { %v2664_v33 = vpack.c.bf16 %v2663_v32, %v2662_v29 }
 0xe20   :  { %3282 = vmatmul.mubr.msk.bf16.vlgmr.msra.gmra.mrb[80].mxu1 %vm2704_vm0, %v2664_v33 }
 0xef3   :  { %v2742_v34 = vpop.f32.mrb[80].mxu1 }
 0xef4   :  { %v2743_v35 = vadd.f32 %v2905_v1, %v2742_v34  ;;  %v3283_v36 = vpop.f32.mrb[81].mxu1 }
 0xef5   :  { %v2745_v37 = vpop.f32.mrb[82].mxu1 }
 0xef6   :  { %v4204_v38 = vadd.f32 %v2743_v35, %v2592_v22  ;;  %v2746_v39 = vadd.f32 %v2905_v1, %v2745_v37  ;;  %v3284_v40 = vpop.f32.mrb[83].mxu1 }
 0xef8   :  { %v4206_v41 = vadd.f32 %v2746_v39, %v2593_v5  ;;  %v2753_v42 = vsel %vm111_vm1, %v4204_v38, 0.0  ;;  %v2761_v44 = vmul.f32 %v4204_v38, %v4204_v38 }
 0xef9   :  { %2754 = vadd.xlane.f32.xlu1 %v2753_v42 }
 0xefa   :  { %v2756_v45 = vsel %vm111_vm1, %v4206_v41, 0.0  ;;  %v2762_v48 = vmul.f32 %v4206_v41, %v4206_v41  ;;  %v2763_v47 = vsel %vm111_vm1, %v2761_v44, 0.0 }
 0xefb   :  { %2757 = vadd.xlane.f32.xlu0 %v2756_v45 }
 0xefc   :  { %v2766_v49 = vsel %vm111_vm1, %v2762_v48, 0.0 }
 0xefd   :  { %2764 = vadd.xlane.f32.xlu1 %v2763_v47 }
 0xeff   :  { %2767 = vadd.xlane.f32.xlu0 %v2766_v49 }
 0xf00   :  { %3407 = shalt.err (!%p3404_p4)
}
 0xf01   :  { %s3408_s10 = scalar_lea.hbm %s4290_s25, 512 }
 0xf02   :  { %p3409_p5 = scmp.ne.s32.totalorder %s4290_s25, %s3408_s10  ;;  %p3412_p6 = scmp.lt.u32.totalorder %s3408_s10, %s4290_s25 }
 0xf04   :  { %p3414_p7 = pnand %p3412_p6, %p3409_p5 }
 0xf06   :  { %3417 = shalt.err (!%p3414_p7)
}
 0xf07   :  { %s3455_s9 = smov 64   ;;  %s3456_s30 = smov 4  }
 0xf08   :  { %2816 = dma.vmem_to_hbm [thread:$0]  %s2811_s20, 512, %s4290_s25, [#allocation4], %s3455_s9, %s3455_s9, %s3456_s30  }
 0xf09   :  { %s3418_s2 = scalar_lea.vmem %s4218_s8, 512  ;;  %p3423_p9 = scmp.lt.s32.totalorder %s4218_s8, %s4218_s8 }
 0xf0a   :  { %p3419_p8 = scmp.ne.s32.totalorder %s4218_s8, %s3418_s2  ;;  %p3424_p10 = scmp.lt.s32.totalorder %s3418_s2, %s3418_s2 }
 0xf0c   :  { %p3425_p11 = por %p3424_p10, %p3423_p9 }
 0xf0e   :  { %p3426_p12 = pnand %p3425_p11, %p3419_p8 }
 0xf10   :  { %3429 = shalt.err (!%p3426_p12)
}
 0xf11   :  { %s3430_s28 = scalar_lea.hbm %s4291_s26, 512 }
 0xf12   :  { %p3431_p13 = scmp.ne.s32.totalorder %s4291_s26, %s3430_s28  ;;  %p3434_p0 = scmp.lt.u32.totalorder %s3430_s28, %s4291_s26 }
 0xf14   :  { %p3436_p1 = pnand %p3434_p0, %p3431_p13 }
 0xf16   :  { %3439 = shalt.err (!%p3436_p1)
}
 0xf17   :  { %2828 = dma.vmem_to_hbm [thread:$0]  %s4218_s8, 512, %s4291_s26, [#allocation6], %s3455_s9, %s3455_s9, %s3456_s30  }
 0xf18   :  { %v2911_v9 = vld [vmem:[%s4287_s22] ss:$0 sm:$0xff] }
 0xf19   :  { %v2912_v3 = vld [vmem:[%s4288_s23] ss:$0 sm:$0xff] }
 0xf86   :  { %v2755_v43 = vpop.xlane.xlu1 %2754 }
 0xf87   :  { %v2759_v50 = vmul.f32 0.03125, %v2755_v43 }
 0xf88   :  { %v2758_v51 = vpop.xlane.xlu0 %2757 }
 0xf89   :  { %v2760_v52 = vmul.f32 0.03125, %v2758_v51  ;;  %v2771_v57 = vmul.f32 %v2759_v50, %v2759_v50  ;;  %v2777_v7 = vsub.f32 %v4204_v38, %v2759_v50 }
 0xf8a   :  { %v2765_v56 = vpop.xlane.xlu1 %2764 }
 0xf8b   :  { %v2769_v53 = vmul.f32 0.03125, %v2765_v56  ;;  %v2772_v55 = vmul.f32 %v2760_v52, %v2760_v52  ;;  %v2778_v4 = vsub.f32 %v4206_v41, %v2760_v52 }
 0xf8c   :  { %v2768_v54 = vpop.xlane.xlu0 %2767 }
 0xf8d   :  { %v2773_v58 = vsub.f32 %v2769_v53, %v2771_v57  ;;  %v2770_v59 = vmul.f32 0.03125, %v2768_v54 }
 0xf8f   :  { %v2775_v61 = vmax.f32 %v2773_v58, 0.0  ;;  %v2774_v62 = vsub.f32 %v2770_v59, %v2772_v55 }
 0xf91   :  { %v2779_v63 = vadd.f32 1e-05, %v2775_v61  ;;  %v2776_v0 = vmax.f32 %v2774_v62, 0.0 }
 0xf93   :  { %3392 = vrsqrt.f32 %v2779_v63  ;;  %v2780_v2 = vadd.f32 1e-05, %v2776_v0 }
 0xf95   :  { %3394 = vrsqrt.f32 %v2780_v2 }
 0xf9d   :  { %v3393_v8 = vpop.eup %3392 }
 0xf9e   :  { %v2783_v11 = vmul.f32 %v3393_v8, %v2777_v7 }
 0xf9f   :  { %v3395_v60 = vpop.eup %3394 }
 0xfa0   :  { %v2791_v12 = vmul.f32 %v2911_v9, %v2783_v11  ;;  %v2784_v14 = vmul.f32 %v3395_v60, %v2778_v4 }
 0xfa2   :  { %v2799_v46 = vadd.f32 %v2912_v3, %v2791_v12  ;;  %v2792_v10 = vmul.f32 %v2911_v9, %v2784_v14 }
 0xfa4   :  { %2801 = vst.msk [vmem:[%s4289_s24] sm:$0xff] %vm111_vm1, %v2799_v46  ;;  %v2800_v15 = vadd.f32 %v2912_v3, %v2792_v10 }
 0xfa6   :  { %2802 = vst.msk [vmem:[%s4289_s24 + $0x8] sm:$0xff] %vm111_vm1, %v2800_v15 }
 0xfa7   :  { %3440 = dma.done.wait [#allocation4], 512  }
 0xfa8   :  { %3441 = vsyncadd [#allocation4], 4294966784 }
 0xfa9   :  { %3442 = dma.done.wait [#allocation6], 512  }
 0xfaa   :  { %3443 = vsyncadd [#allocation6], 4294966784 }
 0xfab   :  { %2837 = vsyncpa [#allocation4], 1 }
 0xfac   :  { %2838 = vsyncpa [#allocation6], 1 }

</bundles_post_ra>
